<compile_context>
chip_gen: v7x
topology: tpu7x:2x2x1
jax: 0.10.0
libtpu: 0.0.40
codegen_flags: <defaults>
</compile_context>

<pallas_src>
import math

import jax
import jax.numpy as jnp
from jax import lax
from jax.experimental import pallas as pl
from jax.experimental.pallas import tpu as pltpu


MATMUL_DTYPE = jnp.bfloat16     # MXU operand dtype; accumulation stays f32.
LRELU_SLOPE = 0.01
IN_EPS = 1e-5
_COL_TILE_CAP = 2048            # lane-tile cap for the two-pass fallback.


def _vmem_capacity_bytes():
    try:
        return int(pltpu.get_tpu_info().vmem_capacity_bytes)
    except Exception:
        return 64 * 2 ** 20     # conservative (v7x per-TensorCore VMEM)


_VMEM_CAP = _vmem_capacity_bytes()
_VMEM_LIMIT = int(min(_VMEM_CAP * 3 // 4, 96 * 2 ** 20))
_FUSED_BUDGET = int(_VMEM_LIMIT * 0.7)


def _compiler_params(n_axes):
    return pltpu.CompilerParams(
        dimension_semantics=("parallel",) * n_axes,
        vmem_limit_bytes=_VMEM_LIMIT)


def _pick_col_tile(m, cap):
    """Largest multiple of 128 dividing m and <= cap; full m if none (or small)."""
    if m <= cap:
        return m
    t = (cap // 128) * 128
    while t >= 128:
        if m % t == 0:
            return t
        t -= 128
    return m   # TODO(synk): pad/mask columns when M has no 128-multiple divisor.


def _pick_head_rows(total, h, cap=4096):
    """Row tile for the head: multiple of H (softmax groups intact) and of 8."""
    if total <= cap:
        return total
    step = (h * 8) // math.gcd(h, 8)
    t = (cap // step) * step
    while t >= step:
        if total % t == 0:
            return t
        t -= step
    return total


# ----------------------------- Pallas kernels -------------------------------

def _conv_in_lrelu_fused_kernel(w_ref, p_ref, o_ref):
    """3x3x3 conv for a whole sample as ONE deep-K matmul (27 taps folded into K),
    fused with InstanceNorm3d(affine=False) + LeakyReLU(0.01).
    Statistics are lane (XLU) reductions; variance uses centered values."""
    y = jnp.dot(w_ref[...], p_ref[...], preferred_element_type=jnp.float32)  # (Cout, M)
    mean = jnp.mean(y, axis=1, keepdims=True)
    yc = y - mean
    var = jnp.mean(yc * yc, axis=1, keepdims=True)
    z = yc * lax.rsqrt(var + IN_EPS)
    o_ref[...] = jnp.where(z >= 0, z, LRELU_SLOPE * z).astype(o_ref.dtype)


def _conv_matmul_kernel(w_ref, p_ref, y_ref):
    """Pass 1 of the two-pass fallback: conv tile matmul, bf16 intermediate."""
    y_ref[...] = jnp.dot(w_ref[...], p_ref[...],
                         preferred_element_type=jnp.float32).astype(y_ref.dtype)


def _in_lrelu_kernel(y_ref, mean_ref, rstd_ref, o_ref):
    """Pass 2 of the two-pass fallback: normalize + LeakyReLU (lane-dense tiles)."""
    z = (y_ref[...].astype(jnp.float32) - mean_ref[...]) * rstd_ref[...]
    o_ref[...] = jnp.where(z >= 0, z, LRELU_SLOPE * z).astype(o_ref.dtype)


def _matmul_bias_kernel(w_ref, x_ref, b_ref, o_ref):
    """Fused ConvTranspose3d(2,2,1): (4*Cout, Cin) @ (Cin, tm) + bias."""
    o_ref[...] = (jnp.dot(w_ref[...], x_ref[...], preferred_element_type=jnp.float32)
                  + b_ref[...]).astype(o_ref.dtype)


# ------------------------------ layer wrappers -------------------------------

def _conv3x3x3_in_lrelu(x, w):
    """x: (N, Cin, D, H, W) bf16;  w: (Cout, Cin, 3, 3, 3) f32.
    Returns LeakyReLU(InstanceNorm3d(conv3d(x, w, pad=1))) as (N, Cout, D, H, W) bf16.
    The conv bias is omitted: a per-channel bias cancels exactly under the
    non-affine InstanceNorm3d that follows."""
    N, Cin, D, H, W = x.shape
    Cout = w.shape[0]
    M = D * H * W
    K = 27 * Cin

    # im2col in XLA (tap-major, channel-minor K order).
    # TODO(synk): replace with in-kernel halo-slab patch construction to remove
    # the ~27x HBM amplification of this materialization.
    xp = jnp.pad(x, ((0, 0), (0, 0), (1, 1), (1, 1), (1, 1)))
    taps = [xp[:, :, kd:kd + D, kh:kh + H, kw:kw + W]
            for kd in range(3) for kh in range(3) for kw in range(3)]
    pats = jnp.stack(taps, axis=1).reshape(N, K, M).astype(MATMUL_DTYPE)
    wmat = jnp.transpose(w, (0, 2, 3, 4, 1)).reshape(Cout, K).astype(MATMUL_DTYPE)

    # VMEM estimate: double-buffered bf16 pats + bf16 out + weight + f32 temps.
    fused_bytes = (2 * (K * M * 2) + 2 * (Cout * M * 2)
                   + 2 * (Cout * K * 2) + 6 * (Cout * M * 4))
    if fused_bytes <= _FUSED_BUDGET:
        out = pl.pallas_call(
            _conv_in_lrelu_fused_kernel,
            grid=(N,),
            in_specs=[pl.BlockSpec((Cout, K), lambda n: (0, 0)),
                      pl.BlockSpec((None, K, M), lambda n: (n, 0, 0))],
            out_specs=pl.BlockSpec((None, Cout, M), lambda n: (n, 0, 0)),
            out_shape=jax.ShapeDtypeStruct((N, Cout, M), MATMUL_DTYPE),
            compiler_params=_compiler_params(1),
        )(wmat, pats)
        return out.reshape(N, Cout, D, H, W)

    # ---- two-pass fallback for samples that do not fit the VMEM budget ----
    tm = _pick_col_tile(M, _COL_TILE_CAP)
    tps = M // tm
    y = pl.pallas_call(
        _conv_matmul_kernel,
        grid=(N, tps),
        in_specs=[pl.BlockSpec((Cout, K), lambda n, j: (0, 0)),
                  pl.BlockSpec((None, K, tm), lambda n, j: (n, 0, j))],
        out_specs=pl.BlockSpec((None, Cout, tm), lambda n, j: (n, 0, j)),
        out_shape=jax.ShapeDtypeStruct((N, Cout, M), MATMUL_DTYPE),
        compiler_params=_compiler_params(2),
    )(wmat, pats)

    # Per-(sample, channel) InstanceNorm stats (biased variance, centered).
    # TODO(synk): emit per-tile (sum, centered-M2) from pass 1 and Chan-combine
    # instead of re-reading y here.
    yf = y.astype(jnp.float32)
    mean = jnp.mean(yf, axis=2, keepdims=True)
    var = jnp.mean(jnp.square(yf - mean), axis=2, keepdims=True)
    rstd = lax.rsqrt(var + IN_EPS)

    out = pl.pallas_call(
        _in_lrelu_kernel,
        grid=(N, tps),
        in_specs=[pl.BlockSpec((None, Cout, tm), lambda n, j: (n, 0, j)),
                  pl.BlockSpec((None, Cout, 1), lambda n, j: (n, 0, 0)),
                  pl.BlockSpec((None, Cout, 1), lambda n, j: (n, 0, 0))],
        out_specs=pl.BlockSpec((None, Cout, tm), lambda n, j: (n, 0, j)),
        out_shape=jax.ShapeDtypeStruct((N, Cout, M), MATMUL_DTYPE),
        compiler_params=_compiler_params(2),
    )(y, mean, rstd)
    return out.reshape(N, Cout, D, H, W)


def _conv_block(x, p):
    # TODO(synk): Dropout3d(0.5) is stochastic in train mode; implemented as
    # eval-mode identity.
    # TODO(synk): when a level's feature map fits VMEM, conv1->conv2 could be
    # fused into one kernel (in-kernel im2col) to cut launches further (v7x item).
    h = _conv3x3x3_in_lrelu(x, p["w1"])
    h = _conv3x3x3_in_lrelu(h, p["w2"])
    return h


def _maxpool_221(x):
    """MaxPool3d(kernel=(2,2,1)) — trivial memory-bound reduce, left to XLA."""
    N, C, D, H, W = x.shape
    return x.reshape(N, C, D // 2, 2, H // 2, 2, W).max(axis=(3, 5))


def _upconv_221(x, w, b):
    """ConvTranspose3d(kernel=(2,2,1), stride=(2,2,1)).
    x: (N, Cin, D, H, W) bf16;  w: (Cin, Cout, 2, 2, 1);  b: (Cout,)."""
    N, Cin, D, H, W = x.shape
    Cout = w.shape[1]
    M = D * H * W
    tm = _pick_col_tile(M, _COL_TILE_CAP)
    tps = M // tm
    xm = x.reshape(N, Cin, M).astype(MATMUL_DTYPE)
    # Rows ordered (co, pd, ph) so the epilogue is a pure reshape of the row dim.
    wmat = jnp.transpose(w[..., 0], (1, 2, 3, 0)).reshape(4 * Cout, Cin).astype(MATMUL_DTYPE)
    bmat = jnp.repeat(b.astype(jnp.float32), 4).reshape(4 * Cout, 1)

    out = pl.pallas_call(
        _matmul_bias_kernel,
        grid=(N, tps),
        in_specs=[pl.BlockSpec((4 * Cout, Cin), lambda n, j: (0, 0)),
                  pl.BlockSpec((None, Cin, tm), lambda n, j: (n, 0, j)),
                  pl.BlockSpec((4 * Cout, 1), lambda n, j: (0, 0))],
        out_specs=pl.BlockSpec((None, 4 * Cout, tm), lambda n, j: (n, 0, j)),
        out_shape=jax.ShapeDtypeStruct((N, 4 * Cout, M), MATMUL_DTYPE),
        compiler_params=_compiler_params(2),
    )(wmat, xm, bmat)

    # TODO(synk): write the four (pd, ph) planes directly in interleaved layout
    # to avoid this XLA strided transpose on the upsampled tensor.
    out = out.reshape(N, Cout, 2, 2, D, H, W)
    out = jnp.transpose(out, (0, 1, 4, 2, 5, 3, 6)).reshape(N, Cout, 2 * D, 2 * H, W)
    return out


def _upcat_block(x_down, x_skip, p):
    x_up = _upconv_221(x_down, p["up_w"], p["up_b"])
    du = x_up.shape[2]
    ci = (x_skip.shape[2] - du) // 2
    # torch crops spatial dims 2,3,4 with the D-derived size; out-of-range stops
    # clamp exactly like torch/numpy slicing.
    x_crop = x_skip[:, :, ci:du + ci, ci:du + ci, ci:du + ci]
    x_in = jnp.concatenate([x_crop, x_up], axis=1)
    return _conv_block(x_in, p)


def _final_head(x, w):
    """Fused Conv3d(1x1x1) + nn.Softmax(dim=3) (softmax over H).
    x: (N, Cin, D, H, W) bf16;  w: (Cout, Cin, 1, 1, 1).
    Returns (N, Cout, D, H, W) f32.  The 1x1 bias is constant along H at fixed
    channel, so it cancels in the softmax and is omitted."""
    N, Cin, D, H, W = x.shape
    Cout = w.shape[0]
    R = N * D * W * H                                     # rows, grouped by H
    xg = jnp.transpose(x, (0, 2, 4, 3, 1)).reshape(R, Cin).astype(MATMUL_DTYPE)
    w2 = w.reshape(Cout, Cin).T.astype(MATMUL_DTYPE)       # (Cin, Cout), single block
    rt = _pick_head_rows(R, H)

    def head_kernel(x_ref, w_ref, o_ref):
        y = jnp.dot(x_ref[...], w_ref[...], preferred_element_type=jnp.float32)
        y = y.reshape(rt // H, H, Cout)
        m = jnp.max(y, axis=1, keepdims=True)
        e = jnp.exp(y - m)
        p = e / jnp.sum(e, axis=1, keepdims=True)
        o_ref[...] = p.reshape(rt, Cout)

    y = pl.pallas_call(
        head_kernel,
        grid=(R // rt,),
        in_specs=[pl.BlockSpec((rt, Cin), lambda g: (g, 0)),
                  pl.BlockSpec((Cin, Cout), lambda g: (0, 0))],
        out_specs=pl.BlockSpec((rt, Cout), lambda g: (g, 0)),
        out_shape=jax.ShapeDtypeStruct((R, Cout), jnp.float32),
        compiler_params=_compiler_params(1),
    )(xg, w2)

    y = y.reshape(N, D, W, H, Cout)
    return jnp.transpose(y, (0, 4, 1, 3, 2))               # (N, Cout, D, H, W)


# ------------------------------ full model -----------------------------------

def nnunet3d_forward(x_ncdhw, params):
    x = x_ncdhw.astype(MATMUL_DTYPE)                       # channels-first throughout
    feats = []
    h = x
    for i in range(5):                                     # encoder
        fm = _conv_block(h, params["enc"][i])
        feats.append(fm)
        if i < 4:
            h = _maxpool_221(fm)
    up = feats[4]
    for i, skip in enumerate([feats[3], feats[2], feats[1], feats[0]]):   # decoder
        up = _upcat_block(up, skip, params["dec"][i])
    return _final_head(up, params["final_w"])              # (N, out_ch, D, H, W)


def init_params(key, in_ch, out_ch, f):
    enc_f = [in_ch, f, 2 * f, 4 * f, 8 * f, 16 * f]
    dec_f = [16 * f, 8 * f, 4 * f, 2 * f, f]
    ks = iter(jax.random.split(key, 128))

    def conv_p(co, ci, ksz):
        fan_in = ci * ksz[0] * ksz[1] * ksz[2]
        w = jax.random.normal(next(ks), (co, ci) + ksz, jnp.float32) / math.sqrt(fan_in)
        b = jax.random.normal(next(ks), (co,), jnp.float32) * 0.01
        return w, b

    def block_p(ci, co):
        w1, b1 = conv_p(co, ci, (3, 3, 3))
        w2, b2 = conv_p(co, co, (3, 3, 3))
        # b1/b2 kept for parity with the torch module but mathematically inert
        # (per-channel bias cancels under the non-affine InstanceNorm3d).
        return {"w1": w1, "b1": b1, "w2": w2, "b2": b2}

    enc = [block_p(enc_f[i], enc_f[i + 1]) for i in range(5)]
    dec = []
    for i in range(4):
        ci, co = dec_f[i], dec_f[i + 1]
        fan_in = ci * 2 * 2 * 1
        up_w = jax.random.normal(next(ks), (ci, co, 2, 2, 1), jnp.float32) / math.sqrt(fan_in)
        up_b = jax.random.normal(next(ks), (co,), jnp.float32) * 0.01
        d = {"up_w": up_w, "up_b": up_b}
        d.update(block_p(ci, co))   # conv_block(in_ch=ci, out_ch=co) after concat
        dec.append(d)
    fw, fb = conv_p(out_ch, f, (1, 1, 1))
    # final_b kept for parity; it cancels in Softmax(dim=3) (constant along H).
    return {"enc": enc, "dec": dec, "final_w": fw, "final_b": fb}


if __name__ == "__main__":
    IN_CH, OUT_CH, FILTER = 2, 3, 4
    # W <= D/8 so the decoder's crop/cat (which crops all spatial dims with the
    # D-derived size) is well-defined, matching the PyTorch module's constraints.
    N, D, H, W = 2, 16, 16, 2

    key = jax.random.PRNGKey(0)
    kx, kp = jax.random.split(key)
    x = jax.random.normal(kx, (N, IN_CH, D, H, W), jnp.float32)
    params = init_params(kp, IN_CH, OUT_CH, FILTER)

    fwd = jax.jit(nnunet3d_forward)
    out = jax.block_until_ready(fwd(x, params))

    assert out.shape == (N, OUT_CH, D, H, W), out.shape
    assert bool(jnp.all(jnp.isfinite(out)))
    print("KERNEL_OK")
</pallas_src>

<mosaic_0001>
module attributes {stable_mosaic.version = 11 : i64} {
  func.func @_conv_in_lrelu_fused_kernel(%arg0: i32, %arg1: memref<4x54xbf16, #tpu.memory_space<vmem>>, %arg2: memref<1x54x512xbf16, #tpu.memory_space<vmem>>, %arg3: memref<1x4x512xbf16, #tpu.memory_space<vmem>>) attributes {dimension_semantics = [#tpu.dimension_semantics<parallel>], iteration_bounds = array<i64: 2>, scalar_prefetch = 0 : i64, scratch_operands = 0 : i64, tpu.core_type = #tpu.core_type<tc>, window_params = [{pipeline_mode = #tpu.pipeline_mode<synchronous>, transform_indices = @transform_0, window_bounds = array<i64: 4, 54>}, {transform_indices = @transform_1, window_bounds = array<i64: 1, 54, 512>}, {transform_indices = @transform_2, window_bounds = array<i64: 1, 4, 512>}]} {
    %c0 = arith.constant 0 : index
    %c0_0 = arith.constant 0 : index
    %0 = vector.load %arg1[%c0, %c0_0] : memref<4x54xbf16, #tpu.memory_space<vmem>>, vector<4x54xbf16>
    %c0_1 = arith.constant 0 : index
    %c0_2 = arith.constant 0 : index
    %c0_3 = arith.constant 0 : index
    %1 = vector.load %arg2[%c0_1, %c0_2, %c0_3] : memref<1x54x512xbf16, #tpu.memory_space<vmem>>, vector<1x54x512xbf16>
    %2 = vector.shape_cast %1 : vector<1x54x512xbf16> to vector<54x512xbf16>
    %cst = arith.constant dense<0.000000e+00> : vector<4x512xf32>
    %3 = tpu.matmul %0, %2, %cst {dimension_numbers = #tpu.dot_dimension_numbers<[1], [0], [0], [1], [0, 0, 1, 1], [], []>} : vector<4x54xbf16>, vector<54x512xbf16>, vector<4x512xf32> -> vector<4x512xf32>
    %cst_4 = arith.constant dense<0.000000e+00> : vector<4xf32>
    %4 = vector.multi_reduction <add>, %3, %cst_4 [1] : vector<4x512xf32> to vector<4xf32>
    %5 = vector.shape_cast %4 : vector<4xf32> to vector<4x1xf32>
    %cst_5 = arith.constant 5.120000e+02 : f32
    %6 = vector.broadcast %cst_5 : f32 to vector<4x1xf32>
    %7 = arith.divf %5, %6 : vector<4x1xf32>
    %8 = vector.broadcast %7 : vector<4x1xf32> to vector<4x512xf32>
    %9 = arith.subf %3, %8 : vector<4x512xf32>
    %10 = arith.mulf %9, %9 : vector<4x512xf32>
    %cst_6 = arith.constant dense<0.000000e+00> : vector<4xf32>
    %11 = vector.multi_reduction <add>, %10, %cst_6 [1] : vector<4x512xf32> to vector<4xf32>
    %12 = vector.shape_cast %11 : vector<4xf32> to vector<4x1xf32>
    %cst_7 = arith.constant 5.120000e+02 : f32
    %13 = vector.broadcast %cst_7 : f32 to vector<4x1xf32>
    %14 = arith.divf %12, %13 : vector<4x1xf32>
    %cst_8 = arith.constant 9.99999974E-6 : f32
    %15 = vector.broadcast %cst_8 : f32 to vector<4x1xf32>
    %16 = arith.addf %14, %15 : vector<4x1xf32>
    %17 = math.rsqrt %16 : vector<4x1xf32>
    %18 = vector.broadcast %17 : vector<4x1xf32> to vector<4x512xf32>
    %19 = arith.mulf %9, %18 : vector<4x512xf32>
    %cst_9 = arith.constant 0.000000e+00 : f32
    %20 = vector.broadcast %cst_9 : f32 to vector<4x512xf32>
    %21 = arith.cmpf oge, %19, %20 : vector<4x512xf32>
    %cst_10 = arith.constant 0.00999999977 : f32
    %22 = vector.broadcast %cst_10 : f32 to vector<4x512xf32>
    %23 = arith.mulf %22, %19 : vector<4x512xf32>
    %24 = arith.select %21, %19, %23 : vector<4x512xi1>, vector<4x512xf32>
    %25 = arith.truncf %24 : vector<4x512xf32> to vector<4x512xbf16>
    %c0_11 = arith.constant 0 : index
    %c0_12 = arith.constant 0 : index
    %c0_13 = arith.constant 0 : index
    %26 = vector.load %arg3[%c0_11, %c0_12, %c0_13] : memref<1x4x512xbf16, #tpu.memory_space<vmem>>, vector<1x4x512xbf16>
    %27 = vector.shape_cast %26 : vector<1x4x512xbf16> to vector<4x512xbf16>
    %28 = vector.shape_cast %25 : vector<4x512xbf16> to vector<1x4x512xbf16>
    tpu.vector_store %arg3[%c0_11, %c0_12, %c0_13], %28 {strides = array<i32>} : memref<1x4x512xbf16, #tpu.memory_space<vmem>>, vector<1x4x512xbf16>,
    return
  }
  func.func @transform_0(%arg0: i32) -> (i32, i32) {
    %c0_i32 = arith.constant 0 : i32
    %c0_i32_0 = arith.constant 0 : i32
    %c0_i32_1 = arith.constant 0 : i32
    return %c0_i32, %c0_i32_0 : i32, i32
  }
  func.func @transform_1(%arg0: i32) -> (i32, i32, i32) {
    %c0_i32 = arith.constant 0 : i32
    %c0_i32_0 = arith.constant 0 : i32
    %c0_i32_1 = arith.constant 0 : i32
    return %arg0, %c0_i32, %c0_i32_0 : i32, i32, i32
  }
  func.func @transform_2(%arg0: i32) -> (i32, i32, i32) {
    %c0_i32 = arith.constant 0 : i32
    %c0_i32_0 = arith.constant 0 : i32
    %c0_i32_1 = arith.constant 0 : i32
    return %arg0, %c0_i32, %c0_i32_0 : i32, i32, i32
  }
}

module attributes {stable_mosaic.version = 11 : i64} {
  func.func @_conv_in_lrelu_fused_kernel(%arg0: i32, %arg1: memref<4x108xbf16, #tpu.memory_space<vmem>>, %arg2: memref<1x108x512xbf16, #tpu.memory_space<vmem>>, %arg3: memref<1x4x512xbf16, #tpu.memory_space<vmem>>) attributes {dimension_semantics = [#tpu.dimension_semantics<parallel>], iteration_bounds = array<i64: 2>, scalar_prefetch = 0 : i64, scratch_operands = 0 : i64, tpu.core_type = #tpu.core_type<tc>, window_params = [{pipeline_mode = #tpu.pipeline_mode<synchronous>, transform_indices = @transform_0, window_bounds = array<i64: 4, 108>}, {transform_indices = @transform_1, window_bounds = array<i64: 1, 108, 512>}, {transform_indices = @transform_2, window_bounds = array<i64: 1, 4, 512>}]} {
    %c0 = arith.constant 0 : index
    %c0_0 = arith.constant 0 : index
    %0 = vector.load %arg1[%c0, %c0_0] : memref<4x108xbf16, #tpu.memory_space<vmem>>, vector<4x108xbf16>
    %c0_1 = arith.constant 0 : index
    %c0_2 = arith.constant 0 : index
    %c0_3 = arith.constant 0 : index
    %1 = vector.load %arg2[%c0_1, %c0_2, %c0_3] : memref<1x108x512xbf16, #tpu.memory_space<vmem>>, vector<1x108x512xbf16>
    %2 = vector.shape_cast %1 : vector<1x108x512xbf16> to vector<108x512xbf16>
    %cst = arith.constant dense<0.000000e+00> : vector<4x512xf32>
    %3 = tpu.matmul %0, %2, %cst {dimension_numbers = #tpu.dot_dimension_numbers<[1], [0], [0], [1], [0, 0, 1, 1], [], []>} : vector<4x108xbf16>, vector<108x512xbf16>, vector<4x512xf32> -> vector<4x512xf32>
    %cst_4 = arith.constant dense<0.000000e+00> : vector<4xf32>
    %4 = vector.multi_reduction <add>, %3, %cst_4 [1] : vector<4x512xf32> to vector<4xf32>
    %5 = vector.shape_cast %4 : vector<4xf32> to vector<4x1xf32>
    %cst_5 = arith.constant 5.120000e+02 : f32
    %6 = vector.broadcast %cst_5 : f32 to vector<4x1xf32>
    %7 = arith.divf %5, %6 : vector<4x1xf32>
    %8 = vector.broadcast %7 : vector<4x1xf32> to vector<4x512xf32>
    %9 = arith.subf %3, %8 : vector<4x512xf32>
    %10 = arith.mulf %9, %9 : vector<4x512xf32>
    %cst_6 = arith.constant dense<0.000000e+00> : vector<4xf32>
    %11 = vector.multi_reduction <add>, %10, %cst_6 [1] : vector<4x512xf32> to vector<4xf32>
    %12 = vector.shape_cast %11 : vector<4xf32> to vector<4x1xf32>
    %cst_7 = arith.constant 5.120000e+02 : f32
    %13 = vector.broadcast %cst_7 : f32 to vector<4x1xf32>
    %14 = arith.divf %12, %13 : vector<4x1xf32>
    %cst_8 = arith.constant 9.99999974E-6 : f32
    %15 = vector.broadcast %cst_8 : f32 to vector<4x1xf32>
    %16 = arith.addf %14, %15 : vector<4x1xf32>
    %17 = math.rsqrt %16 : vector<4x1xf32>
    %18 = vector.broadcast %17 : vector<4x1xf32> to vector<4x512xf32>
    %19 = arith.mulf %9, %18 : vector<4x512xf32>
    %cst_9 = arith.constant 0.000000e+00 : f32
    %20 = vector.broadcast %cst_9 : f32 to vector<4x512xf32>
    %21 = arith.cmpf oge, %19, %20 : vector<4x512xf32>
    %cst_10 = arith.constant 0.00999999977 : f32
    %22 = vector.broadcast %cst_10 : f32 to vector<4x512xf32>
    %23 = arith.mulf %22, %19 : vector<4x512xf32>
    %24 = arith.select %21, %19, %23 : vector<4x512xi1>, vector<4x512xf32>
    %25 = arith.truncf %24 : vector<4x512xf32> to vector<4x512xbf16>
    %c0_11 = arith.constant 0 : index
    %c0_12 = arith.constant 0 : index
    %c0_13 = arith.constant 0 : index
    %26 = vector.load %arg3[%c0_11, %c0_12, %c0_13] : memref<1x4x512xbf16, #tpu.memory_space<vmem>>, vector<1x4x512xbf16>
    %27 = vector.shape_cast %26 : vector<1x4x512xbf16> to vector<4x512xbf16>
    %28 = vector.shape_cast %25 : vector<4x512xbf16> to vector<1x4x512xbf16>
    tpu.vector_store %arg3[%c0_11, %c0_12, %c0_13], %28 {strides = array<i32>} : memref<1x4x512xbf16, #tpu.memory_space<vmem>>, vector<1x4x512xbf16>,
    return
  }
  func.func @transform_0(%arg0: i32) -> (i32, i32) {
    %c0_i32 = arith.constant 0 : i32
    %c0_i32_0 = arith.constant 0 : i32
    %c0_i32_1 = arith.constant 0 : i32
    return %c0_i32, %c0_i32_0 : i32, i32
  }
  func.func @transform_1(%arg0: i32) -> (i32, i32, i32) {
    %c0_i32 = arith.constant 0 : i32
    %c0_i32_0 = arith.constant 0 : i32
    %c0_i32_1 = arith.constant 0 : i32
    return %arg0, %c0_i32, %c0_i32_0 : i32, i32, i32
  }
  func.func @transform_2(%arg0: i32) -> (i32, i32, i32) {
    %c0_i32 = arith.constant 0 : i32
    %c0_i32_0 = arith.constant 0 : i32
    %c0_i32_1 = arith.constant 0 : i32
    return %arg0, %c0_i32, %c0_i32_0 : i32, i32, i32
  }
}

module attributes {stable_mosaic.version = 11 : i64} {
  func.func @_conv_in_lrelu_fused_kernel(%arg0: i32, %arg1: memref<8x108xbf16, #tpu.memory_space<vmem>>, %arg2: memref<1x108x128xbf16, #tpu.memory_space<vmem>>, %arg3: memref<1x8x128xbf16, #tpu.memory_space<vmem>>) attributes {dimension_semantics = [#tpu.dimension_semantics<parallel>], iteration_bounds = array<i64: 2>, scalar_prefetch = 0 : i64, scratch_operands = 0 : i64, tpu.core_type = #tpu.core_type<tc>, window_params = [{pipeline_mode = #tpu.pipeline_mode<synchronous>, transform_indices = @transform_0, window_bounds = array<i64: 8, 108>}, {transform_indices = @transform_1, window_bounds = array<i64: 1, 108, 128>}, {transform_indices = @transform_2, window_bounds = array<i64: 1, 8, 128>}]} {
    %c0 = arith.constant 0 : index
    %c0_0 = arith.constant 0 : index
    %0 = vector.load %arg1[%c0, %c0_0] : memref<8x108xbf16, #tpu.memory_space<vmem>>, vector<8x108xbf16>
    %c0_1 = arith.constant 0 : index
    %c0_2 = arith.constant 0 : index
    %c0_3 = arith.constant 0 : index
    %1 = vector.load %arg2[%c0_1, %c0_2, %c0_3] : memref<1x108x128xbf16, #tpu.memory_space<vmem>>, vector<1x108x128xbf16>
    %2 = vector.shape_cast %1 : vector<1x108x128xbf16> to vector<108x128xbf16>
    %cst = arith.constant dense<0.000000e+00> : vector<8x128xf32>
    %3 = tpu.matmul %0, %2, %cst {dimension_numbers = #tpu.dot_dimension_numbers<[1], [0], [0], [1], [0, 0, 1, 1], [], []>} : vector<8x108xbf16>, vector<108x128xbf16>, vector<8x128xf32> -> vector<8x128xf32>
    %cst_4 = arith.constant dense<0.000000e+00> : vector<8xf32>
    %4 = vector.multi_reduction <add>, %3, %cst_4 [1] : vector<8x128xf32> to vector<8xf32>
    %5 = vector.shape_cast %4 : vector<8xf32> to vector<8x1xf32>
    %cst_5 = arith.constant 1.280000e+02 : f32
    %6 = vector.broadcast %cst_5 : f32 to vector<8x1xf32>
    %7 = arith.divf %5, %6 : vector<8x1xf32>
    %8 = vector.broadcast %7 : vector<8x1xf32> to vector<8x128xf32>
    %9 = arith.subf %3, %8 : vector<8x128xf32>
    %10 = arith.mulf %9, %9 : vector<8x128xf32>
    %cst_6 = arith.constant dense<0.000000e+00> : vector<8xf32>
    %11 = vector.multi_reduction <add>, %10, %cst_6 [1] : vector<8x128xf32> to vector<8xf32>
    %12 = vector.shape_cast %11 : vector<8xf32> to vector<8x1xf32>
    %cst_7 = arith.constant 1.280000e+02 : f32
    %13 = vector.broadcast %cst_7 : f32 to vector<8x1xf32>
    %14 = arith.divf %12, %13 : vector<8x1xf32>
    %cst_8 = arith.constant 9.99999974E-6 : f32
    %15 = vector.broadcast %cst_8 : f32 to vector<8x1xf32>
    %16 = arith.addf %14, %15 : vector<8x1xf32>
    %17 = math.rsqrt %16 : vector<8x1xf32>
    %18 = vector.broadcast %17 : vector<8x1xf32> to vector<8x128xf32>
    %19 = arith.mulf %9, %18 : vector<8x128xf32>
    %cst_9 = arith.constant 0.000000e+00 : f32
    %20 = vector.broadcast %cst_9 : f32 to vector<8x128xf32>
    %21 = arith.cmpf oge, %19, %20 : vector<8x128xf32>
    %cst_10 = arith.constant 0.00999999977 : f32
    %22 = vector.broadcast %cst_10 : f32 to vector<8x128xf32>
    %23 = arith.mulf %22, %19 : vector<8x128xf32>
    %24 = arith.select %21, %19, %23 : vector<8x128xi1>, vector<8x128xf32>
    %25 = arith.truncf %24 : vector<8x128xf32> to vector<8x128xbf16>
    %c0_11 = arith.constant 0 : index
    %c0_12 = arith.constant 0 : index
    %c0_13 = arith.constant 0 : index
    %26 = vector.load %arg3[%c0_11, %c0_12, %c0_13] : memref<1x8x128xbf16, #tpu.memory_space<vmem>>, vector<1x8x128xbf16>
    %27 = vector.shape_cast %26 : vector<1x8x128xbf16> to vector<8x128xbf16>
    %28 = vector.shape_cast %25 : vector<8x128xbf16> to vector<1x8x128xbf16>
    tpu.vector_store %arg3[%c0_11, %c0_12, %c0_13], %28 {strides = array<i32>} : memref<1x8x128xbf16, #tpu.memory_space<vmem>>, vector<1x8x128xbf16>,
    return
  }
  func.func @transform_0(%arg0: i32) -> (i32, i32) {
    %c0_i32 = arith.constant 0 : i32
    %c0_i32_0 = arith.constant 0 : i32
    %c0_i32_1 = arith.constant 0 : i32
    return %c0_i32, %c0_i32_0 : i32, i32
  }
  func.func @transform_1(%arg0: i32) -> (i32, i32, i32) {
    %c0_i32 = arith.constant 0 : i32
    %c0_i32_0 = arith.constant 0 : i32
    %c0_i32_1 = arith.constant 0 : i32
    return %arg0, %c0_i32, %c0_i32_0 : i32, i32, i32
  }
  func.func @transform_2(%arg0: i32) -> (i32, i32, i32) {
    %c0_i32 = arith.constant 0 : i32
    %c0_i32_0 = arith.constant 0 : i32
    %c0_i32_1 = arith.constant 0 : i32
    return %arg0, %c0_i32, %c0_i32_0 : i32, i32, i32
  }
}

module attributes {stable_mosaic.version = 11 : i64} {
  func.func @_conv_in_lrelu_fused_kernel(%arg0: i32, %arg1: memref<8x216xbf16, #tpu.memory_space<vmem>>, %arg2: memref<1x216x128xbf16, #tpu.memory_space<vmem>>, %arg3: memref<1x8x128xbf16, #tpu.memory_space<vmem>>) attributes {dimension_semantics = [#tpu.dimension_semantics<parallel>], iteration_bounds = array<i64: 2>, scalar_prefetch = 0 : i64, scratch_operands = 0 : i64, tpu.core_type = #tpu.core_type<tc>, window_params = [{pipeline_mode = #tpu.pipeline_mode<synchronous>, transform_indices = @transform_0, window_bounds = array<i64: 8, 216>}, {transform_indices = @transform_1, window_bounds = array<i64: 1, 216, 128>}, {transform_indices = @transform_2, window_bounds = array<i64: 1, 8, 128>}]} {
    %c0 = arith.constant 0 : index
    %c0_0 = arith.constant 0 : index
    %0 = vector.load %arg1[%c0, %c0_0] : memref<8x216xbf16, #tpu.memory_space<vmem>>, vector<8x216xbf16>
    %c0_1 = arith.constant 0 : index
    %c0_2 = arith.constant 0 : index
    %c0_3 = arith.constant 0 : index
    %1 = vector.load %arg2[%c0_1, %c0_2, %c0_3] : memref<1x216x128xbf16, #tpu.memory_space<vmem>>, vector<1x216x128xbf16>
    %2 = vector.shape_cast %1 : vector<1x216x128xbf16> to vector<216x128xbf16>
    %cst = arith.constant dense<0.000000e+00> : vector<8x128xf32>
    %3 = tpu.matmul %0, %2, %cst {dimension_numbers = #tpu.dot_dimension_numbers<[1], [0], [0], [1], [0, 0, 1, 1], [], []>} : vector<8x216xbf16>, vector<216x128xbf16>, vector<8x128xf32> -> vector<8x128xf32>
    %cst_4 = arith.constant dense<0.000000e+00> : vector<8xf32>
    %4 = vector.multi_reduction <add>, %3, %cst_4 [1] : vector<8x128xf32> to vector<8xf32>
    %5 = vector.shape_cast %4 : vector<8xf32> to vector<8x1xf32>
    %cst_5 = arith.constant 1.280000e+02 : f32
    %6 = vector.broadcast %cst_5 : f32 to vector<8x1xf32>
    %7 = arith.divf %5, %6 : vector<8x1xf32>
    %8 = vector.broadcast %7 : vector<8x1xf32> to vector<8x128xf32>
    %9 = arith.subf %3, %8 : vector<8x128xf32>
    %10 = arith.mulf %9, %9 : vector<8x128xf32>
    %cst_6 = arith.constant dense<0.000000e+00> : vector<8xf32>
    %11 = vector.multi_reduction <add>, %10, %cst_6 [1] : vector<8x128xf32> to vector<8xf32>
    %12 = vector.shape_cast %11 : vector<8xf32> to vector<8x1xf32>
    %cst_7 = arith.constant 1.280000e+02 : f32
    %13 = vector.broadcast %cst_7 : f32 to vector<8x1xf32>
    %14 = arith.divf %12, %13 : vector<8x1xf32>
    %cst_8 = arith.constant 9.99999974E-6 : f32
    %15 = vector.broadcast %cst_8 : f32 to vector<8x1xf32>
    %16 = arith.addf %14, %15 : vector<8x1xf32>
    %17 = math.rsqrt %16 : vector<8x1xf32>
    %18 = vector.broadcast %17 : vector<8x1xf32> to vector<8x128xf32>
    %19 = arith.mulf %9, %18 : vector<8x128xf32>
    %cst_9 = arith.constant 0.000000e+00 : f32
    %20 = vector.broadcast %cst_9 : f32 to vector<8x128xf32>
    %21 = arith.cmpf oge, %19, %20 : vector<8x128xf32>
    %cst_10 = arith.constant 0.00999999977 : f32
    %22 = vector.broadcast %cst_10 : f32 to vector<8x128xf32>
    %23 = arith.mulf %22, %19 : vector<8x128xf32>
    %24 = arith.select %21, %19, %23 : vector<8x128xi1>, vector<8x128xf32>
    %25 = arith.truncf %24 : vector<8x128xf32> to vector<8x128xbf16>
    %c0_11 = arith.constant 0 : index
    %c0_12 = arith.constant 0 : index
    %c0_13 = arith.constant 0 : index
    %26 = vector.load %arg3[%c0_11, %c0_12, %c0_13] : memref<1x8x128xbf16, #tpu.memory_space<vmem>>, vector<1x8x128xbf16>
    %27 = vector.shape_cast %26 : vector<1x8x128xbf16> to vector<8x128xbf16>
    %28 = vector.shape_cast %25 : vector<8x128xbf16> to vector<1x8x128xbf16>
    tpu.vector_store %arg3[%c0_11, %c0_12, %c0_13], %28 {strides = array<i32>} : memref<1x8x128xbf16, #tpu.memory_space<vmem>>, vector<1x8x128xbf16>,
    return
  }
  func.func @transform_0(%arg0: i32) -> (i32, i32) {
    %c0_i32 = arith.constant 0 : i32
    %c0_i32_0 = arith.constant 0 : i32
    %c0_i32_1 = arith.constant 0 : i32
    return %c0_i32, %c0_i32_0 : i32, i32
  }
  func.func @transform_1(%arg0: i32) -> (i32, i32, i32) {
    %c0_i32 = arith.constant 0 : i32
    %c0_i32_0 = arith.constant 0 : i32
    %c0_i32_1 = arith.constant 0 : i32
    return %arg0, %c0_i32, %c0_i32_0 : i32, i32, i32
  }
  func.func @transform_2(%arg0: i32) -> (i32, i32, i32) {
    %c0_i32 = arith.constant 0 : i32
    %c0_i32_0 = arith.constant 0 : i32
    %c0_i32_1 = arith.constant 0 : i32
    return %arg0, %c0_i32, %c0_i32_0 : i32, i32, i32
  }
}

module attributes {stable_mosaic.version = 11 : i64} {
  func.func @_conv_in_lrelu_fused_kernel(%arg0: i32, %arg1: memref<16x216xbf16, #tpu.memory_space<vmem>>, %arg2: memref<1x216x32xbf16, #tpu.memory_space<vmem>>, %arg3: memref<1x16x32xbf16, #tpu.memory_space<vmem>>) attributes {dimension_semantics = [#tpu.dimension_semantics<parallel>], iteration_bounds = array<i64: 2>, scalar_prefetch = 0 : i64, scratch_operands = 0 : i64, tpu.core_type = #tpu.core_type<tc>, window_params = [{pipeline_mode = #tpu.pipeline_mode<synchronous>, transform_indices = @transform_0, window_bounds = array<i64: 16, 216>}, {transform_indices = @transform_1, window_bounds = array<i64: 1, 216, 32>}, {transform_indices = @transform_2, window_bounds = array<i64: 1, 16, 32>}]} {
    %c0 = arith.constant 0 : index
    %c0_0 = arith.constant 0 : index
    %0 = vector.load %arg1[%c0, %c0_0] : memref<16x216xbf16, #tpu.memory_space<vmem>>, vector<16x216xbf16>
    %c0_1 = arith.constant 0 : index
    %c0_2 = arith.constant 0 : index
    %c0_3 = arith.constant 0 : index
    %1 = vector.load %arg2[%c0_1, %c0_2, %c0_3] : memref<1x216x32xbf16, #tpu.memory_space<vmem>>, vector<1x216x32xbf16>
    %2 = vector.shape_cast %1 : vector<1x216x32xbf16> to vector<216x32xbf16>
    %cst = arith.constant dense<0.000000e+00> : vector<16x32xf32>
    %3 = tpu.matmul %0, %2, %cst {dimension_numbers = #tpu.dot_dimension_numbers<[1], [0], [0], [1], [0, 0, 1, 1], [], []>} : vector<16x216xbf16>, vector<216x32xbf16>, vector<16x32xf32> -> vector<16x32xf32>
    %cst_4 = arith.constant dense<0.000000e+00> : vector<16xf32>
    %4 = vector.multi_reduction <add>, %3, %cst_4 [1] : vector<16x32xf32> to vector<16xf32>
    %5 = vector.shape_cast %4 : vector<16xf32> to vector<16x1xf32>
    %cst_5 = arith.constant 3.200000e+01 : f32
    %6 = vector.broadcast %cst_5 : f32 to vector<16x1xf32>
    %7 = arith.divf %5, %6 : vector<16x1xf32>
    %8 = vector.broadcast %7 : vector<16x1xf32> to vector<16x32xf32>
    %9 = arith.subf %3, %8 : vector<16x32xf32>
    %10 = arith.mulf %9, %9 : vector<16x32xf32>
    %cst_6 = arith.constant dense<0.000000e+00> : vector<16xf32>
    %11 = vector.multi_reduction <add>, %10, %cst_6 [1] : vector<16x32xf32> to vector<16xf32>
    %12 = vector.shape_cast %11 : vector<16xf32> to vector<16x1xf32>
    %cst_7 = arith.constant 3.200000e+01 : f32
    %13 = vector.broadcast %cst_7 : f32 to vector<16x1xf32>
    %14 = arith.divf %12, %13 : vector<16x1xf32>
    %cst_8 = arith.constant 9.99999974E-6 : f32
    %15 = vector.broadcast %cst_8 : f32 to vector<16x1xf32>
    %16 = arith.addf %14, %15 : vector<16x1xf32>
    %17 = math.rsqrt %16 : vector<16x1xf32>
    %18 = vector.broadcast %17 : vector<16x1xf32> to vector<16x32xf32>
    %19 = arith.mulf %9, %18 : vector<16x32xf32>
    %cst_9 = arith.constant 0.000000e+00 : f32
    %20 = vector.broadcast %cst_9 : f32 to vector<16x32xf32>
    %21 = arith.cmpf oge, %19, %20 : vector<16x32xf32>
    %cst_10 = arith.constant 0.00999999977 : f32
    %22 = vector.broadcast %cst_10 : f32 to vector<16x32xf32>
    %23 = arith.mulf %22, %19 : vector<16x32xf32>
    %24 = arith.select %21, %19, %23 : vector<16x32xi1>, vector<16x32xf32>
    %25 = arith.truncf %24 : vector<16x32xf32> to vector<16x32xbf16>
    %c0_11 = arith.constant 0 : index
    %c0_12 = arith.constant 0 : index
    %c0_13 = arith.constant 0 : index
    %26 = vector.load %arg3[%c0_11, %c0_12, %c0_13] : memref<1x16x32xbf16, #tpu.memory_space<vmem>>, vector<1x16x32xbf16>
    %27 = vector.shape_cast %26 : vector<1x16x32xbf16> to vector<16x32xbf16>
    %28 = vector.shape_cast %25 : vector<16x32xbf16> to vector<1x16x32xbf16>
    tpu.vector_store %arg3[%c0_11, %c0_12, %c0_13], %28 {strides = array<i32>} : memref<1x16x32xbf16, #tpu.memory_space<vmem>>, vector<1x16x32xbf16>,
    return
  }
  func.func @transform_0(%arg0: i32) -> (i32, i32) {
    %c0_i32 = arith.constant 0 : i32
    %c0_i32_0 = arith.constant 0 : i32
    %c0_i32_1 = arith.constant 0 : i32
    return %c0_i32, %c0_i32_0 : i32, i32
  }
  func.func @transform_1(%arg0: i32) -> (i32, i32, i32) {
    %c0_i32 = arith.constant 0 : i32
    %c0_i32_0 = arith.constant 0 : i32
    %c0_i32_1 = arith.constant 0 : i32
    return %arg0, %c0_i32, %c0_i32_0 : i32, i32, i32
  }
  func.func @transform_2(%arg0: i32) -> (i32, i32, i32) {
    %c0_i32 = arith.constant 0 : i32
    %c0_i32_0 = arith.constant 0 : i32
    %c0_i32_1 = arith.constant 0 : i32
    return %arg0, %c0_i32, %c0_i32_0 : i32, i32, i32
  }
}

module attributes {stable_mosaic.version = 11 : i64} {
  func.func @_conv_in_lrelu_fused_kernel(%arg0: i32, %arg1: memref<16x432xbf16, #tpu.memory_space<vmem>>, %arg2: memref<1x432x32xbf16, #tpu.memory_space<vmem>>, %arg3: memref<1x16x32xbf16, #tpu.memory_space<vmem>>) attributes {dimension_semantics = [#tpu.dimension_semantics<parallel>], iteration_bounds = array<i64: 2>, scalar_prefetch = 0 : i64, scratch_operands = 0 : i64, tpu.core_type = #tpu.core_type<tc>, window_params = [{pipeline_mode = #tpu.pipeline_mode<synchronous>, transform_indices = @transform_0, window_bounds = array<i64: 16, 432>}, {transform_indices = @transform_1, window_bounds = array<i64: 1, 432, 32>}, {transform_indices = @transform_2, window_bounds = array<i64: 1, 16, 32>}]} {
    %c0 = arith.constant 0 : index
    %c0_0 = arith.constant 0 : index
    %0 = vector.load %arg1[%c0, %c0_0] : memref<16x432xbf16, #tpu.memory_space<vmem>>, vector<16x432xbf16>
    %c0_1 = arith.constant 0 : index
    %c0_2 = arith.constant 0 : index
    %c0_3 = arith.constant 0 : index
    %1 = vector.load %arg2[%c0_1, %c0_2, %c0_3] : memref<1x432x32xbf16, #tpu.memory_space<vmem>>, vector<1x432x32xbf16>
    %2 = vector.shape_cast %1 : vector<1x432x32xbf16> to vector<432x32xbf16>
    %cst = arith.constant dense<0.000000e+00> : vector<16x32xf32>
    %3 = tpu.matmul %0, %2, %cst {dimension_numbers = #tpu.dot_dimension_numbers<[1], [0], [0], [1], [0, 0, 1, 1], [], []>} : vector<16x432xbf16>, vector<432x32xbf16>, vector<16x32xf32> -> vector<16x32xf32>
    %cst_4 = arith.constant dense<0.000000e+00> : vector<16xf32>
    %4 = vector.multi_reduction <add>, %3, %cst_4 [1] : vector<16x32xf32> to vector<16xf32>
    %5 = vector.shape_cast %4 : vector<16xf32> to vector<16x1xf32>
    %cst_5 = arith.constant 3.200000e+01 : f32
    %6 = vector.broadcast %cst_5 : f32 to vector<16x1xf32>
    %7 = arith.divf %5, %6 : vector<16x1xf32>
    %8 = vector.broadcast %7 : vector<16x1xf32> to vector<16x32xf32>
    %9 = arith.subf %3, %8 : vector<16x32xf32>
    %10 = arith.mulf %9, %9 : vector<16x32xf32>
    %cst_6 = arith.constant dense<0.000000e+00> : vector<16xf32>
    %11 = vector.multi_reduction <add>, %10, %cst_6 [1] : vector<16x32xf32> to vector<16xf32>
    %12 = vector.shape_cast %11 : vector<16xf32> to vector<16x1xf32>
    %cst_7 = arith.constant 3.200000e+01 : f32
    %13 = vector.broadcast %cst_7 : f32 to vector<16x1xf32>
    %14 = arith.divf %12, %13 : vector<16x1xf32>
    %cst_8 = arith.constant 9.99999974E-6 : f32
    %15 = vector.broadcast %cst_8 : f32 to vector<16x1xf32>
    %16 = arith.addf %14, %15 : vector<16x1xf32>
    %17 = math.rsqrt %16 : vector<16x1xf32>
    %18 = vector.broadcast %17 : vector<16x1xf32> to vector<16x32xf32>
    %19 = arith.mulf %9, %18 : vector<16x32xf32>
    %cst_9 = arith.constant 0.000000e+00 : f32
    %20 = vector.broadcast %cst_9 : f32 to vector<16x32xf32>
    %21 = arith.cmpf oge, %19, %20 : vector<16x32xf32>
    %cst_10 = arith.constant 0.00999999977 : f32
    %22 = vector.broadcast %cst_10 : f32 to vector<16x32xf32>
    %23 = arith.mulf %22, %19 : vector<16x32xf32>
    %24 = arith.select %21, %19, %23 : vector<16x32xi1>, vector<16x32xf32>
    %25 = arith.truncf %24 : vector<16x32xf32> to vector<16x32xbf16>
    %c0_11 = arith.constant 0 : index
    %c0_12 = arith.constant 0 : index
    %c0_13 = arith.constant 0 : index
    %26 = vector.load %arg3[%c0_11, %c0_12, %c0_13] : memref<1x16x32xbf16, #tpu.memory_space<vmem>>, vector<1x16x32xbf16>
    %27 = vector.shape_cast %26 : vector<1x16x32xbf16> to vector<16x32xbf16>
    %28 = vector.shape_cast %25 : vector<16x32xbf16> to vector<1x16x32xbf16>
    tpu.vector_store %arg3[%c0_11, %c0_12, %c0_13], %28 {strides = array<i32>} : memref<1x16x32xbf16, #tpu.memory_space<vmem>>, vector<1x16x32xbf16>,
    return
  }
  func.func @transform_0(%arg0: i32) -> (i32, i32) {
    %c0_i32 = arith.constant 0 : i32
    %c0_i32_0 = arith.constant 0 : i32
    %c0_i32_1 = arith.constant 0 : i32
    return %c0_i32, %c0_i32_0 : i32, i32
  }
  func.func @transform_1(%arg0: i32) -> (i32, i32, i32) {
    %c0_i32 = arith.constant 0 : i32
    %c0_i32_0 = arith.constant 0 : i32
    %c0_i32_1 = arith.constant 0 : i32
    return %arg0, %c0_i32, %c0_i32_0 : i32, i32, i32
  }
  func.func @transform_2(%arg0: i32) -> (i32, i32, i32) {
    %c0_i32 = arith.constant 0 : i32
    %c0_i32_0 = arith.constant 0 : i32
    %c0_i32_1 = arith.constant 0 : i32
    return %arg0, %c0_i32, %c0_i32_0 : i32, i32, i32
  }
}

module attributes {stable_mosaic.version = 11 : i64} {
  func.func @_conv_in_lrelu_fused_kernel(%arg0: i32, %arg1: memref<32x432xbf16, #tpu.memory_space<vmem>>, %arg2: memref<1x432x8xbf16, #tpu.memory_space<vmem>>, %arg3: memref<1x32x8xbf16, #tpu.memory_space<vmem>>) attributes {dimension_semantics = [#tpu.dimension_semantics<parallel>], iteration_bounds = array<i64: 2>, scalar_prefetch = 0 : i64, scratch_operands = 0 : i64, tpu.core_type = #tpu.core_type<tc>, window_params = [{pipeline_mode = #tpu.pipeline_mode<synchronous>, transform_indices = @transform_0, window_bounds = array<i64: 32, 432>}, {transform_indices = @transform_1, window_bounds = array<i64: 1, 432, 8>}, {transform_indices = @transform_2, window_bounds = array<i64: 1, 32, 8>}]} {
    %c0 = arith.constant 0 : index
    %c0_0 = arith.constant 0 : index
    %0 = vector.load %arg1[%c0, %c0_0] : memref<32x432xbf16, #tpu.memory_space<vmem>>, vector<32x432xbf16>
    %c0_1 = arith.constant 0 : index
    %c0_2 = arith.constant 0 : index
    %c0_3 = arith.constant 0 : index
    %1 = vector.load %arg2[%c0_1, %c0_2, %c0_3] : memref<1x432x8xbf16, #tpu.memory_space<vmem>>, vector<1x432x8xbf16>
    %2 = vector.shape_cast %1 : vector<1x432x8xbf16> to vector<432x8xbf16>
    %cst = arith.constant dense<0.000000e+00> : vector<32x8xf32>
    %3 = tpu.matmul %0, %2, %cst {dimension_numbers = #tpu.dot_dimension_numbers<[1], [0], [0], [1], [0, 0, 1, 1], [], []>} : vector<32x432xbf16>, vector<432x8xbf16>, vector<32x8xf32> -> vector<32x8xf32>
    %cst_4 = arith.constant dense<0.000000e+00> : vector<32xf32>
    %4 = vector.multi_reduction <add>, %3, %cst_4 [1] : vector<32x8xf32> to vector<32xf32>
    %5 = vector.shape_cast %4 : vector<32xf32> to vector<32x1xf32>
    %cst_5 = arith.constant 8.000000e+00 : f32
    %6 = vector.broadcast %cst_5 : f32 to vector<32x1xf32>
    %7 = arith.divf %5, %6 : vector<32x1xf32>
    %8 = vector.broadcast %7 : vector<32x1xf32> to vector<32x8xf32>
    %9 = arith.subf %3, %8 : vector<32x8xf32>
    %10 = arith.mulf %9, %9 : vector<32x8xf32>
    %cst_6 = arith.constant dense<0.000000e+00> : vector<32xf32>
    %11 = vector.multi_reduction <add>, %10, %cst_6 [1] : vector<32x8xf32> to vector<32xf32>
    %12 = vector.shape_cast %11 : vector<32xf32> to vector<32x1xf32>
    %cst_7 = arith.constant 8.000000e+00 : f32
    %13 = vector.broadcast %cst_7 : f32 to vector<32x1xf32>
    %14 = arith.divf %12, %13 : vector<32x1xf32>
    %cst_8 = arith.constant 9.99999974E-6 : f32
    %15 = vector.broadcast %cst_8 : f32 to vector<32x1xf32>
    %16 = arith.addf %14, %15 : vector<32x1xf32>
    %17 = math.rsqrt %16 : vector<32x1xf32>
    %18 = vector.broadcast %17 : vector<32x1xf32> to vector<32x8xf32>
    %19 = arith.mulf %9, %18 : vector<32x8xf32>
    %cst_9 = arith.constant 0.000000e+00 : f32
    %20 = vector.broadcast %cst_9 : f32 to vector<32x8xf32>
    %21 = arith.cmpf oge, %19, %20 : vector<32x8xf32>
    %cst_10 = arith.constant 0.00999999977 : f32
    %22 = vector.broadcast %cst_10 : f32 to vector<32x8xf32>
    %23 = arith.mulf %22, %19 : vector<32x8xf32>
    %24 = arith.select %21, %19, %23 : vector<32x8xi1>, vector<32x8xf32>
    %25 = arith.truncf %24 : vector<32x8xf32> to vector<32x8xbf16>
    %c0_11 = arith.constant 0 : index
    %c0_12 = arith.constant 0 : index
    %c0_13 = arith.constant 0 : index
    %26 = vector.load %arg3[%c0_11, %c0_12, %c0_13] : memref<1x32x8xbf16, #tpu.memory_space<vmem>>, vector<1x32x8xbf16>
    %27 = vector.shape_cast %26 : vector<1x32x8xbf16> to vector<32x8xbf16>
    %28 = vector.shape_cast %25 : vector<32x8xbf16> to vector<1x32x8xbf16>
    tpu.vector_store %arg3[%c0_11, %c0_12, %c0_13], %28 {strides = array<i32>} : memref<1x32x8xbf16, #tpu.memory_space<vmem>>, vector<1x32x8xbf16>,
    return
  }
  func.func @transform_0(%arg0: i32) -> (i32, i32) {
    %c0_i32 = arith.constant 0 : i32
    %c0_i32_0 = arith.constant 0 : i32
    %c0_i32_1 = arith.constant 0 : i32
    return %c0_i32, %c0_i32_0 : i32, i32
  }
  func.func @transform_1(%arg0: i32) -> (i32, i32, i32) {
    %c0_i32 = arith.constant 0 : i32
    %c0_i32_0 = arith.constant 0 : i32
    %c0_i32_1 = arith.constant 0 : i32
    return %arg0, %c0_i32, %c0_i32_0 : i32, i32, i32
  }
  func.func @transform_2(%arg0: i32) -> (i32, i32, i32) {
    %c0_i32 = arith.constant 0 : i32
    %c0_i32_0 = arith.constant 0 : i32
    %c0_i32_1 = arith.constant 0 : i32
    return %arg0, %c0_i32, %c0_i32_0 : i32, i32, i32
  }
}

module attributes {stable_mosaic.version = 11 : i64} {
  func.func @_conv_in_lrelu_fused_kernel(%arg0: i32, %arg1: memref<32x864xbf16, #tpu.memory_space<vmem>>, %arg2: memref<1x864x8xbf16, #tpu.memory_space<vmem>>, %arg3: memref<1x32x8xbf16, #tpu.memory_space<vmem>>) attributes {dimension_semantics = [#tpu.dimension_semantics<parallel>], iteration_bounds = array<i64: 2>, scalar_prefetch = 0 : i64, scratch_operands = 0 : i64, tpu.core_type = #tpu.core_type<tc>, window_params = [{pipeline_mode = #tpu.pipeline_mode<synchronous>, transform_indices = @transform_0, window_bounds = array<i64: 32, 864>}, {transform_indices = @transform_1, window_bounds = array<i64: 1, 864, 8>}, {transform_indices = @transform_2, window_bounds = array<i64: 1, 32, 8>}]} {
    %c0 = arith.constant 0 : index
    %c0_0 = arith.constant 0 : index
    %0 = vector.load %arg1[%c0, %c0_0] : memref<32x864xbf16, #tpu.memory_space<vmem>>, vector<32x864xbf16>
    %c0_1 = arith.constant 0 : index
    %c0_2 = arith.constant 0 : index
    %c0_3 = arith.constant 0 : index
    %1 = vector.load %arg2[%c0_1, %c0_2, %c0_3] : memref<1x864x8xbf16, #tpu.memory_space<vmem>>, vector<1x864x8xbf16>
    %2 = vector.shape_cast %1 : vector<1x864x8xbf16> to vector<864x8xbf16>
    %cst = arith.constant dense<0.000000e+00> : vector<32x8xf32>
    %3 = tpu.matmul %0, %2, %cst {dimension_numbers = #tpu.dot_dimension_numbers<[1], [0], [0], [1], [0, 0, 1, 1], [], []>} : vector<32x864xbf16>, vector<864x8xbf16>, vector<32x8xf32> -> vector<32x8xf32>
    %cst_4 = arith.constant dense<0.000000e+00> : vector<32xf32>
    %4 = vector.multi_reduction <add>, %3, %cst_4 [1] : vector<32x8xf32> to vector<32xf32>
    %5 = vector.shape_cast %4 : vector<32xf32> to vector<32x1xf32>
    %cst_5 = arith.constant 8.000000e+00 : f32
    %6 = vector.broadcast %cst_5 : f32 to vector<32x1xf32>
    %7 = arith.divf %5, %6 : vector<32x1xf32>
    %8 = vector.broadcast %7 : vector<32x1xf32> to vector<32x8xf32>
    %9 = arith.subf %3, %8 : vector<32x8xf32>
    %10 = arith.mulf %9, %9 : vector<32x8xf32>
    %cst_6 = arith.constant dense<0.000000e+00> : vector<32xf32>
    %11 = vector.multi_reduction <add>, %10, %cst_6 [1] : vector<32x8xf32> to vector<32xf32>
    %12 = vector.shape_cast %11 : vector<32xf32> to vector<32x1xf32>
    %cst_7 = arith.constant 8.000000e+00 : f32
    %13 = vector.broadcast %cst_7 : f32 to vector<32x1xf32>
    %14 = arith.divf %12, %13 : vector<32x1xf32>
    %cst_8 = arith.constant 9.99999974E-6 : f32
    %15 = vector.broadcast %cst_8 : f32 to vector<32x1xf32>
    %16 = arith.addf %14, %15 : vector<32x1xf32>
    %17 = math.rsqrt %16 : vector<32x1xf32>
    %18 = vector.broadcast %17 : vector<32x1xf32> to vector<32x8xf32>
    %19 = arith.mulf %9, %18 : vector<32x8xf32>
    %cst_9 = arith.constant 0.000000e+00 : f32
    %20 = vector.broadcast %cst_9 : f32 to vector<32x8xf32>
    %21 = arith.cmpf oge, %19, %20 : vector<32x8xf32>
    %cst_10 = arith.constant 0.00999999977 : f32
    %22 = vector.broadcast %cst_10 : f32 to vector<32x8xf32>
    %23 = arith.mulf %22, %19 : vector<32x8xf32>
    %24 = arith.select %21, %19, %23 : vector<32x8xi1>, vector<32x8xf32>
    %25 = arith.truncf %24 : vector<32x8xf32> to vector<32x8xbf16>
    %c0_11 = arith.constant 0 : index
    %c0_12 = arith.constant 0 : index
    %c0_13 = arith.constant 0 : index
    %26 = vector.load %arg3[%c0_11, %c0_12, %c0_13] : memref<1x32x8xbf16, #tpu.memory_space<vmem>>, vector<1x32x8xbf16>
    %27 = vector.shape_cast %26 : vector<1x32x8xbf16> to vector<32x8xbf16>
    %28 = vector.shape_cast %25 : vector<32x8xbf16> to vector<1x32x8xbf16>
    tpu.vector_store %arg3[%c0_11, %c0_12, %c0_13], %28 {strides = array<i32>} : memref<1x32x8xbf16, #tpu.memory_space<vmem>>, vector<1x32x8xbf16>,
    return
  }
  func.func @transform_0(%arg0: i32) -> (i32, i32) {
    %c0_i32 = arith.constant 0 : i32
    %c0_i32_0 = arith.constant 0 : i32
    %c0_i32_1 = arith.constant 0 : i32
    return %c0_i32, %c0_i32_0 : i32, i32
  }
  func.func @transform_1(%arg0: i32) -> (i32, i32, i32) {
    %c0_i32 = arith.constant 0 : i32
    %c0_i32_0 = arith.constant 0 : i32
    %c0_i32_1 = arith.constant 0 : i32
    return %arg0, %c0_i32, %c0_i32_0 : i32, i32, i32
  }
  func.func @transform_2(%arg0: i32) -> (i32, i32, i32) {
    %c0_i32 = arith.constant 0 : i32
    %c0_i32_0 = arith.constant 0 : i32
    %c0_i32_1 = arith.constant 0 : i32
    return %arg0, %c0_i32, %c0_i32_0 : i32, i32, i32
  }
}

module attributes {stable_mosaic.version = 11 : i64} {
  func.func @_conv_in_lrelu_fused_kernel(%arg0: i32, %arg1: memref<64x864xbf16, #tpu.memory_space<vmem>>, %arg2: memref<1x864x2xbf16, #tpu.memory_space<vmem>>, %arg3: memref<1x64x2xbf16, #tpu.memory_space<vmem>>) attributes {dimension_semantics = [#tpu.dimension_semantics<parallel>], iteration_bounds = array<i64: 2>, scalar_prefetch = 0 : i64, scratch_operands = 0 : i64, tpu.core_type = #tpu.core_type<tc>, window_params = [{pipeline_mode = #tpu.pipeline_mode<synchronous>, transform_indices = @transform_0, window_bounds = array<i64: 64, 864>}, {transform_indices = @transform_1, window_bounds = array<i64: 1, 864, 2>}, {transform_indices = @transform_2, window_bounds = array<i64: 1, 64, 2>}]} {
    %c0 = arith.constant 0 : index
    %c0_0 = arith.constant 0 : index
    %0 = vector.load %arg1[%c0, %c0_0] : memref<64x864xbf16, #tpu.memory_space<vmem>>, vector<64x864xbf16>
    %c0_1 = arith.constant 0 : index
    %c0_2 = arith.constant 0 : index
    %c0_3 = arith.constant 0 : index
    %1 = vector.load %arg2[%c0_1, %c0_2, %c0_3] : memref<1x864x2xbf16, #tpu.memory_space<vmem>>, vector<1x864x2xbf16>
    %2 = vector.shape_cast %1 : vector<1x864x2xbf16> to vector<864x2xbf16>
    %cst = arith.constant dense<0.000000e+00> : vector<64x2xf32>
    %3 = tpu.matmul %0, %2, %cst {dimension_numbers = #tpu.dot_dimension_numbers<[1], [0], [0], [1], [0, 0, 1, 1], [], []>} : vector<64x864xbf16>, vector<864x2xbf16>, vector<64x2xf32> -> vector<64x2xf32>
    %cst_4 = arith.constant dense<0.000000e+00> : vector<64xf32>
    %4 = vector.multi_reduction <add>, %3, %cst_4 [1] : vector<64x2xf32> to vector<64xf32>
    %5 = vector.shape_cast %4 : vector<64xf32> to vector<64x1xf32>
    %cst_5 = arith.constant 2.000000e+00 : f32
    %6 = vector.broadcast %cst_5 : f32 to vector<64x1xf32>
    %7 = arith.divf %5, %6 : vector<64x1xf32>
    %8 = vector.broadcast %7 : vector<64x1xf32> to vector<64x2xf32>
    %9 = arith.subf %3, %8 : vector<64x2xf32>
    %10 = arith.mulf %9, %9 : vector<64x2xf32>
    %cst_6 = arith.constant dense<0.000000e+00> : vector<64xf32>
    %11 = vector.multi_reduction <add>, %10, %cst_6 [1] : vector<64x2xf32> to vector<64xf32>
    %12 = vector.shape_cast %11 : vector<64xf32> to vector<64x1xf32>
    %cst_7 = arith.constant 2.000000e+00 : f32
    %13 = vector.broadcast %cst_7 : f32 to vector<64x1xf32>
    %14 = arith.divf %12, %13 : vector<64x1xf32>
    %cst_8 = arith.constant 9.99999974E-6 : f32
    %15 = vector.broadcast %cst_8 : f32 to vector<64x1xf32>
    %16 = arith.addf %14, %15 : vector<64x1xf32>
    %17 = math.rsqrt %16 : vector<64x1xf32>
    %18 = vector.broadcast %17 : vector<64x1xf32> to vector<64x2xf32>
    %19 = arith.mulf %9, %18 : vector<64x2xf32>
    %cst_9 = arith.constant 0.000000e+00 : f32
    %20 = vector.broadcast %cst_9 : f32 to vector<64x2xf32>
    %21 = arith.cmpf oge, %19, %20 : vector<64x2xf32>
    %cst_10 = arith.constant 0.00999999977 : f32
    %22 = vector.broadcast %cst_10 : f32 to vector<64x2xf32>
    %23 = arith.mulf %22, %19 : vector<64x2xf32>
    %24 = arith.select %21, %19, %23 : vector<64x2xi1>, vector<64x2xf32>
    %25 = arith.truncf %24 : vector<64x2xf32> to vector<64x2xbf16>
    %c0_11 = arith.constant 0 : index
    %c0_12 = arith.constant 0 : index
    %c0_13 = arith.constant 0 : index
    %26 = vector.load %arg3[%c0_11, %c0_12, %c0_13] : memref<1x64x2xbf16, #tpu.memory_space<vmem>>, vector<1x64x2xbf16>
    %27 = vector.shape_cast %26 : vector<1x64x2xbf16> to vector<64x2xbf16>
    %28 = vector.shape_cast %25 : vector<64x2xbf16> to vector<1x64x2xbf16>
    tpu.vector_store %arg3[%c0_11, %c0_12, %c0_13], %28 {strides = array<i32>} : memref<1x64x2xbf16, #tpu.memory_space<vmem>>, vector<1x64x2xbf16>,
    return
  }
  func.func @transform_0(%arg0: i32) -> (i32, i32) {
    %c0_i32 = arith.constant 0 : i32
    %c0_i32_0 = arith.constant 0 : i32
    %c0_i32_1 = arith.constant 0 : i32
    return %c0_i32, %c0_i32_0 : i32, i32
  }
  func.func @transform_1(%arg0: i32) -> (i32, i32, i32) {
    %c0_i32 = arith.constant 0 : i32
    %c0_i32_0 = arith.constant 0 : i32
    %c0_i32_1 = arith.constant 0 : i32
    return %arg0, %c0_i32, %c0_i32_0 : i32, i32, i32
  }
  func.func @transform_2(%arg0: i32) -> (i32, i32, i32) {
    %c0_i32 = arith.constant 0 : i32
    %c0_i32_0 = arith.constant 0 : i32
    %c0_i32_1 = arith.constant 0 : i32
    return %arg0, %c0_i32, %c0_i32_0 : i32, i32, i32
  }
}

module attributes {stable_mosaic.version = 11 : i64} {
  func.func @_conv_in_lrelu_fused_kernel(%arg0: i32, %arg1: memref<64x1728xbf16, #tpu.memory_space<vmem>>, %arg2: memref<1x1728x2xbf16, #tpu.memory_space<vmem>>, %arg3: memref<1x64x2xbf16, #tpu.memory_space<vmem>>) attributes {dimension_semantics = [#tpu.dimension_semantics<parallel>], iteration_bounds = array<i64: 2>, scalar_prefetch = 0 : i64, scratch_operands = 0 : i64, tpu.core_type = #tpu.core_type<tc>, window_params = [{pipeline_mode = #tpu.pipeline_mode<synchronous>, transform_indices = @transform_0, window_bounds = array<i64: 64, 1728>}, {transform_indices = @transform_1, window_bounds = array<i64: 1, 1728, 2>}, {transform_indices = @transform_2, window_bounds = array<i64: 1, 64, 2>}]} {
    %c0 = arith.constant 0 : index
    %c0_0 = arith.constant 0 : index
    %0 = vector.load %arg1[%c0, %c0_0] : memref<64x1728xbf16, #tpu.memory_space<vmem>>, vector<64x1728xbf16>
    %c0_1 = arith.constant 0 : index
    %c0_2 = arith.constant 0 : index
    %c0_3 = arith.constant 0 : index
    %1 = vector.load %arg2[%c0_1, %c0_2, %c0_3] : memref<1x1728x2xbf16, #tpu.memory_space<vmem>>, vector<1x1728x2xbf16>
    %2 = vector.shape_cast %1 : vector<1x1728x2xbf16> to vector<1728x2xbf16>
    %cst = arith.constant dense<0.000000e+00> : vector<64x2xf32>
    %3 = tpu.matmul %0, %2, %cst {dimension_numbers = #tpu.dot_dimension_numbers<[1], [0], [0], [1], [0, 0, 1, 1], [], []>} : vector<64x1728xbf16>, vector<1728x2xbf16>, vector<64x2xf32> -> vector<64x2xf32>
    %cst_4 = arith.constant dense<0.000000e+00> : vector<64xf32>
    %4 = vector.multi_reduction <add>, %3, %cst_4 [1] : vector<64x2xf32> to vector<64xf32>
    %5 = vector.shape_cast %4 : vector<64xf32> to vector<64x1xf32>
    %cst_5 = arith.constant 2.000000e+00 : f32
    %6 = vector.broadcast %cst_5 : f32 to vector<64x1xf32>
    %7 = arith.divf %5, %6 : vector<64x1xf32>
    %8 = vector.broadcast %7 : vector<64x1xf32> to vector<64x2xf32>
    %9 = arith.subf %3, %8 : vector<64x2xf32>
    %10 = arith.mulf %9, %9 : vector<64x2xf32>
    %cst_6 = arith.constant dense<0.000000e+00> : vector<64xf32>
    %11 = vector.multi_reduction <add>, %10, %cst_6 [1] : vector<64x2xf32> to vector<64xf32>
    %12 = vector.shape_cast %11 : vector<64xf32> to vector<64x1xf32>
    %cst_7 = arith.constant 2.000000e+00 : f32
    %13 = vector.broadcast %cst_7 : f32 to vector<64x1xf32>
    %14 = arith.divf %12, %13 : vector<64x1xf32>
    %cst_8 = arith.constant 9.99999974E-6 : f32
    %15 = vector.broadcast %cst_8 : f32 to vector<64x1xf32>
    %16 = arith.addf %14, %15 : vector<64x1xf32>
    %17 = math.rsqrt %16 : vector<64x1xf32>
    %18 = vector.broadcast %17 : vector<64x1xf32> to vector<64x2xf32>
    %19 = arith.mulf %9, %18 : vector<64x2xf32>
    %cst_9 = arith.constant 0.000000e+00 : f32
    %20 = vector.broadcast %cst_9 : f32 to vector<64x2xf32>
    %21 = arith.cmpf oge, %19, %20 : vector<64x2xf32>
    %cst_10 = arith.constant 0.00999999977 : f32
    %22 = vector.broadcast %cst_10 : f32 to vector<64x2xf32>
    %23 = arith.mulf %22, %19 : vector<64x2xf32>
    %24 = arith.select %21, %19, %23 : vector<64x2xi1>, vector<64x2xf32>
    %25 = arith.truncf %24 : vector<64x2xf32> to vector<64x2xbf16>
    %c0_11 = arith.constant 0 : index
    %c0_12 = arith.constant 0 : index
    %c0_13 = arith.constant 0 : index
    %26 = vector.load %arg3[%c0_11, %c0_12, %c0_13] : memref<1x64x2xbf16, #tpu.memory_space<vmem>>, vector<1x64x2xbf16>
    %27 = vector.shape_cast %26 : vector<1x64x2xbf16> to vector<64x2xbf16>
    %28 = vector.shape_cast %25 : vector<64x2xbf16> to vector<1x64x2xbf16>
    tpu.vector_store %arg3[%c0_11, %c0_12, %c0_13], %28 {strides = array<i32>} : memref<1x64x2xbf16, #tpu.memory_space<vmem>>, vector<1x64x2xbf16>,
    return
  }
  func.func @transform_0(%arg0: i32) -> (i32, i32) {
    %c0_i32 = arith.constant 0 : i32
    %c0_i32_0 = arith.constant 0 : i32
    %c0_i32_1 = arith.constant 0 : i32
    return %c0_i32, %c0_i32_0 : i32, i32
  }
  func.func @transform_1(%arg0: i32) -> (i32, i32, i32) {
    %c0_i32 = arith.constant 0 : i32
    %c0_i32_0 = arith.constant 0 : i32
    %c0_i32_1 = arith.constant 0 : i32
    return %arg0, %c0_i32, %c0_i32_0 : i32, i32, i32
  }
  func.func @transform_2(%arg0: i32) -> (i32, i32, i32) {
    %c0_i32 = arith.constant 0 : i32
    %c0_i32_0 = arith.constant 0 : i32
    %c0_i32_1 = arith.constant 0 : i32
    return %arg0, %c0_i32, %c0_i32_0 : i32, i32, i32
  }
}

module attributes {stable_mosaic.version = 11 : i64} {
  func.func @_matmul_bias_kernel(%arg0: i32, %arg1: i32, %arg2: memref<128x64xbf16, #tpu.memory_space<vmem>>, %arg3: memref<1x64x2xbf16, #tpu.memory_space<vmem>>, %arg4: memref<128x1xf32, #tpu.memory_space<vmem>>, %arg5: memref<1x128x2xbf16, #tpu.memory_space<vmem>>) attributes {dimension_semantics = [#tpu.dimension_semantics<parallel>, #tpu.dimension_semantics<parallel>], iteration_bounds = array<i64: 2, 1>, scalar_prefetch = 0 : i64, scratch_operands = 0 : i64, tpu.core_type = #tpu.core_type<tc>, window_params = [{pipeline_mode = #tpu.pipeline_mode<synchronous>, transform_indices = @transform_0, window_bounds = array<i64: 128, 64>}, {transform_indices = @transform_1, window_bounds = array<i64: 1, 64, 2>}, {pipeline_mode = #tpu.pipeline_mode<synchronous>, transform_indices = @transform_2, window_bounds = array<i64: 128, 1>}, {transform_indices = @transform_3, window_bounds = array<i64: 1, 128, 2>}]} {
    %c0 = arith.constant 0 : index
    %c0_0 = arith.constant 0 : index
    %0 = vector.load %arg2[%c0, %c0_0] : memref<128x64xbf16, #tpu.memory_space<vmem>>, vector<128x64xbf16>
    %c0_1 = arith.constant 0 : index
    %c0_2 = arith.constant 0 : index
    %c0_3 = arith.constant 0 : index
    %1 = vector.load %arg3[%c0_1, %c0_2, %c0_3] : memref<1x64x2xbf16, #tpu.memory_space<vmem>>, vector<1x64x2xbf16>
    %2 = vector.shape_cast %1 : vector<1x64x2xbf16> to vector<64x2xbf16>
    %cst = arith.constant dense<0.000000e+00> : vector<128x2xf32>
    %3 = tpu.matmul %0, %2, %cst {dimension_numbers = #tpu.dot_dimension_numbers<[1], [0], [0], [1], [0, 0, 1, 1], [], []>} : vector<128x64xbf16>, vector<64x2xbf16>, vector<128x2xf32> -> vector<128x2xf32>
    %c0_4 = arith.constant 0 : index
    %c0_5 = arith.constant 0 : index
    %4 = vector.load %arg4[%c0_4, %c0_5] : memref<128x1xf32, #tpu.memory_space<vmem>>, vector<128x1xf32>
    %5 = vector.broadcast %4 : vector<128x1xf32> to vector<128x2xf32>
    %6 = arith.addf %3, %5 : vector<128x2xf32>
    %7 = arith.truncf %6 : vector<128x2xf32> to vector<128x2xbf16>
    %c0_6 = arith.constant 0 : index
    %c0_7 = arith.constant 0 : index
    %c0_8 = arith.constant 0 : index
    %8 = vector.load %arg5[%c0_6, %c0_7, %c0_8] : memref<1x128x2xbf16, #tpu.memory_space<vmem>>, vector<1x128x2xbf16>
    %9 = vector.shape_cast %8 : vector<1x128x2xbf16> to vector<128x2xbf16>
    %10 = vector.shape_cast %7 : vector<128x2xbf16> to vector<1x128x2xbf16>
    tpu.vector_store %arg5[%c0_6, %c0_7, %c0_8], %10 {strides = array<i32>} : memref<1x128x2xbf16, #tpu.memory_space<vmem>>, vector<1x128x2xbf16>,
    return
  }
  func.func @transform_0(%arg0: i32, %arg1: i32) -> (i32, i32) {
    %c0_i32 = arith.constant 0 : i32
    %c0_i32_0 = arith.constant 0 : i32
    %c0_i32_1 = arith.constant 0 : i32
    return %c0_i32, %c0_i32_0 : i32, i32
  }
  func.func @transform_1(%arg0: i32, %arg1: i32) -> (i32, i32, i32) {
    %c0_i32 = arith.constant 0 : i32
    %c0_i32_0 = arith.constant 0 : i32
    return %arg0, %c0_i32, %arg1 : i32, i32, i32
  }
  func.func @transform_2(%arg0: i32, %arg1: i32) -> (i32, i32) {
    %c0_i32 = arith.constant 0 : i32
    %c0_i32_0 = arith.constant 0 : i32
    %c0_i32_1 = arith.constant 0 : i32
    return %c0_i32, %c0_i32_0 : i32, i32
  }
  func.func @transform_3(%arg0: i32, %arg1: i32) -> (i32, i32, i32) {
    %c0_i32 = arith.constant 0 : i32
    %c0_i32_0 = arith.constant 0 : i32
    return %arg0, %c0_i32, %arg1 : i32, i32, i32
  }
}

module attributes {stable_mosaic.version = 11 : i64} {
  func.func @_conv_in_lrelu_fused_kernel(%arg0: i32, %arg1: memref<32x1728xbf16, #tpu.memory_space<vmem>>, %arg2: memref<1x1728x8xbf16, #tpu.memory_space<vmem>>, %arg3: memref<1x32x8xbf16, #tpu.memory_space<vmem>>) attributes {dimension_semantics = [#tpu.dimension_semantics<parallel>], iteration_bounds = array<i64: 2>, scalar_prefetch = 0 : i64, scratch_operands = 0 : i64, tpu.core_type = #tpu.core_type<tc>, window_params = [{pipeline_mode = #tpu.pipeline_mode<synchronous>, transform_indices = @transform_0, window_bounds = array<i64: 32, 1728>}, {transform_indices = @transform_1, window_bounds = array<i64: 1, 1728, 8>}, {transform_indices = @transform_2, window_bounds = array<i64: 1, 32, 8>}]} {
    %c0 = arith.constant 0 : index
    %c0_0 = arith.constant 0 : index
    %0 = vector.load %arg1[%c0, %c0_0] : memref<32x1728xbf16, #tpu.memory_space<vmem>>, vector<32x1728xbf16>
    %c0_1 = arith.constant 0 : index
    %c0_2 = arith.constant 0 : index
    %c0_3 = arith.constant 0 : index
    %1 = vector.load %arg2[%c0_1, %c0_2, %c0_3] : memref<1x1728x8xbf16, #tpu.memory_space<vmem>>, vector<1x1728x8xbf16>
    %2 = vector.shape_cast %1 : vector<1x1728x8xbf16> to vector<1728x8xbf16>
    %cst = arith.constant dense<0.000000e+00> : vector<32x8xf32>
    %3 = tpu.matmul %0, %2, %cst {dimension_numbers = #tpu.dot_dimension_numbers<[1], [0], [0], [1], [0, 0, 1, 1], [], []>} : vector<32x1728xbf16>, vector<1728x8xbf16>, vector<32x8xf32> -> vector<32x8xf32>
    %cst_4 = arith.constant dense<0.000000e+00> : vector<32xf32>
    %4 = vector.multi_reduction <add>, %3, %cst_4 [1] : vector<32x8xf32> to vector<32xf32>
    %5 = vector.shape_cast %4 : vector<32xf32> to vector<32x1xf32>
    %cst_5 = arith.constant 8.000000e+00 : f32
    %6 = vector.broadcast %cst_5 : f32 to vector<32x1xf32>
    %7 = arith.divf %5, %6 : vector<32x1xf32>
    %8 = vector.broadcast %7 : vector<32x1xf32> to vector<32x8xf32>
    %9 = arith.subf %3, %8 : vector<32x8xf32>
    %10 = arith.mulf %9, %9 : vector<32x8xf32>
    %cst_6 = arith.constant dense<0.000000e+00> : vector<32xf32>
    %11 = vector.multi_reduction <add>, %10, %cst_6 [1] : vector<32x8xf32> to vector<32xf32>
    %12 = vector.shape_cast %11 : vector<32xf32> to vector<32x1xf32>
    %cst_7 = arith.constant 8.000000e+00 : f32
    %13 = vector.broadcast %cst_7 : f32 to vector<32x1xf32>
    %14 = arith.divf %12, %13 : vector<32x1xf32>
    %cst_8 = arith.constant 9.99999974E-6 : f32
    %15 = vector.broadcast %cst_8 : f32 to vector<32x1xf32>
    %16 = arith.addf %14, %15 : vector<32x1xf32>
    %17 = math.rsqrt %16 : vector<32x1xf32>
    %18 = vector.broadcast %17 : vector<32x1xf32> to vector<32x8xf32>
    %19 = arith.mulf %9, %18 : vector<32x8xf32>
    %cst_9 = arith.constant 0.000000e+00 : f32
    %20 = vector.broadcast %cst_9 : f32 to vector<32x8xf32>
    %21 = arith.cmpf oge, %19, %20 : vector<32x8xf32>
    %cst_10 = arith.constant 0.00999999977 : f32
    %22 = vector.broadcast %cst_10 : f32 to vector<32x8xf32>
    %23 = arith.mulf %22, %19 : vector<32x8xf32>
    %24 = arith.select %21, %19, %23 : vector<32x8xi1>, vector<32x8xf32>
    %25 = arith.truncf %24 : vector<32x8xf32> to vector<32x8xbf16>
    %c0_11 = arith.constant 0 : index
    %c0_12 = arith.constant 0 : index
    %c0_13 = arith.constant 0 : index
    %26 = vector.load %arg3[%c0_11, %c0_12, %c0_13] : memref<1x32x8xbf16, #tpu.memory_space<vmem>>, vector<1x32x8xbf16>
    %27 = vector.shape_cast %26 : vector<1x32x8xbf16> to vector<32x8xbf16>
    %28 = vector.shape_cast %25 : vector<32x8xbf16> to vector<1x32x8xbf16>
    tpu.vector_store %arg3[%c0_11, %c0_12, %c0_13], %28 {strides = array<i32>} : memref<1x32x8xbf16, #tpu.memory_space<vmem>>, vector<1x32x8xbf16>,
    return
  }
  func.func @transform_0(%arg0: i32) -> (i32, i32) {
    %c0_i32 = arith.constant 0 : i32
    %c0_i32_0 = arith.constant 0 : i32
    %c0_i32_1 = arith.constant 0 : i32
    return %c0_i32, %c0_i32_0 : i32, i32
  }
  func.func @transform_1(%arg0: i32) -> (i32, i32, i32) {
    %c0_i32 = arith.constant 0 : i32
    %c0_i32_0 = arith.constant 0 : i32
    %c0_i32_1 = arith.constant 0 : i32
    return %arg0, %c0_i32, %c0_i32_0 : i32, i32, i32
  }
  func.func @transform_2(%arg0: i32) -> (i32, i32, i32) {
    %c0_i32 = arith.constant 0 : i32
    %c0_i32_0 = arith.constant 0 : i32
    %c0_i32_1 = arith.constant 0 : i32
    return %arg0, %c0_i32, %c0_i32_0 : i32, i32, i32
  }
}

module attributes {stable_mosaic.version = 11 : i64} {
  func.func @_matmul_bias_kernel(%arg0: i32, %arg1: i32, %arg2: memref<64x32xbf16, #tpu.memory_space<vmem>>, %arg3: memref<1x32x8xbf16, #tpu.memory_space<vmem>>, %arg4: memref<64x1xf32, #tpu.memory_space<vmem>>, %arg5: memref<1x64x8xbf16, #tpu.memory_space<vmem>>) attributes {dimension_semantics = [#tpu.dimension_semantics<parallel>, #tpu.dimension_semantics<parallel>], iteration_bounds = array<i64: 2, 1>, scalar_prefetch = 0 : i64, scratch_operands = 0 : i64, tpu.core_type = #tpu.core_type<tc>, window_params = [{pipeline_mode = #tpu.pipeline_mode<synchronous>, transform_indices = @transform_0, window_bounds = array<i64: 64, 32>}, {transform_indices = @transform_1, window_bounds = array<i64: 1, 32, 8>}, {pipeline_mode = #tpu.pipeline_mode<synchronous>, transform_indices = @transform_2, window_bounds = array<i64: 64, 1>}, {transform_indices = @transform_3, window_bounds = array<i64: 1, 64, 8>}]} {
    %c0 = arith.constant 0 : index
    %c0_0 = arith.constant 0 : index
    %0 = vector.load %arg2[%c0, %c0_0] : memref<64x32xbf16, #tpu.memory_space<vmem>>, vector<64x32xbf16>
    %c0_1 = arith.constant 0 : index
    %c0_2 = arith.constant 0 : index
    %c0_3 = arith.constant 0 : index
    %1 = vector.load %arg3[%c0_1, %c0_2, %c0_3] : memref<1x32x8xbf16, #tpu.memory_space<vmem>>, vector<1x32x8xbf16>
    %2 = vector.shape_cast %1 : vector<1x32x8xbf16> to vector<32x8xbf16>
    %cst = arith.constant dense<0.000000e+00> : vector<64x8xf32>
    %3 = tpu.matmul %0, %2, %cst {dimension_numbers = #tpu.dot_dimension_numbers<[1], [0], [0], [1], [0, 0, 1, 1], [], []>} : vector<64x32xbf16>, vector<32x8xbf16>, vector<64x8xf32> -> vector<64x8xf32>
    %c0_4 = arith.constant 0 : index
    %c0_5 = arith.constant 0 : index
    %4 = vector.load %arg4[%c0_4, %c0_5] : memref<64x1xf32, #tpu.memory_space<vmem>>, vector<64x1xf32>
    %5 = vector.broadcast %4 : vector<64x1xf32> to vector<64x8xf32>
    %6 = arith.addf %3, %5 : vector<64x8xf32>
    %7 = arith.truncf %6 : vector<64x8xf32> to vector<64x8xbf16>
    %c0_6 = arith.constant 0 : index
    %c0_7 = arith.constant 0 : index
    %c0_8 = arith.constant 0 : index
    %8 = vector.load %arg5[%c0_6, %c0_7, %c0_8] : memref<1x64x8xbf16, #tpu.memory_space<vmem>>, vector<1x64x8xbf16>
    %9 = vector.shape_cast %8 : vector<1x64x8xbf16> to vector<64x8xbf16>
    %10 = vector.shape_cast %7 : vector<64x8xbf16> to vector<1x64x8xbf16>
    tpu.vector_store %arg5[%c0_6, %c0_7, %c0_8], %10 {strides = array<i32>} : memref<1x64x8xbf16, #tpu.memory_space<vmem>>, vector<1x64x8xbf16>,
    return
  }
  func.func @transform_0(%arg0: i32, %arg1: i32) -> (i32, i32) {
    %c0_i32 = arith.constant 0 : i32
    %c0_i32_0 = arith.constant 0 : i32
    %c0_i32_1 = arith.constant 0 : i32
    return %c0_i32, %c0_i32_0 : i32, i32
  }
  func.func @transform_1(%arg0: i32, %arg1: i32) -> (i32, i32, i32) {
    %c0_i32 = arith.constant 0 : i32
    %c0_i32_0 = arith.constant 0 : i32
    return %arg0, %c0_i32, %arg1 : i32, i32, i32
  }
  func.func @transform_2(%arg0: i32, %arg1: i32) -> (i32, i32) {
    %c0_i32 = arith.constant 0 : i32
    %c0_i32_0 = arith.constant 0 : i32
    %c0_i32_1 = arith.constant 0 : i32
    return %c0_i32, %c0_i32_0 : i32, i32
  }
  func.func @transform_3(%arg0: i32, %arg1: i32) -> (i32, i32, i32) {
    %c0_i32 = arith.constant 0 : i32
    %c0_i32_0 = arith.constant 0 : i32
    return %arg0, %c0_i32, %arg1 : i32, i32, i32
  }
}

module attributes {stable_mosaic.version = 11 : i64} {
  func.func @_conv_in_lrelu_fused_kernel(%arg0: i32, %arg1: memref<16x864xbf16, #tpu.memory_space<vmem>>, %arg2: memref<1x864x32xbf16, #tpu.memory_space<vmem>>, %arg3: memref<1x16x32xbf16, #tpu.memory_space<vmem>>) attributes {dimension_semantics = [#tpu.dimension_semantics<parallel>], iteration_bounds = array<i64: 2>, scalar_prefetch = 0 : i64, scratch_operands = 0 : i64, tpu.core_type = #tpu.core_type<tc>, window_params = [{pipeline_mode = #tpu.pipeline_mode<synchronous>, transform_indices = @transform_0, window_bounds = array<i64: 16, 864>}, {transform_indices = @transform_1, window_bounds = array<i64: 1, 864, 32>}, {transform_indices = @transform_2, window_bounds = array<i64: 1, 16, 32>}]} {
    %c0 = arith.constant 0 : index
    %c0_0 = arith.constant 0 : index
    %0 = vector.load %arg1[%c0, %c0_0] : memref<16x864xbf16, #tpu.memory_space<vmem>>, vector<16x864xbf16>
    %c0_1 = arith.constant 0 : index
    %c0_2 = arith.constant 0 : index
    %c0_3 = arith.constant 0 : index
    %1 = vector.load %arg2[%c0_1, %c0_2, %c0_3] : memref<1x864x32xbf16, #tpu.memory_space<vmem>>, vector<1x864x32xbf16>
    %2 = vector.shape_cast %1 : vector<1x864x32xbf16> to vector<864x32xbf16>
    %cst = arith.constant dense<0.000000e+00> : vector<16x32xf32>
    %3 = tpu.matmul %0, %2, %cst {dimension_numbers = #tpu.dot_dimension_numbers<[1], [0], [0], [1], [0, 0, 1, 1], [], []>} : vector<16x864xbf16>, vector<864x32xbf16>, vector<16x32xf32> -> vector<16x32xf32>
    %cst_4 = arith.constant dense<0.000000e+00> : vector<16xf32>
    %4 = vector.multi_reduction <add>, %3, %cst_4 [1] : vector<16x32xf32> to vector<16xf32>
    %5 = vector.shape_cast %4 : vector<16xf32> to vector<16x1xf32>
    %cst_5 = arith.constant 3.200000e+01 : f32
    %6 = vector.broadcast %cst_5 : f32 to vector<16x1xf32>
    %7 = arith.divf %5, %6 : vector<16x1xf32>
    %8 = vector.broadcast %7 : vector<16x1xf32> to vector<16x32xf32>
    %9 = arith.subf %3, %8 : vector<16x32xf32>
    %10 = arith.mulf %9, %9 : vector<16x32xf32>
    %cst_6 = arith.constant dense<0.000000e+00> : vector<16xf32>
    %11 = vector.multi_reduction <add>, %10, %cst_6 [1] : vector<16x32xf32> to vector<16xf32>
    %12 = vector.shape_cast %11 : vector<16xf32> to vector<16x1xf32>
    %cst_7 = arith.constant 3.200000e+01 : f32
    %13 = vector.broadcast %cst_7 : f32 to vector<16x1xf32>
    %14 = arith.divf %12, %13 : vector<16x1xf32>
    %cst_8 = arith.constant 9.99999974E-6 : f32
    %15 = vector.broadcast %cst_8 : f32 to vector<16x1xf32>
    %16 = arith.addf %14, %15 : vector<16x1xf32>
    %17 = math.rsqrt %16 : vector<16x1xf32>
    %18 = vector.broadcast %17 : vector<16x1xf32> to vector<16x32xf32>
    %19 = arith.mulf %9, %18 : vector<16x32xf32>
    %cst_9 = arith.constant 0.000000e+00 : f32
    %20 = vector.broadcast %cst_9 : f32 to vector<16x32xf32>
    %21 = arith.cmpf oge, %19, %20 : vector<16x32xf32>
    %cst_10 = arith.constant 0.00999999977 : f32
    %22 = vector.broadcast %cst_10 : f32 to vector<16x32xf32>
    %23 = arith.mulf %22, %19 : vector<16x32xf32>
    %24 = arith.select %21, %19, %23 : vector<16x32xi1>, vector<16x32xf32>
    %25 = arith.truncf %24 : vector<16x32xf32> to vector<16x32xbf16>
    %c0_11 = arith.constant 0 : index
    %c0_12 = arith.constant 0 : index
    %c0_13 = arith.constant 0 : index
    %26 = vector.load %arg3[%c0_11, %c0_12, %c0_13] : memref<1x16x32xbf16, #tpu.memory_space<vmem>>, vector<1x16x32xbf16>
    %27 = vector.shape_cast %26 : vector<1x16x32xbf16> to vector<16x32xbf16>
    %28 = vector.shape_cast %25 : vector<16x32xbf16> to vector<1x16x32xbf16>
    tpu.vector_store %arg3[%c0_11, %c0_12, %c0_13], %28 {strides = array<i32>} : memref<1x16x32xbf16, #tpu.memory_space<vmem>>, vector<1x16x32xbf16>,
    return
  }
  func.func @transform_0(%arg0: i32) -> (i32, i32) {
    %c0_i32 = arith.constant 0 : i32
    %c0_i32_0 = arith.constant 0 : i32
    %c0_i32_1 = arith.constant 0 : i32
    return %c0_i32, %c0_i32_0 : i32, i32
  }
  func.func @transform_1(%arg0: i32) -> (i32, i32, i32) {
    %c0_i32 = arith.constant 0 : i32
    %c0_i32_0 = arith.constant 0 : i32
    %c0_i32_1 = arith.constant 0 : i32
    return %arg0, %c0_i32, %c0_i32_0 : i32, i32, i32
  }
  func.func @transform_2(%arg0: i32) -> (i32, i32, i32) {
    %c0_i32 = arith.constant 0 : i32
    %c0_i32_0 = arith.constant 0 : i32
    %c0_i32_1 = arith.constant 0 : i32
    return %arg0, %c0_i32, %c0_i32_0 : i32, i32, i32
  }
}

module attributes {stable_mosaic.version = 11 : i64} {
  func.func @_matmul_bias_kernel(%arg0: i32, %arg1: i32, %arg2: memref<32x16xbf16, #tpu.memory_space<vmem>>, %arg3: memref<1x16x32xbf16, #tpu.memory_space<vmem>>, %arg4: memref<32x1xf32, #tpu.memory_space<vmem>>, %arg5: memref<1x32x32xbf16, #tpu.memory_space<vmem>>) attributes {dimension_semantics = [#tpu.dimension_semantics<parallel>, #tpu.dimension_semantics<parallel>], iteration_bounds = array<i64: 2, 1>, scalar_prefetch = 0 : i64, scratch_operands = 0 : i64, tpu.core_type = #tpu.core_type<tc>, window_params = [{pipeline_mode = #tpu.pipeline_mode<synchronous>, transform_indices = @transform_0, window_bounds = array<i64: 32, 16>}, {transform_indices = @transform_1, window_bounds = array<i64: 1, 16, 32>}, {pipeline_mode = #tpu.pipeline_mode<synchronous>, transform_indices = @transform_2, window_bounds = array<i64: 32, 1>}, {transform_indices = @transform_3, window_bounds = array<i64: 1, 32, 32>}]} {
    %c0 = arith.constant 0 : index
    %c0_0 = arith.constant 0 : index
    %0 = vector.load %arg2[%c0, %c0_0] : memref<32x16xbf16, #tpu.memory_space<vmem>>, vector<32x16xbf16>
    %c0_1 = arith.constant 0 : index
    %c0_2 = arith.constant 0 : index
    %c0_3 = arith.constant 0 : index
    %1 = vector.load %arg3[%c0_1, %c0_2, %c0_3] : memref<1x16x32xbf16, #tpu.memory_space<vmem>>, vector<1x16x32xbf16>
    %2 = vector.shape_cast %1 : vector<1x16x32xbf16> to vector<16x32xbf16>
    %cst = arith.constant dense<0.000000e+00> : vector<32x32xf32>
    %3 = tpu.matmul %0, %2, %cst {dimension_numbers = #tpu.dot_dimension_numbers<[1], [0], [0], [1], [0, 0, 1, 1], [], []>} : vector<32x16xbf16>, vector<16x32xbf16>, vector<32x32xf32> -> vector<32x32xf32>
    %c0_4 = arith.constant 0 : index
    %c0_5 = arith.constant 0 : index
    %4 = vector.load %arg4[%c0_4, %c0_5] : memref<32x1xf32, #tpu.memory_space<vmem>>, vector<32x1xf32>
    %5 = vector.broadcast %4 : vector<32x1xf32> to vector<32x32xf32>
    %6 = arith.addf %3, %5 : vector<32x32xf32>
    %7 = arith.truncf %6 : vector<32x32xf32> to vector<32x32xbf16>
    %c0_6 = arith.constant 0 : index
    %c0_7 = arith.constant 0 : index
    %c0_8 = arith.constant 0 : index
    %8 = vector.load %arg5[%c0_6, %c0_7, %c0_8] : memref<1x32x32xbf16, #tpu.memory_space<vmem>>, vector<1x32x32xbf16>
    %9 = vector.shape_cast %8 : vector<1x32x32xbf16> to vector<32x32xbf16>
    %10 = vector.shape_cast %7 : vector<32x32xbf16> to vector<1x32x32xbf16>
    tpu.vector_store %arg5[%c0_6, %c0_7, %c0_8], %10 {strides = array<i32>} : memref<1x32x32xbf16, #tpu.memory_space<vmem>>, vector<1x32x32xbf16>,
    return
  }
  func.func @transform_0(%arg0: i32, %arg1: i32) -> (i32, i32) {
    %c0_i32 = arith.constant 0 : i32
    %c0_i32_0 = arith.constant 0 : i32
    %c0_i32_1 = arith.constant 0 : i32
    return %c0_i32, %c0_i32_0 : i32, i32
  }
  func.func @transform_1(%arg0: i32, %arg1: i32) -> (i32, i32, i32) {
    %c0_i32 = arith.constant 0 : i32
    %c0_i32_0 = arith.constant 0 : i32
    return %arg0, %c0_i32, %arg1 : i32, i32, i32
  }
  func.func @transform_2(%arg0: i32, %arg1: i32) -> (i32, i32) {
    %c0_i32 = arith.constant 0 : i32
    %c0_i32_0 = arith.constant 0 : i32
    %c0_i32_1 = arith.constant 0 : i32
    return %c0_i32, %c0_i32_0 : i32, i32
  }
  func.func @transform_3(%arg0: i32, %arg1: i32) -> (i32, i32, i32) {
    %c0_i32 = arith.constant 0 : i32
    %c0_i32_0 = arith.constant 0 : i32
    return %arg0, %c0_i32, %arg1 : i32, i32, i32
  }
}

module attributes {stable_mosaic.version = 11 : i64} {
  func.func @_conv_in_lrelu_fused_kernel(%arg0: i32, %arg1: memref<8x432xbf16, #tpu.memory_space<vmem>>, %arg2: memref<1x432x128xbf16, #tpu.memory_space<vmem>>, %arg3: memref<1x8x128xbf16, #tpu.memory_space<vmem>>) attributes {dimension_semantics = [#tpu.dimension_semantics<parallel>], iteration_bounds = array<i64: 2>, scalar_prefetch = 0 : i64, scratch_operands = 0 : i64, tpu.core_type = #tpu.core_type<tc>, window_params = [{pipeline_mode = #tpu.pipeline_mode<synchronous>, transform_indices = @transform_0, window_bounds = array<i64: 8, 432>}, {transform_indices = @transform_1, window_bounds = array<i64: 1, 432, 128>}, {transform_indices = @transform_2, window_bounds = array<i64: 1, 8, 128>}]} {
    %c0 = arith.constant 0 : index
    %c0_0 = arith.constant 0 : index
    %0 = vector.load %arg1[%c0, %c0_0] : memref<8x432xbf16, #tpu.memory_space<vmem>>, vector<8x432xbf16>
    %c0_1 = arith.constant 0 : index
    %c0_2 = arith.constant 0 : index
    %c0_3 = arith.constant 0 : index
    %1 = vector.load %arg2[%c0_1, %c0_2, %c0_3] : memref<1x432x128xbf16, #tpu.memory_space<vmem>>, vector<1x432x128xbf16>
    %2 = vector.shape_cast %1 : vector<1x432x128xbf16> to vector<432x128xbf16>
    %cst = arith.constant dense<0.000000e+00> : vector<8x128xf32>
    %3 = tpu.matmul %0, %2, %cst {dimension_numbers = #tpu.dot_dimension_numbers<[1], [0], [0], [1], [0, 0, 1, 1], [], []>} : vector<8x432xbf16>, vector<432x128xbf16>, vector<8x128xf32> -> vector<8x128xf32>
    %cst_4 = arith.constant dense<0.000000e+00> : vector<8xf32>
    %4 = vector.multi_reduction <add>, %3, %cst_4 [1] : vector<8x128xf32> to vector<8xf32>
    %5 = vector.shape_cast %4 : vector<8xf32> to vector<8x1xf32>
    %cst_5 = arith.constant 1.280000e+02 : f32
    %6 = vector.broadcast %cst_5 : f32 to vector<8x1xf32>
    %7 = arith.divf %5, %6 : vector<8x1xf32>
    %8 = vector.broadcast %7 : vector<8x1xf32> to vector<8x128xf32>
    %9 = arith.subf %3, %8 : vector<8x128xf32>
    %10 = arith.mulf %9, %9 : vector<8x128xf32>
    %cst_6 = arith.constant dense<0.000000e+00> : vector<8xf32>
    %11 = vector.multi_reduction <add>, %10, %cst_6 [1] : vector<8x128xf32> to vector<8xf32>
    %12 = vector.shape_cast %11 : vector<8xf32> to vector<8x1xf32>
    %cst_7 = arith.constant 1.280000e+02 : f32
    %13 = vector.broadcast %cst_7 : f32 to vector<8x1xf32>
    %14 = arith.divf %12, %13 : vector<8x1xf32>
    %cst_8 = arith.constant 9.99999974E-6 : f32
    %15 = vector.broadcast %cst_8 : f32 to vector<8x1xf32>
    %16 = arith.addf %14, %15 : vector<8x1xf32>
    %17 = math.rsqrt %16 : vector<8x1xf32>
    %18 = vector.broadcast %17 : vector<8x1xf32> to vector<8x128xf32>
    %19 = arith.mulf %9, %18 : vector<8x128xf32>
    %cst_9 = arith.constant 0.000000e+00 : f32
    %20 = vector.broadcast %cst_9 : f32 to vector<8x128xf32>
    %21 = arith.cmpf oge, %19, %20 : vector<8x128xf32>
    %cst_10 = arith.constant 0.00999999977 : f32
    %22 = vector.broadcast %cst_10 : f32 to vector<8x128xf32>
    %23 = arith.mulf %22, %19 : vector<8x128xf32>
    %24 = arith.select %21, %19, %23 : vector<8x128xi1>, vector<8x128xf32>
    %25 = arith.truncf %24 : vector<8x128xf32> to vector<8x128xbf16>
    %c0_11 = arith.constant 0 : index
    %c0_12 = arith.constant 0 : index
    %c0_13 = arith.constant 0 : index
    %26 = vector.load %arg3[%c0_11, %c0_12, %c0_13] : memref<1x8x128xbf16, #tpu.memory_space<vmem>>, vector<1x8x128xbf16>
    %27 = vector.shape_cast %26 : vector<1x8x128xbf16> to vector<8x128xbf16>
    %28 = vector.shape_cast %25 : vector<8x128xbf16> to vector<1x8x128xbf16>
    tpu.vector_store %arg3[%c0_11, %c0_12, %c0_13], %28 {strides = array<i32>} : memref<1x8x128xbf16, #tpu.memory_space<vmem>>, vector<1x8x128xbf16>,
    return
  }
  func.func @transform_0(%arg0: i32) -> (i32, i32) {
    %c0_i32 = arith.constant 0 : i32
    %c0_i32_0 = arith.constant 0 : i32
    %c0_i32_1 = arith.constant 0 : i32
    return %c0_i32, %c0_i32_0 : i32, i32
  }
  func.func @transform_1(%arg0: i32) -> (i32, i32, i32) {
    %c0_i32 = arith.constant 0 : i32
    %c0_i32_0 = arith.constant 0 : i32
    %c0_i32_1 = arith.constant 0 : i32
    return %arg0, %c0_i32, %c0_i32_0 : i32, i32, i32
  }
  func.func @transform_2(%arg0: i32) -> (i32, i32, i32) {
    %c0_i32 = arith.constant 0 : i32
    %c0_i32_0 = arith.constant 0 : i32
    %c0_i32_1 = arith.constant 0 : i32
    return %arg0, %c0_i32, %c0_i32_0 : i32, i32, i32
  }
}

module attributes {stable_mosaic.version = 11 : i64} {
  func.func @_matmul_bias_kernel(%arg0: i32, %arg1: i32, %arg2: memref<16x8xbf16, #tpu.memory_space<vmem>>, %arg3: memref<1x8x128xbf16, #tpu.memory_space<vmem>>, %arg4: memref<16x1xf32, #tpu.memory_space<vmem>>, %arg5: memref<1x16x128xbf16, #tpu.memory_space<vmem>>) attributes {dimension_semantics = [#tpu.dimension_semantics<parallel>, #tpu.dimension_semantics<parallel>], iteration_bounds = array<i64: 2, 1>, scalar_prefetch = 0 : i64, scratch_operands = 0 : i64, tpu.core_type = #tpu.core_type<tc>, window_params = [{pipeline_mode = #tpu.pipeline_mode<synchronous>, transform_indices = @transform_0, window_bounds = array<i64: 16, 8>}, {transform_indices = @transform_1, window_bounds = array<i64: 1, 8, 128>}, {pipeline_mode = #tpu.pipeline_mode<synchronous>, transform_indices = @transform_2, window_bounds = array<i64: 16, 1>}, {transform_indices = @transform_3, window_bounds = array<i64: 1, 16, 128>}]} {
    %c0 = arith.constant 0 : index
    %c0_0 = arith.constant 0 : index
    %0 = vector.load %arg2[%c0, %c0_0] : memref<16x8xbf16, #tpu.memory_space<vmem>>, vector<16x8xbf16>
    %c0_1 = arith.constant 0 : index
    %c0_2 = arith.constant 0 : index
    %c0_3 = arith.constant 0 : index
    %1 = vector.load %arg3[%c0_1, %c0_2, %c0_3] : memref<1x8x128xbf16, #tpu.memory_space<vmem>>, vector<1x8x128xbf16>
    %2 = vector.shape_cast %1 : vector<1x8x128xbf16> to vector<8x128xbf16>
    %cst = arith.constant dense<0.000000e+00> : vector<16x128xf32>
    %3 = tpu.matmul %0, %2, %cst {dimension_numbers = #tpu.dot_dimension_numbers<[1], [0], [0], [1], [0, 0, 1, 1], [], []>} : vector<16x8xbf16>, vector<8x128xbf16>, vector<16x128xf32> -> vector<16x128xf32>
    %c0_4 = arith.constant 0 : index
    %c0_5 = arith.constant 0 : index
    %4 = vector.load %arg4[%c0_4, %c0_5] : memref<16x1xf32, #tpu.memory_space<vmem>>, vector<16x1xf32>
    %5 = vector.broadcast %4 : vector<16x1xf32> to vector<16x128xf32>
    %6 = arith.addf %3, %5 : vector<16x128xf32>
    %7 = arith.truncf %6 : vector<16x128xf32> to vector<16x128xbf16>
    %c0_6 = arith.constant 0 : index
    %c0_7 = arith.constant 0 : index
    %c0_8 = arith.constant 0 : index
    %8 = vector.load %arg5[%c0_6, %c0_7, %c0_8] : memref<1x16x128xbf16, #tpu.memory_space<vmem>>, vector<1x16x128xbf16>
    %9 = vector.shape_cast %8 : vector<1x16x128xbf16> to vector<16x128xbf16>
    %10 = vector.shape_cast %7 : vector<16x128xbf16> to vector<1x16x128xbf16>
    tpu.vector_store %arg5[%c0_6, %c0_7, %c0_8], %10 {strides = array<i32>} : memref<1x16x128xbf16, #tpu.memory_space<vmem>>, vector<1x16x128xbf16>,
    return
  }
  func.func @transform_0(%arg0: i32, %arg1: i32) -> (i32, i32) {
    %c0_i32 = arith.constant 0 : i32
    %c0_i32_0 = arith.constant 0 : i32
    %c0_i32_1 = arith.constant 0 : i32
    return %c0_i32, %c0_i32_0 : i32, i32
  }
  func.func @transform_1(%arg0: i32, %arg1: i32) -> (i32, i32, i32) {
    %c0_i32 = arith.constant 0 : i32
    %c0_i32_0 = arith.constant 0 : i32
    return %arg0, %c0_i32, %arg1 : i32, i32, i32
  }
  func.func @transform_2(%arg0: i32, %arg1: i32) -> (i32, i32) {
    %c0_i32 = arith.constant 0 : i32
    %c0_i32_0 = arith.constant 0 : i32
    %c0_i32_1 = arith.constant 0 : i32
    return %c0_i32, %c0_i32_0 : i32, i32
  }
  func.func @transform_3(%arg0: i32, %arg1: i32) -> (i32, i32, i32) {
    %c0_i32 = arith.constant 0 : i32
    %c0_i32_0 = arith.constant 0 : i32
    return %arg0, %c0_i32, %arg1 : i32, i32, i32
  }
}

module attributes {stable_mosaic.version = 11 : i64} {
  func.func @_conv_in_lrelu_fused_kernel(%arg0: i32, %arg1: memref<4x216xbf16, #tpu.memory_space<vmem>>, %arg2: memref<1x216x512xbf16, #tpu.memory_space<vmem>>, %arg3: memref<1x4x512xbf16, #tpu.memory_space<vmem>>) attributes {dimension_semantics = [#tpu.dimension_semantics<parallel>], iteration_bounds = array<i64: 2>, scalar_prefetch = 0 : i64, scratch_operands = 0 : i64, tpu.core_type = #tpu.core_type<tc>, window_params = [{pipeline_mode = #tpu.pipeline_mode<synchronous>, transform_indices = @transform_0, window_bounds = array<i64: 4, 216>}, {transform_indices = @transform_1, window_bounds = array<i64: 1, 216, 512>}, {transform_indices = @transform_2, window_bounds = array<i64: 1, 4, 512>}]} {
    %c0 = arith.constant 0 : index
    %c0_0 = arith.constant 0 : index
    %0 = vector.load %arg1[%c0, %c0_0] : memref<4x216xbf16, #tpu.memory_space<vmem>>, vector<4x216xbf16>
    %c0_1 = arith.constant 0 : index
    %c0_2 = arith.constant 0 : index
    %c0_3 = arith.constant 0 : index
    %1 = vector.load %arg2[%c0_1, %c0_2, %c0_3] : memref<1x216x512xbf16, #tpu.memory_space<vmem>>, vector<1x216x512xbf16>
    %2 = vector.shape_cast %1 : vector<1x216x512xbf16> to vector<216x512xbf16>
    %cst = arith.constant dense<0.000000e+00> : vector<4x512xf32>
    %3 = tpu.matmul %0, %2, %cst {dimension_numbers = #tpu.dot_dimension_numbers<[1], [0], [0], [1], [0, 0, 1, 1], [], []>} : vector<4x216xbf16>, vector<216x512xbf16>, vector<4x512xf32> -> vector<4x512xf32>
    %cst_4 = arith.constant dense<0.000000e+00> : vector<4xf32>
    %4 = vector.multi_reduction <add>, %3, %cst_4 [1] : vector<4x512xf32> to vector<4xf32>
    %5 = vector.shape_cast %4 : vector<4xf32> to vector<4x1xf32>
    %cst_5 = arith.constant 5.120000e+02 : f32
    %6 = vector.broadcast %cst_5 : f32 to vector<4x1xf32>
    %7 = arith.divf %5, %6 : vector<4x1xf32>
    %8 = vector.broadcast %7 : vector<4x1xf32> to vector<4x512xf32>
    %9 = arith.subf %3, %8 : vector<4x512xf32>
    %10 = arith.mulf %9, %9 : vector<4x512xf32>
    %cst_6 = arith.constant dense<0.000000e+00> : vector<4xf32>
    %11 = vector.multi_reduction <add>, %10, %cst_6 [1] : vector<4x512xf32> to vector<4xf32>
    %12 = vector.shape_cast %11 : vector<4xf32> to vector<4x1xf32>
    %cst_7 = arith.constant 5.120000e+02 : f32
    %13 = vector.broadcast %cst_7 : f32 to vector<4x1xf32>
    %14 = arith.divf %12, %13 : vector<4x1xf32>
    %cst_8 = arith.constant 9.99999974E-6 : f32
    %15 = vector.broadcast %cst_8 : f32 to vector<4x1xf32>
    %16 = arith.addf %14, %15 : vector<4x1xf32>
    %17 = math.rsqrt %16 : vector<4x1xf32>
    %18 = vector.broadcast %17 : vector<4x1xf32> to vector<4x512xf32>
    %19 = arith.mulf %9, %18 : vector<4x512xf32>
    %cst_9 = arith.constant 0.000000e+00 : f32
    %20 = vector.broadcast %cst_9 : f32 to vector<4x512xf32>
    %21 = arith.cmpf oge, %19, %20 : vector<4x512xf32>
    %cst_10 = arith.constant 0.00999999977 : f32
    %22 = vector.broadcast %cst_10 : f32 to vector<4x512xf32>
    %23 = arith.mulf %22, %19 : vector<4x512xf32>
    %24 = arith.select %21, %19, %23 : vector<4x512xi1>, vector<4x512xf32>
    %25 = arith.truncf %24 : vector<4x512xf32> to vector<4x512xbf16>
    %c0_11 = arith.constant 0 : index
    %c0_12 = arith.constant 0 : index
    %c0_13 = arith.constant 0 : index
    %26 = vector.load %arg3[%c0_11, %c0_12, %c0_13] : memref<1x4x512xbf16, #tpu.memory_space<vmem>>, vector<1x4x512xbf16>
    %27 = vector.shape_cast %26 : vector<1x4x512xbf16> to vector<4x512xbf16>
    %28 = vector.shape_cast %25 : vector<4x512xbf16> to vector<1x4x512xbf16>
    tpu.vector_store %arg3[%c0_11, %c0_12, %c0_13], %28 {strides = array<i32>} : memref<1x4x512xbf16, #tpu.memory_space<vmem>>, vector<1x4x512xbf16>,
    return
  }
  func.func @transform_0(%arg0: i32) -> (i32, i32) {
    %c0_i32 = arith.constant 0 : i32
    %c0_i32_0 = arith.constant 0 : i32
    %c0_i32_1 = arith.constant 0 : i32
    return %c0_i32, %c0_i32_0 : i32, i32
  }
  func.func @transform_1(%arg0: i32) -> (i32, i32, i32) {
    %c0_i32 = arith.constant 0 : i32
    %c0_i32_0 = arith.constant 0 : i32
    %c0_i32_1 = arith.constant 0 : i32
    return %arg0, %c0_i32, %c0_i32_0 : i32, i32, i32
  }
  func.func @transform_2(%arg0: i32) -> (i32, i32, i32) {
    %c0_i32 = arith.constant 0 : i32
    %c0_i32_0 = arith.constant 0 : i32
    %c0_i32_1 = arith.constant 0 : i32
    return %arg0, %c0_i32, %c0_i32_0 : i32, i32, i32
  }
}

module attributes {stable_mosaic.version = 11 : i64} {
  func.func @head_kernel(%arg0: i32, %arg1: memref<1024x4xbf16, #tpu.memory_space<vmem>>, %arg2: memref<4x3xbf16, #tpu.memory_space<vmem>>, %arg3: memref<1024x3xf32, #tpu.memory_space<vmem>>) attributes {dimension_semantics = [#tpu.dimension_semantics<parallel>], iteration_bounds = array<i64: 1>, scalar_prefetch = 0 : i64, scratch_operands = 0 : i64, tpu.core_type = #tpu.core_type<tc>, window_params = [{transform_indices = @transform_0, window_bounds = array<i64: 1024, 4>}, {pipeline_mode = #tpu.pipeline_mode<synchronous>, transform_indices = @transform_1, window_bounds = array<i64: 4, 3>}, {transform_indices = @transform_2, window_bounds = array<i64: 1024, 3>}]} {
    %c0 = arith.constant 0 : index
    %c0_0 = arith.constant 0 : index
    %0 = vector.load %arg1[%c0, %c0_0] : memref<1024x4xbf16, #tpu.memory_space<vmem>>, vector<1024x4xbf16>
    %c0_1 = arith.constant 0 : index
    %c0_2 = arith.constant 0 : index
    %1 = vector.load %arg2[%c0_1, %c0_2] : memref<4x3xbf16, #tpu.memory_space<vmem>>, vector<4x3xbf16>
    %cst = arith.constant dense<0.000000e+00> : vector<1024x3xf32>
    %2 = tpu.matmul %0, %1, %cst {dimension_numbers = #tpu.dot_dimension_numbers<[1], [0], [0], [1], [0, 0, 1, 1], [], []>} : vector<1024x4xbf16>, vector<4x3xbf16>, vector<1024x3xf32> -> vector<1024x3xf32>
    %3 = vector.shape_cast %2 : vector<1024x3xf32> to vector<64x16x3xf32>
    %cst_3 = arith.constant dense<0xFF800000> : vector<64x3xf32>
    %4 = vector.multi_reduction <maximumf>, %3, %cst_3 [1] : vector<64x16x3xf32> to vector<64x3xf32>
    %5 = vector.shape_cast %4 : vector<64x3xf32> to vector<64x1x3xf32>
    %6 = vector.broadcast %5 : vector<64x1x3xf32> to vector<64x16x3xf32>
    %7 = arith.subf %3, %6 : vector<64x16x3xf32>
    %8 = math.exp %7 : vector<64x16x3xf32>
    %cst_4 = arith.constant dense<0.000000e+00> : vector<64x3xf32>
    %9 = vector.multi_reduction <add>, %8, %cst_4 [1] : vector<64x16x3xf32> to vector<64x3xf32>
    %10 = vector.shape_cast %9 : vector<64x3xf32> to vector<64x1x3xf32>
    %11 = vector.broadcast %10 : vector<64x1x3xf32> to vector<64x16x3xf32>
    %12 = arith.divf %8, %11 : vector<64x16x3xf32>
    %13 = vector.shape_cast %12 : vector<64x16x3xf32> to vector<1024x3xf32>
    %c0_5 = arith.constant 0 : index
    %c0_6 = arith.constant 0 : index
    %14 = vector.load %arg3[%c0_5, %c0_6] : memref<1024x3xf32, #tpu.memory_space<vmem>>, vector<1024x3xf32>
    tpu.vector_store %arg3[%c0_5, %c0_6], %13 {strides = array<i32>} : memref<1024x3xf32, #tpu.memory_space<vmem>>, vector<1024x3xf32>,
    return
  }
  func.func @transform_0(%arg0: i32) -> (i32, i32) {
    %c0_i32 = arith.constant 0 : i32
    %c0_i32_0 = arith.constant 0 : i32
    return %arg0, %c0_i32 : i32, i32
  }
  func.func @transform_1(%arg0: i32) -> (i32, i32) {
    %c0_i32 = arith.constant 0 : i32
    %c0_i32_0 = arith.constant 0 : i32
    %c0_i32_1 = arith.constant 0 : i32
    return %c0_i32, %c0_i32_0 : i32, i32
  }
  func.func @transform_2(%arg0: i32) -> (i32, i32) {
    %c0_i32 = arith.constant 0 : i32
    %c0_i32_0 = arith.constant 0 : i32
    return %arg0, %c0_i32 : i32, i32
  }
}

</mosaic_0001>

<bundles_post_ra>
// kernel: nnunet3d_forward.23
= control target key start
LH: loop header
LB: loop body
LE: loop exit
PB: predicated region body
PF: predicated region fallthrough
CT: control target
= control target key end

     0   :  { %s552_s9 = smov 0   ;;  %s584_s0 = inlined_call_operand.vmem [shape: bf16[4,54], index: 0, kind: input, shape index: {}]   ;;  %s585_s1 = inlined_call_operand.vmem [shape: bf16[2,54,512], index: 1, kind: input, shape index: {}]   ;;  %s586_s2 = inlined_call_operand.vmem [shape: bf16[2,4,512], index: 2, kind: output, shape index: {}]  }
   0x1 LB: > { %s459_s10 = sadd.s32 4294967295, %s533_s9   ;;  %p463_p0 = scmp.ge.s32.totalorder %s533_s9, 1  ;;  %s533_s9 = sphi %s552_s9, %s12_s9  }
   0x2   : > { %p112_p1 = scmp.lt.s32.totalorder %s533_s9, 3 }
   0x4   : > { %p113_p2 = pnand %p463_p0, %p112_p1 }
   0x5   : > { %p134_p3 = scmp.lt.s32.totalorder (!%p113_p2), %s459_s10, 1  ;;  %v535_v0 = vmov (!%p113_p2), 0   ;;  %vm234_vm0 = vcmask (!%p113_p2), 1042432   ;;  %v145_v21 = vld [vmem:[%s584_s0] sm:$0x3] (!%p113_p2)  ;;  %vm230_vm1 = vcmask (!%p113_p2), 441344   ;;  %v390_v59 = vlaneseq (!%p113_p2) }
   0x6   : > { %116 = sbr.rel (%p113_p2) target bundleno = 580 (0x244), region = 28  ;;  %279 = vmatprep.mubr.bf16.mxu0 (!%p113_p2), %v535_v0  ;;  %320 = vmatprep.mubr.bf16.mxu1 (!%p113_p2), %v535_v0  ;;  %vm329_vm2 = vcmask (!%p113_p2), 1043456   ;;  %v536_v57 = vmov (!%p113_p2), 1983009808  }
   0x7   : > { %v388_v58 = vunpack.c.l.s4 (!%p113_p2), %v536_v57  ;;  %v391_v62 = vshrl.u32 (!%p113_p2), %v390_v59, 7 }
   0x9   : > { %v389_v61 = vunpack.c.0.s8 (!%p113_p2), %v388_v58 }
   0xd   : > { %s588_s10 = smov (!%p134_p3, %s459_s10), 1 }
   0xe   : > { %s492_s11 = smul.u32 112, %s588_s10  ;;  %s491_s17 = sshll.u32 %s588_s10, 3 }
   0xf   : > { %s143_s20 = scalar_lea.vmem %s586_s2, %s491_s17 }
  0x10   : > { %s138_s14 = scalar_lea.vmem %s585_s1, %s492_s11 }
  0x11   : > { %v503_v1 = vld [vmem:[%s138_s14 + $0x4] ss:$16 sps:$4 sm:$0xff]   ;;  %v505_v2 = vld [vmem:[%s138_s14 + $0xc] ss:$16 sps:$4 sm:$0xff]   ;;  %v507_v3 = vld [vmem:[%s138_s14] ss:$16 sps:$4 sm:$0xff]  }
  0x12   : > { %247 = vmatprep.subr.bf16.mxu0 %v503_v1  ;;  %v508_v4 = vld [vmem:[%s138_s14 + $0x8] ss:$16 sps:$4 sm:$0xff]   ;;  %288 = vmatprep.subr.bf16.mxu1 %v505_v2  ;;  %v509_v5 = vld [vmem:[%s138_s14 + $0x24] ss:$16 sps:$4 sm:$0xff]   ;;  %v511_v6 = vld [vmem:[%s138_s14 + $0x2c] ss:$16 sps:$4 sm:$0xff]  }
  0x13   : > { %248 = vmatpush1.bf16.msra.mxu0 %v507_v3  ;;  %289 = vmatpush1.bf16.msra.mxu1 %v508_v4  ;;  %v513_v7 = vld [vmem:[%s138_s14 + $0x20] ss:$16 sps:$4 sm:$0xff]   ;;  %v514_v8 = vld [vmem:[%s138_s14 + $0x28] ss:$16 sps:$4 sm:$0xff]   ;;  %v515_v9 = vld [vmem:[%s138_s14 + $0x44] ss:$16 sps:$4 sm:$0xff]  }
  0x14   : > { %249 = vmatprep.subr.bf16.mxu0 %v509_v5  ;;  %290 = vmatprep.subr.bf16.mxu1 %v511_v6  ;;  %v517_v10 = vld [vmem:[%s138_s14 + $0x4c] ss:$16 sps:$4 sm:$0xff]   ;;  %v519_v11 = vld [vmem:[%s138_s14 + $0x40] ss:$16 sps:$4 sm:$0xff]   ;;  %v520_v12 = vld [vmem:[%s138_s14 + $0x48] ss:$16 sps:$4 sm:$0xff]   ;;  %v392_v6 = vsub.s32 %v389_v61, %v391_v62 }
  0x15   : > { %v158_v13 = vld [vmem:[%s138_s14 + $0x60] sm:$0x77]  ;;  %v159_v14 = vld [vmem:[%s138_s14 + $0x68] sm:$0x77] }
  0x16   : > { %v480_v15 = vcombine.high %v158_v13, %v158_v13  ;;  %v482_v16 = vcombine.high %v159_v14, %v159_v14  ;;  %v479_v17 = vcombine.low %v158_v13, %v158_v13  ;;  %v481_v18 = vcombine.low %v159_v14, %v159_v14 }
  0x17   : > { %250 = vmatpush1.bf16.msra.mxu0 %v513_v7  ;;  %291 = vmatpush1.bf16.msra.mxu1 %v514_v8 }
  0x18   : > { %251 = vmatprep.subr.bf16.mxu0 %v515_v9  ;;  %292 = vmatprep.subr.bf16.mxu1 %v517_v10  ;;  %v236_v19 = vsel %vm234_vm0, %v479_v17, 0  ;;  %v242_v20 = vsel %vm234_vm0, %v481_v18, 0 }
  0x1b   : > { %252 = vmatpush1.bf16.msra.mxu0 %v519_v11  ;;  %293 = vmatpush1.bf16.msra.mxu1 %v520_v12 }
  0x1c   : > { %483 = vmatprep.subr.msk.bf16.mxu0 %vm234_vm0, %v480_v15  ;;  %485 = vmatprep.subr.msk.bf16.mxu1 %vm234_vm0, %v482_v16 }
  0x1f   : > { %254 = vmatpush1.bf16.msra.mxu0 %v236_v19  ;;  %295 = vmatpush1.bf16.msra.mxu1 %v242_v20 }
  0x22   : > { %484 = vmatmul.mubr.msk.bf16.vlgmr.msra.gmra.mrb[0].mxu0 %vm230_vm1, %v145_v21  ;;  %486 = vmatmul.mubr.msk.bf16.vlgmr.msra.gmra.mrb[0].mxu1 %vm230_vm1, %v145_v21 }
  0xf5   : > { %v281_v22 = vpop.f32.mrb[0].mxu0  ;;  %v322_v23 = vpop.f32.mrb[0].mxu1 }
  0xf6   : > { %v330_v24 = vsel %vm329_vm2, %v281_v22, 0.0  ;;  %v283_v25 = vpop.f32.mrb[1].mxu0  ;;  %v324_v26 = vpop.f32.mrb[1].mxu1  ;;  %v333_v27 = vsel %vm329_vm2, %v322_v23, 0.0 }
  0xf7   : > { %v331_v28 = vsel %vm329_vm2, %v283_v25, 0.0  ;;  %v285_v29 = vpop.f32.mrb[2].mxu0  ;;  %v326_v30 = vpop.f32.mrb[2].mxu1  ;;  %v335_v35 = vsel %vm329_vm2, %v324_v26, 0.0 }
  0xf8   : > { %v332_v31 = vadd.f32 %v331_v28, %v330_v24  ;;  %v286_v32 = vpop.f32.mrb[3].mxu0  ;;  %v327_v33 = vpop.f32.mrb[3].mxu1 }
  0xfa   : > { %v334_v34 = vadd.f32 %v333_v27, %v332_v31 }
  0xfc   : > { %v336_v36 = vadd.f32 %v335_v35, %v334_v34 }
  0xfe   : > { %337 = vadd.xlane.f32.xlu0 %v336_v36 }
 0x18b   : > { %v338_v37 = vpop.xlane.xlu0 %337 }
 0x18c   : > { %v340_v38 = vmul.f32 0.001953125, %v338_v37 }
 0x18e   : > { %v341_v39 = vsub.f32 %v281_v22, %v340_v38  ;;  %v342_v40 = vsub.f32 %v283_v25, %v340_v38  ;;  %v343_v41 = vsub.f32 %v322_v23, %v340_v38  ;;  %v344_v42 = vsub.f32 %v324_v26, %v340_v38 }
 0x190   : > { %v345_v43 = vmul.f32 %v341_v39, %v341_v39  ;;  %v346_v44 = vmul.f32 %v342_v40, %v342_v40  ;;  %v347_v45 = vmul.f32 %v343_v41, %v343_v41  ;;  %v348_v46 = vmul.f32 %v344_v42, %v344_v42 }
 0x192   : > { %v349_v47 = vsel %vm329_vm2, %v345_v43, 0.0  ;;  %v350_v48 = vsel %vm329_vm2, %v346_v44, 0.0  ;;  %v352_v50 = vsel %vm329_vm2, %v347_v45, 0.0  ;;  %v354_v52 = vsel %vm329_vm2, %v348_v46, 0.0 }
 0x193   : > { %v351_v49 = vadd.f32 %v350_v48, %v349_v47 }
 0x195   : > { %v353_v51 = vadd.f32 %v352_v50, %v351_v49 }
 0x197   : > { %v355_v53 = vadd.f32 %v354_v52, %v353_v51 }
 0x199   : > { %356 = vadd.xlane.f32.xlu0 %v355_v53 }
 0x226   : > { %v357_v54 = vpop.xlane.xlu0 %356 }
 0x227   : > { %v358_v55 = vmul.f32 0.001953125, %v357_v54 }
 0x229   : > { %v359_v56 = vadd.f32 1e-05, %v358_v55 }
 0x22b   : > { %525 = vrsqrt.f32 %v359_v56 }
 0x235   : > { %v526_v60 = vpop.eup %525 }
 0x236   : > { %v361_v63 = vmul.f32 %v526_v60, %v341_v39  ;;  %v362_v0 = vmul.f32 %v526_v60, %v342_v40  ;;  %v363_v1 = vmul.f32 %v526_v60, %v343_v41  ;;  %v364_v2 = vmul.f32 %v526_v60, %v344_v42 }
 0x238   : > { %vm365_vm3 = vcmp.ge.f32.partialorder %v361_v63, 0.0  ;;  %vm366_vm4 = vcmp.ge.f32.partialorder %v362_v0, 0.0  ;;  %vm367_vm5 = vcmp.ge.f32.partialorder %v363_v1, 0.0  ;;  %vm368_vm6 = vcmp.ge.f32.partialorder %v364_v2, 0.0 }
 0x239   : > { %v369_v3 = vmul.f32 0.01, %v361_v63  ;;  %v370_v4 = vmul.f32 0.01, %v362_v0  ;;  %v371_v5 = vmul.f32 0.01, %v363_v1 }
 0x23a   : > { %v372_v7 = vmul.f32 0.01, %v364_v2 }
 0x23b   : > { %v373_v8 = vsel %vm365_vm3, %v361_v63, %v369_v3  ;;  %v374_v9 = vsel %vm366_vm4, %v362_v0, %v370_v4  ;;  %v375_v10 = vsel %vm367_vm5, %v363_v1, %v371_v5 }
 0x23c   : > { %v376_v11 = vsel %vm368_vm6, %v364_v2, %v372_v7  ;;  %v487_v12 = vpack.c.bf16 %v374_v9, %v373_v8 }
 0x23d   : > { %v488_v13 = vpack.c.bf16 %v376_v11, %v375_v10 }
 0x23e   : > { %v393_v14 = vrot.slane %v487_v12, %v392_v6 }
 0x23f   : > { %v400_v15 = vrot.slane %v488_v13, %v392_v6 }
 0x241   : > { %v401_v16 = vcombine.low %v393_v14, %v400_v15 }
 0x243   : > { %403 = vst [vmem:[%s143_s20] sm:$0xff] %v401_v16 }
 0x244 PF: > { %s12_s9 = sadd.s32 1, %s533_s9  }
 0x245   : > { %p9_p4 = scmp.ge.s32.totalorder %s12_s9, 4  }
 0x247   :  { %11 = sbr.rel (!%p9_p4) target bundleno = 1 (0x1), region = 58 }

// kernel: nnunet3d_forward.24
= control target key start
LH: loop header
LB: loop body
LE: loop exit
PB: predicated region body
PF: predicated region fallthrough
CT: control target
= control target key end

     0   :  { %s664_s9 = smov 0   ;;  %s726_s0 = inlined_call_operand.vmem [shape: bf16[4,108], index: 0, kind: input, shape index: {}]   ;;  %s727_s1 = inlined_call_operand.vmem [shape: bf16[2,108,512], index: 1, kind: input, shape index: {}]   ;;  %s728_s2 = inlined_call_operand.vmem [shape: bf16[2,4,512], index: 2, kind: output, shape index: {}]  }
   0x1 LB: > { %s539_s10 = sadd.s32 4294967295, %s645_s9   ;;  %p543_p0 = scmp.ge.s32.totalorder %s645_s9, 1  ;;  %s645_s9 = sphi %s664_s9, %s12_s9  }
   0x2   : > { %p112_p1 = scmp.lt.s32.totalorder %s645_s9, 3 }
   0x4   : > { %p113_p2 = pnand %p543_p0, %p112_p1 }
   0x5   : > { %p134_p3 = scmp.lt.s32.totalorder (!%p113_p2), %s539_s10, 1  ;;  %v647_v0 = vmov (!%p113_p2), 0   ;;  %vm314_vm0 = vcmask (!%p113_p2), 1045504   ;;  %v145_v31 = vld [vmem:[%s726_s0] sm:$0x3] (!%p113_p2)  ;;  %vm310_vm1 = vcmask (!%p113_p2), 883712  }
   0x6   : > { %116 = sbr.rel (%p113_p2) target bundleno = 592 (0x250), region = 28  ;;  %359 = vmatprep.mubr.bf16.mxu0 (!%p113_p2), %v647_v0  ;;  %400 = vmatprep.mubr.bf16.mxu1 (!%p113_p2), %v647_v0  ;;  %vm409_vm2 = vcmask (!%p113_p2), 1043456  }
   0xd   : > { %s730_s10 = smov (!%p134_p3, %s539_s10), 1 }
   0xe   : > { %s584_s11 = smul.u32 224, %s730_s10  ;;  %s583_s17 = sshll.u32 %s730_s10, 3 }
   0xf   : > { %s143_s20 = scalar_lea.vmem %s728_s2, %s583_s17 }
  0x10   : > { %s678_s14 = scalar_lea.vmem %s727_s1, %s584_s11 }
  0x11   : > { %v595_v1 = vld [vmem:[%s678_s14 + $0x4] ss:$16 sps:$4 sm:$0xff]   ;;  %v597_v2 = vld [vmem:[%s678_s14 + $0xc] ss:$16 sps:$4 sm:$0xff]   ;;  %v599_v3 = vld [vmem:[%s678_s14] ss:$16 sps:$4 sm:$0xff]  }
  0x12   : > { %327 = vmatprep.subr.bf16.mxu0 %v595_v1  ;;  %v600_v4 = vld [vmem:[%s678_s14 + $0x8] ss:$16 sps:$4 sm:$0xff]   ;;  %368 = vmatprep.subr.bf16.mxu1 %v597_v2  ;;  %v601_v5 = vld [vmem:[%s678_s14 + $0x24] ss:$16 sps:$4 sm:$0xff]   ;;  %v603_v6 = vld [vmem:[%s678_s14 + $0x2c] ss:$16 sps:$4 sm:$0xff]  }
  0x13   : > { %328 = vmatpush1.bf16.msra.mxu0 %v599_v3  ;;  %369 = vmatpush1.bf16.msra.mxu1 %v600_v4  ;;  %v605_v7 = vld [vmem:[%s678_s14 + $0x20] ss:$16 sps:$4 sm:$0xff]   ;;  %v606_v8 = vld [vmem:[%s678_s14 + $0x28] ss:$16 sps:$4 sm:$0xff]   ;;  %v607_v9 = vld [vmem:[%s678_s14 + $0x44] ss:$16 sps:$4 sm:$0xff]  }
  0x14   : > { %329 = vmatprep.subr.bf16.mxu0 %v601_v5  ;;  %370 = vmatprep.subr.bf16.mxu1 %v603_v6  ;;  %v609_v10 = vld [vmem:[%s678_s14 + $0x4c] ss:$16 sps:$4 sm:$0xff]   ;;  %v611_v11 = vld [vmem:[%s678_s14 + $0x40] ss:$16 sps:$4 sm:$0xff]   ;;  %v612_v12 = vld [vmem:[%s678_s14 + $0x48] ss:$16 sps:$4 sm:$0xff]   ;;  %v470_v5 = vlaneseq }
  0x15   : > { %v613_v13 = vld [vmem:[%s678_s14 + $0x64] ss:$16 sps:$4 sm:$0xff]   ;;  %v615_v14 = vld [vmem:[%s678_s14 + $0x6c] ss:$16 sps:$4 sm:$0xff]   ;;  %v617_v15 = vld [vmem:[%s678_s14 + $0x60] ss:$16 sps:$4 sm:$0xff]  }
  0x16   : > { %v618_v16 = vld [vmem:[%s678_s14 + $0x68] ss:$16 sps:$4 sm:$0xff]   ;;  %v619_v17 = vld [vmem:[%s678_s14 + $0x84] ss:$16 sps:$4 sm:$0xff]   ;;  %v621_v18 = vld [vmem:[%s678_s14 + $0x8c] ss:$16 sps:$4 sm:$0xff]  }
  0x17   : > { %330 = vmatpush1.bf16.msra.mxu0 %v605_v7  ;;  %371 = vmatpush1.bf16.msra.mxu1 %v606_v8  ;;  %v623_v19 = vld [vmem:[%s678_s14 + $0x80] ss:$16 sps:$4 sm:$0xff]   ;;  %v624_v20 = vld [vmem:[%s678_s14 + $0x88] ss:$16 sps:$4 sm:$0xff]   ;;  %v625_v21 = vld [vmem:[%s678_s14 + $0xa4] ss:$16 sps:$4 sm:$0xff]  }
  0x18   : > { %331 = vmatprep.subr.bf16.mxu0 %v607_v9  ;;  %372 = vmatprep.subr.bf16.mxu1 %v609_v10  ;;  %v627_v22 = vld [vmem:[%s678_s14 + $0xac] ss:$16 sps:$4 sm:$0xff]   ;;  %v629_v23 = vld [vmem:[%s678_s14 + $0xa0] ss:$16 sps:$4 sm:$0xff]   ;;  %v630_v24 = vld [vmem:[%s678_s14 + $0xa8] ss:$16 sps:$4 sm:$0xff]  }
  0x19   : > { %v631_v25 = vld [vmem:[%s678_s14 + $0xc4] ss:$16 sps:$4 sm:$0x3f]   ;;  %v633_v26 = vld [vmem:[%s678_s14 + $0xcc] ss:$16 sps:$4 sm:$0x3f]  }
  0x1a   : > { %v635_v27 = vld [vmem:[%s678_s14 + $0xc0] ss:$16 sps:$4 sm:$0x3f]   ;;  %v636_v28 = vld [vmem:[%s678_s14 + $0xc8] ss:$16 sps:$4 sm:$0x3f]  }
  0x1b   : > { %332 = vmatpush1.bf16.msra.mxu0 %v611_v11  ;;  %373 = vmatpush1.bf16.msra.mxu1 %v612_v12  ;;  %v316_v29 = vsel %vm314_vm0, %v635_v27, 0  ;;  %v322_v30 = vsel %vm314_vm0, %v636_v28, 0  ;;  %v648_v3 = vmov 1983009808   ;;  %v471_v8 = vshrl.u32 %v470_v5, 7 }
  0x1c   : > { %333 = vmatprep.subr.bf16.mxu0 %v613_v13  ;;  %374 = vmatprep.subr.bf16.mxu1 %v615_v14  ;;  %v468_v4 = vunpack.c.l.s4 %v648_v3 }
  0x1e   : > { %v469_v7 = vunpack.c.0.s8 %v468_v4 }
  0x1f   : > { %334 = vmatpush1.bf16.msra.mxu0 %v617_v15  ;;  %375 = vmatpush1.bf16.msra.mxu1 %v618_v16 }
  0x20   : > { %335 = vmatprep.subr.bf16.mxu0 %v619_v17  ;;  %376 = vmatprep.subr.bf16.mxu1 %v621_v18  ;;  %v472_v16 = vsub.s32 %v469_v7, %v471_v8 }
  0x23   : > { %336 = vmatpush1.bf16.msra.mxu0 %v623_v19  ;;  %377 = vmatpush1.bf16.msra.mxu1 %v624_v20 }
  0x24   : > { %337 = vmatprep.subr.bf16.mxu0 %v625_v21  ;;  %378 = vmatprep.subr.bf16.mxu1 %v627_v22 }
  0x27   : > { %338 = vmatpush1.bf16.msra.mxu0 %v629_v23  ;;  %379 = vmatpush1.bf16.msra.mxu1 %v630_v24 }
  0x28   : > { %575 = vmatprep.subr.msk.bf16.mxu0 %vm314_vm0, %v631_v25  ;;  %577 = vmatprep.subr.msk.bf16.mxu1 %vm314_vm0, %v633_v26 }
  0x2b   : > { %340 = vmatpush1.bf16.msra.mxu0 %v316_v29  ;;  %381 = vmatpush1.bf16.msra.mxu1 %v322_v30 }
  0x2e   : > { %576 = vmatmul.mubr.msk.bf16.vlgmr.msra.gmra.mrb[0].mxu0 %vm310_vm1, %v145_v31  ;;  %578 = vmatmul.mubr.msk.bf16.vlgmr.msra.gmra.mrb[0].mxu1 %vm310_vm1, %v145_v31 }
 0x101   : > { %v361_v32 = vpop.f32.mrb[0].mxu0  ;;  %v402_v33 = vpop.f32.mrb[0].mxu1 }
 0x102   : > { %v410_v34 = vsel %vm409_vm2, %v361_v32, 0.0  ;;  %v363_v35 = vpop.f32.mrb[1].mxu0  ;;  %v404_v36 = vpop.f32.mrb[1].mxu1  ;;  %v413_v37 = vsel %vm409_vm2, %v402_v33, 0.0 }
 0x103   : > { %v411_v38 = vsel %vm409_vm2, %v363_v35, 0.0  ;;  %v365_v39 = vpop.f32.mrb[2].mxu0  ;;  %v406_v40 = vpop.f32.mrb[2].mxu1  ;;  %v415_v45 = vsel %vm409_vm2, %v404_v36, 0.0 }
 0x104   : > { %v412_v41 = vadd.f32 %v411_v38, %v410_v34  ;;  %v366_v42 = vpop.f32.mrb[3].mxu0  ;;  %v407_v43 = vpop.f32.mrb[3].mxu1 }
 0x106   : > { %v414_v44 = vadd.f32 %v413_v37, %v412_v41 }
 0x108   : > { %v416_v46 = vadd.f32 %v415_v45, %v414_v44 }
 0x10a   : > { %417 = vadd.xlane.f32.xlu0 %v416_v46 }
 0x197   : > { %v418_v47 = vpop.xlane.xlu0 %417 }
 0x198   : > { %v420_v48 = vmul.f32 0.001953125, %v418_v47 }
 0x19a   : > { %v421_v49 = vsub.f32 %v361_v32, %v420_v48  ;;  %v422_v50 = vsub.f32 %v363_v35, %v420_v48  ;;  %v423_v51 = vsub.f32 %v402_v33, %v420_v48  ;;  %v424_v52 = vsub.f32 %v404_v36, %v420_v48 }
 0x19c   : > { %v425_v53 = vmul.f32 %v421_v49, %v421_v49  ;;  %v426_v54 = vmul.f32 %v422_v50, %v422_v50  ;;  %v427_v55 = vmul.f32 %v423_v51, %v423_v51  ;;  %v428_v56 = vmul.f32 %v424_v52, %v424_v52 }
 0x19e   : > { %v429_v57 = vsel %vm409_vm2, %v425_v53, 0.0  ;;  %v430_v58 = vsel %vm409_vm2, %v426_v54, 0.0  ;;  %v432_v60 = vsel %vm409_vm2, %v427_v55, 0.0  ;;  %v434_v62 = vsel %vm409_vm2, %v428_v56, 0.0 }
 0x19f   : > { %v431_v59 = vadd.f32 %v430_v58, %v429_v57 }
 0x1a1   : > { %v433_v61 = vadd.f32 %v432_v60, %v431_v59 }
 0x1a3   : > { %v435_v63 = vadd.f32 %v434_v62, %v433_v61 }
 0x1a5   : > { %436 = vadd.xlane.f32.xlu0 %v435_v63 }
 0x232   : > { %v437_v0 = vpop.xlane.xlu0 %436 }
 0x233   : > { %v438_v1 = vmul.f32 0.001953125, %v437_v0 }
 0x235   : > { %v439_v2 = vadd.f32 1e-05, %v438_v1 }
 0x237   : > { %637 = vrsqrt.f32 %v439_v2 }
 0x241   : > { %v638_v6 = vpop.eup %637 }
 0x242   : > { %v441_v9 = vmul.f32 %v638_v6, %v421_v49  ;;  %v442_v10 = vmul.f32 %v638_v6, %v422_v50  ;;  %v443_v11 = vmul.f32 %v638_v6, %v423_v51  ;;  %v444_v12 = vmul.f32 %v638_v6, %v424_v52 }
 0x244   : > { %vm445_vm3 = vcmp.ge.f32.partialorder %v441_v9, 0.0  ;;  %vm446_vm4 = vcmp.ge.f32.partialorder %v442_v10, 0.0  ;;  %vm447_vm5 = vcmp.ge.f32.partialorder %v443_v11, 0.0  ;;  %vm448_vm6 = vcmp.ge.f32.partialorder %v444_v12, 0.0 }
 0x245   : > { %v449_v13 = vmul.f32 0.01, %v441_v9  ;;  %v450_v14 = vmul.f32 0.01, %v442_v10  ;;  %v451_v15 = vmul.f32 0.01, %v443_v11 }
 0x246   : > { %v452_v17 = vmul.f32 0.01, %v444_v12 }
 0x247   : > { %v453_v18 = vsel %vm445_vm3, %v441_v9, %v449_v13  ;;  %v454_v19 = vsel %vm446_vm4, %v442_v10, %v450_v14  ;;  %v455_v20 = vsel %vm447_vm5, %v443_v11, %v451_v15 }
 0x248   : > { %v456_v21 = vsel %vm448_vm6, %v444_v12, %v452_v17  ;;  %v579_v22 = vpack.c.bf16 %v454_v19, %v453_v18 }
 0x249   : > { %v580_v23 = vpack.c.bf16 %v456_v21, %v455_v20 }
 0x24a   : > { %v473_v24 = vrot.slane %v579_v22, %v472_v16 }
 0x24b   : > { %v480_v25 = vrot.slane %v580_v23, %v472_v16 }
 0x24d   : > { %v481_v26 = vcombine.low %v473_v24, %v480_v25 }
 0x24f   : > { %483 = vst [vmem:[%s143_s20] sm:$0xff] %v481_v26 }
 0x250 PF: > { %s12_s9 = sadd.s32 1, %s645_s9  }
 0x251   : > { %p9_p4 = scmp.ge.s32.totalorder %s12_s9, 4  }
 0x253   :  { %11 = sbr.rel (!%p9_p4) target bundleno = 1 (0x1), region = 58 }

// kernel: nnunet3d_forward.25
= control target key start
LH: loop header
LB: loop body
LE: loop exit
PB: predicated region body
PF: predicated region fallthrough
CT: control target
= control target key end

     0   :  { %s405_s9 = smov 0   ;;  %s429_s0 = inlined_call_operand.vmem [shape: bf16[8,108], index: 0, kind: input, shape index: {}]   ;;  %s430_s1 = inlined_call_operand.vmem [shape: bf16[2,108,128], index: 1, kind: input, shape index: {}]   ;;  %s431_s2 = inlined_call_operand.vmem [shape: bf16[2,8,128], index: 2, kind: output, shape index: {}]  }
   0x1 LB: > { %s317_s10 = sadd.s32 4294967295, %s386_s9   ;;  %p321_p0 = scmp.ge.s32.totalorder %s386_s9, 1  ;;  %s386_s9 = sphi %s405_s9, %s12_s9  }
   0x2   : > { %p112_p1 = scmp.lt.s32.totalorder %s386_s9, 3 }
   0x4   : > { %p113_p2 = pnand %p321_p0, %p112_p1 }
   0x5   : > { %p133_p3 = scmp.lt.s32.totalorder (!%p113_p2), %s317_s10, 1  ;;  %v388_v0 = vmov (!%p113_p2), 0.0   ;;  %vm389_vm0 = vmmov (!%p113_p2), 0   ;;  %vm203_vm1 = vcmask (!%p113_p2), 1045504   ;;  %v143_v9 = vld [vmem:[%s429_s0] sm:$0xf] (!%p113_p2) }
   0x6   : > { %116 = sbr.rel (%p113_p2) target bundleno = 570 (0x23a), region = 28  ;;  %342 = vmatprep.subr.bf16.mxu0 (!%p113_p2), %v388_v0  ;;  %356 = vmatprep.mubr.msk.bf16.mxu0 (!%p113_p2), %vm389_vm0, %v388_v0  ;;  %vm199_vm2 = vcmask (!%p113_p2), 883712  }
   0xd   : > { %s433_s10 = smov (!%p133_p3, %s317_s10), 1 }
   0xe   : > { %s360_s11 = smul.u32 56, %s433_s10  ;;  %s323_s17 = sshll.u32 %s433_s10, 2 }
   0xf   : > { %s141_s20 = scalar_lea.vmem %s431_s2, %s323_s17 }
  0x10   : > { %s137_s14 = scalar_lea.vmem %s430_s1, %s360_s11 }
  0x11   : > { %v371_v1 = vld [vmem:[%s137_s14] sm:$0xff]   ;;  %v372_v2 = vld [vmem:[%s137_s14 + $0x8] sm:$0xff]   ;;  %v373_v3 = vld [vmem:[%s137_s14 + $0x10] sm:$0xff]  }
  0x12   : > { %343 = vmatpush3.bf16.msra.mxu0 %v371_v1  ;;  %v374_v4 = vld [vmem:[%s137_s14 + $0x18] sm:$0xff]   ;;  %v375_v5 = vld [vmem:[%s137_s14 + $0x20] sm:$0xff]   ;;  %v376_v6 = vld [vmem:[%s137_s14 + $0x28] sm:$0xff]  }
  0x13   : > { %344 = vmatprep.subr.bf16.mxu0 %v388_v0  ;;  %v377_v7 = vld [vmem:[%s137_s14 + $0x30] sm:$0x3f]  }
  0x14   : > { %v205_v8 = vsel %vm203_vm1, %v377_v7, 0 }
  0x16   : > { %345 = vmatpush3.bf16.msra.mxu0 %v372_v2 }
  0x17   : > { %346 = vmatprep.subr.bf16.mxu0 %v388_v0 }
  0x1a   : > { %347 = vmatpush3.bf16.msra.mxu0 %v373_v3 }
  0x1b   : > { %348 = vmatprep.subr.bf16.mxu0 %v388_v0 }
  0x1e   : > { %349 = vmatpush3.bf16.msra.mxu0 %v374_v4 }
  0x1f   : > { %350 = vmatprep.subr.bf16.mxu0 %v388_v0 }
  0x22   : > { %351 = vmatpush3.bf16.msra.mxu0 %v375_v5 }
  0x23   : > { %352 = vmatprep.subr.bf16.mxu0 %v388_v0 }
  0x26   : > { %353 = vmatpush3.bf16.msra.mxu0 %v376_v6 }
  0x27   : > { %354 = vmatprep.subr.bf16.mxu0 %v388_v0 }
  0x2a   : > { %355 = vmatpush3.bf16.msra.mxu0 %v205_v8 }
  0x2d   : > { %357 = vmatmul.mubr.msk.bf16.vlgmr.msra.gmra.mrb[0].mxu0 %vm199_vm2, %v143_v9 }
 0x100   : > { %v241_v10 = vpop.f32.mrb[0].mxu0 }
 0x101   : > { %247 = vadd.xlane.f32.xlu0 %v241_v10  ;;  %v358_v11 = vpop.f32.mrb[1].mxu0 }
 0x102   : > { %v244_v12 = vpop.f32.mrb[2].mxu0 }
 0x103   : > { %v359_v13 = vpop.f32.mrb[3].mxu0 }
 0x18e   : > { %v248_v14 = vpop.xlane.xlu0 %247 }
 0x18f   : > { %v250_v15 = vmul.f32 0.0078125, %v248_v14 }
 0x191   : > { %v251_v16 = vsub.f32 %v241_v10, %v250_v15 }
 0x193   : > { %v252_v17 = vmul.f32 %v251_v16, %v251_v16 }
 0x195   : > { %253 = vadd.xlane.f32.xlu0 %v252_v17 }
 0x222   : > { %v254_v18 = vpop.xlane.xlu0 %253 }
 0x223   : > { %v255_v19 = vmul.f32 0.0078125, %v254_v18 }
 0x225   : > { %v256_v20 = vadd.f32 1e-05, %v255_v19 }
 0x227   : > { %378 = vrsqrt.f32 %v256_v20 }
 0x231   : > { %v379_v21 = vpop.eup %378 }
 0x232   : > { %v258_v22 = vmul.f32 %v379_v21, %v251_v16 }
 0x234   : > { %vm259_vm3 = vcmp.ge.f32.partialorder %v258_v22, 0.0  ;;  %v260_v23 = vmul.f32 0.01, %v258_v22 }
 0x236   : > { %v261_v24 = vsel %vm259_vm3, %v258_v22, %v260_v23 }
 0x237   : > { %v262_v25 = vpack.c.bf16 %v261_v24, %v261_v24 }
 0x239   : > { %263 = vst [vmem:[%s141_s20] sm:$0xf] %v262_v25 }
 0x23a PF: > { %s12_s9 = sadd.s32 1, %s386_s9  }
 0x23b   : > { %p9_p4 = scmp.ge.s32.totalorder %s12_s9, 4  }
 0x23d   :  { %11 = sbr.rel (!%p9_p4) target bundleno = 1 (0x1), region = 58 }

// kernel: nnunet3d_forward.26
= control target key start
LH: loop header
LB: loop body
LE: loop exit
PB: predicated region body
PF: predicated region fallthrough
CT: control target
= control target key end

     0   :  { %s454_s9 = smov 0   ;;  %s494_s0 = inlined_call_operand.vmem [shape: bf16[8,216], index: 0, kind: input, shape index: {}]   ;;  %s495_s1 = inlined_call_operand.vmem [shape: bf16[2,216,128], index: 1, kind: input, shape index: {}]   ;;  %s496_s2 = inlined_call_operand.vmem [shape: bf16[2,8,128], index: 2, kind: output, shape index: {}]  }
   0x1 LB: > { %s376_s10 = sadd.s32 4294967295, %s436_s9   ;;  %p380_p0 = scmp.ge.s32.totalorder %s436_s9, 1  ;;  %s436_s9 = sphi %s454_s9, %s12_s9  }
   0x2   : > { %p112_p1 = scmp.lt.s32.totalorder %s436_s9, 3 }
   0x4   : > { %p113_p2 = pnand %p380_p0, %p112_p1 }
   0x5   : > { %p133_p3 = scmp.lt.s32.totalorder (!%p113_p2), %s376_s10, 1  ;;  %v143_v0 = vld [vmem:[%s494_s0] sm:$0xff] (!%p113_p2)  ;;  %vm258_vm0 = vcmask (!%p113_p2), 719872   ;;  %v438_v1 = vmov (!%p113_p2), 0   ;;  %vm262_vm1 = vcmask (!%p113_p2), 1043456  }
   0x6   : > { %116 = sbr.rel (%p113_p2) target bundleno = 598 (0x256), region = 28  ;;  %266 = vmatprep.subr.bf16.mxu0 (!%p113_p2), %v438_v1  ;;  %v384_v2 = vcombine.high (!%p113_p2), %v143_v0, %v143_v0  ;;  %v383_v18 = vcombine.low (!%p113_p2), %v143_v0, %v143_v0 }
   0x8   : > { %399 = vmatprep.mubr.msk.bf16.mxu0 (!%p113_p2), %vm258_vm0, %v384_v2 }
   0xd   : > { %s498_s10 = smov (!%p133_p3, %s376_s10), 1 }
   0xe   : > { %s402_s13 = smul.u32 108, %s498_s10  ;;  %s382_s17 = sshll.u32 %s498_s10, 2 }
   0xf   : > { %s141_s20 = scalar_lea.vmem %s496_s2, %s382_s17 }
  0x10   : > { %s471_s16 = scalar_lea.vmem %s495_s1, %s402_s13 }
  0x11   : > { %v412_v3 = vld [vmem:[%s471_s16] sm:$0xff]   ;;  %v413_v4 = vld [vmem:[%s471_s16 + $0x8] sm:$0xff]   ;;  %v414_v5 = vld [vmem:[%s471_s16 + $0x10] sm:$0xff]  }
  0x12   : > { %267 = vmatpush1.bf16.msra.mxu0 %v412_v3  ;;  %v415_v6 = vld [vmem:[%s471_s16 + $0x18] sm:$0xff]   ;;  %v416_v7 = vld [vmem:[%s471_s16 + $0x20] sm:$0xff]   ;;  %v417_v8 = vld [vmem:[%s471_s16 + $0x28] sm:$0xff]  }
  0x13   : > { %268 = vmatprep.subr.bf16.mxu0 %v438_v1  ;;  %v418_v9 = vld [vmem:[%s471_s16 + $0x30] sm:$0xff]   ;;  %v419_v10 = vld [vmem:[%s471_s16 + $0x38] sm:$0xff]   ;;  %v420_v11 = vld [vmem:[%s471_s16 + $0x40] sm:$0xff]  }
  0x14   : > { %v421_v12 = vld [vmem:[%s471_s16 + $0x48] sm:$0xff]   ;;  %v422_v13 = vld [vmem:[%s471_s16 + $0x50] sm:$0xff]   ;;  %v423_v14 = vld [vmem:[%s471_s16 + $0x58] sm:$0xff]  }
  0x15   : > { %v424_v15 = vld [vmem:[%s471_s16 + $0x60] sm:$0xff]   ;;  %v425_v16 = vld [vmem:[%s471_s16 + $0x68] ss:$0 sps:$4 sm:$0xff]  }
  0x16   : > { %269 = vmatpush1.bf16.msra.mxu0 %v413_v4  ;;  %v264_v17 = vsel %vm262_vm1, %v425_v16, 0 }
  0x17   : > { %270 = vmatprep.subr.bf16.mxu0 %v438_v1 }
  0x1a   : > { %271 = vmatpush1.bf16.msra.mxu0 %v414_v5 }
  0x1b   : > { %272 = vmatprep.subr.bf16.mxu0 %v438_v1 }
  0x1e   : > { %273 = vmatpush1.bf16.msra.mxu0 %v415_v6 }
  0x1f   : > { %274 = vmatprep.subr.bf16.mxu0 %v438_v1 }
  0x22   : > { %275 = vmatpush1.bf16.msra.mxu0 %v416_v7 }
  0x23   : > { %276 = vmatprep.subr.bf16.mxu0 %v438_v1 }
  0x26   : > { %277 = vmatpush1.bf16.msra.mxu0 %v417_v8 }
  0x27   : > { %278 = vmatprep.subr.bf16.mxu0 %v438_v1 }
  0x2a   : > { %279 = vmatpush1.bf16.msra.mxu0 %v418_v9 }
  0x2b   : > { %280 = vmatprep.subr.bf16.mxu0 %v438_v1 }
  0x2e   : > { %281 = vmatpush1.bf16.msra.mxu0 %v419_v10 }
  0x2f   : > { %282 = vmatprep.subr.bf16.mxu0 %v438_v1 }
  0x32   : > { %283 = vmatpush1.bf16.msra.mxu0 %v420_v11 }
  0x33   : > { %284 = vmatprep.subr.bf16.mxu0 %v438_v1 }
  0x36   : > { %285 = vmatpush1.bf16.msra.mxu0 %v421_v12 }
  0x37   : > { %286 = vmatprep.subr.bf16.mxu0 %v438_v1 }
  0x3a   : > { %287 = vmatpush1.bf16.msra.mxu0 %v422_v13 }
  0x3b   : > { %288 = vmatprep.subr.bf16.mxu0 %v438_v1 }
  0x3e   : > { %289 = vmatpush1.bf16.msra.mxu0 %v423_v14 }
  0x3f   : > { %290 = vmatprep.subr.bf16.mxu0 %v438_v1 }
  0x42   : > { %291 = vmatpush1.bf16.msra.mxu0 %v424_v15 }
  0x43   : > { %292 = vmatprep.subr.bf16.mxu0 %v438_v1 }
  0x46   : > { %293 = vmatpush1.bf16.msra.mxu0 %v264_v17 }
  0x49   : > { %299 = vmatmul.mubr.bf16.vlgmr.msra.gmra.mrb[0].mxu0 %v383_v18 }
 0x11c   : > { %v300_v19 = vpop.f32.mrb[0].mxu0 }
 0x11d   : > { %306 = vadd.xlane.f32.xlu0 %v300_v19  ;;  %v302_v20 = vpop.f32.mrb[1].mxu0 }
 0x11e   : > { %v303_v21 = vpop.f32.mrb[2].mxu0 }
 0x11f   : > { %v304_v22 = vpop.f32.mrb[3].mxu0 }
 0x1aa   : > { %v307_v23 = vpop.xlane.xlu0 %306 }
 0x1ab   : > { %v309_v24 = vmul.f32 0.0078125, %v307_v23 }
 0x1ad   : > { %v310_v25 = vsub.f32 %v300_v19, %v309_v24 }
 0x1af   : > { %v311_v26 = vmul.f32 %v310_v25, %v310_v25 }
 0x1b1   : > { %312 = vadd.xlane.f32.xlu0 %v311_v26 }
 0x23e   : > { %v313_v27 = vpop.xlane.xlu0 %312 }
 0x23f   : > { %v314_v28 = vmul.f32 0.0078125, %v313_v27 }
 0x241   : > { %v315_v29 = vadd.f32 1e-05, %v314_v28 }
 0x243   : > { %428 = vrsqrt.f32 %v315_v29 }
 0x24d   : > { %v429_v30 = vpop.eup %428 }
 0x24e   : > { %v317_v31 = vmul.f32 %v429_v30, %v310_v25 }
 0x250   : > { %vm318_vm2 = vcmp.ge.f32.partialorder %v317_v31, 0.0  ;;  %v319_v32 = vmul.f32 0.01, %v317_v31 }
 0x252   : > { %v320_v33 = vsel %vm318_vm2, %v317_v31, %v319_v32 }
 0x253   : > { %v321_v34 = vpack.c.bf16 %v320_v33, %v320_v33 }
 0x255   : > { %322 = vst [vmem:[%s141_s20] sm:$0xf] %v321_v34 }
 0x256 PF: > { %s12_s9 = sadd.s32 1, %s436_s9  }
 0x257   : > { %p9_p4 = scmp.ge.s32.totalorder %s12_s9, 4  }
 0x259   :  { %11 = sbr.rel (!%p9_p4) target bundleno = 1 (0x1), region = 58 }

// kernel: nnunet3d_forward.27
= control target key start
LH: loop header
LB: loop body
LE: loop exit
PB: predicated region body
PF: predicated region fallthrough
CT: control target
= control target key end

     0   :  { %s500_s9 = smov 0   ;;  %s547_s0 = inlined_call_operand.vmem [shape: bf16[16,216], index: 0, kind: input, shape index: {}]   ;;  %s548_s1 = inlined_call_operand.vmem [shape: bf16[2,216,32], index: 1, kind: input, shape index: {}]   ;;  %s549_s2 = inlined_call_operand.vmem [shape: bf16[2,16,32], index: 2, kind: output, shape index: {}]  }
   0x1 LB: > { %s413_s10 = sadd.s32 4294967295, %s482_s9   ;;  %p417_p0 = scmp.ge.s32.totalorder %s482_s9, 1  ;;  %s482_s9 = sphi %s500_s9, %s12_s9  }
   0x2   : > { %p112_p1 = scmp.lt.s32.totalorder %s482_s9, 3 }
   0x4   : > { %p113_p2 = pnand %p417_p0, %p112_p1 }
   0x5   : > { %p134_p3 = scmp.lt.s32.totalorder (!%p113_p2), %s413_s10, 1  ;;  %vm264_vm0 = vcmask (!%p113_p2), 719872   ;;  %v484_v0 = vmov (!%p113_p2), 0   ;;  %v471_v1 = vld [vmem:[%s547_s0 + $0x4] ss:$8 sps:$4 sm:$0xff] (!%p113_p2)   ;;  %vm268_vm1 = vcmask (!%p113_p2), 1043456  }
   0x6   : > { %116 = sbr.rel (%p113_p2) target bundleno = 604 (0x25c), region = 28  ;;  %272 = vmatprep.subr.bf16.mxu0 (!%p113_p2), %v484_v0  ;;  %437 = vmatprep.mubr.msk.bf16.mxu0 (!%p113_p2), %vm264_vm0, %v471_v1  ;;  %v469_v17 = vld [vmem:[%s547_s0] ss:$8 sps:$4 sm:$0xff] (!%p113_p2)   ;;  %vm313_vm2 = vcmask (!%p113_p2), 261120   ;;  %vm355_vm4 = vcmask (!%p113_p2), 257024  }
   0xd   : > { %s551_s10 = smov (!%p134_p3, %s413_s10), 1 }
   0xe   : > { %s445_s13 = smul.u32 108, %s551_s10  ;;  %s442_s19 = sshll.u32 %s551_s10, 3 }
   0xf   : > { %s143_s22 = scalar_lea.vmem %s549_s2, %s442_s19 }
  0x10   : > { %s517_s16 = scalar_lea.vmem %s548_s1, %s445_s13 }
  0x11   : > { %v455_v2 = vld [vmem:[%s517_s16] sm:$0xff]   ;;  %v456_v3 = vld [vmem:[%s517_s16 + $0x8] sm:$0xff]   ;;  %v457_v4 = vld [vmem:[%s517_s16 + $0x10] sm:$0xff]  }
  0x12   : > { %273 = vmatpush1.bf16.msra.mxu0 %v455_v2  ;;  %v458_v5 = vld [vmem:[%s517_s16 + $0x18] sm:$0xff]   ;;  %v459_v6 = vld [vmem:[%s517_s16 + $0x20] sm:$0xff]   ;;  %v460_v7 = vld [vmem:[%s517_s16 + $0x28] sm:$0xff]  }
  0x13   : > { %274 = vmatprep.subr.bf16.mxu0 %v484_v0  ;;  %v461_v8 = vld [vmem:[%s517_s16 + $0x30] sm:$0xff]   ;;  %v462_v9 = vld [vmem:[%s517_s16 + $0x38] sm:$0xff]   ;;  %v463_v10 = vld [vmem:[%s517_s16 + $0x40] sm:$0xff]  }
  0x14   : > { %v464_v11 = vld [vmem:[%s517_s16 + $0x48] sm:$0xff]   ;;  %v465_v12 = vld [vmem:[%s517_s16 + $0x50] sm:$0xff]   ;;  %v466_v13 = vld [vmem:[%s517_s16 + $0x58] sm:$0xff]  }
  0x15   : > { %v467_v14 = vld [vmem:[%s517_s16 + $0x60] sm:$0xff]   ;;  %v468_v15 = vld [vmem:[%s517_s16 + $0x68] ss:$0 sps:$4 sm:$0xff]  }
  0x16   : > { %275 = vmatpush1.bf16.msra.mxu0 %v456_v3  ;;  %v270_v16 = vsel %vm268_vm1, %v468_v15, 0 }
  0x17   : > { %276 = vmatprep.subr.bf16.mxu0 %v484_v0 }
  0x1a   : > { %277 = vmatpush1.bf16.msra.mxu0 %v457_v4 }
  0x1b   : > { %278 = vmatprep.subr.bf16.mxu0 %v484_v0 }
  0x1e   : > { %279 = vmatpush1.bf16.msra.mxu0 %v458_v5 }
  0x1f   : > { %280 = vmatprep.subr.bf16.mxu0 %v484_v0 }
  0x22   : > { %281 = vmatpush1.bf16.msra.mxu0 %v459_v6 }
  0x23   : > { %282 = vmatprep.subr.bf16.mxu0 %v484_v0 }
  0x26   : > { %283 = vmatpush1.bf16.msra.mxu0 %v460_v7 }
  0x27   : > { %284 = vmatprep.subr.bf16.mxu0 %v484_v0 }
  0x2a   : > { %285 = vmatpush1.bf16.msra.mxu0 %v461_v8 }
  0x2b   : > { %286 = vmatprep.subr.bf16.mxu0 %v484_v0 }
  0x2e   : > { %287 = vmatpush1.bf16.msra.mxu0 %v462_v9 }
  0x2f   : > { %288 = vmatprep.subr.bf16.mxu0 %v484_v0 }
  0x32   : > { %289 = vmatpush1.bf16.msra.mxu0 %v463_v10 }
  0x33   : > { %290 = vmatprep.subr.bf16.mxu0 %v484_v0 }
  0x36   : > { %291 = vmatpush1.bf16.msra.mxu0 %v464_v11 }
  0x37   : > { %292 = vmatprep.subr.bf16.mxu0 %v484_v0 }
  0x3a   : > { %293 = vmatpush1.bf16.msra.mxu0 %v465_v12 }
  0x3b   : > { %294 = vmatprep.subr.bf16.mxu0 %v484_v0 }
  0x3e   : > { %295 = vmatpush1.bf16.msra.mxu0 %v466_v13 }
  0x3f   : > { %296 = vmatprep.subr.bf16.mxu0 %v484_v0 }
  0x42   : > { %297 = vmatpush1.bf16.msra.mxu0 %v467_v14 }
  0x43   : > { %298 = vmatprep.subr.bf16.mxu0 %v484_v0 }
  0x46   : > { %299 = vmatpush1.bf16.msra.mxu0 %v270_v16 }
  0x49   : > { %305 = vmatmul.mubr.bf16.vlgmr.msra.gmra.mrb[0].mxu0 %v469_v17 }
 0x11c   : > { %v306_v18 = vpop.f32.mrb[0].mxu0 }
 0x11d   : > { %v308_v19 = vpop.f32.mrb[1].mxu0  ;;  %v314_v20 = vsel %vm313_vm2, %v306_v18, 0.0 }
 0x11e   : > { %315 = vadd.xlane.f32.xlu0 %v314_v20  ;;  %v309_v21 = vpop.f32.mrb[2].mxu0 }
 0x11f   : > { %v311_v22 = vpop.f32.mrb[3].mxu0  ;;  %v317_v23 = vsel %vm313_vm2, %v309_v21, 0.0 }
 0x122   : > { %318 = vadd.xlane.f32.xlu0 %v317_v23 }
 0x1ab   : > { %v316_v24 = vpop.xlane.xlu0 %315 }
 0x1ac   : > { %v321_v25 = vmul.f32 0.03125, %v316_v24 }
 0x1ae   : > { %v323_v26 = vsub.f32 %v306_v18, %v321_v25 }
 0x1af   : > { %v319_v27 = vpop.xlane.xlu0 %318 }
 0x1b0   : > { %v322_v28 = vmul.f32 0.03125, %v319_v27  ;;  %v325_v29 = vmul.f32 %v323_v26, %v323_v26 }
 0x1b2   : > { %v324_v30 = vsub.f32 %v309_v21, %v322_v28  ;;  %v327_v31 = vsel %vm313_vm2, %v325_v29, 0.0 }
 0x1b3   : > { %328 = vadd.xlane.f32.xlu1 %v327_v31 }
 0x1b4   : > { %v326_v32 = vmul.f32 %v324_v30, %v324_v30 }
 0x1b6   : > { %v330_v33 = vsel %vm313_vm2, %v326_v32, 0.0 }
 0x1b7   : > { %331 = vadd.xlane.f32.xlu1 %v330_v33 }
 0x240   : > { %v329_v34 = vpop.xlane.xlu1 %328 }
 0x241   : > { %v333_v35 = vmul.f32 0.03125, %v329_v34 }
 0x243   : > { %v335_v36 = vadd.f32 1e-05, %v333_v35 }
 0x244   : > { %v332_v37 = vpop.xlane.xlu1 %331 }
 0x245   : > { %472 = vrsqrt.f32 %v335_v36  ;;  %v334_v38 = vmul.f32 0.03125, %v332_v37 }
 0x247   : > { %v336_v39 = vadd.f32 1e-05, %v334_v38 }
 0x249   : > { %474 = vrsqrt.f32 %v336_v39 }
 0x24f   : > { %v473_v40 = vpop.eup %472 }
 0x250   : > { %v339_v41 = vmul.f32 %v473_v40, %v323_v26 }
 0x252   : > { %vm341_vm3 = vcmp.ge.f32.partialorder %v339_v41, 0.0  ;;  %v343_v42 = vmul.f32 0.01, %v339_v41 }
 0x253   : > { %v475_v43 = vpop.eup %474 }
 0x254   : > { %v345_v44 = vsel %vm341_vm3, %v339_v41, %v343_v42  ;;  %v340_v45 = vmul.f32 %v475_v43, %v324_v30 }
 0x255   : > { %v443_v46 = vpack.c.bf16 %v345_v44, %v345_v44 }
 0x256   : > { %vm342_vm5 = vcmp.ge.f32.partialorder %v340_v45, 0.0  ;;  %v344_v47 = vmul.f32 0.01, %v340_v45 }
 0x257   : > { %356 = vst.msk [vmem:[%s143_s22] sm:$0xf] %vm355_vm4, %v443_v46 }
 0x258   : > { %v346_v48 = vsel %vm342_vm5, %v340_v45, %v344_v47 }
 0x259   : > { %v444_v49 = vpack.c.bf16 %v346_v48, %v346_v48 }
 0x25b   : > { %357 = vst.msk [vmem:[%s143_s22 + $0x4] sm:$0xf] %vm355_vm4, %v444_v49 }
 0x25c PF: > { %s12_s9 = sadd.s32 1, %s482_s9  }
 0x25d   : > { %p9_p4 = scmp.ge.s32.totalorder %s12_s9, 4  }
 0x25f   :  { %11 = sbr.rel (!%p9_p4) target bundleno = 1 (0x1), region = 58 }

// kernel: nnunet3d_forward.28
= control target key start
LH: loop header
LB: loop body
LE: loop exit
PB: predicated region body
PF: predicated region fallthrough
CT: control target
= control target key end

     0   :  { %s710_s9 = smov 0   ;;  %s787_s0 = inlined_call_operand.vmem [shape: bf16[16,432], index: 0, kind: input, shape index: {}]   ;;  %s788_s1 = inlined_call_operand.vmem [shape: bf16[2,432,32], index: 1, kind: input, shape index: {}]   ;;  %s789_s2 = inlined_call_operand.vmem [shape: bf16[2,16,32], index: 2, kind: output, shape index: {}]  }
   0x1 LB: > { %s570_s10 = sadd.s32 4294967295, %s692_s9   ;;  %p574_p0 = scmp.ge.s32.totalorder %s692_s9, 1  ;;  %s692_s9 = sphi %s710_s9, %s12_s9  }
   0x2   : > { %p112_p1 = scmp.lt.s32.totalorder %s692_s9, 3 }
   0x4   : > { %p113_p2 = pnand %p574_p0, %p112_p1 }
   0x5   : > { %p134_p3 = scmp.lt.s32.totalorder (!%p113_p2), %s570_s10, 1  ;;  %v694_v0 = vmov (!%p113_p2), 0   ;;  %v676_v1 = vld [vmem:[%s787_s0 + $0x4] ss:$16 sps:$4 sm:$0xff] (!%p113_p2)   ;;  %vm384_vm0 = vcmask (!%p113_p2), 392192   ;;  %vm470_vm1 = vcmask (!%p113_p2), 261120  }
   0x6   : > { %116 = sbr.rel (%p113_p2) target bundleno = 594 (0x252), region = 28  ;;  %429 = vmatprep.subr.bf16.mxu1 (!%p113_p2), %v694_v0  ;;  %v681_v2 = vld [vmem:[%s787_s0 + $0xc] ss:$16 sps:$4 sm:$0xff] (!%p113_p2)   ;;  %420 = vmatprep.mubr.bf16.mxu0 (!%p113_p2), %v676_v1  ;;  %v674_v28 = vld [vmem:[%s787_s0] ss:$16 sps:$4 sm:$0xff] (!%p113_p2)   ;;  %vm512_vm3 = vcmask (!%p113_p2), 257024  }
   0x7   : > { %609 = vmatprep.mubr.msk.bf16.mxu1 (!%p113_p2), %vm384_vm0, %v681_v2  ;;  %v679_v31 = vld [vmem:[%s787_s0 + $0x8] ss:$16 sps:$4 sm:$0xff] (!%p113_p2)  }
   0xd   : > { %s791_s10 = smov (!%p134_p3, %s570_s10), 1 }
   0xe   : > { %s639_s15 = smul.u32 216, %s791_s10  ;;  %s614_s23 = sshll.u32 %s791_s10, 3 }
   0xf   : > { %s143_s26 = scalar_lea.vmem %s789_s2, %s614_s23 }
  0x10   : > { %s731_s18 = scalar_lea.vmem %s788_s1, %s639_s15 }
  0x11   : > { %v649_v3 = vld [vmem:[%s731_s18 + $0x80] sm:$0xff]   ;;  %v650_v4 = vld [vmem:[%s731_s18 + $0x88] sm:$0xff]   ;;  %v653_v7 = vld [vmem:[%s731_s18 + $0x90] sm:$0xff]  }
  0x12   : > { %430 = vmatpush1.bf16.msra.mxu1 %v649_v3  ;;  %v651_v5 = vld [vmem:[%s731_s18 + $0x40] sm:$0xff]   ;;  %v654_v8 = vld [vmem:[%s731_s18 + $0x48] sm:$0xff]   ;;  %v657_v10 = vld [vmem:[%s731_s18 + $0x50] sm:$0xff]  }
  0x13   : > { %431 = vmatprep.subr.bf16.mxu1 %v694_v0  ;;  %v652_v6 = vld [vmem:[%s731_s18] sm:$0xff]   ;;  %617 = vmatprep.subr.bf16.mxu0 %v651_v5  ;;  %v655_v9 = vld [vmem:[%s731_s18 + $0x8] sm:$0xff]   ;;  %v658_v11 = vld [vmem:[%s731_s18 + $0x10] sm:$0xff]  }
  0x14   : > { %618 = vmatpush3.bf16.msra.mxu0 %v652_v6  ;;  %v656_v12 = vld [vmem:[%s731_s18 + $0x98] sm:$0xff]   ;;  %v659_v14 = vld [vmem:[%s731_s18 + $0xa0] sm:$0xff]   ;;  %v662_v17 = vld [vmem:[%s731_s18 + $0xa8] sm:$0xff]  }
  0x15   : > { %619 = vmatprep.subr.bf16.mxu0 %v654_v8  ;;  %v660_v13 = vld [vmem:[%s731_s18 + $0x58] sm:$0xff]   ;;  %v663_v16 = vld [vmem:[%s731_s18 + $0x60] sm:$0xff]   ;;  %v666_v19 = vld [vmem:[%s731_s18 + $0x68] sm:$0xff]  }
  0x16   : > { %432 = vmatpush1.bf16.msra.mxu1 %v650_v4  ;;  %v661_v15 = vld [vmem:[%s731_s18 + $0x18] sm:$0xff]   ;;  %v664_v18 = vld [vmem:[%s731_s18 + $0x20] sm:$0xff]   ;;  %v665_v20 = vld [vmem:[%s731_s18 + $0xb0] sm:$0xff]  }
  0x17   : > { %433 = vmatprep.subr.bf16.mxu1 %v694_v0  ;;  %v667_v21 = vld [vmem:[%s731_s18 + $0x28] sm:$0xff]   ;;  %v669_v22 = vld [vmem:[%s731_s18 + $0x70] sm:$0xff]   ;;  %v668_v23 = vld [vmem:[%s731_s18 + $0xb8] sm:$0xff]  }
  0x18   : > { %620 = vmatpush3.bf16.msra.mxu0 %v655_v9  ;;  %v670_v24 = vld [vmem:[%s731_s18 + $0x30] sm:$0xff]   ;;  %v672_v25 = vld [vmem:[%s731_s18 + $0x78] sm:$0xff]   ;;  %v671_v27 = vld [vmem:[%s731_s18 + $0xc0] sm:$0xff]  }
  0x19   : > { %621 = vmatprep.subr.bf16.mxu0 %v657_v10  ;;  %v673_v26 = vld [vmem:[%s731_s18 + $0x38] sm:$0xff]   ;;  %v677_v29 = vld [vmem:[%s731_s18 + $0xc8] sm:$0xff]   ;;  %v678_v30 = vld [vmem:[%s731_s18 + $0xd0] sm:$0xff]  }
  0x1a   : > { %434 = vmatpush1.bf16.msra.mxu1 %v653_v7 }
  0x1b   : > { %435 = vmatprep.subr.bf16.mxu1 %v694_v0 }
  0x1c   : > { %622 = vmatpush3.bf16.msra.mxu0 %v658_v11 }
  0x1d   : > { %623 = vmatprep.subr.bf16.mxu0 %v660_v13 }
  0x1e   : > { %436 = vmatpush1.bf16.msra.mxu1 %v656_v12 }
  0x1f   : > { %437 = vmatprep.subr.bf16.mxu1 %v694_v0 }
  0x20   : > { %624 = vmatpush3.bf16.msra.mxu0 %v661_v15 }
  0x21   : > { %625 = vmatprep.subr.bf16.mxu0 %v663_v16 }
  0x22   : > { %438 = vmatpush1.bf16.msra.mxu1 %v659_v14 }
  0x23   : > { %439 = vmatprep.subr.bf16.mxu1 %v694_v0 }
  0x24   : > { %626 = vmatpush3.bf16.msra.mxu0 %v664_v18 }
  0x25   : > { %627 = vmatprep.subr.bf16.mxu0 %v666_v19 }
  0x26   : > { %440 = vmatpush1.bf16.msra.mxu1 %v662_v17 }
  0x27   : > { %441 = vmatprep.subr.bf16.mxu1 %v694_v0 }
  0x28   : > { %628 = vmatpush3.bf16.msra.mxu0 %v667_v21 }
  0x29   : > { %629 = vmatprep.subr.bf16.mxu0 %v669_v22 }
  0x2a   : > { %442 = vmatpush1.bf16.msra.mxu1 %v665_v20 }
  0x2b   : > { %443 = vmatprep.subr.bf16.mxu1 %v694_v0 }
  0x2c   : > { %630 = vmatpush3.bf16.msra.mxu0 %v670_v24 }
  0x2d   : > { %631 = vmatprep.subr.bf16.mxu0 %v672_v25 }
  0x2e   : > { %444 = vmatpush1.bf16.msra.mxu1 %v668_v23 }
  0x2f   : > { %445 = vmatprep.subr.bf16.mxu1 %v694_v0 }
  0x30   : > { %632 = vmatpush3.bf16.msra.mxu0 %v673_v26 }
  0x32   : > { %446 = vmatpush1.bf16.msra.mxu1 %v671_v27 }
  0x33   : > { %447 = vmatprep.subr.bf16.mxu1 %v694_v0  ;;  %421 = vmatmul.mubr.bf16.vlgmr.msra.gmra.mrb[0].mxu0 %v674_v28 }
  0x36   : > { %448 = vmatpush1.bf16.msra.mxu1 %v677_v29 }
  0x37   : > { %449 = vmatprep.subr.bf16.mxu1 %v694_v0 }
  0x3a   : > { %450 = vmatpush1.bf16.msra.mxu1 %v678_v30 }
  0x3d   : > { %462 = vmatmul.mubr.bf16.vlgmr.msra.gmra.mrb[0].mxu1 %v679_v31 }
 0x106   : > { %v633_v32 = vpop.f32.mrb[0].mxu0 }
 0x107   : > { %v634_v33 = vpop.f32.mrb[1].mxu0 }
 0x108   : > { %v635_v34 = vadd.f32 %v634_v33, %v633_v32  ;;  %v636_v35 = vpop.f32.mrb[2].mxu0 }
 0x109   : > { %v637_v36 = vpop.f32.mrb[3].mxu0 }
 0x10a   : > { %v638_v37 = vadd.f32 %v637_v36, %v636_v35 }
 0x110   : > { %v463_v38 = vpop.f32.mrb[0].mxu1 }
 0x111   : > { %v464_v39 = vadd.f32 %v635_v34, %v463_v38  ;;  %v465_v40 = vpop.f32.mrb[1].mxu1 }
 0x112   : > { %v466_v41 = vpop.f32.mrb[2].mxu1 }
 0x113   : > { %v467_v42 = vadd.f32 %v638_v37, %v466_v41  ;;  %v468_v43 = vpop.f32.mrb[3].mxu1  ;;  %v471_v44 = vsel %vm470_vm1, %v464_v39, 0.0 }
 0x114   : > { %472 = vadd.xlane.f32.xlu0 %v471_v44 }
 0x115   : > { %v474_v45 = vsel %vm470_vm1, %v467_v42, 0.0 }
 0x118   : > { %475 = vadd.xlane.f32.xlu0 %v474_v45 }
 0x1a1   : > { %v473_v46 = vpop.xlane.xlu0 %472 }
 0x1a2   : > { %v478_v47 = vmul.f32 0.03125, %v473_v46 }
 0x1a4   : > { %v480_v48 = vsub.f32 %v464_v39, %v478_v47 }
 0x1a5   : > { %v476_v49 = vpop.xlane.xlu0 %475 }
 0x1a6   : > { %v479_v50 = vmul.f32 0.03125, %v476_v49  ;;  %v482_v51 = vmul.f32 %v480_v48, %v480_v48 }
 0x1a8   : > { %v481_v52 = vsub.f32 %v467_v42, %v479_v50  ;;  %v484_v53 = vsel %vm470_vm1, %v482_v51, 0.0 }
 0x1a9   : > { %485 = vadd.xlane.f32.xlu1 %v484_v53 }
 0x1aa   : > { %v483_v54 = vmul.f32 %v481_v52, %v481_v52 }
 0x1ac   : > { %v487_v55 = vsel %vm470_vm1, %v483_v54, 0.0 }
 0x1ad   : > { %488 = vadd.xlane.f32.xlu1 %v487_v55 }
 0x236   : > { %v486_v56 = vpop.xlane.xlu1 %485 }
 0x237   : > { %v490_v57 = vmul.f32 0.03125, %v486_v56 }
 0x239   : > { %v492_v58 = vadd.f32 1e-05, %v490_v57 }
 0x23a   : > { %v489_v59 = vpop.xlane.xlu1 %488 }
 0x23b   : > { %682 = vrsqrt.f32 %v492_v58  ;;  %v491_v60 = vmul.f32 0.03125, %v489_v59 }
 0x23d   : > { %v493_v61 = vadd.f32 1e-05, %v491_v60 }
 0x23f   : > { %684 = vrsqrt.f32 %v493_v61 }
 0x245   : > { %v683_v62 = vpop.eup %682 }
 0x246   : > { %v496_v63 = vmul.f32 %v683_v62, %v480_v48 }
 0x248   : > { %vm498_vm2 = vcmp.ge.f32.partialorder %v496_v63, 0.0  ;;  %v500_v0 = vmul.f32 0.01, %v496_v63 }
 0x249   : > { %v685_v1 = vpop.eup %684 }
 0x24a   : > { %v502_v2 = vsel %vm498_vm2, %v496_v63, %v500_v0  ;;  %v497_v3 = vmul.f32 %v685_v1, %v481_v52 }
 0x24b   : > { %v615_v4 = vpack.c.bf16 %v502_v2, %v502_v2 }
 0x24c   : > { %vm499_vm4 = vcmp.ge.f32.partialorder %v497_v3, 0.0  ;;  %v501_v5 = vmul.f32 0.01, %v497_v3 }
 0x24d   : > { %513 = vst.msk [vmem:[%s143_s26] sm:$0xf] %vm512_vm3, %v615_v4 }
 0x24e   : > { %v503_v6 = vsel %vm499_vm4, %v497_v3, %v501_v5 }
 0x24f   : > { %v616_v7 = vpack.c.bf16 %v503_v6, %v503_v6 }
 0x251   : > { %514 = vst.msk [vmem:[%s143_s26 + $0x4] sm:$0xf] %vm512_vm3, %v616_v7 }
 0x252 PF: > { %s12_s9 = sadd.s32 1, %s692_s9  }
 0x253   : > { %p9_p4 = scmp.ge.s32.totalorder %s12_s9, 4  }
 0x255   :  { %11 = sbr.rel (!%p9_p4) target bundleno = 1 (0x1), region = 58 }

// kernel: nnunet3d_forward.29
= control target key start
LH: loop header
LB: loop body
LE: loop exit
PB: predicated region body
PF: predicated region fallthrough
CT: control target
= control target key end

     0   :  { %s819_s9 = smov 0   ;;  %s918_s0 = inlined_call_operand.vmem [shape: bf16[32,432], index: 0, kind: input, shape index: {}]   ;;  %s919_s1 = inlined_call_operand.vmem [shape: bf16[2,432,8], index: 1, kind: input, shape index: {}]   ;;  %s920_s2 = inlined_call_operand.vmem [shape: bf16[2,32,8], index: 2, kind: output, shape index: {}]  }
   0x1 LB: > { %s654_s10 = sadd.s32 4294967295, %s801_s9   ;;  %p658_p0 = scmp.ge.s32.totalorder %s801_s9, 1  ;;  %s801_s9 = sphi %s819_s9, %s12_s9  }
   0x2   : > { %p112_p1 = scmp.lt.s32.totalorder %s801_s9, 3 }
   0x4   : > { %p113_p2 = pnand %p658_p0, %p112_p1 }
   0x5   : > { %p134_p3 = scmp.lt.s32.totalorder (!%p113_p2), %s654_s10, 1  ;;  %v803_v0 = vmov (!%p113_p2), 0   ;;  %v775_v1 = vld [vmem:[%s918_s0 + $0x4] ss:$16 sps:$4 sm:$0xff] (!%p113_p2)   ;;  %vm407_vm0 = vcmask (!%p113_p2), 392192   ;;  %vm512_vm1 = vcmask (!%p113_p2), 64512  }
   0x6   : > { %116 = sbr.rel (%p113_p2) target bundleno = 602 (0x25a), region = 28  ;;  %463 = vmatprep.subr.bf16.mxu1 (!%p113_p2), %v803_v0  ;;  %v780_v2 = vld [vmem:[%s918_s0 + $0xc] ss:$16 sps:$4 sm:$0xff] (!%p113_p2)   ;;  %446 = vmatprep.mubr.bf16.mxu0 (!%p113_p2), %v775_v1  ;;  %v773_v28 = vld [vmem:[%s918_s0] ss:$16 sps:$4 sm:$0xff] (!%p113_p2)   ;;  %vm594_vm3 = vcmask (!%p113_p2), 60416  }
   0x7   : > { %697 = vmatprep.mubr.msk.bf16.mxu1 (!%p113_p2), %vm407_vm0, %v780_v2  ;;  %v781_v29 = vld [vmem:[%s918_s0 + $0x24] ss:$16 sps:$4 sm:$0xff] (!%p113_p2)   ;;  %v783_v32 = vld [vmem:[%s918_s0 + $0x20] ss:$16 sps:$4 sm:$0xff] (!%p113_p2)   ;;  %v778_v33 = vld [vmem:[%s918_s0 + $0x8] ss:$16 sps:$4 sm:$0xff] (!%p113_p2)  }
   0x8   : > { %v784_v34 = vld [vmem:[%s918_s0 + $0x2c] ss:$16 sps:$4 sm:$0xff] (!%p113_p2)   ;;  %v786_v35 = vld [vmem:[%s918_s0 + $0x28] ss:$16 sps:$4 sm:$0xff] (!%p113_p2)  }
   0xd   : > { %s922_s10 = smov (!%p134_p3, %s654_s10), 1 }
   0xe   : > { %s738_s15 = smul.u32 216, %s922_s10  ;;  %s705_s3 = sshll.u32 %s922_s10, 4 }
   0xf   : > { %s143_s6 = scalar_lea.vmem %s920_s2, %s705_s3 }
  0x10   : > { %s841_s18 = scalar_lea.vmem %s919_s1, %s738_s15 }
  0x11   : > { %v748_v3 = vld [vmem:[%s841_s18 + $0x80] sm:$0xff]   ;;  %v749_v4 = vld [vmem:[%s841_s18 + $0x88] sm:$0xff]   ;;  %v752_v7 = vld [vmem:[%s841_s18 + $0x90] sm:$0xff]  }
  0x12   : > { %464 = vmatpush1.bf16.msra.mxu1 %v748_v3  ;;  %v750_v5 = vld [vmem:[%s841_s18 + $0x40] sm:$0xff]   ;;  %v753_v8 = vld [vmem:[%s841_s18 + $0x48] sm:$0xff]   ;;  %v756_v10 = vld [vmem:[%s841_s18 + $0x50] sm:$0xff]  }
  0x13   : > { %465 = vmatprep.subr.bf16.mxu1 %v803_v0  ;;  %v751_v6 = vld [vmem:[%s841_s18] sm:$0xff]   ;;  %710 = vmatprep.subr.bf16.mxu0 %v750_v5  ;;  %v754_v9 = vld [vmem:[%s841_s18 + $0x8] sm:$0xff]   ;;  %v757_v11 = vld [vmem:[%s841_s18 + $0x10] sm:$0xff]  }
  0x14   : > { %711 = vmatpush3.bf16.msra.mxu0 %v751_v6  ;;  %v755_v12 = vld [vmem:[%s841_s18 + $0x98] sm:$0xff]   ;;  %v758_v14 = vld [vmem:[%s841_s18 + $0xa0] sm:$0xff]   ;;  %v761_v17 = vld [vmem:[%s841_s18 + $0xa8] sm:$0xff]  }
  0x15   : > { %712 = vmatprep.subr.bf16.mxu0 %v753_v8  ;;  %v759_v13 = vld [vmem:[%s841_s18 + $0x58] sm:$0xff]   ;;  %v762_v16 = vld [vmem:[%s841_s18 + $0x60] sm:$0xff]   ;;  %v765_v19 = vld [vmem:[%s841_s18 + $0x68] sm:$0xff]  }
  0x16   : > { %466 = vmatpush1.bf16.msra.mxu1 %v749_v4  ;;  %v760_v15 = vld [vmem:[%s841_s18 + $0x18] sm:$0xff]   ;;  %v763_v18 = vld [vmem:[%s841_s18 + $0x20] sm:$0xff]   ;;  %v764_v20 = vld [vmem:[%s841_s18 + $0xb0] sm:$0xff]  }
  0x17   : > { %467 = vmatprep.subr.bf16.mxu1 %v803_v0  ;;  %v766_v21 = vld [vmem:[%s841_s18 + $0x28] sm:$0xff]   ;;  %v768_v22 = vld [vmem:[%s841_s18 + $0x70] sm:$0xff]   ;;  %v767_v23 = vld [vmem:[%s841_s18 + $0xb8] sm:$0xff]  }
  0x18   : > { %713 = vmatpush3.bf16.msra.mxu0 %v754_v9  ;;  %v769_v24 = vld [vmem:[%s841_s18 + $0x30] sm:$0xff]   ;;  %v771_v25 = vld [vmem:[%s841_s18 + $0x78] sm:$0xff]   ;;  %v770_v27 = vld [vmem:[%s841_s18 + $0xc0] sm:$0xff]  }
  0x19   : > { %714 = vmatprep.subr.bf16.mxu0 %v756_v10  ;;  %v772_v26 = vld [vmem:[%s841_s18 + $0x38] sm:$0xff]   ;;  %v776_v30 = vld [vmem:[%s841_s18 + $0xc8] sm:$0xff]   ;;  %v777_v31 = vld [vmem:[%s841_s18 + $0xd0] sm:$0xff]  }
  0x1a   : > { %468 = vmatpush1.bf16.msra.mxu1 %v752_v7 }
  0x1b   : > { %469 = vmatprep.subr.bf16.mxu1 %v803_v0 }
  0x1c   : > { %715 = vmatpush3.bf16.msra.mxu0 %v757_v11 }
  0x1d   : > { %716 = vmatprep.subr.bf16.mxu0 %v759_v13 }
  0x1e   : > { %470 = vmatpush1.bf16.msra.mxu1 %v755_v12 }
  0x1f   : > { %471 = vmatprep.subr.bf16.mxu1 %v803_v0 }
  0x20   : > { %717 = vmatpush3.bf16.msra.mxu0 %v760_v15 }
  0x21   : > { %718 = vmatprep.subr.bf16.mxu0 %v762_v16 }
  0x22   : > { %472 = vmatpush1.bf16.msra.mxu1 %v758_v14 }
  0x23   : > { %473 = vmatprep.subr.bf16.mxu1 %v803_v0 }
  0x24   : > { %719 = vmatpush3.bf16.msra.mxu0 %v763_v18 }
  0x25   : > { %720 = vmatprep.subr.bf16.mxu0 %v765_v19 }
  0x26   : > { %474 = vmatpush1.bf16.msra.mxu1 %v761_v17 }
  0x27   : > { %475 = vmatprep.subr.bf16.mxu1 %v803_v0 }
  0x28   : > { %721 = vmatpush3.bf16.msra.mxu0 %v766_v21 }
  0x29   : > { %722 = vmatprep.subr.bf16.mxu0 %v768_v22 }
  0x2a   : > { %476 = vmatpush1.bf16.msra.mxu1 %v764_v20 }
  0x2b   : > { %477 = vmatprep.subr.bf16.mxu1 %v803_v0 }
  0x2c   : > { %723 = vmatpush3.bf16.msra.mxu0 %v769_v24 }
  0x2d   : > { %724 = vmatprep.subr.bf16.mxu0 %v771_v25 }
  0x2e   : > { %478 = vmatpush1.bf16.msra.mxu1 %v767_v23 }
  0x2f   : > { %479 = vmatprep.subr.bf16.mxu1 %v803_v0 }
  0x30   : > { %725 = vmatpush3.bf16.msra.mxu0 %v772_v26 }
  0x32   : > { %480 = vmatpush1.bf16.msra.mxu1 %v770_v27 }
  0x33   : > { %481 = vmatprep.subr.bf16.mxu1 %v803_v0  ;;  %447 = vmatmul.mubr.bf16.vlgmr.msra.gmra.mrb[0].mxu0 %v773_v28 }
  0x34   : > { %454 = vmatprep.mubr.bf16.mxu0 %v781_v29 }
  0x36   : > { %482 = vmatpush1.bf16.msra.mxu1 %v776_v30 }
  0x37   : > { %483 = vmatprep.subr.bf16.mxu1 %v803_v0 }
  0x3a   : > { %484 = vmatpush1.bf16.msra.mxu1 %v777_v31 }
  0x3b   : > { %455 = vmatmul.mubr.bf16.gmra.mrb[4].mxu0 %v783_v32 }
  0x3d   : > { %496 = vmatmul.mubr.bf16.vlgmr.msra.gmra.mrb[0].mxu1 %v778_v33 }
  0x3e   : > { %698 = vmatprep.mubr.msk.bf16.mxu1 %vm407_vm0, %v784_v34 }
  0x45   : > { %504 = vmatmul.mubr.bf16.gmra.mrb[4].mxu1 %v786_v35 }
 0x106   : > { %v726_v36 = vpop.f32.mrb[0].mxu0 }
 0x107   : > { %v727_v37 = vpop.f32.mrb[1].mxu0 }
 0x108   : > { %v728_v38 = vadd.f32 %v727_v37, %v726_v36  ;;  %v729_v39 = vpop.f32.mrb[2].mxu0 }
 0x109   : > { %v730_v40 = vpop.f32.mrb[3].mxu0 }
 0x10a   : > { %v731_v41 = vadd.f32 %v730_v40, %v729_v39 }
 0x10e   : > { %v732_v42 = vpop.f32.mrb[4].mxu0 }
 0x10f   : > { %v733_v44 = vpop.f32.mrb[5].mxu0 }
 0x110   : > { %v497_v43 = vpop.f32.mrb[0].mxu1  ;;  %v734_v47 = vadd.f32 %v733_v44, %v732_v42  ;;  %v735_v48 = vpop.f32.mrb[6].mxu0 }
 0x111   : > { %v498_v45 = vadd.f32 %v728_v38, %v497_v43  ;;  %v499_v46 = vpop.f32.mrb[1].mxu1  ;;  %v736_v50 = vpop.f32.mrb[7].mxu0 }
 0x112   : > { %v500_v49 = vpop.f32.mrb[2].mxu1  ;;  %v737_v54 = vadd.f32 %v736_v50, %v735_v48 }
 0x113   : > { %v501_v51 = vadd.f32 %v731_v41, %v500_v49  ;;  %v502_v52 = vpop.f32.mrb[3].mxu1  ;;  %v513_v53 = vsel %vm512_vm1, %v498_v45, 0.0 }
 0x114   : > { %514 = vadd.xlane.f32.xlu0 %v513_v53 }
 0x115   : > { %v516_v55 = vsel %vm512_vm1, %v501_v51, 0.0 }
 0x118   : > { %v505_v56 = vpop.f32.mrb[4].mxu1  ;;  %517 = vadd.xlane.f32.xlu0 %v516_v55 }
 0x119   : > { %v506_v57 = vadd.f32 %v734_v47, %v505_v56  ;;  %v507_v58 = vpop.f32.mrb[5].mxu1 }
 0x11a   : > { %v508_v59 = vpop.f32.mrb[6].mxu1 }
 0x11b   : > { %v509_v60 = vadd.f32 %v737_v54, %v508_v59  ;;  %v510_v61 = vpop.f32.mrb[7].mxu1  ;;  %v519_v62 = vsel %vm512_vm1, %v506_v57, 0.0 }
 0x11c   : > { %520 = vadd.xlane.f32.xlu1 %v519_v62 }
 0x11d   : > { %v522_v63 = vsel %vm512_vm1, %v509_v60, 0.0 }
 0x120   : > { %523 = vadd.xlane.f32.xlu1 %v522_v63 }
 0x1a1   : > { %v515_v0 = vpop.xlane.xlu0 %514 }
 0x1a2   : > { %v526_v1 = vmul.f32 0.125, %v515_v0 }
 0x1a4   : > { %v530_v2 = vsub.f32 %v498_v45, %v526_v1 }
 0x1a5   : > { %v518_v3 = vpop.xlane.xlu0 %517 }
 0x1a6   : > { %v527_v4 = vmul.f32 0.125, %v518_v3  ;;  %v534_v5 = vmul.f32 %v530_v2, %v530_v2 }
 0x1a8   : > { %v531_v6 = vsub.f32 %v501_v51, %v527_v4  ;;  %v538_v7 = vsel %vm512_vm1, %v534_v5, 0.0 }
 0x1a9   : > { %v521_v8 = vpop.xlane.xlu1 %520  ;;  %539 = vadd.xlane.f32.xlu0 %v538_v7 }
 0x1aa   : > { %v528_v9 = vmul.f32 0.125, %v521_v8  ;;  %v535_v10 = vmul.f32 %v531_v6, %v531_v6 }
 0x1ac   : > { %v532_v11 = vsub.f32 %v506_v57, %v528_v9  ;;  %v541_v12 = vsel %vm512_vm1, %v535_v10, 0.0 }
 0x1ad   : > { %v524_v13 = vpop.xlane.xlu1 %523  ;;  %542 = vadd.xlane.f32.xlu1 %v541_v12 }
 0x1ae   : > { %v529_v14 = vmul.f32 0.125, %v524_v13  ;;  %v536_v15 = vmul.f32 %v532_v11, %v532_v11 }
 0x1b0   : > { %v533_v16 = vsub.f32 %v509_v60, %v529_v14  ;;  %v544_v17 = vsel %vm512_vm1, %v536_v15, 0.0 }
 0x1b1   : > { %545 = vadd.xlane.f32.xlu0 %v544_v17 }
 0x1b2   : > { %v537_v18 = vmul.f32 %v533_v16, %v533_v16 }
 0x1b4   : > { %v547_v19 = vsel %vm512_vm1, %v537_v18, 0.0 }
 0x1b5   : > { %548 = vadd.xlane.f32.xlu1 %v547_v19 }
 0x236   : > { %v540_v20 = vpop.xlane.xlu0 %539 }
 0x237   : > { %v550_v21 = vmul.f32 0.125, %v540_v20 }
 0x239   : > { %v554_v22 = vadd.f32 1e-05, %v550_v21 }
 0x23a   : > { %v543_v23 = vpop.xlane.xlu1 %542 }
 0x23b   : > { %787 = vrsqrt.f32 %v554_v22  ;;  %v551_v24 = vmul.f32 0.125, %v543_v23 }
 0x23d   : > { %v555_v25 = vadd.f32 1e-05, %v551_v24 }
 0x23e   : > { %v546_v26 = vpop.xlane.xlu0 %545 }
 0x23f   : > { %789 = vrsqrt.f32 %v555_v25  ;;  %v552_v27 = vmul.f32 0.125, %v546_v26 }
 0x241   : > { %v556_v28 = vadd.f32 1e-05, %v552_v27 }
 0x242   : > { %v549_v29 = vpop.xlane.xlu1 %548 }
 0x243   : > { %791 = vrsqrt.f32 %v556_v28  ;;  %v553_v30 = vmul.f32 0.125, %v549_v29 }
 0x245   : > { %v788_v31 = vpop.eup %787  ;;  %v557_v32 = vadd.f32 1e-05, %v553_v30 }
 0x246   : > { %v562_v33 = vmul.f32 %v788_v31, %v530_v2 }
 0x247   : > { %793 = vrsqrt.f32 %v557_v32 }
 0x248   : > { %vm566_vm2 = vcmp.ge.f32.partialorder %v562_v33, 0.0  ;;  %v570_v34 = vmul.f32 0.01, %v562_v33 }
 0x249   : > { %v790_v35 = vpop.eup %789 }
 0x24a   : > { %v574_v36 = vsel %vm566_vm2, %v562_v33, %v570_v34  ;;  %v563_v37 = vmul.f32 %v790_v35, %v531_v6 }
 0x24b   : > { %v706_v38 = vpack.c.bf16 %v574_v36, %v574_v36 }
 0x24c   : > { %vm567_vm4 = vcmp.ge.f32.partialorder %v563_v37, 0.0  ;;  %v571_v39 = vmul.f32 0.01, %v563_v37 }
 0x24d   : > { %v792_v40 = vpop.eup %791  ;;  %595 = vst.msk [vmem:[%s143_s6] sm:$0xf] %vm594_vm3, %v706_v38 }
 0x24e   : > { %v575_v41 = vsel %vm567_vm4, %v563_v37, %v571_v39  ;;  %v564_v42 = vmul.f32 %v792_v40, %v532_v11 }
 0x24f   : > { %v707_v43 = vpack.c.bf16 %v575_v41, %v575_v41 }
 0x250   : > { %vm568_vm5 = vcmp.ge.f32.partialorder %v564_v42, 0.0  ;;  %v572_v44 = vmul.f32 0.01, %v564_v42 }
 0x251   : > { %v794_v45 = vpop.eup %793  ;;  %596 = vst.msk [vmem:[%s143_s6 + $0x4] sm:$0xf] %vm594_vm3, %v707_v43 }
 0x252   : > { %v576_v46 = vsel %vm568_vm5, %v564_v42, %v572_v44  ;;  %v565_v47 = vmul.f32 %v794_v45, %v533_v16 }
 0x253   : > { %v708_v48 = vpack.c.bf16 %v576_v46, %v576_v46 }
 0x254   : > { %vm569_vm6 = vcmp.ge.f32.partialorder %v565_v47, 0.0  ;;  %v573_v49 = vmul.f32 0.01, %v565_v47 }
 0x255   : > { %597 = vst.msk [vmem:[%s143_s6 + $0x8] sm:$0xf] %vm594_vm3, %v708_v48 }
 0x256   : > { %v577_v50 = vsel %vm569_vm6, %v565_v47, %v573_v49 }
 0x257   : > { %v709_v51 = vpack.c.bf16 %v577_v50, %v577_v50 }
 0x259   : > { %598 = vst.msk [vmem:[%s143_s6 + $0xc] sm:$0xf] %vm594_vm3, %v709_v51 }
 0x25a PF: > { %s12_s9 = sadd.s32 1, %s801_s9  }
 0x25b   : > { %p9_p4 = scmp.ge.s32.totalorder %s12_s9, 4  }
 0x25d   :  { %11 = sbr.rel (!%p9_p4) target bundleno = 1 (0x1), region = 58 }

// kernel: nnunet3d_forward.30
= control target key start
LH: loop header
LB: loop body
LE: loop exit
PB: predicated region body
PF: predicated region fallthrough
CT: control target
= control target key end

     0   :  { %s1319_s9 = smov 0   ;;  %s1452_s0 = inlined_call_operand.vmem [shape: bf16[32,864], index: 0, kind: input, shape index: {}]   ;;  %s1453_s1 = inlined_call_operand.vmem [shape: bf16[2,864,8], index: 1, kind: input, shape index: {}]   ;;  %s1454_s2 = inlined_call_operand.vmem [shape: bf16[2,32,8], index: 2, kind: output, shape index: {}]  }
   0x1 LB: > { %s1008_s10 = sadd.s32 4294967295, %s1302_s9   ;;  %p1012_p0 = scmp.ge.s32.totalorder %s1302_s9, 1  ;;  %s1302_s9 = sphi %s1319_s9, %s12_s9  }
   0x2   : > { %p112_p1 = scmp.lt.s32.totalorder %s1302_s9, 3 }
   0x4   : > { %p113_p2 = pnand %p1012_p0, %p112_p1 }
   0x5   : > { %p134_p3 = scmp.lt.s32.totalorder (!%p113_p2), %s1008_s10, 1  ;;  %v1248_v0 = vld [vmem:[%s1452_s0 + $0x4] ss:$28 sps:$4 sm:$0xff] (!%p113_p2)   ;;  %v1251_v1 = vld [vmem:[%s1452_s0 + $0xc] ss:$28 sps:$4 sm:$0xff] (!%p113_p2)   ;;  %vm663_vm0 = vcmask (!%p113_p2), 785408  }
   0x6   : > { %116 = sbr.rel (%p113_p2) target bundleno = 629 (0x275), region = 28  ;;  %702 = vmatprep.mubr.bf16.mxu0 (!%p113_p2), %v1248_v0  ;;  %751 = vmatprep.mubr.bf16.mxu1 (!%p113_p2), %v1251_v1  ;;  %v1246_v32 = vld [vmem:[%s1452_s0] ss:$28 sps:$4 sm:$0xff] (!%p113_p2)   ;;  %v1249_v34 = vld [vmem:[%s1452_s0 + $0x8] ss:$28 sps:$4 sm:$0xff] (!%p113_p2)   ;;  %vm866_vm1 = vcmask (!%p113_p2), 64512  }
   0x7   : > { %v1264_v36 = vld [vmem:[%s1452_s0 + $0x3c] ss:$28 sps:$4 sm:$0xff] (!%p113_p2)   ;;  %v1266_v38 = vld [vmem:[%s1452_s0 + $0x44] ss:$28 sps:$4 sm:$0xff] (!%p113_p2)   ;;  %v1281_v47 = vld [vmem:[%s1452_s0 + $0x14] ss:$28 sps:$4 sm:$0xff] (!%p113_p2)  }
   0x8   : > { %v1270_v43 = vld [vmem:[%s1452_s0 + $0x38] ss:$28 sps:$4 sm:$0xff] (!%p113_p2)   ;;  %v1271_v45 = vld [vmem:[%s1452_s0 + $0x40] ss:$28 sps:$4 sm:$0xff] (!%p113_p2)   ;;  %v1284_v0 = vld [vmem:[%s1452_s0 + $0x50] ss:$28 sps:$4 sm:$0xff] (!%p113_p2)  }
   0x9   : > { %v1283_v59 = vld [vmem:[%s1452_s0 + $0x18] ss:$28 sps:$4 sm:$0xff] (!%p113_p2)   ;;  %v1279_v1 = vld [vmem:[%s1452_s0 + $0x10] ss:$28 sps:$4 sm:$0xff] (!%p113_p2)   ;;  %vm948_vm3 = vcmask (!%p113_p2), 60416  }
   0xd   : > { %s1456_s10 = smov (!%p134_p3, %s1008_s10), 1 }
   0xe   : > { %s1205_s15 = smul.u32 432, %s1456_s10  ;;  %s1092_s17 = sshll.u32 %s1456_s10, 4 }
   0xf   : > { %s143_s20 = scalar_lea.vmem %s1454_s2, %s1092_s17 }
  0x10   : > { %s1339_s18 = scalar_lea.vmem %s1453_s1, %s1205_s15 }
  0x11   : > { %v1214_v2 = vld [vmem:[%s1339_s18 + $0x40] sm:$0xff]   ;;  %v1218_v6 = vld [vmem:[%s1339_s18 + $0x48] sm:$0xff]   ;;  %v1222_v10 = vld [vmem:[%s1339_s18 + $0x50] sm:$0xff]  }
  0x12   : > { %v1215_v3 = vld [vmem:[%s1339_s18 + $0xc0] sm:$0xff]   ;;  %1097 = vmatprep.subr.bf16.mxu0 %v1214_v2  ;;  %v1219_v7 = vld [vmem:[%s1339_s18 + $0xc8] sm:$0xff]   ;;  %v1223_v11 = vld [vmem:[%s1339_s18 + $0xd0] sm:$0xff]  }
  0x13   : > { %v1216_v4 = vld [vmem:[%s1339_s18] sm:$0xff]   ;;  %1125 = vmatprep.subr.bf16.mxu1 %v1215_v3  ;;  %v1220_v8 = vld [vmem:[%s1339_s18 + $0x8] sm:$0xff]   ;;  %v1224_v12 = vld [vmem:[%s1339_s18 + $0x10] sm:$0xff]  }
  0x14   : > { %v1217_v5 = vld [vmem:[%s1339_s18 + $0x80] sm:$0xff]   ;;  %1098 = vmatpush3.bf16.msra.mxu0 %v1216_v4  ;;  %v1221_v9 = vld [vmem:[%s1339_s18 + $0x88] sm:$0xff]   ;;  %v1225_v13 = vld [vmem:[%s1339_s18 + $0x90] sm:$0xff]  }
  0x15   : > { %1126 = vmatpush3.bf16.msra.mxu1 %v1217_v5  ;;  %1099 = vmatprep.subr.bf16.mxu0 %v1218_v6  ;;  %v1226_v14 = vld [vmem:[%s1339_s18 + $0x58] sm:$0xff]   ;;  %v1230_v18 = vld [vmem:[%s1339_s18 + $0x60] sm:$0xff]   ;;  %v1234_v22 = vld [vmem:[%s1339_s18 + $0x68] sm:$0xff]  }
  0x16   : > { %1127 = vmatprep.subr.bf16.mxu1 %v1219_v7  ;;  %v1227_v15 = vld [vmem:[%s1339_s18 + $0xd8] sm:$0xff]   ;;  %v1231_v19 = vld [vmem:[%s1339_s18 + $0xe0] sm:$0xff]   ;;  %v1235_v23 = vld [vmem:[%s1339_s18 + $0xe8] sm:$0xff]  }
  0x17   : > { %v1228_v16 = vld [vmem:[%s1339_s18 + $0x18] sm:$0xff]   ;;  %v1232_v20 = vld [vmem:[%s1339_s18 + $0x20] sm:$0xff]   ;;  %v1236_v24 = vld [vmem:[%s1339_s18 + $0x28] sm:$0xff]  }
  0x18   : > { %1100 = vmatpush3.bf16.msra.mxu0 %v1220_v8  ;;  %v1229_v17 = vld [vmem:[%s1339_s18 + $0x98] sm:$0xff]   ;;  %v1233_v21 = vld [vmem:[%s1339_s18 + $0xa0] sm:$0xff]   ;;  %v1237_v25 = vld [vmem:[%s1339_s18 + $0xa8] sm:$0xff]  }
  0x19   : > { %1128 = vmatpush3.bf16.msra.mxu1 %v1221_v9  ;;  %1101 = vmatprep.subr.bf16.mxu0 %v1222_v10  ;;  %v1238_v26 = vld [vmem:[%s1339_s18 + $0x70] sm:$0xff]   ;;  %v1242_v30 = vld [vmem:[%s1339_s18 + $0x78] sm:$0xff]   ;;  %v1252_v37 = vld [vmem:[%s1339_s18 + $0x140] sm:$0xff]  }
  0x1a   : > { %1129 = vmatprep.subr.bf16.mxu1 %v1223_v11  ;;  %v1239_v27 = vld [vmem:[%s1339_s18 + $0xf0] sm:$0xff]   ;;  %v1243_v31 = vld [vmem:[%s1339_s18 + $0xf8] sm:$0xff]   ;;  %v1253_v39 = vld [vmem:[%s1339_s18 + $0x100] sm:$0xff]  }
  0x1b   : > { %v1240_v28 = vld [vmem:[%s1339_s18 + $0x30] sm:$0xff]   ;;  %v1244_v33 = vld [vmem:[%s1339_s18 + $0x38] sm:$0xff]   ;;  %v1254_v40 = vld [vmem:[%s1339_s18 + $0x148] sm:$0xff]  }
  0x1c   : > { %1102 = vmatpush3.bf16.msra.mxu0 %v1224_v12  ;;  %v1241_v29 = vld [vmem:[%s1339_s18 + $0xb0] sm:$0xff]   ;;  %v1245_v35 = vld [vmem:[%s1339_s18 + $0xb8] sm:$0xff]   ;;  %v1255_v41 = vld [vmem:[%s1339_s18 + $0x108] sm:$0xff]  }
  0x1d   : > { %1130 = vmatpush3.bf16.msra.mxu1 %v1225_v13  ;;  %1103 = vmatprep.subr.bf16.mxu0 %v1226_v14  ;;  %v1256_v42 = vld [vmem:[%s1339_s18 + $0x150] sm:$0xff]   ;;  %v1259_v44 = vld [vmem:[%s1339_s18 + $0x180] sm:$0xff]   ;;  %v1258_v48 = vld [vmem:[%s1339_s18 + $0x158] sm:$0xff]  }
  0x1e   : > { %1131 = vmatprep.subr.bf16.mxu1 %v1227_v15  ;;  %v1257_v46 = vld [vmem:[%s1339_s18 + $0x110] sm:$0xff]   ;;  %v1262_v49 = vld [vmem:[%s1339_s18 + $0x188] sm:$0xff]   ;;  %v1260_v50 = vld [vmem:[%s1339_s18 + $0x118] sm:$0xff]  }
  0x1f   : > { %v1261_v51 = vld [vmem:[%s1339_s18 + $0x160] sm:$0xff]   ;;  %v1269_v52 = vld [vmem:[%s1339_s18 + $0x190] sm:$0xff]   ;;  %v1274_v54 = vld [vmem:[%s1339_s18 + $0x198] sm:$0xff]  }
  0x20   : > { %1104 = vmatpush3.bf16.msra.mxu0 %v1228_v16  ;;  %v1263_v53 = vld [vmem:[%s1339_s18 + $0x120] sm:$0xff]   ;;  %v1268_v55 = vld [vmem:[%s1339_s18 + $0x168] sm:$0xff]   ;;  %v1273_v58 = vld [vmem:[%s1339_s18 + $0x170] sm:$0xff]  }
  0x21   : > { %1132 = vmatpush3.bf16.msra.mxu1 %v1229_v17  ;;  %1105 = vmatprep.subr.bf16.mxu0 %v1230_v18  ;;  %v1277_v56 = vld [vmem:[%s1339_s18 + $0x1a0] sm:$0xff]   ;;  %v1272_v57 = vld [vmem:[%s1339_s18 + $0x128] sm:$0xff]   ;;  %v1275_v61 = vld [vmem:[%s1339_s18 + $0x130] sm:$0xff]  }
  0x22   : > { %1133 = vmatprep.subr.bf16.mxu1 %v1231_v19  ;;  %v1282_v60 = vld [vmem:[%s1339_s18 + $0x1a8] sm:$0xff]   ;;  %v1276_v62 = vld [vmem:[%s1339_s18 + $0x178] sm:$0xff]  }
  0x23   : > { %v1278_v63 = vld [vmem:[%s1339_s18 + $0x138] sm:$0xff]   ;;  %v1285_v2 = vld [vmem:[%s1452_s0 + $0x4c] ss:$28 sps:$4 sm:$0xff]  }
  0x24   : > { %1106 = vmatpush3.bf16.msra.mxu0 %v1232_v20  ;;  %v1287_v3 = vld [vmem:[%s1452_s0 + $0x48] ss:$28 sps:$4 sm:$0xff]  }
  0x25   : > { %1134 = vmatpush3.bf16.msra.mxu1 %v1233_v21  ;;  %1107 = vmatprep.subr.bf16.mxu0 %v1234_v22 }
  0x26   : > { %1135 = vmatprep.subr.bf16.mxu1 %v1235_v23 }
  0x28   : > { %1108 = vmatpush3.bf16.msra.mxu0 %v1236_v24 }
  0x29   : > { %1136 = vmatpush3.bf16.msra.mxu1 %v1237_v25  ;;  %1109 = vmatprep.subr.bf16.mxu0 %v1238_v26 }
  0x2a   : > { %1137 = vmatprep.subr.bf16.mxu1 %v1239_v27 }
  0x2c   : > { %1110 = vmatpush3.bf16.msra.mxu0 %v1240_v28 }
  0x2d   : > { %1138 = vmatpush3.bf16.msra.mxu1 %v1241_v29  ;;  %1111 = vmatprep.subr.bf16.mxu0 %v1242_v30 }
  0x2e   : > { %1139 = vmatprep.subr.bf16.mxu1 %v1243_v31 }
  0x30   : > { %1112 = vmatpush3.bf16.msra.mxu0 %v1244_v33 }
  0x31   : > { %1140 = vmatpush3.bf16.msra.mxu1 %v1245_v35  ;;  %1153 = vmatprep.subr.bf16.mxu0 %v1252_v37 }
  0x32   : > { %1189 = vmatprep.subr.bf16.mxu1 %v1259_v44 }
  0x33   : > { %703 = vmatmul.mubr.bf16.vlgmr.msra.gmra.mrb[0].mxu0 %v1246_v32 }
  0x34   : > { %752 = vmatmul.mubr.bf16.vlgmr.msra.gmra.mrb[0].mxu1 %v1249_v34  ;;  %1154 = vmatpush3.bf16.msra.mxu0 %v1253_v39 }
  0x35   : > { %1155 = vmatprep.subr.bf16.mxu0 %v1254_v40  ;;  %710 = vmatprep.mubr.bf16.mxu0 %v1264_v36 }
  0x36   : > { %759 = vmatprep.mubr.bf16.mxu1 %v1266_v38  ;;  %1190 = vmatpush3.bf16.msra.mxu1 %v1259_v44 }
  0x37   : > { %1191 = vmatprep.subr.bf16.mxu1 %v1262_v49 }
  0x38   : > { %1156 = vmatpush3.bf16.msra.mxu0 %v1255_v41 }
  0x39   : > { %1157 = vmatprep.subr.bf16.mxu0 %v1256_v42 }
  0x3a   : > { %1192 = vmatpush3.bf16.msra.mxu1 %v1262_v49 }
  0x3b   : > { %711 = vmatmul.mubr.bf16.gmra.mrb[4].mxu0 %v1270_v43  ;;  %1193 = vmatprep.subr.bf16.mxu1 %v1269_v52 }
  0x3c   : > { %1158 = vmatpush3.bf16.msra.mxu0 %v1257_v46  ;;  %760 = vmatmul.mubr.bf16.gmra.mrb[4].mxu1 %v1271_v45 }
  0x3d   : > { %1159 = vmatprep.subr.bf16.mxu0 %v1258_v48  ;;  %800 = vmatprep.mubr.bf16.mxu0 %v1281_v47 }
  0x3e   : > { %1194 = vmatpush3.bf16.msra.mxu1 %v1269_v52  ;;  %1201 = vmatprep.mubr.msk.bf16.mxu1 %vm663_vm0, %v1283_v59 }
  0x3f   : > { %1195 = vmatprep.subr.bf16.mxu1 %v1274_v54 }
  0x40   : > { %1160 = vmatpush3.bf16.msra.mxu0 %v1260_v50 }
  0x41   : > { %1161 = vmatprep.subr.bf16.mxu0 %v1261_v51 }
  0x42   : > { %1196 = vmatpush3.bf16.msra.mxu1 %v1274_v54 }
  0x43   : > { %1197 = vmatprep.subr.bf16.mxu1 %v1277_v56 }
  0x44   : > { %1162 = vmatpush3.bf16.msra.mxu0 %v1263_v53 }
  0x45   : > { %1163 = vmatprep.subr.bf16.mxu0 %v1268_v55 }
  0x46   : > { %1198 = vmatpush3.bf16.msra.mxu1 %v1277_v56 }
  0x47   : > { %1199 = vmatprep.subr.bf16.mxu1 %v1282_v60 }
  0x48   : > { %1164 = vmatpush3.bf16.msra.mxu0 %v1272_v57 }
  0x49   : > { %1165 = vmatprep.subr.bf16.mxu0 %v1273_v58 }
  0x4a   : > { %1200 = vmatpush3.bf16.msra.mxu1 %v1282_v60 }
  0x4c   : > { %1166 = vmatpush3.bf16.msra.mxu0 %v1275_v61 }
  0x4d   : > { %1167 = vmatprep.subr.bf16.mxu0 %v1276_v62  ;;  %1202 = vmatmul.mubr.msk.bf16.vlgmr.msra.gmra.mrb[8].mxu1 %vm663_vm0, %v1284_v0 }
  0x50   : > { %1168 = vmatpush3.bf16.msra.mxu0 %v1278_v63 }
  0x53   : > { %801 = vmatmul.mubr.bf16.vlgmr.msra.gmra.mrb[8].mxu0 %v1279_v1 }
  0x54   : > { %808 = vmatprep.mubr.bf16.mxu0 %v1285_v2 }
  0x5b   : > { %809 = vmatmul.mubr.bf16.gmra.mrb[12].mxu0 %v1287_v3 }
 0x106   : > { %v1113_v4 = vpop.f32.mrb[0].mxu0 }
 0x107   : > { %v1141_v5 = vpop.f32.mrb[0].mxu1  ;;  %v1114_v6 = vpop.f32.mrb[1].mxu0 }
 0x108   : > { %v1115_v7 = vadd.f32 %v1114_v6, %v1113_v4  ;;  %v1142_v8 = vpop.f32.mrb[1].mxu1  ;;  %v1116_v9 = vpop.f32.mrb[2].mxu0 }
 0x109   : > { %v1143_v10 = vadd.f32 %v1142_v8, %v1141_v5  ;;  %v1144_v11 = vpop.f32.mrb[2].mxu1  ;;  %v1117_v12 = vpop.f32.mrb[3].mxu0 }
 0x10a   : > { %v1118_v13 = vadd.f32 %v1117_v12, %v1116_v9  ;;  %v1145_v14 = vpop.f32.mrb[3].mxu1 }
 0x10b   : > { %v754_v15 = vadd.f32 %v1143_v10, %v1115_v7  ;;  %v1146_v16 = vadd.f32 %v1145_v14, %v1144_v11 }
 0x10d   : > { %v757_v17 = vadd.f32 %v1146_v16, %v1118_v13 }
 0x10e   : > { %v1119_v18 = vpop.f32.mrb[4].mxu0 }
 0x10f   : > { %v1120_v19 = vpop.f32.mrb[5].mxu0  ;;  %v1147_v20 = vpop.f32.mrb[4].mxu1 }
 0x110   : > { %v1121_v21 = vadd.f32 %v1120_v19, %v1119_v18  ;;  %v1122_v22 = vpop.f32.mrb[6].mxu0  ;;  %v1148_v23 = vpop.f32.mrb[5].mxu1 }
 0x111   : > { %v1123_v24 = vpop.f32.mrb[7].mxu0  ;;  %v1149_v25 = vadd.f32 %v1148_v23, %v1147_v20  ;;  %v1150_v26 = vpop.f32.mrb[6].mxu1 }
 0x112   : > { %v1124_v27 = vadd.f32 %v1123_v24, %v1122_v22  ;;  %v1151_v28 = vpop.f32.mrb[7].mxu1 }
 0x113   : > { %v762_v29 = vadd.f32 %v1149_v25, %v1121_v21  ;;  %v1152_v30 = vadd.f32 %v1151_v28, %v1150_v26 }
 0x115   : > { %v765_v31 = vadd.f32 %v1152_v30, %v1124_v27 }
 0x120   : > { %v1203_v32 = vpop.f32.mrb[8].mxu1 }
 0x121   : > { %v851_v33 = vpop.f32.mrb[9].mxu1 }
 0x122   : > { %v1204_v35 = vpop.f32.mrb[10].mxu1 }
 0x123   : > { %v854_v37 = vpop.f32.mrb[11].mxu1 }
 0x126   : > { %v1169_v34 = vpop.f32.mrb[8].mxu0 }
 0x127   : > { %v1170_v36 = vpop.f32.mrb[9].mxu0 }
 0x128   : > { %v1171_v38 = vadd.f32 %v1170_v36, %v1169_v34  ;;  %v1172_v39 = vpop.f32.mrb[10].mxu0 }
 0x129   : > { %v1173_v40 = vpop.f32.mrb[11].mxu0 }
 0x12a   : > { %v1174_v41 = vadd.f32 %v1173_v40, %v1172_v39  ;;  %v803_v42 = vadd.f32 %v1171_v38, %v754_v15 }
 0x12c   : > { %v852_v43 = vadd.f32 %v851_v33, %v803_v42  ;;  %v806_v44 = vadd.f32 %v1174_v41, %v757_v17 }
 0x12e   : > { %v855_v45 = vadd.f32 %v854_v37, %v806_v44  ;;  %v1175_v46 = vpop.f32.mrb[12].mxu0  ;;  %v867_v47 = vsel %vm866_vm1, %v852_v43, 0.0 }
 0x12f   : > { %v1176_v48 = vpop.f32.mrb[13].mxu0  ;;  %868 = vadd.xlane.f32.xlu0 %v867_v47 }
 0x130   : > { %v1177_v49 = vadd.f32 %v1176_v48, %v1175_v46  ;;  %v1178_v50 = vpop.f32.mrb[14].mxu0  ;;  %v870_v54 = vsel %vm866_vm1, %v855_v45, 0.0 }
 0x131   : > { %v1179_v51 = vpop.f32.mrb[15].mxu0 }
 0x132   : > { %v811_v52 = vadd.f32 %v1177_v49, %v762_v29  ;;  %v1180_v53 = vadd.f32 %v1179_v51, %v1178_v50 }
 0x133   : > { %871 = vadd.xlane.f32.xlu0 %v870_v54 }
 0x134   : > { %v814_v55 = vadd.f32 %v1180_v53, %v765_v31  ;;  %v860_v56 = vadd.f32 %v1203_v32, %v811_v52 }
 0x136   : > { %v873_v57 = vsel %vm866_vm1, %v860_v56, 0.0  ;;  %v863_v58 = vadd.f32 %v1204_v35, %v814_v55 }
 0x137   : > { %874 = vadd.xlane.f32.xlu1 %v873_v57 }
 0x138   : > { %v876_v59 = vsel %vm866_vm1, %v863_v58, 0.0 }
 0x13b   : > { %877 = vadd.xlane.f32.xlu1 %v876_v59 }
 0x1bc   : > { %v869_v60 = vpop.xlane.xlu0 %868 }
 0x1bd   : > { %v880_v61 = vmul.f32 0.125, %v869_v60 }
 0x1bf   : > { %v884_v62 = vsub.f32 %v852_v43, %v880_v61 }
 0x1c0   : > { %v872_v63 = vpop.xlane.xlu0 %871 }
 0x1c1   : > { %v881_v0 = vmul.f32 0.125, %v872_v63  ;;  %v888_v1 = vmul.f32 %v884_v62, %v884_v62 }
 0x1c3   : > { %v885_v2 = vsub.f32 %v855_v45, %v881_v0  ;;  %v892_v3 = vsel %vm866_vm1, %v888_v1, 0.0 }
 0x1c4   : > { %v875_v4 = vpop.xlane.xlu1 %874  ;;  %893 = vadd.xlane.f32.xlu0 %v892_v3 }
 0x1c5   : > { %v882_v5 = vmul.f32 0.125, %v875_v4  ;;  %v889_v6 = vmul.f32 %v885_v2, %v885_v2 }
 0x1c7   : > { %v886_v7 = vsub.f32 %v860_v56, %v882_v5  ;;  %v895_v8 = vsel %vm866_vm1, %v889_v6, 0.0 }
 0x1c8   : > { %v878_v9 = vpop.xlane.xlu1 %877  ;;  %896 = vadd.xlane.f32.xlu1 %v895_v8 }
 0x1c9   : > { %v883_v10 = vmul.f32 0.125, %v878_v9  ;;  %v890_v11 = vmul.f32 %v886_v7, %v886_v7 }
 0x1cb   : > { %v887_v12 = vsub.f32 %v863_v58, %v883_v10  ;;  %v898_v13 = vsel %vm866_vm1, %v890_v11, 0.0 }
 0x1cc   : > { %899 = vadd.xlane.f32.xlu0 %v898_v13 }
 0x1cd   : > { %v891_v14 = vmul.f32 %v887_v12, %v887_v12 }
 0x1cf   : > { %v901_v15 = vsel %vm866_vm1, %v891_v14, 0.0 }
 0x1d0   : > { %902 = vadd.xlane.f32.xlu1 %v901_v15 }
 0x251   : > { %v894_v16 = vpop.xlane.xlu0 %893 }
 0x252   : > { %v904_v17 = vmul.f32 0.125, %v894_v16 }
 0x254   : > { %v908_v18 = vadd.f32 1e-05, %v904_v17 }
 0x255   : > { %v897_v19 = vpop.xlane.xlu1 %896 }
 0x256   : > { %1288 = vrsqrt.f32 %v908_v18  ;;  %v905_v20 = vmul.f32 0.125, %v897_v19 }
 0x258   : > { %v909_v21 = vadd.f32 1e-05, %v905_v20 }
 0x259   : > { %v900_v22 = vpop.xlane.xlu0 %899 }
 0x25a   : > { %1290 = vrsqrt.f32 %v909_v21  ;;  %v906_v23 = vmul.f32 0.125, %v900_v22 }
 0x25c   : > { %v910_v24 = vadd.f32 1e-05, %v906_v23 }
 0x25d   : > { %v903_v25 = vpop.xlane.xlu1 %902 }
 0x25e   : > { %1292 = vrsqrt.f32 %v910_v24  ;;  %v907_v26 = vmul.f32 0.125, %v903_v25 }
 0x260   : > { %v1289_v27 = vpop.eup %1288  ;;  %v911_v28 = vadd.f32 1e-05, %v907_v26 }
 0x261   : > { %v916_v29 = vmul.f32 %v1289_v27, %v884_v62 }
 0x262   : > { %1294 = vrsqrt.f32 %v911_v28 }
 0x263   : > { %vm920_vm2 = vcmp.ge.f32.partialorder %v916_v29, 0.0  ;;  %v924_v30 = vmul.f32 0.01, %v916_v29 }
 0x264   : > { %v1291_v31 = vpop.eup %1290 }
 0x265   : > { %v928_v32 = vsel %vm920_vm2, %v916_v29, %v924_v30  ;;  %v917_v33 = vmul.f32 %v1291_v31, %v885_v2 }
 0x266   : > { %v1093_v34 = vpack.c.bf16 %v928_v32, %v928_v32 }
 0x267   : > { %vm921_vm4 = vcmp.ge.f32.partialorder %v917_v33, 0.0  ;;  %v925_v35 = vmul.f32 0.01, %v917_v33 }
 0x268   : > { %v1293_v36 = vpop.eup %1292  ;;  %949 = vst.msk [vmem:[%s143_s20] sm:$0xf] %vm948_vm3, %v1093_v34 }
 0x269   : > { %v929_v37 = vsel %vm921_vm4, %v917_v33, %v925_v35  ;;  %v918_v38 = vmul.f32 %v1293_v36, %v886_v7 }
 0x26a   : > { %v1094_v39 = vpack.c.bf16 %v929_v37, %v929_v37 }
 0x26b   : > { %vm922_vm5 = vcmp.ge.f32.partialorder %v918_v38, 0.0  ;;  %v926_v40 = vmul.f32 0.01, %v918_v38 }
 0x26c   : > { %v1295_v41 = vpop.eup %1294  ;;  %950 = vst.msk [vmem:[%s143_s20 + $0x4] sm:$0xf] %vm948_vm3, %v1094_v39 }
 0x26d   : > { %v930_v42 = vsel %vm922_vm5, %v918_v38, %v926_v40  ;;  %v919_v43 = vmul.f32 %v1295_v41, %v887_v12 }
 0x26e   : > { %v1095_v44 = vpack.c.bf16 %v930_v42, %v930_v42 }
 0x26f   : > { %vm923_vm6 = vcmp.ge.f32.partialorder %v919_v43, 0.0  ;;  %v927_v45 = vmul.f32 0.01, %v919_v43 }
 0x270   : > { %951 = vst.msk [vmem:[%s143_s20 + $0x8] sm:$0xf] %vm948_vm3, %v1095_v44 }
 0x271   : > { %v931_v46 = vsel %vm923_vm6, %v919_v43, %v927_v45 }
 0x272   : > { %v1096_v47 = vpack.c.bf16 %v931_v46, %v931_v46 }
 0x274   : > { %952 = vst.msk [vmem:[%s143_s20 + $0xc] sm:$0xf] %vm948_vm3, %v1096_v47 }
 0x275 PF: > { %s12_s9 = sadd.s32 1, %s1302_s9  }
 0x276   : > { %p9_p4 = scmp.ge.s32.totalorder %s12_s9, 4  }
 0x278   :  { %11 = sbr.rel (!%p9_p4) target bundleno = 1 (0x1), region = 58 }

// kernel: nnunet3d_forward.31
= control target key start
LH: loop header
LB: loop body
LE: loop exit
PB: predicated region body
PF: predicated region fallthrough
CT: control target
= control target key end

     0   :  { %s1653_s9 = smov 0   ;;  %s1887_s0 = inlined_call_operand.vmem [shape: bf16[64,864], index: 0, kind: input, shape index: {}]   ;;  %s1888_s1 = inlined_call_operand.vmem [shape: bf16[2,864,2], index: 1, kind: input, shape index: {}]   ;;  %s1889_s2 = inlined_call_operand.vmem [shape: bf16[2,64,2], index: 2, kind: output, shape index: {}]  }
   0x1 LB: > { %s1248_s10 = sadd.s32 4294967295, %s1636_s9   ;;  %p1252_p0 = scmp.ge.s32.totalorder %s1636_s9, 1  ;;  %s1636_s9 = sphi %s1653_s9, %s12_s9  }
   0x2   : > { %p112_p1 = scmp.lt.s32.totalorder %s1636_s9, 3 }
   0x4   : > { %p113_p2 = pnand %p1252_p0, %p112_p1 }
   0x5   : > { %p134_p3 = scmp.lt.s32.totalorder (!%p113_p2), %s1248_s10, 1  ;;  %v1554_v0 = vld [vmem:[%s1887_s0 + $0x4] ss:$28 sps:$4 sm:$0xff] (!%p113_p2)   ;;  %v1557_v1 = vld [vmem:[%s1887_s0 + $0xc] ss:$28 sps:$4 sm:$0xff] (!%p113_p2)   ;;  %vm749_vm0 = vcmask (!%p113_p2), 785408  }
   0x6   : > { %116 = sbr.rel (%p113_p2) target bundleno = 643 (0x283), region = 28  ;;  %794 = vmatprep.mubr.bf16.mxu0 (!%p113_p2), %v1554_v0  ;;  %859 = vmatprep.mubr.bf16.mxu1 (!%p113_p2), %v1557_v1  ;;  %v1552_v32 = vld [vmem:[%s1887_s0] ss:$28 sps:$4 sm:$0xff] (!%p113_p2)   ;;  %v1555_v34 = vld [vmem:[%s1887_s0 + $0x8] ss:$28 sps:$4 sm:$0xff] (!%p113_p2)   ;;  %vm1022_vm1 = vcmask (!%p113_p2), 15360  }
   0x7   : > { %v1562_v36 = vld [vmem:[%s1887_s0 + $0x3c] ss:$28 sps:$4 sm:$0xff] (!%p113_p2)   ;;  %v1564_v38 = vld [vmem:[%s1887_s0 + $0x44] ss:$28 sps:$4 sm:$0xff] (!%p113_p2)   ;;  %v1573_v48 = vld [vmem:[%s1887_s0 + $0x74] ss:$28 sps:$4 sm:$0xff] (!%p113_p2)  }
   0x8   : > { %v1566_v42 = vld [vmem:[%s1887_s0 + $0x38] ss:$28 sps:$4 sm:$0xff] (!%p113_p2)   ;;  %v1567_v44 = vld [vmem:[%s1887_s0 + $0x40] ss:$28 sps:$4 sm:$0xff] (!%p113_p2)   ;;  %v1577_v52 = vld [vmem:[%s1887_s0 + $0x70] ss:$28 sps:$4 sm:$0xff] (!%p113_p2)  }
   0x9   : > { %v1575_v49 = vld [vmem:[%s1887_s0 + $0x7c] ss:$28 sps:$4 sm:$0xff] (!%p113_p2)   ;;  %v1585_v58 = vld [vmem:[%s1887_s0 + $0xac] ss:$28 sps:$4 sm:$0xff] (!%p113_p2)   ;;  %v1587_v59 = vld [vmem:[%s1887_s0 + $0xb4] ss:$28 sps:$4 sm:$0xff] (!%p113_p2)  }
   0xa   : > { %v1578_v54 = vld [vmem:[%s1887_s0 + $0x78] ss:$28 sps:$4 sm:$0xff] (!%p113_p2)   ;;  %v1589_v62 = vld [vmem:[%s1887_s0 + $0xa8] ss:$28 sps:$4 sm:$0xff] (!%p113_p2)   ;;  %v1590_v0 = vld [vmem:[%s1887_s0 + $0xb0] ss:$28 sps:$4 sm:$0xff] (!%p113_p2)  }
   0xb   : > { %vm1184_vm3 = vcmask (!%p113_p2), 11264  }
   0xd   : > { %s1891_s10 = smov (!%p134_p3, %s1248_s10), 1 }
   0xe   : > { %s1511_s15 = smul.u32 432, %s1891_s10  ;;  %s1352_s20 = sshll.u32 %s1891_s10, 5 }
   0xf   : > { %s1859_s23 = scalar_lea.vmem %s1889_s2, %s1352_s20 }
  0x10   : > { %s1673_s18 = scalar_lea.vmem %s1888_s1, %s1511_s15 }
  0x11   : > { %v1520_v2 = vld [vmem:[%s1673_s18 + $0x40] sm:$0xff]   ;;  %v1524_v6 = vld [vmem:[%s1673_s18 + $0x48] sm:$0xff]   ;;  %v1528_v10 = vld [vmem:[%s1673_s18 + $0x50] sm:$0xff]  }
  0x12   : > { %v1521_v3 = vld [vmem:[%s1673_s18 + $0xc0] sm:$0xff]   ;;  %1361 = vmatprep.subr.bf16.mxu0 %v1520_v2  ;;  %v1525_v7 = vld [vmem:[%s1673_s18 + $0xc8] sm:$0xff]   ;;  %v1529_v11 = vld [vmem:[%s1673_s18 + $0xd0] sm:$0xff]  }
  0x13   : > { %v1522_v4 = vld [vmem:[%s1673_s18] sm:$0xff]   ;;  %1401 = vmatprep.subr.bf16.mxu1 %v1521_v3  ;;  %v1526_v8 = vld [vmem:[%s1673_s18 + $0x8] sm:$0xff]   ;;  %v1530_v12 = vld [vmem:[%s1673_s18 + $0x10] sm:$0xff]  }
  0x14   : > { %v1523_v5 = vld [vmem:[%s1673_s18 + $0x80] sm:$0xff]   ;;  %1362 = vmatpush3.bf16.msra.mxu0 %v1522_v4  ;;  %v1527_v9 = vld [vmem:[%s1673_s18 + $0x88] sm:$0xff]   ;;  %v1531_v13 = vld [vmem:[%s1673_s18 + $0x90] sm:$0xff]  }
  0x15   : > { %1402 = vmatpush3.bf16.msra.mxu1 %v1523_v5  ;;  %1363 = vmatprep.subr.bf16.mxu0 %v1524_v6  ;;  %v1532_v14 = vld [vmem:[%s1673_s18 + $0x58] sm:$0xff]   ;;  %v1536_v18 = vld [vmem:[%s1673_s18 + $0x60] sm:$0xff]   ;;  %v1540_v22 = vld [vmem:[%s1673_s18 + $0x68] sm:$0xff]  }
  0x16   : > { %1403 = vmatprep.subr.bf16.mxu1 %v1525_v7  ;;  %v1533_v15 = vld [vmem:[%s1673_s18 + $0xd8] sm:$0xff]   ;;  %v1537_v19 = vld [vmem:[%s1673_s18 + $0xe0] sm:$0xff]   ;;  %v1541_v23 = vld [vmem:[%s1673_s18 + $0xe8] sm:$0xff]  }
  0x17   : > { %v1534_v16 = vld [vmem:[%s1673_s18 + $0x18] sm:$0xff]   ;;  %v1538_v20 = vld [vmem:[%s1673_s18 + $0x20] sm:$0xff]   ;;  %v1542_v24 = vld [vmem:[%s1673_s18 + $0x28] sm:$0xff]  }
  0x18   : > { %1364 = vmatpush3.bf16.msra.mxu0 %v1526_v8  ;;  %v1535_v17 = vld [vmem:[%s1673_s18 + $0x98] sm:$0xff]   ;;  %v1539_v21 = vld [vmem:[%s1673_s18 + $0xa0] sm:$0xff]   ;;  %v1543_v25 = vld [vmem:[%s1673_s18 + $0xa8] sm:$0xff]  }
  0x19   : > { %1404 = vmatpush3.bf16.msra.mxu1 %v1527_v9  ;;  %1365 = vmatprep.subr.bf16.mxu0 %v1528_v10  ;;  %v1544_v26 = vld [vmem:[%s1673_s18 + $0x70] sm:$0xff]   ;;  %v1548_v30 = vld [vmem:[%s1673_s18 + $0x78] sm:$0xff]   ;;  %v1558_v37 = vld [vmem:[%s1673_s18 + $0x140] sm:$0xff]  }
  0x1a   : > { %1405 = vmatprep.subr.bf16.mxu1 %v1529_v11  ;;  %v1545_v27 = vld [vmem:[%s1673_s18 + $0xf0] sm:$0xff]   ;;  %v1549_v31 = vld [vmem:[%s1673_s18 + $0xf8] sm:$0xff]   ;;  %v1559_v39 = vld [vmem:[%s1673_s18 + $0x100] sm:$0xff]  }
  0x1b   : > { %v1546_v28 = vld [vmem:[%s1673_s18 + $0x30] sm:$0xff]   ;;  %v1550_v33 = vld [vmem:[%s1673_s18 + $0x38] sm:$0xff]   ;;  %v1560_v40 = vld [vmem:[%s1673_s18 + $0x148] sm:$0xff]  }
  0x1c   : > { %1366 = vmatpush3.bf16.msra.mxu0 %v1530_v12  ;;  %v1547_v29 = vld [vmem:[%s1673_s18 + $0xb0] sm:$0xff]   ;;  %v1551_v35 = vld [vmem:[%s1673_s18 + $0xb8] sm:$0xff]   ;;  %v1561_v41 = vld [vmem:[%s1673_s18 + $0x108] sm:$0xff]  }
  0x1d   : > { %1406 = vmatpush3.bf16.msra.mxu1 %v1531_v13  ;;  %1367 = vmatprep.subr.bf16.mxu0 %v1532_v14  ;;  %v1568_v43 = vld [vmem:[%s1673_s18 + $0x150] sm:$0xff]   ;;  %v1571_v45 = vld [vmem:[%s1673_s18 + $0x180] sm:$0xff]   ;;  %v1570_v47 = vld [vmem:[%s1673_s18 + $0x158] sm:$0xff]  }
  0x1e   : > { %1407 = vmatprep.subr.bf16.mxu1 %v1533_v15  ;;  %v1569_v46 = vld [vmem:[%s1673_s18 + $0x110] sm:$0xff]   ;;  %v1580_v50 = vld [vmem:[%s1673_s18 + $0x188] sm:$0xff]   ;;  %v1572_v51 = vld [vmem:[%s1673_s18 + $0x118] sm:$0xff]  }
  0x1f   : > { %v1579_v53 = vld [vmem:[%s1673_s18 + $0x160] sm:$0xff]   ;;  %v1583_v55 = vld [vmem:[%s1673_s18 + $0x190] sm:$0xff]   ;;  %v1582_v57 = vld [vmem:[%s1673_s18 + $0x168] sm:$0xff]  }
  0x20   : > { %1368 = vmatpush3.bf16.msra.mxu0 %v1534_v16  ;;  %v1581_v56 = vld [vmem:[%s1673_s18 + $0x120] sm:$0xff]   ;;  %v1584_v60 = vld [vmem:[%s1673_s18 + $0x128] sm:$0xff]   ;;  %v1592_v61 = vld [vmem:[%s1673_s18 + $0x198] sm:$0xff]  }
  0x21   : > { %1408 = vmatpush3.bf16.msra.mxu1 %v1535_v17  ;;  %1369 = vmatprep.subr.bf16.mxu0 %v1536_v18  ;;  %v1591_v63 = vld [vmem:[%s1673_s18 + $0x170] sm:$0xff]   ;;  %v1595_v1 = vld [vmem:[%s1673_s18 + $0x1a0] sm:$0xff]   ;;  %v1594_v3 = vld [vmem:[%s1673_s18 + $0x178] sm:$0xff]  }
  0x22   : > { %1409 = vmatprep.subr.bf16.mxu1 %v1537_v19  ;;  %v1593_v2 = vld [vmem:[%s1673_s18 + $0x130] sm:$0xff]   ;;  %v1600_v5 = vld [vmem:[%s1673_s18 + $0x1a8] sm:$0xff]   ;;  %v1596_v7 = vld [vmem:[%s1673_s18 + $0x138] sm:$0xff]  }
  0x23   : > { %v1599_v4 = vld [vmem:[%s1887_s0 + $0x14] ss:$28 sps:$4 sm:$0xff]   ;;  %v1603_v10 = vld [vmem:[%s1887_s0 + $0x4c] ss:$28 sps:$4 sm:$0xff]   ;;  %v1606_v13 = vld [vmem:[%s1887_s0 + $0x84] ss:$28 sps:$4 sm:$0xff]  }
  0x24   : > { %1370 = vmatpush3.bf16.msra.mxu0 %v1538_v20  ;;  %v1601_v6 = vld [vmem:[%s1887_s0 + $0x18] ss:$28 sps:$4 sm:$0xff]   ;;  %v1597_v8 = vld [vmem:[%s1887_s0 + $0x10] ss:$28 sps:$4 sm:$0xff]   ;;  %v1609_v11 = vld [vmem:[%s1887_s0 + $0x88] ss:$28 sps:$4 sm:$0xff]  }
  0x25   : > { %1410 = vmatpush3.bf16.msra.mxu1 %v1539_v21  ;;  %1371 = vmatprep.subr.bf16.mxu0 %v1540_v22  ;;  %v1602_v9 = vld [vmem:[%s1887_s0 + $0x50] ss:$28 sps:$4 sm:$0xff]   ;;  %v1605_v12 = vld [vmem:[%s1887_s0 + $0x48] ss:$28 sps:$4 sm:$0xff]   ;;  %v1610_v14 = vld [vmem:[%s1887_s0 + $0xc0] ss:$28 sps:$4 sm:$0xff]  }
  0x26   : > { %1411 = vmatprep.subr.bf16.mxu1 %v1541_v23  ;;  %v1608_v15 = vld [vmem:[%s1887_s0 + $0x80] ss:$28 sps:$4 sm:$0xff]   ;;  %v1613_v17 = vld [vmem:[%s1887_s0 + $0xb8] ss:$28 sps:$4 sm:$0xff]  }
  0x27   : > { %v1611_v16 = vld [vmem:[%s1887_s0 + $0xbc] ss:$28 sps:$4 sm:$0xff]  }
  0x28   : > { %1372 = vmatpush3.bf16.msra.mxu0 %v1542_v24 }
  0x29   : > { %1412 = vmatpush3.bf16.msra.mxu1 %v1543_v25  ;;  %1373 = vmatprep.subr.bf16.mxu0 %v1544_v26 }
  0x2a   : > { %1413 = vmatprep.subr.bf16.mxu1 %v1545_v27 }
  0x2c   : > { %1374 = vmatpush3.bf16.msra.mxu0 %v1546_v28 }
  0x2d   : > { %1414 = vmatpush3.bf16.msra.mxu1 %v1547_v29  ;;  %1375 = vmatprep.subr.bf16.mxu0 %v1548_v30 }
  0x2e   : > { %1415 = vmatprep.subr.bf16.mxu1 %v1549_v31 }
  0x30   : > { %1376 = vmatpush3.bf16.msra.mxu0 %v1550_v33 }
  0x31   : > { %1416 = vmatpush3.bf16.msra.mxu1 %v1551_v35  ;;  %1441 = vmatprep.subr.bf16.mxu0 %v1558_v37 }
  0x32   : > { %1491 = vmatprep.subr.bf16.mxu1 %v1571_v45 }
  0x33   : > { %795 = vmatmul.mubr.bf16.vlgmr.msra.gmra.mrb[0].mxu0 %v1552_v32 }
  0x34   : > { %860 = vmatmul.mubr.bf16.vlgmr.msra.gmra.mrb[0].mxu1 %v1555_v34  ;;  %1442 = vmatpush3.bf16.msra.mxu0 %v1559_v39 }
  0x35   : > { %1443 = vmatprep.subr.bf16.mxu0 %v1560_v40  ;;  %802 = vmatprep.mubr.bf16.mxu0 %v1562_v36 }
  0x36   : > { %867 = vmatprep.mubr.bf16.mxu1 %v1564_v38  ;;  %1492 = vmatpush3.bf16.msra.mxu1 %v1571_v45 }
  0x37   : > { %1493 = vmatprep.subr.bf16.mxu1 %v1580_v50 }
  0x38   : > { %1444 = vmatpush3.bf16.msra.mxu0 %v1561_v41 }
  0x39   : > { %1445 = vmatprep.subr.bf16.mxu0 %v1568_v43 }
  0x3a   : > { %1494 = vmatpush3.bf16.msra.mxu1 %v1580_v50 }
  0x3b   : > { %803 = vmatmul.mubr.bf16.gmra.mrb[4].mxu0 %v1566_v42  ;;  %1495 = vmatprep.subr.bf16.mxu1 %v1583_v55 }
  0x3c   : > { %868 = vmatmul.mubr.bf16.gmra.mrb[4].mxu1 %v1567_v44  ;;  %1446 = vmatpush3.bf16.msra.mxu0 %v1569_v46 }
  0x3d   : > { %1447 = vmatprep.subr.bf16.mxu0 %v1570_v47  ;;  %810 = vmatprep.mubr.bf16.mxu0 %v1573_v48 }
  0x3e   : > { %875 = vmatprep.mubr.bf16.mxu1 %v1575_v49  ;;  %1496 = vmatpush3.bf16.msra.mxu1 %v1583_v55 }
  0x3f   : > { %1497 = vmatprep.subr.bf16.mxu1 %v1592_v61 }
  0x40   : > { %1448 = vmatpush3.bf16.msra.mxu0 %v1572_v51 }
  0x41   : > { %1449 = vmatprep.subr.bf16.mxu0 %v1579_v53 }
  0x42   : > { %1498 = vmatpush3.bf16.msra.mxu1 %v1592_v61 }
  0x43   : > { %811 = vmatmul.mubr.bf16.gmra.mrb[8].mxu0 %v1577_v52  ;;  %1499 = vmatprep.subr.bf16.mxu1 %v1595_v1 }
  0x44   : > { %876 = vmatmul.mubr.bf16.gmra.mrb[8].mxu1 %v1578_v54  ;;  %1450 = vmatpush3.bf16.msra.mxu0 %v1581_v56 }
  0x45   : > { %1451 = vmatprep.subr.bf16.mxu0 %v1582_v57  ;;  %818 = vmatprep.mubr.bf16.mxu0 %v1585_v58 }
  0x46   : > { %883 = vmatprep.mubr.bf16.mxu1 %v1587_v59  ;;  %1500 = vmatpush3.bf16.msra.mxu1 %v1595_v1 }
  0x47   : > { %1501 = vmatprep.subr.bf16.mxu1 %v1600_v5 }
  0x48   : > { %1452 = vmatpush3.bf16.msra.mxu0 %v1584_v60 }
  0x49   : > { %1453 = vmatprep.subr.bf16.mxu0 %v1591_v63 }
  0x4a   : > { %1502 = vmatpush3.bf16.msra.mxu1 %v1600_v5 }
  0x4b   : > { %819 = vmatmul.mubr.bf16.gmra.mrb[12].mxu0 %v1589_v62 }
  0x4c   : > { %884 = vmatmul.mubr.bf16.gmra.mrb[12].mxu1 %v1590_v0  ;;  %1454 = vmatpush3.bf16.msra.mxu0 %v1593_v2 }
  0x4d   : > { %1455 = vmatprep.subr.bf16.mxu0 %v1594_v3  ;;  %924 = vmatprep.mubr.bf16.mxu0 %v1599_v4 }
  0x4e   : > { %1503 = vmatprep.mubr.msk.bf16.mxu1 %vm749_vm0, %v1601_v6 }
  0x50   : > { %1456 = vmatpush3.bf16.msra.mxu0 %v1596_v7 }
  0x53   : > { %925 = vmatmul.mubr.bf16.vlgmr.msra.gmra.mrb[16].mxu0 %v1597_v8 }
  0x54   : > { %1504 = vmatmul.mubr.msk.bf16.vlgmr.msra.gmra.mrb[16].mxu1 %vm749_vm0, %v1602_v9  ;;  %932 = vmatprep.mubr.bf16.mxu0 %v1603_v10 }
  0x55   : > { %1507 = vmatprep.mubr.msk.bf16.mxu1 %vm749_vm0, %v1609_v11 }
  0x5b   : > { %933 = vmatmul.mubr.bf16.gmra.mrb[20].mxu0 %v1605_v12 }
  0x5c   : > { %940 = vmatprep.mubr.bf16.mxu0 %v1606_v13  ;;  %1508 = vmatmul.mubr.msk.bf16.gmra.mrb[20].mxu1 %vm749_vm0, %v1610_v14 }
  0x63   : > { %941 = vmatmul.mubr.bf16.gmra.mrb[24].mxu0 %v1608_v15 }
  0x64   : > { %948 = vmatprep.mubr.bf16.mxu0 %v1611_v16 }
  0x6b   : > { %949 = vmatmul.mubr.bf16.gmra.mrb[28].mxu0 %v1613_v17 }
 0x106   : > { %v1377_v18 = vpop.f32.mrb[0].mxu0 }
 0x107   : > { %v1417_v19 = vpop.f32.mrb[0].mxu1  ;;  %v1378_v20 = vpop.f32.mrb[1].mxu0 }
 0x108   : > { %v1379_v21 = vadd.f32 %v1378_v20, %v1377_v18  ;;  %v1418_v22 = vpop.f32.mrb[1].mxu1  ;;  %v1380_v23 = vpop.f32.mrb[2].mxu0 }
 0x109   : > { %v1419_v24 = vadd.f32 %v1418_v22, %v1417_v19  ;;  %v1420_v25 = vpop.f32.mrb[2].mxu1  ;;  %v1381_v26 = vpop.f32.mrb[3].mxu0 }
 0x10a   : > { %v1382_v27 = vadd.f32 %v1381_v26, %v1380_v23  ;;  %v1421_v28 = vpop.f32.mrb[3].mxu1 }
 0x10b   : > { %v862_v29 = vadd.f32 %v1419_v24, %v1379_v21  ;;  %v1422_v30 = vadd.f32 %v1421_v28, %v1420_v25 }
 0x10d   : > { %v865_v31 = vadd.f32 %v1422_v30, %v1382_v27 }
 0x10e   : > { %v1383_v32 = vpop.f32.mrb[4].mxu0 }
 0x10f   : > { %v1423_v33 = vpop.f32.mrb[4].mxu1  ;;  %v1384_v34 = vpop.f32.mrb[5].mxu0 }
 0x110   : > { %v1385_v35 = vadd.f32 %v1384_v34, %v1383_v32  ;;  %v1424_v36 = vpop.f32.mrb[5].mxu1  ;;  %v1386_v37 = vpop.f32.mrb[6].mxu0 }
 0x111   : > { %v1425_v38 = vadd.f32 %v1424_v36, %v1423_v33  ;;  %v1426_v39 = vpop.f32.mrb[6].mxu1  ;;  %v1387_v40 = vpop.f32.mrb[7].mxu0 }
 0x112   : > { %v1388_v41 = vadd.f32 %v1387_v40, %v1386_v37  ;;  %v1427_v42 = vpop.f32.mrb[7].mxu1 }
 0x113   : > { %v870_v43 = vadd.f32 %v1425_v38, %v1385_v35  ;;  %v1428_v44 = vadd.f32 %v1427_v42, %v1426_v39 }
 0x115   : > { %v873_v45 = vadd.f32 %v1428_v44, %v1388_v41 }
 0x116   : > { %v1389_v46 = vpop.f32.mrb[8].mxu0 }
 0x117   : > { %v1429_v47 = vpop.f32.mrb[8].mxu1  ;;  %v1390_v48 = vpop.f32.mrb[9].mxu0 }
 0x118   : > { %v1391_v49 = vadd.f32 %v1390_v48, %v1389_v46  ;;  %v1430_v50 = vpop.f32.mrb[9].mxu1  ;;  %v1392_v51 = vpop.f32.mrb[10].mxu0 }
 0x119   : > { %v1431_v52 = vadd.f32 %v1430_v50, %v1429_v47  ;;  %v1432_v53 = vpop.f32.mrb[10].mxu1  ;;  %v1393_v54 = vpop.f32.mrb[11].mxu0 }
 0x11a   : > { %v1394_v55 = vadd.f32 %v1393_v54, %v1392_v51  ;;  %v1433_v56 = vpop.f32.mrb[11].mxu1 }
 0x11b   : > { %v878_v57 = vadd.f32 %v1431_v52, %v1391_v49  ;;  %v1434_v58 = vadd.f32 %v1433_v56, %v1432_v53 }
 0x11d   : > { %v881_v59 = vadd.f32 %v1434_v58, %v1394_v55 }
 0x11e   : > { %v1395_v60 = vpop.f32.mrb[12].mxu0 }
 0x11f   : > { %v1435_v61 = vpop.f32.mrb[12].mxu1  ;;  %v1396_v62 = vpop.f32.mrb[13].mxu0 }
 0x120   : > { %v1397_v63 = vadd.f32 %v1396_v62, %v1395_v60  ;;  %v1436_v0 = vpop.f32.mrb[13].mxu1  ;;  %v1398_v1 = vpop.f32.mrb[14].mxu0 }
 0x121   : > { %v1437_v2 = vadd.f32 %v1436_v0, %v1435_v61  ;;  %v1438_v3 = vpop.f32.mrb[14].mxu1  ;;  %v1399_v4 = vpop.f32.mrb[15].mxu0 }
 0x122   : > { %v1400_v5 = vadd.f32 %v1399_v4, %v1398_v1  ;;  %v1439_v6 = vpop.f32.mrb[15].mxu1 }
 0x123   : > { %v886_v7 = vadd.f32 %v1437_v2, %v1397_v63  ;;  %v1440_v8 = vadd.f32 %v1439_v6, %v1438_v3 }
 0x125   : > { %v889_v9 = vadd.f32 %v1440_v8, %v1400_v5 }
 0x126   : > { %v1457_v10 = vpop.f32.mrb[16].mxu0 }
 0x127   : > { %v1458_v11 = vpop.f32.mrb[17].mxu0  ;;  %v1505_v12 = vpop.f32.mrb[16].mxu1 }
 0x128   : > { %v1459_v13 = vadd.f32 %v1458_v11, %v1457_v10  ;;  %v1460_v14 = vpop.f32.mrb[18].mxu0  ;;  %v991_v15 = vpop.f32.mrb[17].mxu1 }
 0x129   : > { %v1461_v16 = vpop.f32.mrb[19].mxu0  ;;  %v1506_v17 = vpop.f32.mrb[18].mxu1 }
 0x12a   : > { %v1462_v18 = vadd.f32 %v1461_v16, %v1460_v14  ;;  %v927_v19 = vadd.f32 %v1459_v13, %v862_v29  ;;  %v994_v20 = vpop.f32.mrb[19].mxu1 }
 0x12c   : > { %v992_v21 = vadd.f32 %v991_v15, %v927_v19  ;;  %v930_v22 = vadd.f32 %v1462_v18, %v865_v31 }
 0x12e   : > { %v995_v23 = vadd.f32 %v994_v20, %v930_v22  ;;  %v1463_v24 = vpop.f32.mrb[20].mxu0  ;;  %v1023_v25 = vsel %vm1022_vm1, %v992_v21, 0.0 }
 0x12f   : > { %v1464_v26 = vpop.f32.mrb[21].mxu0  ;;  %1024 = vadd.xlane.f32.xlu0 %v1023_v25  ;;  %v1509_v27 = vpop.f32.mrb[20].mxu1 }
 0x130   : > { %v1465_v28 = vadd.f32 %v1464_v26, %v1463_v24  ;;  %v1466_v30 = vpop.f32.mrb[22].mxu0  ;;  %v1007_v32 = vpop.f32.mrb[21].mxu1  ;;  %v1026_v29 = vsel %vm1022_vm1, %v995_v23, 0.0 }
 0x131   : > { %v1467_v33 = vpop.f32.mrb[23].mxu0  ;;  %v1510_v34 = vpop.f32.mrb[22].mxu1 }
 0x132   : > { %v935_v35 = vadd.f32 %v1465_v28, %v870_v43  ;;  %v1468_v36 = vadd.f32 %v1467_v33, %v1466_v30  ;;  %v1010_v37 = vpop.f32.mrb[23].mxu1 }
 0x133   : > { %1027 = vadd.xlane.f32.xlu0 %v1026_v29 }
 0x134   : > { %v938_v38 = vadd.f32 %v1468_v36, %v873_v45  ;;  %v1000_v31 = vadd.f32 %v1505_v12, %v935_v35 }
 0x136   : > { %v1469_v39 = vpop.f32.mrb[24].mxu0  ;;  %v1029_v40 = vsel %vm1022_vm1, %v1000_v31, 0.0  ;;  %v1003_v41 = vadd.f32 %v1506_v17, %v938_v38 }
 0x137   : > { %v1470_v42 = vpop.f32.mrb[25].mxu0  ;;  %1030 = vadd.xlane.f32.xlu1 %v1029_v40 }
 0x138   : > { %v1471_v44 = vadd.f32 %v1470_v42, %v1469_v39  ;;  %v1472_v46 = vpop.f32.mrb[26].mxu0  ;;  %v1032_v43 = vsel %vm1022_vm1, %v1003_v41, 0.0 }
 0x139   : > { %v1473_v47 = vpop.f32.mrb[27].mxu0 }
 0x13a   : > { %v1474_v48 = vadd.f32 %v1473_v47, %v1472_v46  ;;  %v943_v49 = vadd.f32 %v1471_v44, %v878_v57 }
 0x13b   : > { %1033 = vadd.xlane.f32.xlu1 %v1032_v43 }
 0x13c   : > { %v1008_v50 = vadd.f32 %v1007_v32, %v943_v49  ;;  %v946_v51 = vadd.f32 %v1474_v48, %v881_v59 }
 0x13e   : > { %v1011_v52 = vadd.f32 %v1010_v37, %v946_v51  ;;  %v1475_v53 = vpop.f32.mrb[28].mxu0  ;;  %v1035_v45 = vsel %vm1022_vm1, %v1008_v50, 0.0 }
 0x13f   : > { %v1476_v54 = vpop.f32.mrb[29].mxu0  ;;  %1036 = vadd.xlane.f32.xlu0 %v1035_v45 }
 0x140   : > { %v1477_v55 = vadd.f32 %v1476_v54, %v1475_v53  ;;  %v1478_v56 = vpop.f32.mrb[30].mxu0  ;;  %v1038_v58 = vsel %vm1022_vm1, %v1011_v52, 0.0 }
 0x141   : > { %v1479_v60 = vpop.f32.mrb[31].mxu0  ;;  %1039 = vadd.xlane.f32.xlu1 %v1038_v58 }
 0x142   : > { %v951_v61 = vadd.f32 %v1477_v55, %v886_v7  ;;  %v1480_v62 = vadd.f32 %v1479_v60, %v1478_v56 }
 0x144   : > { %v954_v57 = vadd.f32 %v1480_v62, %v889_v9  ;;  %v1016_v63 = vadd.f32 %v1509_v27, %v951_v61 }
 0x146   : > { %v1041_v0 = vsel %vm1022_vm1, %v1016_v63, 0.0  ;;  %v1019_v1 = vadd.f32 %v1510_v34, %v954_v57 }
 0x147   : > { %1042 = vadd.xlane.f32.xlu0 %v1041_v0 }
 0x148   : > { %v1044_v59 = vsel %vm1022_vm1, %v1019_v1, 0.0 }
 0x149   : > { %1045 = vadd.xlane.f32.xlu1 %v1044_v59 }
 0x1bc   : > { %v1025_v2 = vpop.xlane.xlu0 %1024 }
 0x1bd   : > { %v1048_v3 = vmul.f32 0.5, %v1025_v2 }
 0x1bf   : > { %v1056_v4 = vsub.f32 %v992_v21, %v1048_v3 }
 0x1c0   : > { %v1028_v5 = vpop.xlane.xlu0 %1027 }
 0x1c1   : > { %v1049_v6 = vmul.f32 0.5, %v1028_v5  ;;  %v1064_v8 = vmul.f32 %v1056_v4, %v1056_v4 }
 0x1c3   : > { %v1819_v10 = vsub.f32 %v995_v23, %v1049_v6  ;;  %v1072_v7 = vsel %vm1022_vm1, %v1064_v8, 0.0 }
 0x1c4   : > { %v1031_v11 = vpop.xlane.xlu1 %1030  ;;  %1073 = vadd.xlane.f32.xlu0 %v1072_v7 }
 0x1c5   : > { %v1050_v9 = vmul.f32 0.5, %v1031_v11  ;;  %v1065_v12 = vmul.f32 %v1819_v10, %v1819_v10 }
 0x1c7   : > { %v1824_v13 = vsub.f32 %v1000_v31, %v1050_v9  ;;  %v1075_v14 = vsel %vm1022_vm1, %v1065_v12, 0.0 }
 0x1c8   : > { %v1034_v15 = vpop.xlane.xlu1 %1033  ;;  %1076 = vadd.xlane.f32.xlu1 %v1075_v14 }
 0x1c9   : > { %v1051_v16 = vmul.f32 0.5, %v1034_v15  ;;  %v1066_v17 = vmul.f32 %v1824_v13, %v1824_v13 }
 0x1cb   : > { %v1829_v18 = vsub.f32 %v1003_v41, %v1051_v16  ;;  %v1078_v19 = vsel %vm1022_vm1, %v1066_v17, 0.0 }
 0x1cc   : > { %1079 = vadd.xlane.f32.xlu0 %v1078_v19  ;;  %v1037_v20 = vpop.xlane.xlu0 %1036 }
 0x1cd   : > { %v1052_v21 = vmul.f32 0.5, %v1037_v20  ;;  %v1067_v22 = vmul.f32 %v1829_v18, %v1829_v18 }
 0x1ce   : > { %v1040_v23 = vpop.xlane.xlu1 %1039 }
 0x1cf   : > { %v1834_v24 = vsub.f32 %v1008_v50, %v1052_v21  ;;  %v1053_v25 = vmul.f32 0.5, %v1040_v23  ;;  %v1081_v26 = vsel %vm1022_vm1, %v1067_v22, 0.0 }
 0x1d0   : > { %1082 = vadd.xlane.f32.xlu1 %v1081_v26 }
 0x1d1   : > { %v1837_v27 = vsub.f32 %v1011_v52, %v1053_v25  ;;  %v1068_v28 = vmul.f32 %v1834_v24, %v1834_v24 }
 0x1d3   : > { %v1084_v30 = vsel %vm1022_vm1, %v1068_v28, 0.0  ;;  %v1069_v32 = vmul.f32 %v1837_v27, %v1837_v27 }
 0x1d4   : > { %1085 = vadd.xlane.f32.xlu0 %v1084_v30  ;;  %v1043_v33 = vpop.xlane.xlu0 %1042 }
 0x1d5   : > { %v1054_v34 = vmul.f32 0.5, %v1043_v33  ;;  %v1087_v35 = vsel %vm1022_vm1, %v1069_v32, 0.0 }
 0x1d6   : > { %v1046_v36 = vpop.xlane.xlu1 %1045  ;;  %1088 = vadd.xlane.f32.xlu1 %v1087_v35 }
 0x1d7   : > { %v1845_v29 = vsub.f32 %v1016_v63, %v1054_v34  ;;  %v1055_v37 = vmul.f32 0.5, %v1046_v36 }
 0x1d9   : > { %v1847_v38 = vsub.f32 %v1019_v1, %v1055_v37  ;;  %v1070_v31 = vmul.f32 %v1845_v29, %v1845_v29 }
 0x1db   : > { %v1090_v39 = vsel %vm1022_vm1, %v1070_v31, 0.0  ;;  %v1071_v40 = vmul.f32 %v1847_v38, %v1847_v38 }
 0x1dc   : > { %1091 = vadd.xlane.f32.xlu0 %v1090_v39 }
 0x1dd   : > { %v1093_v41 = vsel %vm1022_vm1, %v1071_v40, 0.0 }
 0x1de   : > { %1094 = vadd.xlane.f32.xlu1 %v1093_v41 }
 0x251   : > { %v1074_v42 = vpop.xlane.xlu0 %1073 }
 0x252   : > { %v1096_v44 = vmul.f32 0.5, %v1074_v42 }
 0x254   : > { %v1104_v46 = vadd.f32 1e-05, %v1096_v44 }
 0x255   : > { %v1077_v47 = vpop.xlane.xlu1 %1076 }
 0x256   : > { %1614 = vrsqrt.f32 %v1104_v46  ;;  %v1097_v48 = vmul.f32 0.5, %v1077_v47 }
 0x258   : > { %v1105_v49 = vadd.f32 1e-05, %v1097_v48 }
 0x259   : > { %v1080_v43 = vpop.xlane.xlu0 %1079 }
 0x25a   : > { %1616 = vrsqrt.f32 %v1105_v49  ;;  %v1098_v50 = vmul.f32 0.5, %v1080_v43 }
 0x25c   : > { %v1106_v51 = vadd.f32 1e-05, %v1098_v50 }
 0x25d   : > { %v1083_v52 = vpop.xlane.xlu1 %1082 }
 0x25e   : > { %1618 = vrsqrt.f32 %v1106_v51  ;;  %v1099_v53 = vmul.f32 0.5, %v1083_v52 }
 0x260   : > { %v1615_v45 = vpop.eup %1614  ;;  %v1107_v54 = vadd.f32 1e-05, %v1099_v53 }
 0x261   : > { %v1120_v55 = vmul.f32 %v1615_v45, %v1056_v4  ;;  %v1086_v56 = vpop.xlane.xlu0 %1085 }
 0x262   : > { %1620 = vrsqrt.f32 %v1107_v54  ;;  %v1100_v58 = vmul.f32 0.5, %v1086_v56 }
 0x263   : > { %vm1128_vm2 = vcmp.ge.f32.partialorder %v1120_v55, 0.0  ;;  %v1136_v60 = vmul.f32 0.01, %v1120_v55  ;;  %v1089_v61 = vpop.xlane.xlu1 %1088 }
 0x264   : > { %v1617_v62 = vpop.eup %1616  ;;  %v1108_v57 = vadd.f32 1e-05, %v1100_v58  ;;  %v1101_v63 = vmul.f32 0.5, %v1089_v61 }
 0x265   : > { %v1144_v0 = vsel %vm1128_vm2, %v1120_v55, %v1136_v60  ;;  %v1121_v1 = vmul.f32 %v1617_v62, %v1819_v10 }
 0x266   : > { %v1353_v59 = vpack.c.bf16 %v1144_v0, %v1144_v0  ;;  %1622 = vrsqrt.f32 %v1108_v57  ;;  %v1109_v2 = vadd.f32 1e-05, %v1101_v63 }
 0x267   : > { %vm1129_vm4 = vcmp.ge.f32.partialorder %v1121_v1, 0.0  ;;  %v1137_v3 = vmul.f32 0.01, %v1121_v1 }
 0x268   : > { %v1619_v4 = vpop.eup %1618  ;;  %1185 = vst.msk [vmem:[%s1859_s23] sm:$0xf] %vm1184_vm3, %v1353_v59  ;;  %1624 = vrsqrt.f32 %v1109_v2 }
 0x269   : > { %v1145_v5 = vsel %vm1129_vm4, %v1121_v1, %v1137_v3  ;;  %v1122_v6 = vmul.f32 %v1619_v4, %v1824_v13  ;;  %v1092_v8 = vpop.xlane.xlu0 %1091 }
 0x26a   : > { %v1354_v7 = vpack.c.bf16 %v1145_v5, %v1145_v5  ;;  %v1102_v11 = vmul.f32 0.5, %v1092_v8 }
 0x26b   : > { %vm1130_vm5 = vcmp.ge.f32.partialorder %v1122_v6, 0.0  ;;  %v1138_v9 = vmul.f32 0.01, %v1122_v6  ;;  %v1095_v10 = vpop.xlane.xlu1 %1094 }
 0x26c   : > { %v1621_v12 = vpop.eup %1620  ;;  %1186 = vst.msk [vmem:[%s1859_s23 + $0x4] sm:$0xf] %vm1184_vm3, %v1354_v7  ;;  %v1110_v14 = vadd.f32 1e-05, %v1102_v11  ;;  %v1103_v15 = vmul.f32 0.5, %v1095_v10 }
 0x26d   : > { %v1146_v16 = vsel %vm1130_vm5, %v1122_v6, %v1138_v9  ;;  %v1123_v17 = vmul.f32 %v1621_v12, %v1829_v18 }
 0x26e   : > { %v1355_v19 = vpack.c.bf16 %v1146_v16, %v1146_v16  ;;  %1626 = vrsqrt.f32 %v1110_v14  ;;  %v1111_v20 = vadd.f32 1e-05, %v1103_v15 }
 0x26f   : > { %vm1131_vm6 = vcmp.ge.f32.partialorder %v1123_v17, 0.0  ;;  %v1139_v13 = vmul.f32 0.01, %v1123_v17 }
 0x270   : > { %v1623_v21 = vpop.eup %1622  ;;  %1187 = vst.msk [vmem:[%s1859_s23 + $0x8] sm:$0xf] %vm1184_vm3, %v1355_v19  ;;  %1628 = vrsqrt.f32 %v1111_v20 }
 0x271   : > { %v1147_v22 = vsel %vm1131_vm6, %v1123_v17, %v1139_v13  ;;  %v1124_v23 = vmul.f32 %v1623_v21, %v1834_v24 }
 0x272   : > { %v1625_v25 = vpop.eup %1624  ;;  %v1356_v26 = vpack.c.bf16 %v1147_v22, %v1147_v22 }
 0x273   : > { %vm1132_vm7 = vcmp.ge.f32.partialorder %v1124_v23, 0.0  ;;  %v1140_v28 = vmul.f32 0.01, %v1124_v23  ;;  %v1125_v18 = vmul.f32 %v1625_v25, %v1837_v27 }
 0x274   : > { %1188 = vst.msk [vmem:[%s1859_s23 + $0xc] sm:$0xf] %vm1184_vm3, %v1356_v26 }
 0x275   : > { %v1148_v30 = vsel %vm1132_vm7, %v1124_v23, %v1140_v28  ;;  %vm1133_vm8 = vcmp.ge.f32.partialorder %v1125_v18, 0.0  ;;  %v1141_v32 = vmul.f32 0.01, %v1125_v18 }
 0x276   : > { %v1357_v33 = vpack.c.bf16 %v1148_v30, %v1148_v30 }
 0x277   : > { %v1149_v34 = vsel %vm1133_vm8, %v1125_v18, %v1141_v32 }
 0x278   : > { %v1627_v35 = vpop.eup %1626  ;;  %1189 = vst.msk [vmem:[%s1859_s23 + $0x10] sm:$0xf] %vm1184_vm3, %v1357_v33  ;;  %v1358_v24 = vpack.c.bf16 %v1149_v34, %v1149_v34 }
 0x279   : > { %v1126_v36 = vmul.f32 %v1627_v35, %v1845_v29 }
 0x27a   : > { %v1629_v37 = vpop.eup %1628  ;;  %1190 = vst.msk [vmem:[%s1859_s23 + $0x14] sm:$0xf] %vm1184_vm3, %v1358_v24 }
 0x27b   : > { %vm1134_vm9 = vcmp.ge.f32.partialorder %v1126_v36, 0.0  ;;  %v1142_v27 = vmul.f32 0.01, %v1126_v36  ;;  %v1127_v31 = vmul.f32 %v1629_v37, %v1847_v38 }
 0x27d   : > { %v1150_v39 = vsel %vm1134_vm9, %v1126_v36, %v1142_v27  ;;  %vm1135_vm10 = vcmp.ge.f32.partialorder %v1127_v31, 0.0  ;;  %v1143_v40 = vmul.f32 0.01, %v1127_v31 }
 0x27e   : > { %v1359_v41 = vpack.c.bf16 %v1150_v39, %v1150_v39 }
 0x27f   : > { %v1151_v42 = vsel %vm1135_vm10, %v1127_v31, %v1143_v40 }
 0x280   : > { %1191 = vst.msk [vmem:[%s1859_s23 + $0x18] sm:$0xf] %vm1184_vm3, %v1359_v41  ;;  %v1360_v44 = vpack.c.bf16 %v1151_v42, %v1151_v42 }
 0x282   : > { %1192 = vst.msk [vmem:[%s1859_s23 + $0x1c] sm:$0xf] %vm1184_vm3, %v1360_v44 }
 0x283 PF: > { %s12_s9 = sadd.s32 1, %s1636_s9  }
 0x284   : > { %p9_p4 = scmp.ge.s32.totalorder %s12_s9, 4  }
 0x286   :  { %11 = sbr.rel (!%p9_p4) target bundleno = 1 (0x1), region = 58 }

// kernel: nnunet3d_forward.32
= control target key start
LH: loop header
LB: loop body
LE: loop exit
PB: predicated region body
PF: predicated region fallthrough
CT: control target
= control target key end

     0   :  { %s2712_s9 = smov 0   ;;  %s3116_s0 = inlined_call_operand.vmem [shape: bf16[64,1728], index: 0, kind: input, shape index: {}]   ;;  %s3117_s1 = inlined_call_operand.vmem [shape: bf16[2,1728,2], index: 1, kind: input, shape index: {}]   ;;  %s3118_s2 = inlined_call_operand.vmem [shape: bf16[2,64,2], index: 2, kind: output, shape index: {}]  }
   0x1 LB: > { %s2035_s10 = sadd.s32 4294967295, %s2694_s9   ;;  %p2039_p0 = scmp.ge.s32.totalorder %s2694_s9, 1  ;;  %s2694_s9 = sphi %s2712_s9, %s12_s9  }
   0x2   : > { %p112_p1 = scmp.lt.s32.totalorder %s2694_s9, 3 }
   0x4   : > { %p113_p2 = pnand %p2039_p0, %p112_p1 }
   0x5   : > { %p134_p3 = scmp.lt.s32.totalorder (!%p113_p2), %s2035_s10, 1  ;;  %v2504_v0 = vld [vmem:[%s3116_s0 + $0x4] ss:$56 sps:$4 sm:$0xff] (!%p113_p2)   ;;  %v2533_v1 = vld [vmem:[%s3116_s0 + $0x14] ss:$56 sps:$4 sm:$0xff] (!%p113_p2)   ;;  %vm1341_vm0 = vcmask (!%p113_p2), 523264  }
   0x6   : > { %116 = sbr.rel (%p113_p2) target bundleno = 706 (0x2c2), region = 28  ;;  %1386 = vmatprep.mubr.bf16.mxu1 (!%p113_p2), %v2504_v0  ;;  %1516 = vmatprep.mubr.bf16.mxu0 (!%p113_p2), %v2533_v1  ;;  %v2502_v28 = vld [vmem:[%s3116_s0] ss:$56 sps:$4 sm:$0xff] (!%p113_p2)   ;;  %v2513_v31 = vld [vmem:[%s3116_s0 + $0x74] ss:$56 sps:$4 sm:$0xff] (!%p113_p2)   ;;  %vm1809_vm1 = vcmask (!%p113_p2), 15360  }
   0x7   : > { %v2516_v38 = vld [vmem:[%s3116_s0 + $0x70] ss:$56 sps:$4 sm:$0xff] (!%p113_p2)   ;;  %v2524_v41 = vld [vmem:[%s3116_s0 + $0xe4] ss:$56 sps:$4 sm:$0xff] (!%p113_p2)   ;;  %v2527_v49 = vld [vmem:[%s3116_s0 + $0xe0] ss:$56 sps:$4 sm:$0xff] (!%p113_p2)  }
   0x8   : > { %v2531_v44 = vld [vmem:[%s3116_s0 + $0x10] ss:$56 sps:$4 sm:$0xff] (!%p113_p2)   ;;  %v2538_v52 = vld [vmem:[%s3116_s0 + $0x154] ss:$56 sps:$4 sm:$0xff] (!%p113_p2)   ;;  %v2545_v57 = vld [vmem:[%s3116_s0 + $0x84] ss:$56 sps:$4 sm:$0xff] (!%p113_p2)  }
   0x9   : > { %v2541_v59 = vld [vmem:[%s3116_s0 + $0x150] ss:$56 sps:$4 sm:$0xff] (!%p113_p2)   ;;  %v2549_v61 = vld [vmem:[%s3116_s0 + $0x80] ss:$56 sps:$4 sm:$0xff] (!%p113_p2)   ;;  %v2554_v1 = vld [vmem:[%s3116_s0 + $0xc] ss:$56 sps:$4 sm:$0xff] (!%p113_p2)  }
   0xa   : > { %vm1971_vm3 = vcmask (!%p113_p2), 11264  }
   0xd   : > { %s3120_s10 = smov (!%p134_p3, %s2035_s10), 1 }
   0xe   : > { %s2470_s13 = smul.u32 864, %s3120_s10  ;;  %s2221_s26 = sshll.u32 %s3120_s10, 5 }
   0xf   : > { %s3088_s29 = scalar_lea.vmem %s3118_s2, %s2221_s26 }
  0x10   : > { %s2732_s18 = scalar_lea.vmem %s3117_s1, %s2470_s13 }
  0x11   : > { %v2480_v2 = vld [vmem:[%s2732_s18 + $0x40] sm:$0xff]   ;;  %v2482_v4 = vld [vmem:[%s2732_s18 + $0x48] sm:$0xff]   ;;  %v2484_v6 = vld [vmem:[%s2732_s18 + $0x50] sm:$0xff]  }
  0x12   : > { %v2481_v3 = vld [vmem:[%s2732_s18] sm:$0xff]   ;;  %2230 = vmatprep.subr.bf16.mxu1 %v2480_v2  ;;  %v2483_v5 = vld [vmem:[%s2732_s18 + $0x8] sm:$0xff]   ;;  %v2485_v7 = vld [vmem:[%s2732_s18 + $0x10] sm:$0xff]  }
  0x13   : > { %2231 = vmatpush3.bf16.msra.mxu1 %v2481_v3  ;;  %v2486_v8 = vld [vmem:[%s2732_s18 + $0x58] sm:$0xff]   ;;  %v2490_v10 = vld [vmem:[%s2732_s18 + $0x140] sm:$0xff]   ;;  %v2494_v14 = vld [vmem:[%s2732_s18 + $0x148] sm:$0xff]  }
  0x14   : > { %2232 = vmatprep.subr.bf16.mxu1 %v2482_v4  ;;  %v2487_v9 = vld [vmem:[%s2732_s18 + $0x18] sm:$0xff]   ;;  %v2488_v11 = vld [vmem:[%s2732_s18 + $0x60] sm:$0xff]   ;;  %2310 = vmatprep.subr.bf16.mxu0 %v2490_v10  ;;  %v2491_v15 = vld [vmem:[%s2732_s18 + $0x68] sm:$0xff]  }
  0x15   : > { %v2492_v12 = vld [vmem:[%s2732_s18 + $0x100] sm:$0xff]   ;;  %v2496_v16 = vld [vmem:[%s2732_s18 + $0x108] sm:$0xff]   ;;  %v2498_v18 = vld [vmem:[%s2732_s18 + $0x150] sm:$0xff]  }
  0x16   : > { %v2489_v13 = vld [vmem:[%s2732_s18 + $0x20] sm:$0xff]   ;;  %2311 = vmatpush3.bf16.msra.mxu0 %v2492_v12  ;;  %v2493_v17 = vld [vmem:[%s2732_s18 + $0x28] sm:$0xff]   ;;  %v2495_v19 = vld [vmem:[%s2732_s18 + $0x70] sm:$0xff]  }
  0x17   : > { %2233 = vmatpush3.bf16.msra.mxu1 %v2483_v5  ;;  %2312 = vmatprep.subr.bf16.mxu0 %v2494_v14  ;;  %v2500_v20 = vld [vmem:[%s2732_s18 + $0x110] sm:$0xff]   ;;  %v2505_v22 = vld [vmem:[%s2732_s18 + $0x158] sm:$0xff]   ;;  %v2509_v26 = vld [vmem:[%s2732_s18 + $0x160] sm:$0xff]  }
  0x18   : > { %2234 = vmatprep.subr.bf16.mxu1 %v2484_v6  ;;  %v2497_v21 = vld [vmem:[%s2732_s18 + $0x30] sm:$0xff]   ;;  %v2499_v23 = vld [vmem:[%s2732_s18 + $0x78] sm:$0xff]   ;;  %v2506_v27 = vld [vmem:[%s2732_s18 + $0xc0] sm:$0xff]  }
  0x19   : > { %v2507_v24 = vld [vmem:[%s2732_s18 + $0x118] sm:$0xff]   ;;  %v2511_v29 = vld [vmem:[%s2732_s18 + $0x120] sm:$0xff]   ;;  %v2515_v32 = vld [vmem:[%s2732_s18 + $0x168] sm:$0xff]  }
  0x1a   : > { %2313 = vmatpush3.bf16.msra.mxu0 %v2496_v16  ;;  %v2501_v25 = vld [vmem:[%s2732_s18 + $0x38] sm:$0xff]   ;;  %v2508_v30 = vld [vmem:[%s2732_s18 + $0x80] sm:$0xff]   ;;  %v2510_v33 = vld [vmem:[%s2732_s18 + $0xc8] sm:$0xff]  }
  0x1b   : > { %2235 = vmatpush3.bf16.msra.mxu1 %v2485_v7  ;;  %2314 = vmatprep.subr.bf16.mxu0 %v2498_v18  ;;  %v2518_v34 = vld [vmem:[%s2732_s18 + $0x128] sm:$0xff]   ;;  %v2520_v36 = vld [vmem:[%s2732_s18 + $0x170] sm:$0xff]   ;;  %v2526_v42 = vld [vmem:[%s2732_s18 + $0x178] sm:$0xff]  }
  0x1c   : > { %2236 = vmatprep.subr.bf16.mxu1 %v2486_v8  ;;  %v2512_v35 = vld [vmem:[%s2732_s18 + $0x88] sm:$0xff]   ;;  %v2517_v37 = vld [vmem:[%s2732_s18 + $0xd0] sm:$0xff]   ;;  %v2521_v43 = vld [vmem:[%s2732_s18 + $0xd8] sm:$0xff]  }
  0x1d   : > { %v2522_v39 = vld [vmem:[%s2732_s18 + $0x130] sm:$0xff]   ;;  %v2529_v45 = vld [vmem:[%s2732_s18 + $0x138] sm:$0xff]   ;;  %v2534_v47 = vld [vmem:[%s2732_s18 + $0x240] sm:$0xff]  }
  0x1e   : > { %2315 = vmatpush3.bf16.msra.mxu0 %v2500_v20  ;;  %v2519_v40 = vld [vmem:[%s2732_s18 + $0x90] sm:$0xff]   ;;  %v2523_v46 = vld [vmem:[%s2732_s18 + $0x98] sm:$0xff]   ;;  %v2528_v48 = vld [vmem:[%s2732_s18 + $0xe0] sm:$0xff]  }
  0x1f   : > { %2237 = vmatpush3.bf16.msra.mxu1 %v2487_v9  ;;  %2316 = vmatprep.subr.bf16.mxu0 %v2505_v22  ;;  %v2536_v50 = vld [vmem:[%s2732_s18 + $0x200] sm:$0xff]   ;;  %v2540_v53 = vld [vmem:[%s2732_s18 + $0x248] sm:$0xff]   ;;  %v2547_v58 = vld [vmem:[%s2732_s18 + $0x250] sm:$0xff]  }
  0x20   : > { %2238 = vmatprep.subr.bf16.mxu1 %v2488_v11  ;;  %v2530_v51 = vld [vmem:[%s2732_s18 + $0xa0] sm:$0xff]   ;;  %v2535_v54 = vld [vmem:[%s2732_s18 + $0xe8] sm:$0xff]   ;;  %v2542_v60 = vld [vmem:[%s2732_s18 + $0xf0] sm:$0xff]  }
  0x21   : > { %v2543_v55 = vld [vmem:[%s2732_s18 + $0x208] sm:$0xff]   ;;  %v2550_v62 = vld [vmem:[%s2732_s18 + $0x210] sm:$0xff]   ;;  %v2548_v0 = vld [vmem:[%s2732_s18 + $0xf8] sm:$0xff]  }
  0x22   : > { %2317 = vmatpush3.bf16.msra.mxu0 %v2507_v24  ;;  %v2537_v56 = vld [vmem:[%s2732_s18 + $0xa8] sm:$0xff]   ;;  %v2544_v63 = vld [vmem:[%s2732_s18 + $0xb0] sm:$0xff]   ;;  %v2555_v2 = vld [vmem:[%s2732_s18 + $0x258] sm:$0xff]  }
  0x23   : > { %2239 = vmatpush3.bf16.msra.mxu1 %v2489_v13  ;;  %2318 = vmatprep.subr.bf16.mxu0 %v2509_v26  ;;  %v2551_v3 = vld [vmem:[%s2732_s18 + $0xb8] sm:$0xff]   ;;  %v2552_v5 = vld [vmem:[%s3116_s0 + $0x8] ss:$56 sps:$4 sm:$0xff]   ;;  %v2559_v8 = vld [vmem:[%s3116_s0 + $0xf4] ss:$56 sps:$4 sm:$0xff]  }
  0x24   : > { %2240 = vmatprep.subr.bf16.mxu1 %v2491_v15  ;;  %v2557_v4 = vld [vmem:[%s2732_s18 + $0x218] sm:$0xff]   ;;  %v2556_v6 = vld [vmem:[%s2732_s18 + $0x1c0] sm:$0xff]   ;;  %v2562_v10 = vld [vmem:[%s3116_s0 + $0xf0] ss:$56 sps:$4 sm:$0xff]  }
  0x25   : > { %v2558_v7 = vld [vmem:[%s2732_s18 + $0x180] sm:$0xff]   ;;  %v2563_v11 = vld [vmem:[%s2732_s18 + $0x1c8] sm:$0xff]   ;;  %v2566_v13 = vld [vmem:[%s3116_s0 + $0x7c] ss:$56 sps:$4 sm:$0xff]  }
  0x26   : > { %2319 = vmatpush3.bf16.msra.mxu0 %v2511_v29  ;;  %v2561_v9 = vld [vmem:[%s2732_s18 + $0x260] sm:$0xff]   ;;  %v2565_v14 = vld [vmem:[%s2732_s18 + $0x188] sm:$0xff]   ;;  %v2569_v16 = vld [vmem:[%s3116_s0 + $0x78] ss:$56 sps:$4 sm:$0xff]  }
  0x27   : > { %2241 = vmatpush3.bf16.msra.mxu1 %v2493_v17  ;;  %2320 = vmatprep.subr.bf16.mxu0 %v2515_v32  ;;  %v2564_v12 = vld [vmem:[%s2732_s18 + $0x220] sm:$0xff]   ;;  %v2568_v15 = vld [vmem:[%s2732_s18 + $0x268] sm:$0xff]   ;;  %v2570_v17 = vld [vmem:[%s2732_s18 + $0x1d0] sm:$0xff]  }
  0x28   : > { %2242 = vmatprep.subr.bf16.mxu1 %v2495_v19  ;;  %v2571_v18 = vld [vmem:[%s2732_s18 + $0x228] sm:$0xff]   ;;  %v2572_v19 = vld [vmem:[%s2732_s18 + $0x190] sm:$0xff]   ;;  %v2573_v20 = vld [vmem:[%s3116_s0 + $0x164] ss:$56 sps:$4 sm:$0xff]  }
  0x29   : > { %v2576_v22 = vld [vmem:[%s3116_s0 + $0x160] ss:$56 sps:$4 sm:$0xff]   ;;  %v2578_v24 = vld [vmem:[%s2732_s18 + $0x230] sm:$0xff]   ;;  %v2580_v26 = vld [vmem:[%s3116_s0 + $0xec] ss:$56 sps:$4 sm:$0xff]  }
  0x2a   : > { %2321 = vmatpush3.bf16.msra.mxu0 %v2518_v34  ;;  %v2584_v29 = vld [vmem:[%s2732_s18 + $0x1e0] sm:$0xff]   ;;  %v2696_v34 = vmov 0  }
  0x2b   : > { %2243 = vmatpush3.bf16.msra.mxu1 %v2497_v21  ;;  %2322 = vmatprep.subr.bf16.mxu0 %v2520_v36  ;;  %v2575_v21 = vld [vmem:[%s2732_s18 + $0x270] sm:$0xff]   ;;  %v2587_v32 = vld [vmem:[%s3116_s0 + $0x20] ss:$56 sps:$4 sm:$0xff]  }
  0x2c   : > { %2244 = vmatprep.subr.bf16.mxu1 %v2499_v23  ;;  %v2577_v23 = vld [vmem:[%s2732_s18 + $0x1d8] sm:$0xff]   ;;  %v2591_v36 = vld [vmem:[%s2732_s18 + $0x300] sm:$0xff]  }
  0x2e   : > { %2323 = vmatpush3.bf16.msra.mxu0 %v2522_v39  ;;  %v2595_v39 = vld [vmem:[%s3116_s0 + $0x158] ss:$56 sps:$4 sm:$0xff]  }
  0x2f   : > { %2245 = vmatpush3.bf16.msra.mxu1 %v2501_v25  ;;  %2324 = vmatprep.subr.bf16.mxu0 %v2526_v42  ;;  %v2579_v25 = vld [vmem:[%s2732_s18 + $0x198] sm:$0xff]   ;;  %v2598_v42 = vld [vmem:[%s2732_s18 + $0x1b0] sm:$0xff]  }
  0x30   : > { %2270 = vmatprep.subr.bf16.mxu1 %v2506_v27  ;;  %v2582_v27 = vld [vmem:[%s2732_s18 + $0x278] sm:$0xff]  }
  0x32   : > { %1387 = vmatmul.mubr.bf16.vlgmr.msra.gmra.mrb[0].mxu1 %v2502_v28  ;;  %2325 = vmatpush3.bf16.msra.mxu0 %v2529_v45  ;;  %v2583_v28 = vld [vmem:[%s3116_s0 + $0xe8] ss:$56 sps:$4 sm:$0xff]   ;;  %v2601_v45 = vld [vmem:[%s2732_s18 + $0x1b8] sm:$0xff]  }
  0x33   : > { %2271 = vmatpush3.bf16.msra.mxu1 %v2508_v30  ;;  %1394 = vmatprep.mubr.bf16.mxu1 %v2513_v31  ;;  %v2585_v30 = vld [vmem:[%s2732_s18 + $0x238] sm:$0xff]   ;;  %v2586_v31 = vld [vmem:[%s2732_s18 + $0x1a0] sm:$0xff]  }
  0x34   : > { %2272 = vmatprep.subr.bf16.mxu1 %v2510_v33  ;;  %2390 = vmatprep.subr.bf16.mxu0 %v2534_v47  ;;  %v2589_v33 = vld [vmem:[%s3116_s0 + $0x24] ss:$56 sps:$4 sm:$0xff]  }
  0x35   : > { %1517 = vmatmul.mubr.bf16.vlgmr.msra.gmra.mrb[0].mxu0 %v2531_v44  ;;  %v2600_v44 = vld [vmem:[%s2732_s18 + $0x310] sm:$0xff]  }
  0x36   : > { %2391 = vmatpush3.bf16.msra.mxu0 %v2536_v50  ;;  %1524 = vmatprep.mubr.bf16.mxu0 %v2545_v57  ;;  %v2604_v47 = vld [vmem:[%s3116_s0 + $0x1c] ss:$56 sps:$4 sm:$0xff]   ;;  %v2607_v50 = vld [vmem:[%s2732_s18 + $0x280] sm:$0xff]   ;;  %v2615_v57 = vld [vmem:[%s2732_s18 + $0x328] sm:$0xff]  }
  0x37   : > { %2273 = vmatpush3.bf16.msra.mxu1 %v2512_v35  ;;  %2392 = vmatprep.subr.bf16.mxu0 %v2540_v53  ;;  %v2590_v35 = vld [vmem:[%s2732_s18 + $0x1e8] sm:$0xff]  }
  0x38   : > { %2274 = vmatprep.subr.bf16.mxu1 %v2517_v37  ;;  %v2592_v37 = vld [vmem:[%s2732_s18 + $0x1a8] sm:$0xff]  }
  0x39   : > { %v2610_v53 = vld [vmem:[%s2732_s18 + $0x288] sm:$0xff]  }
  0x3a   : > { %1395 = vmatmul.mubr.bf16.gmra.mrb[4].mxu1 %v2516_v38  ;;  %2393 = vmatpush3.bf16.msra.mxu0 %v2543_v55  ;;  %v2593_v38 = vld [vmem:[%s3116_s0 + $0x15c] ss:$56 sps:$4 sm:$0xff]   ;;  %v2613_v55 = vld [vmem:[%s3116_s0 + $0x88] ss:$56 sps:$4 sm:$0xff]  }
  0x3b   : > { %2275 = vmatpush3.bf16.msra.mxu1 %v2519_v40  ;;  %1402 = vmatprep.mubr.bf16.mxu1 %v2524_v41  ;;  %v2596_v40 = vld [vmem:[%s2732_s18 + $0x1f0] sm:$0xff]   ;;  %v2597_v41 = vld [vmem:[%s2732_s18 + $0x308] sm:$0xff]  }
  0x3c   : > { %2276 = vmatprep.subr.bf16.mxu1 %v2521_v43  ;;  %2394 = vmatprep.subr.bf16.mxu0 %v2547_v58  ;;  %v2599_v43 = vld [vmem:[%s2732_s18 + $0x1f8] sm:$0xff]   ;;  %v2616_v58 = vld [vmem:[%s3116_s0 + $0x94] ss:$56 sps:$4 sm:$0xff]  }
  0x3d   : > { %1525 = vmatmul.mubr.bf16.gmra.mrb[4].mxu0 %v2549_v61  ;;  %v2620_v61 = vld [vmem:[%s2732_s18 + $0x2d8] sm:$0xff]  }
  0x3e   : > { %2395 = vmatpush3.bf16.msra.mxu0 %v2550_v62  ;;  %1532 = vmatprep.mubr.bf16.mxu0 %v2559_v8  ;;  %v2621_v62 = vld [vmem:[%s2732_s18 + $0x330] sm:$0xff]   ;;  %v2633_v8 = vld [vmem:[%s2732_s18 + $0x340] sm:$0xff]  }
  0x3f   : > { %2277 = vmatpush3.bf16.msra.mxu1 %v2523_v46  ;;  %2396 = vmatprep.subr.bf16.mxu0 %v2555_v2  ;;  %v2602_v46 = vld [vmem:[%s3116_s0 + $0x18] ss:$56 sps:$4 sm:$0xff]   ;;  %v2626_v2 = vld [vmem:[%s2732_s18 + $0x2e0] sm:$0xff]  }
  0x40   : > { %2278 = vmatprep.subr.bf16.mxu1 %v2528_v48  ;;  %v2605_v48 = vld [vmem:[%s2732_s18 + $0x2c0] sm:$0xff]  }
  0x42   : > { %1403 = vmatmul.mubr.bf16.gmra.mrb[8].mxu1 %v2527_v49  ;;  %2397 = vmatpush3.bf16.msra.mxu0 %v2557_v4  ;;  %v2606_v49 = vld [vmem:[%s2732_s18 + $0x318] sm:$0xff]  }
  0x43   : > { %2279 = vmatpush3.bf16.msra.mxu1 %v2530_v51  ;;  %1410 = vmatprep.mubr.bf16.mxu1 %v2538_v52  ;;  %v2608_v51 = vld [vmem:[%s2732_s18 + $0x2c8] sm:$0xff]   ;;  %v2609_v52 = vld [vmem:[%s2732_s18 + $0x320] sm:$0xff]  }
  0x44   : > { %2280 = vmatprep.subr.bf16.mxu1 %v2535_v54  ;;  %2398 = vmatprep.subr.bf16.mxu0 %v2561_v9  ;;  %v2611_v54 = vld [vmem:[%s3116_s0 + $0x8c] ss:$56 sps:$4 sm:$0xff]  }
  0x45   : > { %1533 = vmatmul.mubr.bf16.gmra.mrb[8].mxu0 %v2562_v10  ;;  %v2628_v4 = vld [vmem:[%s3116_s0 + $0x104] ss:$56 sps:$4 sm:$0xff]   ;;  %v2634_v9 = vld [vmem:[%s2732_s18 + $0x2a8] sm:$0xff]  }
  0x46   : > { %2399 = vmatpush3.bf16.msra.mxu0 %v2564_v12  ;;  %1540 = vmatprep.mubr.bf16.mxu0 %v2573_v20  ;;  %v2635_v10 = vld [vmem:[%s3116_s0 + $0x16c] ss:$56 sps:$4 sm:$0xff]   ;;  %v2638_v12 = vld [vmem:[%s2732_s18 + $0x2f0] sm:$0xff]   ;;  %v2647_v20 = vld [vmem:[%s3116_s0 + $0x28] ss:$56 sps:$4 sm:$0xff]  }
  0x47   : > { %2281 = vmatpush3.bf16.msra.mxu1 %v2537_v56  ;;  %2400 = vmatprep.subr.bf16.mxu0 %v2568_v15  ;;  %v2614_v56 = vld [vmem:[%s2732_s18 + $0x2d0] sm:$0xff]  }
  0x48   : > { %2282 = vmatprep.subr.bf16.mxu1 %v2542_v60  ;;  %v2619_v60 = vld [vmem:[%s3116_s0 + $0x90] ss:$56 sps:$4 sm:$0xff]  }
  0x49   : > { %v2642_v15 = vld [vmem:[%s2732_s18 + $0x2b0] sm:$0xff]  }
  0x4a   : > { %1411 = vmatmul.mubr.bf16.gmra.mrb[12].mxu1 %v2541_v59  ;;  %2401 = vmatpush3.bf16.msra.mxu0 %v2571_v18  ;;  %v2618_v59 = vld [vmem:[%s2732_s18 + $0x290] sm:$0xff]  }
  0x4b   : > { %2283 = vmatpush3.bf16.msra.mxu1 %v2544_v63  ;;  %1451 = vmatprep.mubr.bf16.mxu1 %v2554_v1  ;;  %v2622_v63 = vld [vmem:[%s2732_s18 + $0x298] sm:$0xff]   ;;  %v2645_v18 = vld [vmem:[%s2732_s18 + $0x350] sm:$0xff]  }
  0x4c   : > { %2284 = vmatprep.subr.bf16.mxu1 %v2548_v0  ;;  %2402 = vmatprep.subr.bf16.mxu0 %v2575_v21  ;;  %v2623_v0 = vld [vmem:[%s3116_s0 + $0xfc] ss:$56 sps:$4 sm:$0xff]   ;;  %v2625_v1 = vld [vmem:[%s3116_s0 + $0xf8] ss:$56 sps:$4 sm:$0xff]   ;;  %v2649_v21 = vld [vmem:[%s3116_s0 + $0x2c] ss:$56 sps:$4 sm:$0xff]  }
  0x4d   : > { %1541 = vmatmul.mubr.bf16.gmra.mrb[12].mxu0 %v2576_v22  ;;  %v2650_v22 = vld [vmem:[%s2732_s18 + $0x358] sm:$0xff]  }
  0x4e   : > { %2403 = vmatpush3.bf16.msra.mxu0 %v2578_v24  ;;  %1646 = vmatprep.mubr.bf16.mxu0 %v2589_v33  ;;  %v2653_v24 = vld [vmem:[%s3116_s0 + $0x34] ss:$56 sps:$4 sm:$0xff]   ;;  %v2665_v33 = vld [vmem:[%s3116_s0 + $0x110] ss:$56 sps:$4 sm:$0xff]  }
  0x4f   : > { %2285 = vmatpush3.bf16.msra.mxu1 %v2551_v3  ;;  %2404 = vmatprep.subr.bf16.mxu0 %v2582_v27  ;;  %v2627_v3 = vld [vmem:[%s2732_s18 + $0x338] sm:$0xff]  }
  0x50   : > { %2350 = vmatprep.subr.bf16.mxu1 %v2556_v6  ;;  %v2631_v6 = vld [vmem:[%s3116_s0 + $0x100] ss:$56 sps:$4 sm:$0xff]  }
  0x51   : > { %v2656_v27 = vld [vmem:[%s3116_s0 + $0x98] ss:$56 sps:$4 sm:$0xff]  }
  0x52   : > { %1452 = vmatmul.mubr.bf16.vlgmr.msra.gmra.mrb[16].mxu1 %v2552_v5  ;;  %2405 = vmatpush3.bf16.msra.mxu0 %v2585_v30  ;;  %v2630_v5 = vld [vmem:[%s2732_s18 + $0x2a0] sm:$0xff]   ;;  %v2663_v30 = vld [vmem:[%s3116_s0 + $0x114] ss:$56 sps:$4 sm:$0xff]  }
  0x53   : > { %2351 = vmatpush3.bf16.msra.mxu1 %v2558_v7  ;;  %1459 = vmatprep.mubr.bf16.mxu1 %v2566_v13  ;;  %v2632_v7 = vld [vmem:[%s2732_s18 + $0x2e8] sm:$0xff]  }
  0x54   : > { %2352 = vmatprep.subr.bf16.mxu1 %v2563_v11  ;;  %1744 = vmatprep.subr.bf16.mxu0 %v2696_v34  ;;  %v2637_v11 = vld [vmem:[%s3116_s0 + $0x168] ss:$56 sps:$4 sm:$0xff]  }
  0x55   : > { %1647 = vmatmul.mubr.bf16.vlgmr.msra.gmra.mrb[16].mxu0 %v2587_v32  ;;  %v2639_v13 = vld [vmem:[%s2732_s18 + $0x348] sm:$0xff]   ;;  %v2666_v32 = vld [vmem:[%s3116_s0 + $0x17c] ss:$56 sps:$4 sm:$0xff]  }
  0x56   : > { %1745 = vmatpush1.bf16.msra.mxu0 %v2591_v36  ;;  %1654 = vmatprep.mubr.bf16.mxu0 %v2616_v58  ;;  %v2671_v36 = vld [vmem:[%s3116_s0 + $0x180] ss:$56 sps:$4 sm:$0xff]  }
  0x57   : > { %2353 = vmatpush3.bf16.msra.mxu1 %v2565_v14  ;;  %1746 = vmatprep.subr.bf16.mxu0 %v2696_v34  ;;  %v2640_v14 = vld [vmem:[%s3116_s0 + $0x174] ss:$56 sps:$4 sm:$0xff]  }
  0x58   : > { %2354 = vmatprep.subr.bf16.mxu1 %v2570_v17  ;;  %v2644_v17 = vld [vmem:[%s2732_s18 + $0x2f8] sm:$0xff]  }
  0x5a   : > { %1460 = vmatmul.mubr.bf16.gmra.mrb[20].mxu1 %v2569_v16  ;;  %1747 = vmatpush1.bf16.msra.mxu0 %v2597_v41  ;;  %v2643_v16 = vld [vmem:[%s3116_s0 + $0x170] ss:$56 sps:$4 sm:$0xff]  }
  0x5b   : > { %2355 = vmatpush3.bf16.msra.mxu1 %v2572_v19  ;;  %1467 = vmatprep.mubr.bf16.mxu1 %v2580_v26  ;;  %v2646_v19 = vld [vmem:[%s2732_s18 + $0x2b8] sm:$0xff]  }
  0x5c   : > { %2356 = vmatprep.subr.bf16.mxu1 %v2577_v23  ;;  %1748 = vmatprep.subr.bf16.mxu0 %v2696_v34  ;;  %v2651_v23 = vld [vmem:[%s3116_s0 + $0x30] ss:$56 sps:$4 sm:$0xff]   ;;  %v2657_v26 = vld [vmem:[%s3116_s0 + $0xa4] ss:$56 sps:$4 sm:$0xff]  }
  0x5d   : > { %1655 = vmatmul.mubr.bf16.gmra.mrb[20].mxu0 %v2619_v60 }
  0x5e   : > { %1749 = vmatpush1.bf16.msra.mxu0 %v2600_v44  ;;  %1662 = vmatprep.mubr.bf16.mxu0 %v2628_v4 }
  0x5f   : > { %2357 = vmatpush3.bf16.msra.mxu1 %v2579_v25  ;;  %1750 = vmatprep.subr.bf16.mxu0 %v2696_v34  ;;  %v2654_v25 = vld [vmem:[%s3116_s0 + $0x9c] ss:$56 sps:$4 sm:$0xff]  }
  0x60   : > { %2358 = vmatprep.subr.bf16.mxu1 %v2584_v29  ;;  %v2659_v29 = vld [vmem:[%s3116_s0 + $0xa0] ss:$56 sps:$4 sm:$0xff]  }
  0x62   : > { %1468 = vmatmul.mubr.bf16.gmra.mrb[24].mxu1 %v2583_v28  ;;  %1751 = vmatpush1.bf16.msra.mxu0 %v2606_v49  ;;  %v2660_v28 = vld [vmem:[%s3116_s0 + $0x10c] ss:$56 sps:$4 sm:$0xff]  }
  0x63   : > { %2359 = vmatpush3.bf16.msra.mxu1 %v2586_v31  ;;  %1475 = vmatprep.mubr.bf16.mxu1 %v2593_v38  ;;  %v2662_v31 = vld [vmem:[%s3116_s0 + $0x108] ss:$56 sps:$4 sm:$0xff]  }
  0x64   : > { %2360 = vmatprep.subr.bf16.mxu1 %v2590_v35  ;;  %1752 = vmatprep.subr.bf16.mxu0 %v2696_v34  ;;  %v2668_v35 = vld [vmem:[%s3116_s0 + $0x178] ss:$56 sps:$4 sm:$0xff]  }
  0x65   : > { %1663 = vmatmul.mubr.bf16.gmra.mrb[24].mxu0 %v2631_v6 }
  0x66   : > { %1753 = vmatpush1.bf16.msra.mxu0 %v2609_v52  ;;  %1670 = vmatprep.mubr.bf16.mxu0 %v2640_v14 }
  0x67   : > { %2361 = vmatpush3.bf16.msra.mxu1 %v2592_v37  ;;  %1754 = vmatprep.subr.bf16.mxu0 %v2696_v34 }
  0x68   : > { %2362 = vmatprep.subr.bf16.mxu1 %v2596_v40 }
  0x6a   : > { %1476 = vmatmul.mubr.bf16.gmra.mrb[28].mxu1 %v2595_v39  ;;  %1755 = vmatpush1.bf16.msra.mxu0 %v2615_v57 }
  0x6b   : > { %2363 = vmatpush3.bf16.msra.mxu1 %v2598_v42  ;;  %1581 = vmatprep.mubr.bf16.mxu1 %v2604_v47 }
  0x6c   : > { %2364 = vmatprep.subr.bf16.mxu1 %v2599_v43  ;;  %1756 = vmatprep.subr.bf16.mxu0 %v2696_v34 }
  0x6d   : > { %1671 = vmatmul.mubr.bf16.gmra.mrb[28].mxu0 %v2643_v16 }
  0x6e   : > { %1757 = vmatpush1.bf16.msra.mxu0 %v2621_v62  ;;  %2207 = vmatprep.mubr.msk.bf16.mxu0 %vm1341_vm0, %v2653_v24 }
  0x6f   : > { %2365 = vmatpush3.bf16.msra.mxu1 %v2601_v45  ;;  %1758 = vmatprep.subr.bf16.mxu0 %v2696_v34 }
  0x70   : > { %2430 = vmatprep.subr.bf16.mxu1 %v2605_v48 }
  0x72   : > { %1582 = vmatmul.mubr.bf16.vlgmr.msra.gmra.mrb[32].mxu1 %v2602_v46  ;;  %1759 = vmatpush1.bf16.msra.mxu0 %v2627_v3 }
  0x73   : > { %2431 = vmatpush3.bf16.msra.mxu1 %v2607_v50  ;;  %1589 = vmatprep.mubr.bf16.mxu1 %v2611_v54 }
  0x74   : > { %2432 = vmatprep.subr.bf16.mxu1 %v2608_v51  ;;  %1760 = vmatprep.subr.bf16.mxu0 %v2696_v34 }
  0x76   : > { %1761 = vmatpush1.bf16.msra.mxu0 %v2633_v8 }
  0x77   : > { %2433 = vmatpush3.bf16.msra.mxu1 %v2610_v53  ;;  %1762 = vmatprep.subr.bf16.mxu0 %v2696_v34 }
  0x78   : > { %2434 = vmatprep.subr.bf16.mxu1 %v2614_v56 }
  0x7a   : > { %1590 = vmatmul.mubr.bf16.gmra.mrb[36].mxu1 %v2613_v55  ;;  %1763 = vmatpush1.bf16.msra.mxu0 %v2639_v13 }
  0x7b   : > { %2435 = vmatpush3.bf16.msra.mxu1 %v2618_v59  ;;  %1597 = vmatprep.mubr.bf16.mxu1 %v2623_v0 }
  0x7c   : > { %2436 = vmatprep.subr.bf16.mxu1 %v2620_v61  ;;  %1764 = vmatprep.subr.bf16.mxu0 %v2696_v34 }
  0x7e   : > { %1765 = vmatpush1.bf16.msra.mxu0 %v2645_v18 }
  0x7f   : > { %2437 = vmatpush3.bf16.msra.mxu1 %v2622_v63  ;;  %1766 = vmatprep.subr.bf16.mxu0 %v2696_v34  ;;  %v2669_v34 = vld [vmem:[%s3116_s0 + $0x184] ss:$56 sps:$4 sm:$0xff]  }
  0x80   : > { %2438 = vmatprep.subr.bf16.mxu1 %v2626_v2 }
  0x82   : > { %1598 = vmatmul.mubr.bf16.gmra.mrb[40].mxu1 %v2625_v1  ;;  %1767 = vmatpush1.bf16.msra.mxu0 %v2650_v22 }
  0x83   : > { %2439 = vmatpush3.bf16.msra.mxu1 %v2630_v5  ;;  %1605 = vmatprep.mubr.bf16.mxu1 %v2635_v10 }
  0x84   : > { %2440 = vmatprep.subr.bf16.mxu1 %v2632_v7 }
  0x85   : > { %1777 = vmatmul.mubr.bf16.vlgmr.msra.gmra.mrb[32].mxu0 %v2651_v23 }
  0x86   : > { %2208 = vmatprep.mubr.msk.bf16.mxu0 %vm1341_vm0, %v2657_v26 }
  0x87   : > { %2441 = vmatpush3.bf16.msra.mxu1 %v2634_v9 }
  0x88   : > { %2442 = vmatprep.subr.bf16.mxu1 %v2638_v12 }
  0x8a   : > { %1606 = vmatmul.mubr.bf16.gmra.mrb[44].mxu1 %v2637_v11 }
  0x8b   : > { %2443 = vmatpush3.bf16.msra.mxu1 %v2642_v15  ;;  %1711 = vmatprep.mubr.bf16.mxu1 %v2649_v21 }
  0x8c   : > { %2444 = vmatprep.subr.bf16.mxu1 %v2644_v17 }
  0x8d   : > { %1785 = vmatmul.mubr.bf16.gmra.mrb[36].mxu0 %v2659_v29 }
  0x8e   : > { %2209 = vmatprep.mubr.msk.bf16.mxu0 %vm1341_vm0, %v2663_v30 }
  0x8f   : > { %2445 = vmatpush3.bf16.msra.mxu1 %v2646_v19 }
  0x92   : > { %1712 = vmatmul.mubr.bf16.vlgmr.msra.gmra.mrb[48].mxu1 %v2647_v20 }
  0x93   : > { %1719 = vmatprep.mubr.bf16.mxu1 %v2654_v25 }
  0x95   : > { %1793 = vmatmul.mubr.bf16.gmra.mrb[40].mxu0 %v2665_v33 }
  0x96   : > { %2210 = vmatprep.mubr.msk.bf16.mxu0 %vm1341_vm0, %v2669_v34 }
  0x9a   : > { %1720 = vmatmul.mubr.bf16.gmra.mrb[52].mxu1 %v2656_v27 }
  0x9b   : > { %1727 = vmatprep.mubr.bf16.mxu1 %v2660_v28 }
  0x9d   : > { %1801 = vmatmul.mubr.bf16.gmra.mrb[44].mxu0 %v2671_v36 }
  0xa2   : > { %1728 = vmatmul.mubr.bf16.gmra.mrb[56].mxu1 %v2662_v31 }
  0xa3   : > { %1735 = vmatprep.mubr.bf16.mxu1 %v2666_v32 }
  0xaa   : > { %1736 = vmatmul.mubr.bf16.gmra.mrb[60].mxu1 %v2668_v35 }
 0x105   : > { %v2246_v37 = vpop.f32.mrb[0].mxu1 }
 0x106   : > { %v2247_v38 = vpop.f32.mrb[1].mxu1 }
 0x107   : > { %v2248_v39 = vadd.f32 %v2247_v38, %v2246_v37  ;;  %v2249_v40 = vpop.f32.mrb[2].mxu1 }
 0x108   : > { %v2250_v41 = vpop.f32.mrb[3].mxu1  ;;  %v2326_v48 = vpop.f32.mrb[0].mxu0 }
 0x109   : > { %v2251_v42 = vadd.f32 %v2250_v41, %v2249_v40  ;;  %v2327_v50 = vpop.f32.mrb[1].mxu0 }
 0x10a   : > { %v2328_v51 = vadd.f32 %v2327_v50, %v2326_v48  ;;  %v2329_v52 = vpop.f32.mrb[2].mxu0 }
 0x10b   : > { %v2330_v53 = vpop.f32.mrb[3].mxu0 }
 0x10c   : > { %v2331_v54 = vadd.f32 %v2330_v53, %v2329_v52 }
 0x10d   : > { %v2252_v43 = vpop.f32.mrb[4].mxu1 }
 0x10e   : > { %v2253_v44 = vpop.f32.mrb[5].mxu1 }
 0x10f   : > { %v2254_v45 = vadd.f32 %v2253_v44, %v2252_v43  ;;  %v2255_v46 = vpop.f32.mrb[6].mxu1 }
 0x110   : > { %v2256_v47 = vpop.f32.mrb[7].mxu1  ;;  %v2332_v61 = vpop.f32.mrb[4].mxu0 }
 0x111   : > { %v2257_v49 = vadd.f32 %v2256_v47, %v2255_v46  ;;  %v2333_v62 = vpop.f32.mrb[5].mxu0 }
 0x112   : > { %v2334_v63 = vadd.f32 %v2333_v62, %v2332_v61  ;;  %v2335_v0 = vpop.f32.mrb[6].mxu0 }
 0x113   : > { %v2336_v1 = vpop.f32.mrb[7].mxu0 }
 0x114   : > { %v2337_v3 = vadd.f32 %v2336_v1, %v2335_v0 }
 0x115   : > { %v2258_v55 = vpop.f32.mrb[8].mxu1 }
 0x116   : > { %v2259_v56 = vpop.f32.mrb[9].mxu1 }
 0x117   : > { %v2260_v57 = vadd.f32 %v2259_v56, %v2258_v55  ;;  %v2261_v58 = vpop.f32.mrb[10].mxu1 }
 0x118   : > { %v2262_v59 = vpop.f32.mrb[11].mxu1  ;;  %v2338_v9 = vpop.f32.mrb[8].mxu0 }
 0x119   : > { %v2263_v60 = vadd.f32 %v2262_v59, %v2261_v58  ;;  %v2339_v11 = vpop.f32.mrb[9].mxu0 }
 0x11a   : > { %v2340_v13 = vadd.f32 %v2339_v11, %v2338_v9  ;;  %v2341_v14 = vpop.f32.mrb[10].mxu0 }
 0x11b   : > { %v2342_v17 = vpop.f32.mrb[11].mxu0 }
 0x11c   : > { %v2343_v19 = vadd.f32 %v2342_v17, %v2341_v14 }
 0x11d   : > { %v2264_v2 = vpop.f32.mrb[12].mxu1 }
 0x11e   : > { %v2265_v4 = vpop.f32.mrb[13].mxu1 }
 0x11f   : > { %v2266_v5 = vadd.f32 %v2265_v4, %v2264_v2  ;;  %v2267_v6 = vpop.f32.mrb[14].mxu1 }
 0x120   : > { %v2268_v7 = vpop.f32.mrb[15].mxu1  ;;  %v2344_v27 = vpop.f32.mrb[12].mxu0 }
 0x121   : > { %v2269_v8 = vadd.f32 %v2268_v7, %v2267_v6  ;;  %v2345_v30 = vpop.f32.mrb[13].mxu0 }
 0x122   : > { %v2346_v32 = vadd.f32 %v2345_v30, %v2344_v27  ;;  %v2347_v33 = vpop.f32.mrb[14].mxu0 }
 0x123   : > { %v2348_v36 = vpop.f32.mrb[15].mxu0 }
 0x124   : > { %v2349_v37 = vadd.f32 %v2348_v36, %v2347_v33 }
 0x125   : > { %v2286_v10 = vpop.f32.mrb[16].mxu1 }
 0x126   : > { %v2287_v12 = vpop.f32.mrb[17].mxu1 }
 0x127   : > { %v2288_v15 = vadd.f32 %v2287_v12, %v2286_v10  ;;  %v2289_v16 = vpop.f32.mrb[18].mxu1 }
 0x128   : > { %v2290_v18 = vpop.f32.mrb[19].mxu1  ;;  %v2406_v47 = vpop.f32.mrb[16].mxu0 }
 0x129   : > { %v1454_v20 = vadd.f32 %v2288_v15, %v2248_v39  ;;  %v2291_v21 = vadd.f32 %v2290_v18, %v2289_v16 }
 0x12b   : > { %v1457_v22 = vadd.f32 %v2291_v21, %v2251_v42  ;;  %v1519_v23 = vadd.f32 %v2328_v51, %v1454_v20  ;;  %v2407_v51 = vpop.f32.mrb[17].mxu0 }
 0x12c   : > { %v2408_v52 = vadd.f32 %v2407_v51, %v2406_v47  ;;  %v2409_v53 = vpop.f32.mrb[18].mxu0 }
 0x12d   : > { %v2292_v24 = vpop.f32.mrb[20].mxu1  ;;  %v1522_v25 = vadd.f32 %v2331_v54, %v1457_v22  ;;  %v2410_v55 = vpop.f32.mrb[19].mxu0 }
 0x12e   : > { %v2293_v26 = vpop.f32.mrb[21].mxu1  ;;  %v2411_v56 = vadd.f32 %v2410_v55, %v2409_v53 }
 0x12f   : > { %v2294_v28 = vadd.f32 %v2293_v26, %v2292_v24  ;;  %v2295_v29 = vpop.f32.mrb[22].mxu1 }
 0x130   : > { %v2296_v31 = vpop.f32.mrb[23].mxu1  ;;  %v2412_v17 = vpop.f32.mrb[20].mxu0 }
 0x131   : > { %v1462_v34 = vadd.f32 %v2294_v28, %v2254_v45  ;;  %v2297_v35 = vadd.f32 %v2296_v31, %v2295_v29 }
 0x133   : > { %v1465_v38 = vadd.f32 %v2297_v35, %v2257_v49  ;;  %v1527_v40 = vadd.f32 %v2334_v63, %v1462_v34 }
 0x135   : > { %v2298_v39 = vpop.f32.mrb[24].mxu1  ;;  %v1530_v41 = vadd.f32 %v2337_v3, %v1465_v38 }
 0x136   : > { %v2299_v42 = vpop.f32.mrb[25].mxu1 }
 0x137   : > { %v2300_v43 = vadd.f32 %v2299_v42, %v2298_v39  ;;  %v2301_v44 = vpop.f32.mrb[26].mxu1 }
 0x138   : > { %v2302_v46 = vpop.f32.mrb[27].mxu1 }
 0x139   : > { %v1470_v48 = vadd.f32 %v2300_v43, %v2260_v57  ;;  %v2303_v50 = vadd.f32 %v2302_v46, %v2301_v44 }
 0x13b   : > { %v1473_v54 = vadd.f32 %v2303_v50, %v2263_v60  ;;  %v1535_v45 = vadd.f32 %v2340_v13, %v1470_v48 }
 0x13d   : > { %v2304_v58 = vpop.f32.mrb[28].mxu1  ;;  %v1538_v59 = vadd.f32 %v2343_v19, %v1473_v54 }
 0x13e   : > { %v2305_v49 = vpop.f32.mrb[29].mxu1 }
 0x13f   : > { %v2306_v61 = vadd.f32 %v2305_v49, %v2304_v58  ;;  %v2307_v62 = vpop.f32.mrb[30].mxu1 }
 0x140   : > { %v2308_v63 = vpop.f32.mrb[31].mxu1 }
 0x141   : > { %v1478_v0 = vadd.f32 %v2306_v61, %v2266_v5  ;;  %v2309_v1 = vadd.f32 %v2308_v63, %v2307_v62  ;;  %v2413_v5 = vpop.f32.mrb[21].mxu0 }
 0x142   : > { %v2415_v21 = vpop.f32.mrb[22].mxu0 }
 0x143   : > { %v1481_v2 = vadd.f32 %v2309_v1, %v2269_v8  ;;  %v1543_v3 = vadd.f32 %v2346_v32, %v1478_v0  ;;  %v2414_v8 = vadd.f32 %v2413_v5, %v2412_v17  ;;  %v2416_v26 = vpop.f32.mrb[23].mxu0 }
 0x144   : > { %v2417_v27 = vadd.f32 %v2416_v26, %v2415_v21  ;;  %v2418_v33 = vpop.f32.mrb[24].mxu0 }
 0x145   : > { %v1546_v4 = vadd.f32 %v2349_v37, %v1481_v2  ;;  %v2366_v57 = vpop.f32.mrb[32].mxu1  ;;  %v2419_v35 = vpop.f32.mrb[25].mxu0 }
 0x146   : > { %v2367_v6 = vpop.f32.mrb[33].mxu1  ;;  %v2420_v38 = vadd.f32 %v2419_v35, %v2418_v33  ;;  %v2421_v39 = vpop.f32.mrb[26].mxu0 }
 0x147   : > { %v2368_v7 = vadd.f32 %v2367_v6, %v2366_v57  ;;  %v2369_v9 = vpop.f32.mrb[34].mxu1  ;;  %v2422_v42 = vpop.f32.mrb[27].mxu0 }
 0x148   : > { %v2370_v10 = vpop.f32.mrb[35].mxu1  ;;  %v2423_v44 = vadd.f32 %v2422_v42, %v2421_v39  ;;  %v2424_v51 = vpop.f32.mrb[28].mxu0 }
 0x149   : > { %v1584_v60 = vadd.f32 %v2368_v7, %v1519_v23  ;;  %v2371_v11 = vadd.f32 %v2370_v10, %v2369_v9  ;;  %v2425_v53 = vpop.f32.mrb[29].mxu0 }
 0x14b   : > { %v1587_v12 = vadd.f32 %v2371_v11, %v1522_v25  ;;  %v1649_v13 = vadd.f32 %v2408_v52, %v1584_v60 }
 0x14d   : > { %v2372_v14 = vpop.f32.mrb[36].mxu1  ;;  %v1652_v15 = vadd.f32 %v2411_v56, %v1587_v12  ;;  %v2426_v56 = vadd.f32 %v2425_v53, %v2424_v51 }
 0x14e   : > { %v2373_v16 = vpop.f32.mrb[37].mxu1 }
 0x14f   : > { %v2374_v18 = vadd.f32 %v2373_v16, %v2372_v14  ;;  %v2375_v19 = vpop.f32.mrb[38].mxu1 }
 0x150   : > { %v2376_v20 = vpop.f32.mrb[39].mxu1 }
 0x151   : > { %v1592_v22 = vadd.f32 %v2374_v18, %v1527_v40  ;;  %v2377_v24 = vadd.f32 %v2376_v20, %v2375_v19 }
 0x153   : > { %v1595_v28 = vadd.f32 %v2377_v24, %v1530_v41  ;;  %v1657_v29 = vadd.f32 %v2414_v8, %v1592_v22 }
 0x155   : > { %v3020_v23 = vadd.f32 %v2417_v27, %v1595_v28  ;;  %v2378_v25 = vpop.f32.mrb[40].mxu1 }
 0x156   : > { %v2379_v30 = vpop.f32.mrb[41].mxu1 }
 0x157   : > { %v2380_v31 = vadd.f32 %v2379_v30, %v2378_v25  ;;  %v2381_v32 = vpop.f32.mrb[42].mxu1 }
 0x158   : > { %v2382_v34 = vpop.f32.mrb[43].mxu1 }
 0x159   : > { %v1600_v36 = vadd.f32 %v2380_v31, %v1535_v45  ;;  %v2383_v37 = vadd.f32 %v2382_v34, %v2381_v32  ;;  %v2427_v45 = vpop.f32.mrb[30].mxu0 }
 0x15a   : > { %v2428_v58 = vpop.f32.mrb[31].mxu0 }
 0x15b   : > { %v1603_v40 = vadd.f32 %v2383_v37, %v1538_v59  ;;  %v1665_v43 = vadd.f32 %v2420_v38, %v1600_v36  ;;  %v2429_v59 = vadd.f32 %v2428_v58, %v2427_v45  ;;  %v1778_v57 = vpop.f32.mrb[32].mxu0 }
 0x15c   : > { %v1780_v7 = vpop.f32.mrb[33].mxu0 }
 0x15d   : > { %v3022_v46 = vadd.f32 %v2423_v44, %v1603_v40  ;;  %v2384_v41 = vpop.f32.mrb[44].mxu1 }
 0x15e   : > { %v2385_v47 = vpop.f32.mrb[45].mxu1 }
 0x15f   : > { %v2386_v48 = vadd.f32 %v2385_v47, %v2384_v41  ;;  %v2387_v50 = vpop.f32.mrb[46].mxu1 }
 0x160   : > { %v2388_v52 = vpop.f32.mrb[47].mxu1 }
 0x161   : > { %v1608_v54 = vadd.f32 %v2386_v48, %v1543_v3  ;;  %v2389_v55 = vadd.f32 %v2388_v52, %v2387_v50  ;;  %v1781_v3 = vpop.f32.mrb[34].mxu0 }
 0x162   : > { %v1783_v60 = vpop.f32.mrb[35].mxu0 }
 0x163   : > { %v1611_v49 = vadd.f32 %v2389_v55, %v1546_v4  ;;  %v3024_v61 = vadd.f32 %v2426_v56, %v1608_v54  ;;  %v1786_v5 = vpop.f32.mrb[36].mxu0 }
 0x164   : > { %v1788_v8 = vpop.f32.mrb[37].mxu0 }
 0x165   : > { %v3026_v62 = vadd.f32 %v2429_v59, %v1611_v49  ;;  %v2446_v63 = vpop.f32.mrb[48].mxu1  ;;  %v1789_v22 = vpop.f32.mrb[38].mxu0 }
 0x166   : > { %v2447_v0 = vpop.f32.mrb[49].mxu1 }
 0x167   : > { %v2448_v1 = vadd.f32 %v2447_v0, %v2446_v63  ;;  %v2449_v2 = vpop.f32.mrb[50].mxu1 }
 0x168   : > { %v2450_v6 = vpop.f32.mrb[51].mxu1 }
 0x169   : > { %v2451_v9 = vadd.f32 %v2450_v6, %v2449_v2  ;;  %v1714_v10 = vadd.f32 %v2448_v1, %v1649_v13 }
 0x16b   : > { %v3028_v11 = vadd.f32 %v1778_v57, %v1714_v10  ;;  %v1717_v4 = vadd.f32 %v2451_v9, %v1652_v15  ;;  %v1791_v15 = vpop.f32.mrb[39].mxu0 }
 0x16c   : > { %v1794_v34 = vpop.f32.mrb[40].mxu0 }
 0x16d   : > { %v3030_v12 = vadd.f32 %v1781_v3, %v1717_v4  ;;  %v2452_v14 = vpop.f32.mrb[52].mxu1  ;;  %v1810_v16 = vsel %vm1809_vm1, %v3028_v11, 0.0 }
 0x16e   : > { %v2453_v17 = vpop.f32.mrb[53].mxu1  ;;  %1811 = vadd.xlane.f32.xlu0 %v1810_v16 }
 0x16f   : > { %v2454_v18 = vadd.f32 %v2453_v17, %v2452_v14  ;;  %v2455_v19 = vpop.f32.mrb[54].mxu1  ;;  %v1813_v24 = vsel %vm1809_vm1, %v3030_v12, 0.0 }
 0x170   : > { %v2456_v20 = vpop.f32.mrb[55].mxu1 }
 0x171   : > { %v2457_v13 = vadd.f32 %v2456_v20, %v2455_v19  ;;  %v1722_v21 = vadd.f32 %v2454_v18, %v1657_v29  ;;  %v1796_v29 = vpop.f32.mrb[41].mxu0 }
 0x172   : > { %1814 = vadd.xlane.f32.xlu0 %v1813_v24  ;;  %v1797_v38 = vpop.f32.mrb[42].mxu0 }
 0x173   : > { %v1787_v26 = vadd.f32 %v1786_v5, %v1722_v21  ;;  %v1725_v27 = vadd.f32 %v2457_v13, %v3020_v23  ;;  %v1799_v42 = vpop.f32.mrb[43].mxu0 }
 0x174   : > { %v1802_v52 = vpop.f32.mrb[44].mxu0 }
 0x175   : > { %v1790_v28 = vadd.f32 %v1789_v22, %v1725_v27  ;;  %v2458_v25 = vpop.f32.mrb[56].mxu1  ;;  %v1816_v30 = vsel %vm1809_vm1, %v1787_v26, 0.0  ;;  %v1804_v54 = vpop.f32.mrb[45].mxu0 }
 0x176   : > { %v2459_v31 = vpop.f32.mrb[57].mxu1  ;;  %1817 = vadd.xlane.f32.xlu1 %v1816_v30  ;;  %v1805_v45 = vpop.f32.mrb[46].mxu0 }
 0x177   : > { %v2460_v32 = vadd.f32 %v2459_v31, %v2458_v25  ;;  %v2461_v33 = vpop.f32.mrb[58].mxu1  ;;  %v1819_v39 = vsel %vm1809_vm1, %v1790_v28, 0.0  ;;  %v1807_v58 = vpop.f32.mrb[47].mxu0 }
 0x178   : > { %v2462_v35 = vpop.f32.mrb[59].mxu1 }
 0x179   : > { %v2463_v36 = vadd.f32 %v2462_v35, %v2461_v33  ;;  %v1730_v37 = vadd.f32 %v2460_v32, %v1665_v43 }
 0x17a   : > { %1820 = vadd.xlane.f32.xlu1 %v1819_v39 }
 0x17b   : > { %v1795_v40 = vadd.f32 %v1794_v34, %v1730_v37  ;;  %v1733_v23 = vadd.f32 %v2463_v36, %v3022_v46 }
 0x17d   : > { %v1798_v44 = vadd.f32 %v1797_v38, %v1733_v23  ;;  %v2464_v41 = vpop.f32.mrb[60].mxu1  ;;  %v1822_v47 = vsel %vm1809_vm1, %v1795_v40, 0.0 }
 0x17e   : > { %v2465_v48 = vpop.f32.mrb[61].mxu1  ;;  %1823 = vadd.xlane.f32.xlu0 %v1822_v47 }
 0x17f   : > { %v2466_v50 = vadd.f32 %v2465_v48, %v2464_v41  ;;  %v2467_v51 = vpop.f32.mrb[62].mxu1  ;;  %v1825_v53 = vsel %vm1809_vm1, %v1798_v44, 0.0 }
 0x180   : > { %v2468_v43 = vpop.f32.mrb[63].mxu1  ;;  %1826 = vadd.xlane.f32.xlu1 %v1825_v53 }
 0x181   : > { %v2469_v55 = vadd.f32 %v2468_v43, %v2467_v51  ;;  %v1738_v56 = vadd.f32 %v2466_v50, %v3024_v61 }
 0x183   : > { %v1803_v46 = vadd.f32 %v1802_v52, %v1738_v56  ;;  %v1741_v49 = vadd.f32 %v2469_v55, %v3026_v62 }
 0x185   : > { %v1806_v59 = vadd.f32 %v1805_v45, %v1741_v49  ;;  %v1828_v63 = vsel %vm1809_vm1, %v1803_v46, 0.0 }
 0x186   : > { %1829 = vadd.xlane.f32.xlu0 %v1828_v63 }
 0x187   : > { %v1831_v0 = vsel %vm1809_vm1, %v1806_v59, 0.0 }
 0x188   : > { %1832 = vadd.xlane.f32.xlu1 %v1831_v0 }
 0x1fb   : > { %v1812_v1 = vpop.xlane.xlu0 %1811 }
 0x1fc   : > { %v1835_v2 = vmul.f32 0.5, %v1812_v1 }
 0x1fe   : > { %v1843_v57 = vsub.f32 %v3028_v11, %v1835_v2 }
 0x1ff   : > { %v1815_v6 = vpop.xlane.xlu0 %1814 }
 0x200   : > { %v1836_v7 = vmul.f32 0.5, %v1815_v6  ;;  %v1851_v9 = vmul.f32 %v1843_v57, %v1843_v57 }
 0x202   : > { %v3048_v61 = vsub.f32 %v3030_v12, %v1836_v7  ;;  %v1859_v10 = vsel %vm1809_vm1, %v1851_v9, 0.0 }
 0x203   : > { %v1818_v62 = vpop.xlane.xlu1 %1817  ;;  %1860 = vadd.xlane.f32.xlu0 %v1859_v10 }
 0x204   : > { %v1837_v3 = vmul.f32 0.5, %v1818_v62  ;;  %v1852_v60 = vmul.f32 %v3048_v61, %v3048_v61 }
 0x206   : > { %v3053_v4 = vsub.f32 %v1787_v26, %v1837_v3  ;;  %v1862_v14 = vsel %vm1809_vm1, %v1852_v60, 0.0 }
 0x207   : > { %v1821_v16 = vpop.xlane.xlu1 %1820  ;;  %1863 = vadd.xlane.f32.xlu1 %v1862_v14 }
 0x208   : > { %v1838_v11 = vmul.f32 0.5, %v1821_v16  ;;  %v1853_v17 = vmul.f32 %v3053_v4, %v3053_v4 }
 0x20a   : > { %v3058_v12 = vsub.f32 %v1790_v28, %v1838_v11  ;;  %v1865_v18 = vsel %vm1809_vm1, %v1853_v17, 0.0 }
 0x20b   : > { %1866 = vadd.xlane.f32.xlu0 %v1865_v18  ;;  %v1824_v19 = vpop.xlane.xlu0 %1823 }
 0x20c   : > { %v1839_v5 = vmul.f32 0.5, %v1824_v19  ;;  %v1854_v20 = vmul.f32 %v3058_v12, %v3058_v12 }
 0x20d   : > { %v1827_v8 = vpop.xlane.xlu1 %1826 }
 0x20e   : > { %v3063_v13 = vsub.f32 %v1795_v40, %v1839_v5  ;;  %v1840_v21 = vmul.f32 0.5, %v1827_v8  ;;  %v1868_v22 = vsel %vm1809_vm1, %v1854_v20, 0.0 }
 0x20f   : > { %1869 = vadd.xlane.f32.xlu1 %v1868_v22 }
 0x210   : > { %v3066_v24 = vsub.f32 %v1798_v44, %v1840_v21  ;;  %v1855_v15 = vmul.f32 %v3063_v13, %v3063_v13 }
 0x212   : > { %v1871_v26 = vsel %vm1809_vm1, %v1855_v15, 0.0  ;;  %v1856_v27 = vmul.f32 %v3066_v24, %v3066_v24 }
 0x213   : > { %1872 = vadd.xlane.f32.xlu0 %v1871_v26  ;;  %v1830_v28 = vpop.xlane.xlu0 %1829 }
 0x214   : > { %v1841_v25 = vmul.f32 0.5, %v1830_v28  ;;  %v1874_v30 = vsel %vm1809_vm1, %v1856_v27, 0.0 }
 0x215   : > { %v1833_v31 = vpop.xlane.xlu1 %1832  ;;  %1875 = vadd.xlane.f32.xlu1 %v1874_v30 }
 0x216   : > { %v3074_v32 = vsub.f32 %v1803_v46, %v1841_v25  ;;  %v1842_v33 = vmul.f32 0.5, %v1833_v31 }
 0x218   : > { %v3076_v34 = vsub.f32 %v1806_v59, %v1842_v33  ;;  %v1857_v35 = vmul.f32 %v3074_v32, %v3074_v32 }
 0x21a   : > { %v1877_v29 = vsel %vm1809_vm1, %v1857_v35, 0.0  ;;  %v1858_v36 = vmul.f32 %v3076_v34, %v3076_v34 }
 0x21b   : > { %1878 = vadd.xlane.f32.xlu0 %v1877_v29 }
 0x21c   : > { %v1880_v37 = vsel %vm1809_vm1, %v1858_v36, 0.0 }
 0x21d   : > { %1881 = vadd.xlane.f32.xlu1 %v1880_v37 }
 0x290   : > { %v1861_v38 = vpop.xlane.xlu0 %1860 }
 0x291   : > { %v1883_v39 = vmul.f32 0.5, %v1861_v38 }
 0x293   : > { %v1891_v42 = vadd.f32 1e-05, %v1883_v39 }
 0x294   : > { %v1864_v40 = vpop.xlane.xlu1 %1863 }
 0x295   : > { %2672 = vrsqrt.f32 %v1891_v42  ;;  %v1884_v23 = vmul.f32 0.5, %v1864_v40 }
 0x297   : > { %v1892_v44 = vadd.f32 1e-05, %v1884_v23 }
 0x298   : > { %v1867_v41 = vpop.xlane.xlu0 %1866 }
 0x299   : > { %2674 = vrsqrt.f32 %v1892_v44  ;;  %v1885_v47 = vmul.f32 0.5, %v1867_v41 }
 0x29b   : > { %v1893_v48 = vadd.f32 1e-05, %v1885_v47 }
 0x29c   : > { %v1870_v50 = vpop.xlane.xlu1 %1869 }
 0x29d   : > { %2676 = vrsqrt.f32 %v1893_v48  ;;  %v1886_v51 = vmul.f32 0.5, %v1870_v50 }
 0x29f   : > { %v2673_v52 = vpop.eup %2672  ;;  %v1894_v53 = vadd.f32 1e-05, %v1886_v51 }
 0x2a0   : > { %v1907_v43 = vmul.f32 %v2673_v52, %v1843_v57  ;;  %v1873_v54 = vpop.xlane.xlu0 %1872 }
 0x2a1   : > { %2678 = vrsqrt.f32 %v1894_v53  ;;  %v1887_v55 = vmul.f32 0.5, %v1873_v54 }
 0x2a2   : > { %vm1915_vm2 = vcmp.ge.f32.partialorder %v1907_v43, 0.0  ;;  %v1923_v56 = vmul.f32 0.01, %v1907_v43  ;;  %v1876_v45 = vpop.xlane.xlu1 %1875 }
 0x2a3   : > { %v2675_v58 = vpop.eup %2674  ;;  %v1895_v46 = vadd.f32 1e-05, %v1887_v55  ;;  %v1888_v49 = vmul.f32 0.5, %v1876_v45 }
 0x2a4   : > { %v1931_v59 = vsel %vm1915_vm2, %v1907_v43, %v1923_v56  ;;  %v1908_v63 = vmul.f32 %v2675_v58, %v3048_v61 }
 0x2a5   : > { %v2222_v0 = vpack.c.bf16 %v1931_v59, %v1931_v59  ;;  %2680 = vrsqrt.f32 %v1895_v46  ;;  %v1896_v1 = vadd.f32 1e-05, %v1888_v49 }
 0x2a6   : > { %vm1916_vm4 = vcmp.ge.f32.partialorder %v1908_v63, 0.0  ;;  %v1924_v2 = vmul.f32 0.01, %v1908_v63 }
 0x2a7   : > { %v2677_v57 = vpop.eup %2676  ;;  %1972 = vst.msk [vmem:[%s3088_s29] sm:$0xf] %vm1971_vm3, %v2222_v0  ;;  %2682 = vrsqrt.f32 %v1896_v1 }
 0x2a8   : > { %v1932_v6 = vsel %vm1916_vm4, %v1908_v63, %v1924_v2  ;;  %v1909_v7 = vmul.f32 %v2677_v57, %v3053_v4  ;;  %v1879_v9 = vpop.xlane.xlu0 %1878 }
 0x2a9   : > { %v2223_v10 = vpack.c.bf16 %v1932_v6, %v1932_v6  ;;  %v1889_v62 = vmul.f32 0.5, %v1879_v9 }
 0x2aa   : > { %vm1917_vm5 = vcmp.ge.f32.partialorder %v1909_v7, 0.0  ;;  %v1925_v3 = vmul.f32 0.01, %v1909_v7  ;;  %v1882_v61 = vpop.xlane.xlu1 %1881 }
 0x2ab   : > { %v2679_v60 = vpop.eup %2678  ;;  %1973 = vst.msk [vmem:[%s3088_s29 + $0x4] sm:$0xf] %vm1971_vm3, %v2223_v10  ;;  %v1897_v14 = vadd.f32 1e-05, %v1889_v62  ;;  %v1890_v16 = vmul.f32 0.5, %v1882_v61 }
 0x2ac   : > { %v1933_v11 = vsel %vm1917_vm5, %v1909_v7, %v1925_v3  ;;  %v1910_v17 = vmul.f32 %v2679_v60, %v3058_v12 }
 0x2ad   : > { %v2224_v18 = vpack.c.bf16 %v1933_v11, %v1933_v11  ;;  %2684 = vrsqrt.f32 %v1897_v14  ;;  %v1898_v19 = vadd.f32 1e-05, %v1890_v16 }
 0x2ae   : > { %vm1918_vm6 = vcmp.ge.f32.partialorder %v1910_v17, 0.0  ;;  %v1926_v4 = vmul.f32 0.01, %v1910_v17 }
 0x2af   : > { %v2681_v5 = vpop.eup %2680  ;;  %1974 = vst.msk [vmem:[%s3088_s29 + $0x8] sm:$0xf] %vm1971_vm3, %v2224_v18  ;;  %2686 = vrsqrt.f32 %v1898_v19 }
 0x2b0   : > { %v1934_v20 = vsel %vm1918_vm6, %v1910_v17, %v1926_v4  ;;  %v1911_v8 = vmul.f32 %v2681_v5, %v3063_v13 }
 0x2b1   : > { %v2683_v21 = vpop.eup %2682  ;;  %v2225_v22 = vpack.c.bf16 %v1934_v20, %v1934_v20 }
 0x2b2   : > { %vm1919_vm7 = vcmp.ge.f32.partialorder %v1911_v8, 0.0  ;;  %v1927_v15 = vmul.f32 0.01, %v1911_v8  ;;  %v1912_v12 = vmul.f32 %v2683_v21, %v3066_v24 }
 0x2b3   : > { %1975 = vst.msk [vmem:[%s3088_s29 + $0xc] sm:$0xf] %vm1971_vm3, %v2225_v22 }
 0x2b4   : > { %v1935_v26 = vsel %vm1919_vm7, %v1911_v8, %v1927_v15  ;;  %vm1920_vm8 = vcmp.ge.f32.partialorder %v1912_v12, 0.0  ;;  %v1928_v27 = vmul.f32 0.01, %v1912_v12 }
 0x2b5   : > { %v2226_v28 = vpack.c.bf16 %v1935_v26, %v1935_v26 }
 0x2b6   : > { %v1936_v25 = vsel %vm1920_vm8, %v1912_v12, %v1928_v27 }
 0x2b7   : > { %v2685_v30 = vpop.eup %2684  ;;  %1976 = vst.msk [vmem:[%s3088_s29 + $0x10] sm:$0xf] %vm1971_vm3, %v2226_v28  ;;  %v2227_v13 = vpack.c.bf16 %v1936_v25, %v1936_v25 }
 0x2b8   : > { %v1913_v31 = vmul.f32 %v2685_v30, %v3074_v32 }
 0x2b9   : > { %v2687_v33 = vpop.eup %2686  ;;  %1977 = vst.msk [vmem:[%s3088_s29 + $0x14] sm:$0xf] %vm1971_vm3, %v2227_v13 }
 0x2ba   : > { %vm1921_vm9 = vcmp.ge.f32.partialorder %v1913_v31, 0.0  ;;  %v1929_v24 = vmul.f32 0.01, %v1913_v31  ;;  %v1914_v35 = vmul.f32 %v2687_v33, %v3076_v34 }
 0x2bc   : > { %v1937_v29 = vsel %vm1921_vm9, %v1913_v31, %v1929_v24  ;;  %vm1922_vm10 = vcmp.ge.f32.partialorder %v1914_v35, 0.0  ;;  %v1930_v36 = vmul.f32 0.01, %v1914_v35 }
 0x2bd   : > { %v2228_v37 = vpack.c.bf16 %v1937_v29, %v1937_v29 }
 0x2be   : > { %v1938_v38 = vsel %vm1922_vm10, %v1914_v35, %v1930_v36 }
 0x2bf   : > { %1978 = vst.msk [vmem:[%s3088_s29 + $0x18] sm:$0xf] %vm1971_vm3, %v2228_v37  ;;  %v2229_v39 = vpack.c.bf16 %v1938_v38, %v1938_v38 }
 0x2c1   : > { %1979 = vst.msk [vmem:[%s3088_s29 + $0x1c] sm:$0xf] %vm1971_vm3, %v2229_v39 }
 0x2c2 PF: > { %s12_s9 = sadd.s32 1, %s2694_s9  }
 0x2c3   : > { %p9_p4 = scmp.ge.s32.totalorder %s12_s9, 4  }
 0x2c5   :  { %11 = sbr.rel (!%p9_p4) target bundleno = 1 (0x1), region = 58 }

// kernel: nnunet3d_forward.33
= control target key start
LH: loop header
LB: loop body
LE: loop exit
PB: predicated region body
PF: predicated region fallthrough
CT: control target
= control target key end

     0   :  { %s866_s12 = smov 0   ;;  %s868_s13 = smov 0   ;;  %s1020_s0 = inlined_call_operand.vmem [shape: bf16[128,64], index: 0, kind: input, shape index: {}]   ;;  %s1021_s1 = inlined_call_operand.vmem [shape: bf16[2,64,2], index: 1, kind: input, shape index: {}]   ;;  %s1022_s2 = inlined_call_operand.vmem [shape: f32[128,1], index: 2, kind: input, shape index: {}]   ;;  %s1023_s3 = inlined_call_operand.vmem [shape: bf16[2,128,2], index: 3, kind: output, shape index: {}]  }
   0x1   :  { %s870_s14 = smov 0  }
   0x2 LB: > { %s25_s15 = sadd.s32 1, %s839_s13  ;;  %p677_p0 = scmp.ge.s32.totalorder %s843_s14, 1  ;;  %s843_s14 = sphi %s870_s14, %s13_s14   ;;  %s839_s13 = sphi %s868_s13, %s1025_s13   ;;  %s835_s12 = sphi %s866_s12, %s1024_s12  }
   0x3   : > { %p27_p1 = scmp.ge.s32.totalorder %s25_s15, 2  ;;  %p156_p2 = scmp.lt.s32.totalorder %s843_s14, 3 }
   0x5   : > { %s1027_s15 = smov (%p27_p1, %s25_s15), 0  ;;  %p157_p3 = pnand %p677_p0, %p156_p2 }
   0x6   : > { %p186_p4 = scmp.lt.s32.totalorder (!%p157_p3), %s835_s12, 1  ;;  %v813_v0 = vld [vmem:[%s1020_s0] sm:$0xff] (!%p157_p3)   ;;  %vm387_vm0 = vcmask (!%p157_p3), 523264   ;;  %v845_v2 = vmov (!%p157_p3), 0   ;;  %v229_v6 = vld [vmem:[%s1022_s2 + $0x10] sm:$0xff] (!%p157_p3)  ;;  %v230_v9 = vld [vmem:[%s1022_s2 + $0x18] sm:$0xff] (!%p157_p3) }
   0x7   : > { %160 = sbr.rel (%p157_p3) target bundleno = 262 (0x106), region = 32  ;;  %v814_v1 = vld [vmem:[%s1020_s0 + $0x20] sm:$0xff] (!%p157_p3)   ;;  %758 = vmatprep.mubr.msk.bf16.mxu0 (!%p157_p3), %vm387_vm0, %v813_v0  ;;  %808 = vset.pattern.permute.xlu1 (!%p157_p3), %v845_v2  ;;  %v228_v10 = vld [vmem:[%s1022_s2 + $0x8] sm:$0xff] (!%p157_p3)  ;;  %v817_v15 = vld [vmem:[%s1020_s0 + $0x10] sm:$0xff] (!%p157_p3)   ;;  %vm573_vm1 = vcmask (!%p157_p3), 11264  }
   0x8   : > { %766 = vmatprep.mubr.msk.bf16.mxu1 (!%p157_p3), %vm387_vm0, %v814_v1  ;;  %807 = vset.pattern.permute.xlu0 (!%p157_p3), %v845_v2  ;;  %v227_v7 = vld [vmem:[%s1022_s2] sm:$0xff] (!%p157_p3)  ;;  %v815_v11 = vld [vmem:[%s1020_s0 + $0x8] sm:$0xff] (!%p157_p3)   ;;  %v818_v16 = vld [vmem:[%s1020_s0 + $0x30] sm:$0xff] (!%p157_p3)  }
   0x9   : > { %255 = vperm.xlu1 (!%p157_p3), %808, %v229_v6   ;;  %245 = vperm.xlu0 (!%p157_p3), %807, %v227_v7   ;;  %v816_v12 = vld [vmem:[%s1020_s0 + $0x28] sm:$0xff] (!%p157_p3)   ;;  %v231_v14 = vld [vmem:[%s1022_s2 + $0x20] sm:$0xff] (!%p157_p3)  ;;  %v234_v17 = vld [vmem:[%s1022_s2 + $0x38] sm:$0xff] (!%p157_p3) }
   0xa   : > { %v232_v13 = vld [vmem:[%s1022_s2 + $0x28] sm:$0xff] (!%p157_p3)  ;;  %v233_v18 = vld [vmem:[%s1022_s2 + $0x30] sm:$0xff] (!%p157_p3)  ;;  %v819_v19 = vld [vmem:[%s1020_s0 + $0x18] sm:$0xff] (!%p157_p3)  }
   0xb   : > { %v820_v20 = vld [vmem:[%s1020_s0 + $0x38] sm:$0xff] (!%p157_p3)   ;;  %v236_v21 = vld [vmem:[%s1022_s2 + $0x48] sm:$0xff] (!%p157_p3)  ;;  %v235_v22 = vld [vmem:[%s1022_s2 + $0x40] sm:$0xff] (!%p157_p3) }
   0xc   : > { %v238_v23 = vld [vmem:[%s1022_s2 + $0x58] sm:$0xff] (!%p157_p3)  ;;  %v237_v24 = vld [vmem:[%s1022_s2 + $0x50] sm:$0xff] (!%p157_p3)  ;;  %v240_v25 = vld [vmem:[%s1022_s2 + $0x68] sm:$0xff] (!%p157_p3) }
   0xd   : > { %260 = vperm.xlu1 (!%p157_p3), %808, %v230_v9   ;;  %250 = vperm.xlu0 (!%p157_p3), %807, %v228_v10   ;;  %v239_v26 = vld [vmem:[%s1022_s2 + $0x60] sm:$0xff] (!%p157_p3)  ;;  %v242_v27 = vld [vmem:[%s1022_s2 + $0x78] sm:$0xff] (!%p157_p3)  ;;  %v241_v28 = vld [vmem:[%s1022_s2 + $0x70] sm:$0xff] (!%p157_p3) }
   0xe   : > { %s1029_s12 = smov (!%p186_p4, %s835_s12), 1 }
   0xf   : > { %s720_s20 = sshll.u32 %s1029_s12, 5  ;;  %s721_s22 = sshll.u32 %s1029_s12, 6 }
  0x10   : > { %s193_s23 = scalar_lea.vmem %s1021_s1, %s720_s20  ;;  %s976_s25 = scalar_lea.vmem %s1023_s3, %s721_s22 }
  0x11   : > { %v809_v3 = vld [vmem:[%s193_s23] sm:$0xff]   ;;  %v810_v4 = vld [vmem:[%s193_s23 + $0x8] sm:$0xff]   ;;  %v811_v5 = vld [vmem:[%s193_s23 + $0x10] sm:$0xff]   ;;  %270 = vperm.xlu1 %808, %v232_v13   ;;  %265 = vperm.xlu0 %807, %v231_v14  }
  0x12   : > { %750 = vmatprep.subr.bf16.mxu0 %v809_v3  ;;  %774 = vmatprep.subr.bf16.mxu1 %v809_v3  ;;  %v812_v8 = vld [vmem:[%s193_s23 + $0x18] sm:$0xff]  }
  0x13   : > { %751 = vmatpush3.bf16.msra.mxu0 %v809_v3  ;;  %778 = vmatpush3.bf16.msra.mxu1 %v809_v3 }
  0x14   : > { %752 = vmatprep.subr.bf16.mxu0 %v810_v4  ;;  %775 = vmatprep.subr.bf16.mxu1 %v810_v4 }
  0x15   : > { %280 = vperm.xlu1 %808, %v234_v17   ;;  %275 = vperm.xlu0 %807, %v233_v18  }
  0x17   : > { %753 = vmatpush3.bf16.msra.mxu0 %v810_v4  ;;  %779 = vmatpush3.bf16.msra.mxu1 %v810_v4 }
  0x18   : > { %754 = vmatprep.subr.bf16.mxu0 %v811_v5  ;;  %776 = vmatprep.subr.bf16.mxu1 %v811_v5 }
  0x19   : > { %290 = vperm.xlu1 %808, %v236_v21   ;;  %285 = vperm.xlu0 %807, %v235_v22  }
  0x1b   : > { %755 = vmatpush3.bf16.msra.mxu0 %v811_v5  ;;  %780 = vmatpush3.bf16.msra.mxu1 %v811_v5 }
  0x1c   : > { %756 = vmatprep.subr.bf16.mxu0 %v812_v8  ;;  %777 = vmatprep.subr.bf16.mxu1 %v812_v8 }
  0x1d   : > { %300 = vperm.xlu1 %808, %v238_v23   ;;  %295 = vperm.xlu0 %807, %v237_v24  }
  0x1f   : > { %757 = vmatpush3.bf16.msra.mxu0 %v812_v8  ;;  %781 = vmatpush3.bf16.msra.mxu1 %v812_v8 }
  0x21   : > { %310 = vperm.xlu1 %808, %v240_v25   ;;  %305 = vperm.xlu0 %807, %v239_v26  }
  0x22   : > { %759 = vmatmul.mubr.msk.bf16.vlgmr.msra.gmra.mrb[0].mxu0 %vm387_vm0, %v815_v11  ;;  %767 = vmatmul.mubr.msk.bf16.vlgmr.msra.gmra.mrb[0].mxu1 %vm387_vm0, %v816_v12 }
  0x23   : > { %762 = vmatprep.mubr.msk.bf16.mxu0 %vm387_vm0, %v817_v15  ;;  %770 = vmatprep.mubr.msk.bf16.mxu1 %vm387_vm0, %v818_v16 }
  0x25   : > { %320 = vperm.xlu1 %808, %v242_v27   ;;  %315 = vperm.xlu0 %807, %v241_v28  }
  0x2a   : > { %763 = vmatmul.mubr.msk.bf16.gmra.mrb[4].mxu0 %vm387_vm0, %v819_v19  ;;  %771 = vmatmul.mubr.msk.bf16.gmra.mrb[4].mxu1 %vm387_vm0, %v820_v20 }
  0x88   : > { %v256_v29 = vpop.permute.xlu1 %255  ;;  %v246_v30 = vpop.permute.xlu0 %245 }
  0x8c   : > { %v261_v31 = vpop.permute.xlu1 %260  ;;  %v251_v32 = vpop.permute.xlu0 %250 }
  0x90   : > { %v970_v33 = vpop.permute.xlu1 %270  ;;  %v266_v34 = vpop.permute.xlu0 %265 }
  0x94   : > { %v281_v35 = vpop.permute.xlu1 %280  ;;  %v276_v36 = vpop.permute.xlu0 %275 }
  0x98   : > { %v291_v37 = vpop.permute.xlu1 %290  ;;  %v286_v38 = vpop.permute.xlu0 %285 }
  0x9c   : > { %v301_v39 = vpop.permute.xlu1 %300  ;;  %v296_v40 = vpop.permute.xlu0 %295 }
  0xa0   : > { %v311_v41 = vpop.permute.xlu1 %310  ;;  %v306_v42 = vpop.permute.xlu0 %305 }
  0xa4   : > { %v321_v3 = vpop.permute.xlu1 %320  ;;  %v316_v4 = vpop.permute.xlu0 %315 }
  0xf5   : > { %v760_v43 = vpop.f32.mrb[0].mxu0  ;;  %v768_v44 = vpop.f32.mrb[0].mxu1 }
  0xf6   : > { %v455_v45 = vadd.f32 %v760_v43, %v256_v29  ;;  %v487_v46 = vadd.f32 %v768_v44, %v296_v40  ;;  %v446_v47 = vpop.f32.mrb[1].mxu0  ;;  %v478_v48 = vpop.f32.mrb[1].mxu1 }
  0xf7   : > { %v447_v49 = vadd.f32 %v446_v47, %v246_v30  ;;  %v479_v50 = vadd.f32 %v478_v48, %v286_v38  ;;  %v761_v51 = vpop.f32.mrb[2].mxu0  ;;  %v769_v52 = vpop.f32.mrb[2].mxu1 }
  0xf8   : > { %v724_v53 = vpack.c.bf16 %v455_v45, %v455_v45  ;;  %v732_v54 = vpack.c.bf16 %v487_v46, %v487_v46  ;;  %v458_v55 = vadd.f32 %v761_v51, %v261_v31  ;;  %v490_v56 = vadd.f32 %v769_v52, %v301_v39  ;;  %v449_v57 = vpop.f32.mrb[3].mxu0  ;;  %v481_v58 = vpop.f32.mrb[3].mxu1 }
  0xf9   : > { %v722_v59 = vpack.c.bf16 %v447_v49, %v447_v49  ;;  %v730_v60 = vpack.c.bf16 %v479_v50, %v479_v50  ;;  %v450_v61 = vadd.f32 %v449_v57, %v251_v32  ;;  %v482_v62 = vadd.f32 %v481_v58, %v291_v37 }
  0xfa   : > { %576 = vst.msk [vmem:[%s976_s25 + $0x8] sm:$0xf] %vm573_vm1, %v724_v53  ;;  %584 = vst.msk [vmem:[%s976_s25 + $0x28] sm:$0xf] %vm573_vm1, %v732_v54  ;;  %v725_v63 = vpack.c.bf16 %v458_v55, %v458_v55  ;;  %v733_v0 = vpack.c.bf16 %v490_v56, %v490_v56 }
  0xfb   : > { %574 = vst.msk [vmem:[%s976_s25] sm:$0xf] %vm573_vm1, %v722_v59  ;;  %582 = vst.msk [vmem:[%s976_s25 + $0x20] sm:$0xf] %vm573_vm1, %v730_v60  ;;  %v723_v1 = vpack.c.bf16 %v450_v61, %v450_v61  ;;  %v731_v2 = vpack.c.bf16 %v482_v62, %v482_v62 }
  0xfc   : > { %577 = vst.msk [vmem:[%s976_s25 + $0xc] sm:$0xf] %vm573_vm1, %v725_v63  ;;  %585 = vst.msk [vmem:[%s976_s25 + $0x2c] sm:$0xf] %vm573_vm1, %v733_v0 }
  0xfd   : > { %575 = vst.msk [vmem:[%s976_s25 + $0x4] sm:$0xf] %vm573_vm1, %v723_v1  ;;  %583 = vst.msk [vmem:[%s976_s25 + $0x24] sm:$0xf] %vm573_vm1, %v731_v2  ;;  %v764_v5 = vpop.f32.mrb[4].mxu0  ;;  %v772_v6 = vpop.f32.mrb[4].mxu1 }
  0xfe   : > { %v471_v7 = vadd.f32 %v764_v5, %v276_v36  ;;  %v503_v8 = vadd.f32 %v772_v6, %v316_v4  ;;  %v462_v9 = vpop.f32.mrb[5].mxu0  ;;  %v494_v10 = vpop.f32.mrb[5].mxu1 }
  0xff   : > { %v463_v11 = vadd.f32 %v462_v9, %v266_v34  ;;  %v495_v12 = vadd.f32 %v494_v10, %v306_v42  ;;  %v765_v13 = vpop.f32.mrb[6].mxu0  ;;  %v773_v14 = vpop.f32.mrb[6].mxu1 }
 0x100   : > { %v728_v15 = vpack.c.bf16 %v471_v7, %v471_v7  ;;  %v736_v16 = vpack.c.bf16 %v503_v8, %v503_v8  ;;  %v474_v17 = vadd.f32 %v765_v13, %v281_v35  ;;  %v506_v18 = vadd.f32 %v773_v14, %v321_v3  ;;  %v465_v19 = vpop.f32.mrb[7].mxu0  ;;  %v497_v20 = vpop.f32.mrb[7].mxu1 }
 0x101   : > { %v726_v21 = vpack.c.bf16 %v463_v11, %v463_v11  ;;  %v734_v22 = vpack.c.bf16 %v495_v12, %v495_v12  ;;  %v466_v23 = vadd.f32 %v465_v19, %v970_v33  ;;  %v498_v24 = vadd.f32 %v497_v20, %v311_v41 }
 0x102   : > { %580 = vst.msk [vmem:[%s976_s25 + $0x18] sm:$0xf] %vm573_vm1, %v728_v15  ;;  %588 = vst.msk [vmem:[%s976_s25 + $0x38] sm:$0xf] %vm573_vm1, %v736_v16  ;;  %v729_v25 = vpack.c.bf16 %v474_v17, %v474_v17  ;;  %v737_v26 = vpack.c.bf16 %v506_v18, %v506_v18 }
 0x103   : > { %578 = vst.msk [vmem:[%s976_s25 + $0x10] sm:$0xf] %vm573_vm1, %v726_v21  ;;  %586 = vst.msk [vmem:[%s976_s25 + $0x30] sm:$0xf] %vm573_vm1, %v734_v22  ;;  %v727_v27 = vpack.c.bf16 %v466_v23, %v466_v23  ;;  %v735_v28 = vpack.c.bf16 %v498_v24, %v498_v24 }
 0x104   : > { %581 = vst.msk [vmem:[%s976_s25 + $0x1c] sm:$0xf] %vm573_vm1, %v729_v25  ;;  %589 = vst.msk [vmem:[%s976_s25 + $0x3c] sm:$0xf] %vm573_vm1, %v737_v26 }
 0x105   : > { %579 = vst.msk [vmem:[%s976_s25 + $0x14] sm:$0xf] %vm573_vm1, %v727_v27  ;;  %587 = vst.msk [vmem:[%s976_s25 + $0x34] sm:$0xf] %vm573_vm1, %v735_v28 }
 0x106 PF: > { %s13_s14 = sadd.s32 1, %s843_s14   ;;  %s1024_s12 = smov %s839_s13 }
 0x107   : > { %p10_p5 = scmp.ge.s32.totalorder %s13_s14, 4   ;;  %s1025_s13 = smov %s1027_s15 }
 0x109   :  { %12 = sbr.rel (!%p10_p5) target bundleno = 2 (0x2), region = 62 }

// kernel: nnunet3d_forward.34
= control target key start
LH: loop header
LB: loop body
LE: loop exit
PB: predicated region body
PF: predicated region fallthrough
CT: control target
= control target key end

     0   :  { %s2184_s9 = smov 0   ;;  %s2425_s0 = inlined_call_operand.vmem [shape: bf16[32,1728], index: 0, kind: input, shape index: {}]   ;;  %s2426_s1 = inlined_call_operand.vmem [shape: bf16[2,1728,8], index: 1, kind: input, shape index: {}]   ;;  %s2427_s2 = inlined_call_operand.vmem [shape: bf16[2,32,8], index: 2, kind: output, shape index: {}]  }
   0x1 LB: > { %s1667_s10 = sadd.s32 4294967295, %s2166_s9   ;;  %p1671_p0 = scmp.ge.s32.totalorder %s2166_s9, 1  ;;  %s2166_s9 = sphi %s2184_s9, %s12_s9  }
   0x2   : > { %p112_p1 = scmp.lt.s32.totalorder %s2166_s9, 3 }
   0x4   : > { %p113_p2 = pnand %p1671_p0, %p112_p1 }
   0x5   : > { %p134_p3 = scmp.lt.s32.totalorder (!%p113_p2), %s1667_s10, 1  ;;  %v2027_v0 = vld [vmem:[%s2425_s0 + $0x4] ss:$56 sps:$4 sm:$0xff] (!%p113_p2)   ;;  %v2049_v1 = vld [vmem:[%s2425_s0 + $0x14] ss:$56 sps:$4 sm:$0xff] (!%p113_p2)   ;;  %vm1175_vm0 = vcmask (!%p113_p2), 523264  }
   0x6   : > { %116 = sbr.rel (%p113_p2) target bundleno = 692 (0x2b4), region = 28  ;;  %1214 = vmatprep.mubr.bf16.mxu1 (!%p113_p2), %v2027_v0  ;;  %1312 = vmatprep.mubr.bf16.mxu0 (!%p113_p2), %v2049_v1  ;;  %v2025_v28 = vld [vmem:[%s2425_s0] ss:$56 sps:$4 sm:$0xff] (!%p113_p2)   ;;  %v2053_v31 = vld [vmem:[%s2425_s0 + $0x74] ss:$56 sps:$4 sm:$0xff] (!%p113_p2)   ;;  %vm1525_vm1 = vcmask (!%p113_p2), 64512  }
   0x7   : > { %v2056_v39 = vld [vmem:[%s2425_s0 + $0x70] ss:$56 sps:$4 sm:$0xff] (!%p113_p2)   ;;  %v2068_v41 = vld [vmem:[%s2425_s0 + $0xc] ss:$56 sps:$4 sm:$0xff] (!%p113_p2)   ;;  %vm1607_vm3 = vcmask (!%p113_p2), 60416  }
   0x8   : > { %v2047_v44 = vld [vmem:[%s2425_s0 + $0x10] ss:$56 sps:$4 sm:$0xff] (!%p113_p2)  }
   0x9   : > { %v2066_v1 = vld [vmem:[%s2425_s0 + $0x8] ss:$56 sps:$4 sm:$0xff] (!%p113_p2)  }
   0xd   : > { %s2429_s10 = smov (!%p134_p3, %s1667_s10), 1 }
   0xe   : > { %s1992_s15 = smul.u32 864, %s2429_s10  ;;  %s1819_s20 = sshll.u32 %s2429_s10, 4 }
   0xf   : > { %s143_s23 = scalar_lea.vmem %s2427_s2, %s1819_s20 }
  0x10   : > { %s2204_s18 = scalar_lea.vmem %s2426_s1, %s1992_s15 }
  0x11   : > { %v2002_v2 = vld [vmem:[%s2204_s18 + $0x40] sm:$0xff]   ;;  %v2004_v4 = vld [vmem:[%s2204_s18 + $0x48] sm:$0xff]   ;;  %v2006_v6 = vld [vmem:[%s2204_s18 + $0x50] sm:$0xff]  }
  0x12   : > { %v2003_v3 = vld [vmem:[%s2204_s18] sm:$0xff]   ;;  %1824 = vmatprep.subr.bf16.mxu1 %v2002_v2  ;;  %v2005_v5 = vld [vmem:[%s2204_s18 + $0x8] sm:$0xff]   ;;  %v2007_v7 = vld [vmem:[%s2204_s18 + $0x10] sm:$0xff]  }
  0x13   : > { %1825 = vmatpush3.bf16.msra.mxu1 %v2003_v3  ;;  %v2008_v8 = vld [vmem:[%s2204_s18 + $0x58] sm:$0xff]   ;;  %v2012_v10 = vld [vmem:[%s2204_s18 + $0x140] sm:$0xff]   ;;  %v2016_v14 = vld [vmem:[%s2204_s18 + $0x148] sm:$0xff]  }
  0x14   : > { %1826 = vmatprep.subr.bf16.mxu1 %v2004_v4  ;;  %v2009_v9 = vld [vmem:[%s2204_s18 + $0x18] sm:$0xff]   ;;  %v2013_v11 = vld [vmem:[%s2204_s18 + $0x100] sm:$0xff]   ;;  %1880 = vmatprep.subr.bf16.mxu0 %v2012_v10  ;;  %v2017_v15 = vld [vmem:[%s2204_s18 + $0x108] sm:$0xff]  }
  0x15   : > { %v2010_v12 = vld [vmem:[%s2204_s18 + $0x60] sm:$0xff]   ;;  %1881 = vmatpush3.bf16.msra.mxu0 %v2013_v11  ;;  %v2014_v16 = vld [vmem:[%s2204_s18 + $0x68] sm:$0xff]   ;;  %v2020_v18 = vld [vmem:[%s2204_s18 + $0x150] sm:$0xff]  }
  0x16   : > { %v2011_v13 = vld [vmem:[%s2204_s18 + $0x20] sm:$0xff]   ;;  %1882 = vmatprep.subr.bf16.mxu0 %v2016_v14  ;;  %v2015_v17 = vld [vmem:[%s2204_s18 + $0x28] sm:$0xff]   ;;  %v2021_v19 = vld [vmem:[%s2204_s18 + $0x110] sm:$0xff]  }
  0x17   : > { %1827 = vmatpush3.bf16.msra.mxu1 %v2005_v5  ;;  %v2018_v20 = vld [vmem:[%s2204_s18 + $0x70] sm:$0xff]   ;;  %v2024_v22 = vld [vmem:[%s2204_s18 + $0x158] sm:$0xff]   ;;  %v2031_v26 = vld [vmem:[%s2204_s18 + $0x160] sm:$0xff]  }
  0x18   : > { %1828 = vmatprep.subr.bf16.mxu1 %v2006_v6  ;;  %v2019_v21 = vld [vmem:[%s2204_s18 + $0x30] sm:$0xff]   ;;  %v2028_v23 = vld [vmem:[%s2204_s18 + $0x118] sm:$0xff]   ;;  %v2032_v27 = vld [vmem:[%s2204_s18 + $0x120] sm:$0xff]  }
  0x19   : > { %1883 = vmatpush3.bf16.msra.mxu0 %v2017_v15  ;;  %v2022_v24 = vld [vmem:[%s2204_s18 + $0x78] sm:$0xff]   ;;  %v2029_v29 = vld [vmem:[%s2204_s18 + $0xc0] sm:$0xff]   ;;  %v2035_v32 = vld [vmem:[%s2204_s18 + $0x168] sm:$0xff]  }
  0x1a   : > { %1884 = vmatprep.subr.bf16.mxu0 %v2020_v18  ;;  %v2023_v25 = vld [vmem:[%s2204_s18 + $0x38] sm:$0xff]   ;;  %v2030_v30 = vld [vmem:[%s2204_s18 + $0x80] sm:$0xff]   ;;  %v2036_v33 = vld [vmem:[%s2204_s18 + $0x128] sm:$0xff]  }
  0x1b   : > { %1829 = vmatpush3.bf16.msra.mxu1 %v2007_v7  ;;  %v2033_v34 = vld [vmem:[%s2204_s18 + $0xc8] sm:$0xff]   ;;  %v2039_v36 = vld [vmem:[%s2204_s18 + $0x170] sm:$0xff]   ;;  %v2043_v42 = vld [vmem:[%s2204_s18 + $0x178] sm:$0xff]  }
  0x1c   : > { %1830 = vmatprep.subr.bf16.mxu1 %v2008_v8  ;;  %v2034_v35 = vld [vmem:[%s2204_s18 + $0x88] sm:$0xff]   ;;  %v2040_v37 = vld [vmem:[%s2204_s18 + $0x130] sm:$0xff]   ;;  %v2044_v43 = vld [vmem:[%s2204_s18 + $0x138] sm:$0xff]  }
  0x1d   : > { %1885 = vmatpush3.bf16.msra.mxu0 %v2021_v19  ;;  %v2037_v38 = vld [vmem:[%s2204_s18 + $0xd0] sm:$0xff]   ;;  %v2041_v45 = vld [vmem:[%s2204_s18 + $0xd8] sm:$0xff]   ;;  %v2050_v47 = vld [vmem:[%s2204_s18 + $0x240] sm:$0xff]  }
  0x1e   : > { %1886 = vmatprep.subr.bf16.mxu0 %v2024_v22  ;;  %v2038_v40 = vld [vmem:[%s2204_s18 + $0x90] sm:$0xff]   ;;  %v2042_v46 = vld [vmem:[%s2204_s18 + $0x98] sm:$0xff]   ;;  %v2051_v48 = vld [vmem:[%s2204_s18 + $0x200] sm:$0xff]   ;;  %v2168_v22 = vmov 0  }
  0x1f   : > { %1831 = vmatpush3.bf16.msra.mxu1 %v2009_v9  ;;  %v2045_v49 = vld [vmem:[%s2204_s18 + $0xe0] sm:$0xff]   ;;  %v2057_v51 = vld [vmem:[%s2204_s18 + $0x248] sm:$0xff]   ;;  %v2061_v55 = vld [vmem:[%s2204_s18 + $0x250] sm:$0xff]  }
  0x20   : > { %1832 = vmatprep.subr.bf16.mxu1 %v2010_v12  ;;  %v2046_v50 = vld [vmem:[%s2204_s18 + $0xa0] sm:$0xff]   ;;  %v2058_v52 = vld [vmem:[%s2204_s18 + $0x208] sm:$0xff]   ;;  %v2062_v56 = vld [vmem:[%s2204_s18 + $0x210] sm:$0xff]  }
  0x21   : > { %1887 = vmatpush3.bf16.msra.mxu0 %v2028_v23  ;;  %v2052_v53 = vld [vmem:[%s2204_s18 + $0xe8] sm:$0xff]   ;;  %v2059_v57 = vld [vmem:[%s2204_s18 + $0xf0] sm:$0xff]   ;;  %v2065_v59 = vld [vmem:[%s2204_s18 + $0x258] sm:$0xff]  }
  0x22   : > { %1888 = vmatprep.subr.bf16.mxu0 %v2031_v26  ;;  %v2055_v54 = vld [vmem:[%s2204_s18 + $0xa8] sm:$0xff]   ;;  %v2060_v58 = vld [vmem:[%s2204_s18 + $0xb0] sm:$0xff]   ;;  %v2069_v60 = vld [vmem:[%s2204_s18 + $0x218] sm:$0xff]  }
  0x23   : > { %1833 = vmatpush3.bf16.msra.mxu1 %v2011_v13  ;;  %v2063_v61 = vld [vmem:[%s2204_s18 + $0xf8] sm:$0xff]   ;;  %v2072_v63 = vld [vmem:[%s2204_s18 + $0x260] sm:$0xff]   ;;  %v2076_v5 = vld [vmem:[%s2204_s18 + $0x268] sm:$0xff]  }
  0x24   : > { %1834 = vmatprep.subr.bf16.mxu1 %v2014_v16  ;;  %v2064_v62 = vld [vmem:[%s2204_s18 + $0xb8] sm:$0xff]   ;;  %v2073_v0 = vld [vmem:[%s2204_s18 + $0x220] sm:$0xff]   ;;  %v2079_v6 = vld [vmem:[%s2204_s18 + $0x228] sm:$0xff]  }
  0x25   : > { %1889 = vmatpush3.bf16.msra.mxu0 %v2032_v27  ;;  %v2070_v2 = vld [vmem:[%s2204_s18 + $0x1c0] sm:$0xff]   ;;  %v2077_v4 = vld [vmem:[%s2425_s0 + $0x7c] ss:$56 sps:$4 sm:$0xff]   ;;  %v2074_v7 = vld [vmem:[%s2204_s18 + $0x1c8] sm:$0xff]  }
  0x26   : > { %1890 = vmatprep.subr.bf16.mxu0 %v2035_v32  ;;  %v2071_v3 = vld [vmem:[%s2204_s18 + $0x180] sm:$0xff]   ;;  %v2075_v8 = vld [vmem:[%s2204_s18 + $0x188] sm:$0xff]   ;;  %v2081_v10 = vld [vmem:[%s2204_s18 + $0x1d0] sm:$0xff]  }
  0x27   : > { %1835 = vmatpush3.bf16.msra.mxu1 %v2015_v17  ;;  %v2082_v9 = vld [vmem:[%s2425_s0 + $0x84] ss:$56 sps:$4 sm:$0xff]   ;;  %v2085_v11 = vld [vmem:[%s2425_s0 + $0x80] ss:$56 sps:$4 sm:$0xff]   ;;  %v2086_v12 = vld [vmem:[%s2204_s18 + $0x270] sm:$0xff]  }
  0x28   : > { %1836 = vmatprep.subr.bf16.mxu1 %v2018_v20  ;;  %v2080_v13 = vld [vmem:[%s2425_s0 + $0x78] ss:$56 sps:$4 sm:$0xff]   ;;  %v2092_v20 = vld [vmem:[%s2204_s18 + $0x1e0] sm:$0xff]   ;;  %v2098_v26 = vld [vmem:[%s2204_s18 + $0x1e8] sm:$0xff]  }
  0x29   : > { %1891 = vmatpush3.bf16.msra.mxu0 %v2036_v33  ;;  %v2087_v14 = vld [vmem:[%s2204_s18 + $0x230] sm:$0xff]   ;;  %v2088_v16 = vld [vmem:[%s2204_s18 + $0x1d8] sm:$0xff]   ;;  %v2100_v27 = vld [vmem:[%s2204_s18 + $0x308] sm:$0xff]  }
  0x2a   : > { %1892 = vmatprep.subr.bf16.mxu0 %v2039_v36  ;;  %v2084_v15 = vld [vmem:[%s2204_s18 + $0x190] sm:$0xff]   ;;  %v2090_v17 = vld [vmem:[%s2204_s18 + $0x278] sm:$0xff]   ;;  %v2110_v36 = vld [vmem:[%s2204_s18 + $0x2c0] sm:$0xff]  }
  0x2b   : > { %1837 = vmatpush3.bf16.msra.mxu1 %v2019_v21  ;;  %v2091_v18 = vld [vmem:[%s2204_s18 + $0x238] sm:$0xff]  }
  0x2c   : > { %1838 = vmatprep.subr.bf16.mxu1 %v2022_v24  ;;  %v2089_v19 = vld [vmem:[%s2204_s18 + $0x198] sm:$0xff]   ;;  %v2097_v24 = vld [vmem:[%s2204_s18 + $0x300] sm:$0xff]  }
  0x2d   : > { %1893 = vmatpush3.bf16.msra.mxu0 %v2040_v37  ;;  %v2094_v21 = vld [vmem:[%s2425_s0 + $0x20] ss:$56 sps:$4 sm:$0xff]   ;;  %v2096_v23 = vld [vmem:[%s2425_s0 + $0x24] ss:$56 sps:$4 sm:$0xff]  }
  0x2e   : > { %1894 = vmatprep.subr.bf16.mxu0 %v2043_v42  ;;  %v2108_v32 = vld [vmem:[%s2425_s0 + $0x1c] ss:$56 sps:$4 sm:$0xff]   ;;  %v2106_v37 = vld [vmem:[%s2425_s0 + $0x18] ss:$56 sps:$4 sm:$0xff]   ;;  %v2117_v42 = vld [vmem:[%s2204_s18 + $0x328] sm:$0xff]  }
  0x2f   : > { %1839 = vmatpush3.bf16.msra.mxu1 %v2023_v25  ;;  %v2093_v25 = vld [vmem:[%s2204_s18 + $0x1a0] sm:$0xff]   ;;  %v2104_v33 = vld [vmem:[%s2204_s18 + $0x1f8] sm:$0xff]  }
  0x30   : > { %1852 = vmatprep.subr.bf16.mxu1 %v2029_v29  ;;  %v2101_v29 = vld [vmem:[%s2204_s18 + $0x1f0] sm:$0xff]  }
  0x31   : > { %1895 = vmatpush3.bf16.msra.mxu0 %v2044_v43  ;;  %v2120_v43 = vld [vmem:[%s2425_s0 + $0x94] ss:$56 sps:$4 sm:$0xff]  }
  0x32   : > { %1215 = vmatmul.mubr.bf16.vlgmr.msra.gmra.mrb[0].mxu1 %v2025_v28  ;;  %1936 = vmatprep.subr.bf16.mxu0 %v2050_v47  ;;  %v2099_v28 = vld [vmem:[%s2204_s18 + $0x1a8] sm:$0xff]   ;;  %v2124_v47 = vld [vmem:[%s2204_s18 + $0x330] sm:$0xff]  }
  0x33   : > { %1853 = vmatpush3.bf16.msra.mxu1 %v2030_v30  ;;  %1222 = vmatprep.mubr.bf16.mxu1 %v2053_v31  ;;  %v2103_v30 = vld [vmem:[%s2204_s18 + $0x310] sm:$0xff]  }
  0x34   : > { %1854 = vmatprep.subr.bf16.mxu1 %v2033_v34  ;;  %1313 = vmatmul.mubr.bf16.vlgmr.msra.gmra.mrb[0].mxu0 %v2047_v44  ;;  %v2102_v31 = vld [vmem:[%s2204_s18 + $0x1b0] sm:$0xff]   ;;  %v2109_v34 = vld [vmem:[%s2204_s18 + $0x318] sm:$0xff]   ;;  %v2114_v44 = vld [vmem:[%s2204_s18 + $0x288] sm:$0xff]  }
  0x35   : > { %1937 = vmatpush3.bf16.msra.mxu0 %v2051_v48  ;;  %1320 = vmatprep.mubr.bf16.mxu0 %v2082_v9  ;;  %v2118_v48 = vld [vmem:[%s2425_s0 + $0x88] ss:$56 sps:$4 sm:$0xff]  }
  0x36   : > { %1938 = vmatprep.subr.bf16.mxu0 %v2057_v51  ;;  %v2127_v51 = vld [vmem:[%s2204_s18 + $0x338] sm:$0xff]  }
  0x37   : > { %1855 = vmatpush3.bf16.msra.mxu1 %v2034_v35  ;;  %v2105_v35 = vld [vmem:[%s2204_s18 + $0x1b8] sm:$0xff]  }
  0x38   : > { %1856 = vmatprep.subr.bf16.mxu1 %v2037_v38  ;;  %v2112_v38 = vld [vmem:[%s2204_s18 + $0x320] sm:$0xff]  }
  0x39   : > { %1939 = vmatpush3.bf16.msra.mxu0 %v2058_v52  ;;  %v2126_v52 = vld [vmem:[%s2204_s18 + $0x298] sm:$0xff]  }
  0x3a   : > { %1223 = vmatmul.mubr.bf16.gmra.mrb[4].mxu1 %v2056_v39  ;;  %1940 = vmatprep.subr.bf16.mxu0 %v2061_v55  ;;  %v2111_v39 = vld [vmem:[%s2204_s18 + $0x280] sm:$0xff]  }
  0x3b   : > { %1857 = vmatpush3.bf16.msra.mxu1 %v2038_v40  ;;  %1263 = vmatprep.mubr.bf16.mxu1 %v2068_v41  ;;  %v2113_v40 = vld [vmem:[%s2204_s18 + $0x2c8] sm:$0xff]   ;;  %v2129_v55 = vld [vmem:[%s2204_s18 + $0x2a0] sm:$0xff]  }
  0x3c   : > { %1858 = vmatprep.subr.bf16.mxu1 %v2041_v45  ;;  %1321 = vmatmul.mubr.bf16.gmra.mrb[4].mxu0 %v2085_v11  ;;  %v2115_v41 = vld [vmem:[%s2425_s0 + $0x8c] ss:$56 sps:$4 sm:$0xff]   ;;  %v2123_v45 = vld [vmem:[%s2425_s0 + $0x90] ss:$56 sps:$4 sm:$0xff]  }
  0x3d   : > { %1941 = vmatpush3.bf16.msra.mxu0 %v2062_v56  ;;  %1410 = vmatprep.mubr.bf16.mxu0 %v2096_v23  ;;  %v2131_v56 = vld [vmem:[%s2204_s18 + $0x2e8] sm:$0xff]  }
  0x3e   : > { %1942 = vmatprep.subr.bf16.mxu0 %v2065_v59  ;;  %v2141_v59 = vld [vmem:[%s2425_s0 + $0x2c] ss:$56 sps:$4 sm:$0xff]  }
  0x3f   : > { %1859 = vmatpush3.bf16.msra.mxu1 %v2042_v46  ;;  %v2119_v46 = vld [vmem:[%s2204_s18 + $0x2d0] sm:$0xff]  }
  0x40   : > { %1860 = vmatprep.subr.bf16.mxu1 %v2045_v49  ;;  %v2122_v49 = vld [vmem:[%s2204_s18 + $0x290] sm:$0xff]  }
  0x41   : > { %1943 = vmatpush3.bf16.msra.mxu0 %v2069_v60  ;;  %v2134_v60 = vld [vmem:[%s2204_s18 + $0x2f0] sm:$0xff]  }
  0x42   : > { %1944 = vmatprep.subr.bf16.mxu0 %v2072_v63  ;;  %v2135_v63 = vld [vmem:[%s2204_s18 + $0x2b0] sm:$0xff]  }
  0x43   : > { %1861 = vmatpush3.bf16.msra.mxu1 %v2046_v50  ;;  %v2125_v50 = vld [vmem:[%s2204_s18 + $0x2d8] sm:$0xff]  }
  0x44   : > { %1862 = vmatprep.subr.bf16.mxu1 %v2052_v53  ;;  %v2128_v53 = vld [vmem:[%s2204_s18 + $0x2e0] sm:$0xff]  }
  0x45   : > { %1945 = vmatpush3.bf16.msra.mxu0 %v2073_v0  ;;  %v2137_v0 = vld [vmem:[%s2204_s18 + $0x2f8] sm:$0xff]  }
  0x46   : > { %1946 = vmatprep.subr.bf16.mxu0 %v2076_v5  ;;  %v2139_v5 = vld [vmem:[%s2425_s0 + $0x28] ss:$56 sps:$4 sm:$0xff]  }
  0x47   : > { %1863 = vmatpush3.bf16.msra.mxu1 %v2055_v54  ;;  %v2130_v54 = vld [vmem:[%s2204_s18 + $0x340] sm:$0xff]  }
  0x48   : > { %1864 = vmatprep.subr.bf16.mxu1 %v2059_v57  ;;  %v2133_v57 = vld [vmem:[%s2204_s18 + $0x348] sm:$0xff]  }
  0x49   : > { %1947 = vmatpush3.bf16.msra.mxu0 %v2079_v6  ;;  %v2146_v6 = vld [vmem:[%s2425_s0 + $0x9c] ss:$56 sps:$4 sm:$0xff]  }
  0x4a   : > { %1948 = vmatprep.subr.bf16.mxu0 %v2086_v12 }
  0x4b   : > { %1865 = vmatpush3.bf16.msra.mxu1 %v2060_v58  ;;  %v2132_v58 = vld [vmem:[%s2204_s18 + $0x2a8] sm:$0xff]  }
  0x4c   : > { %1866 = vmatprep.subr.bf16.mxu1 %v2063_v61  ;;  %v2136_v61 = vld [vmem:[%s2204_s18 + $0x350] sm:$0xff]  }
  0x4d   : > { %1949 = vmatpush3.bf16.msra.mxu0 %v2087_v14 }
  0x4e   : > { %1950 = vmatprep.subr.bf16.mxu0 %v2090_v17 }
  0x4f   : > { %1867 = vmatpush3.bf16.msra.mxu1 %v2064_v62  ;;  %v2145_v62 = vld [vmem:[%s2425_s0 + $0x34] ss:$56 sps:$4 sm:$0xff]  }
  0x50   : > { %1908 = vmatprep.subr.bf16.mxu1 %v2070_v2  ;;  %v2138_v2 = vld [vmem:[%s2204_s18 + $0x2b8] sm:$0xff]  }
  0x51   : > { %1951 = vmatpush3.bf16.msra.mxu0 %v2091_v18 }
  0x52   : > { %1264 = vmatmul.mubr.bf16.vlgmr.msra.gmra.mrb[8].mxu1 %v2066_v1  ;;  %1476 = vmatprep.subr.bf16.mxu0 %v2168_v22  ;;  %v2142_v1 = vld [vmem:[%s2204_s18 + $0x358] sm:$0xff]  }
  0x53   : > { %1909 = vmatpush3.bf16.msra.mxu1 %v2071_v3  ;;  %1271 = vmatprep.mubr.bf16.mxu1 %v2077_v4  ;;  %v2143_v3 = vld [vmem:[%s2425_s0 + $0x30] ss:$56 sps:$4 sm:$0xff]   ;;  %v2149_v4 = vld [vmem:[%s2425_s0 + $0xa4] ss:$56 sps:$4 sm:$0xff]  }
  0x54   : > { %1910 = vmatprep.subr.bf16.mxu1 %v2074_v7  ;;  %1411 = vmatmul.mubr.bf16.vlgmr.msra.gmra.mrb[8].mxu0 %v2094_v21  ;;  %v2151_v7 = vld [vmem:[%s2425_s0 + $0xa0] ss:$56 sps:$4 sm:$0xff]  }
  0x55   : > { %1477 = vmatpush1.bf16.msra.mxu0 %v2097_v24  ;;  %1418 = vmatprep.mubr.bf16.mxu0 %v2120_v43 }
  0x56   : > { %1478 = vmatprep.subr.bf16.mxu0 %v2168_v22 }
  0x57   : > { %1911 = vmatpush3.bf16.msra.mxu1 %v2075_v8  ;;  %v2148_v8 = vld [vmem:[%s2425_s0 + $0x98] ss:$56 sps:$4 sm:$0xff]  }
  0x58   : > { %1912 = vmatprep.subr.bf16.mxu1 %v2081_v10 }
  0x59   : > { %1479 = vmatpush1.bf16.msra.mxu0 %v2100_v27 }
  0x5a   : > { %1272 = vmatmul.mubr.bf16.gmra.mrb[12].mxu1 %v2080_v13  ;;  %1480 = vmatprep.subr.bf16.mxu0 %v2168_v22 }
  0x5b   : > { %1913 = vmatpush3.bf16.msra.mxu1 %v2084_v15  ;;  %1361 = vmatprep.mubr.bf16.mxu1 %v2108_v32 }
  0x5c   : > { %1914 = vmatprep.subr.bf16.mxu1 %v2088_v16  ;;  %1419 = vmatmul.mubr.bf16.gmra.mrb[12].mxu0 %v2123_v45 }
  0x5d   : > { %1481 = vmatpush1.bf16.msra.mxu0 %v2103_v30  ;;  %1811 = vmatprep.mubr.msk.bf16.mxu0 %vm1175_vm0, %v2145_v62 }
  0x5e   : > { %1482 = vmatprep.subr.bf16.mxu0 %v2168_v22 }
  0x5f   : > { %1915 = vmatpush3.bf16.msra.mxu1 %v2089_v19 }
  0x60   : > { %1916 = vmatprep.subr.bf16.mxu1 %v2092_v20 }
  0x61   : > { %1483 = vmatpush1.bf16.msra.mxu0 %v2109_v34 }
  0x62   : > { %1484 = vmatprep.subr.bf16.mxu0 %v2168_v22 }
  0x63   : > { %1917 = vmatpush3.bf16.msra.mxu1 %v2093_v25 }
  0x64   : > { %1918 = vmatprep.subr.bf16.mxu1 %v2098_v26 }
  0x65   : > { %1485 = vmatpush1.bf16.msra.mxu0 %v2112_v38 }
  0x66   : > { %1486 = vmatprep.subr.bf16.mxu0 %v2168_v22 }
  0x67   : > { %1919 = vmatpush3.bf16.msra.mxu1 %v2099_v28 }
  0x68   : > { %1920 = vmatprep.subr.bf16.mxu1 %v2101_v29 }
  0x69   : > { %1487 = vmatpush1.bf16.msra.mxu0 %v2117_v42 }
  0x6a   : > { %1488 = vmatprep.subr.bf16.mxu0 %v2168_v22 }
  0x6b   : > { %1921 = vmatpush3.bf16.msra.mxu1 %v2102_v31 }
  0x6c   : > { %1922 = vmatprep.subr.bf16.mxu1 %v2104_v33 }
  0x6d   : > { %1489 = vmatpush1.bf16.msra.mxu0 %v2124_v47 }
  0x6e   : > { %1490 = vmatprep.subr.bf16.mxu0 %v2168_v22 }
  0x6f   : > { %1923 = vmatpush3.bf16.msra.mxu1 %v2105_v35 }
  0x70   : > { %1964 = vmatprep.subr.bf16.mxu1 %v2110_v36 }
  0x71   : > { %1491 = vmatpush1.bf16.msra.mxu0 %v2127_v51 }
  0x72   : > { %1362 = vmatmul.mubr.bf16.vlgmr.msra.gmra.mrb[16].mxu1 %v2106_v37  ;;  %1492 = vmatprep.subr.bf16.mxu0 %v2168_v22 }
  0x73   : > { %1965 = vmatpush3.bf16.msra.mxu1 %v2111_v39  ;;  %1369 = vmatprep.mubr.bf16.mxu1 %v2115_v41 }
  0x74   : > { %1966 = vmatprep.subr.bf16.mxu1 %v2113_v40 }
  0x75   : > { %1493 = vmatpush1.bf16.msra.mxu0 %v2130_v54 }
  0x76   : > { %1494 = vmatprep.subr.bf16.mxu0 %v2168_v22 }
  0x77   : > { %1967 = vmatpush3.bf16.msra.mxu1 %v2114_v44 }
  0x78   : > { %1968 = vmatprep.subr.bf16.mxu1 %v2119_v46 }
  0x79   : > { %1495 = vmatpush1.bf16.msra.mxu0 %v2133_v57 }
  0x7a   : > { %1370 = vmatmul.mubr.bf16.gmra.mrb[20].mxu1 %v2118_v48  ;;  %1496 = vmatprep.subr.bf16.mxu0 %v2168_v22 }
  0x7b   : > { %1969 = vmatpush3.bf16.msra.mxu1 %v2122_v49  ;;  %1459 = vmatprep.mubr.bf16.mxu1 %v2141_v59 }
  0x7c   : > { %1970 = vmatprep.subr.bf16.mxu1 %v2125_v50 }
  0x7d   : > { %1497 = vmatpush1.bf16.msra.mxu0 %v2136_v61 }
  0x7e   : > { %1498 = vmatprep.subr.bf16.mxu0 %v2168_v22 }
  0x7f   : > { %1971 = vmatpush3.bf16.msra.mxu1 %v2126_v52 }
  0x80   : > { %1972 = vmatprep.subr.bf16.mxu1 %v2128_v53 }
  0x81   : > { %1499 = vmatpush1.bf16.msra.mxu0 %v2142_v1 }
  0x83   : > { %1973 = vmatpush3.bf16.msra.mxu1 %v2129_v55 }
  0x84   : > { %1974 = vmatprep.subr.bf16.mxu1 %v2131_v56  ;;  %1509 = vmatmul.mubr.bf16.vlgmr.msra.gmra.mrb[16].mxu0 %v2143_v3 }
  0x85   : > { %1812 = vmatprep.mubr.msk.bf16.mxu0 %vm1175_vm0, %v2149_v4 }
  0x87   : > { %1975 = vmatpush3.bf16.msra.mxu1 %v2132_v58 }
  0x88   : > { %1976 = vmatprep.subr.bf16.mxu1 %v2134_v60 }
  0x8b   : > { %1977 = vmatpush3.bf16.msra.mxu1 %v2135_v63 }
  0x8c   : > { %1978 = vmatprep.subr.bf16.mxu1 %v2137_v0  ;;  %1517 = vmatmul.mubr.bf16.gmra.mrb[20].mxu0 %v2151_v7 }
  0x8f   : > { %1979 = vmatpush3.bf16.msra.mxu1 %v2138_v2 }
  0x92   : > { %1460 = vmatmul.mubr.bf16.vlgmr.msra.gmra.mrb[24].mxu1 %v2139_v5 }
  0x93   : > { %1467 = vmatprep.mubr.bf16.mxu1 %v2146_v6 }
  0x9a   : > { %1468 = vmatmul.mubr.bf16.gmra.mrb[28].mxu1 %v2148_v8 }
 0x105   : > { %v1840_v9 = vpop.f32.mrb[0].mxu1 }
 0x106   : > { %v1841_v10 = vpop.f32.mrb[1].mxu1 }
 0x107   : > { %v1842_v11 = vadd.f32 %v1841_v10, %v1840_v9  ;;  %v1843_v12 = vpop.f32.mrb[2].mxu1  ;;  %v1896_v19 = vpop.f32.mrb[0].mxu0 }
 0x108   : > { %v1844_v13 = vpop.f32.mrb[3].mxu1  ;;  %v1897_v21 = vpop.f32.mrb[1].mxu0 }
 0x109   : > { %v1845_v14 = vadd.f32 %v1844_v13, %v1843_v12  ;;  %v1898_v23 = vadd.f32 %v1897_v21, %v1896_v19  ;;  %v1899_v24 = vpop.f32.mrb[2].mxu0 }
 0x10a   : > { %v1900_v25 = vpop.f32.mrb[3].mxu0 }
 0x10b   : > { %v1901_v26 = vadd.f32 %v1900_v25, %v1899_v24 }
 0x10d   : > { %v1846_v15 = vpop.f32.mrb[4].mxu1 }
 0x10e   : > { %v1847_v16 = vpop.f32.mrb[5].mxu1 }
 0x10f   : > { %v1848_v17 = vadd.f32 %v1847_v16, %v1846_v15  ;;  %v1849_v18 = vpop.f32.mrb[6].mxu1  ;;  %v1902_v32 = vpop.f32.mrb[4].mxu0 }
 0x110   : > { %v1850_v20 = vpop.f32.mrb[7].mxu1  ;;  %v1903_v35 = vpop.f32.mrb[5].mxu0 }
 0x111   : > { %v1851_v22 = vadd.f32 %v1850_v20, %v1849_v18  ;;  %v1904_v36 = vadd.f32 %v1903_v35, %v1902_v32  ;;  %v1905_v37 = vpop.f32.mrb[6].mxu0 }
 0x112   : > { %v1906_v39 = vpop.f32.mrb[7].mxu0 }
 0x113   : > { %v1907_v41 = vadd.f32 %v1906_v39, %v1905_v37 }
 0x125   : > { %v1868_v27 = vpop.f32.mrb[8].mxu1 }
 0x126   : > { %v1869_v28 = vpop.f32.mrb[9].mxu1 }
 0x127   : > { %v1870_v29 = vadd.f32 %v1869_v28, %v1868_v27  ;;  %v1871_v30 = vpop.f32.mrb[10].mxu1  ;;  %v1952_v50 = vpop.f32.mrb[8].mxu0 }
 0x128   : > { %v1872_v31 = vpop.f32.mrb[11].mxu1  ;;  %v1953_v53 = vpop.f32.mrb[9].mxu0 }
 0x129   : > { %v1266_v33 = vadd.f32 %v1870_v29, %v1842_v11  ;;  %v1873_v34 = vadd.f32 %v1872_v31, %v1871_v30  ;;  %v1954_v54 = vadd.f32 %v1953_v53, %v1952_v50  ;;  %v1955_v55 = vpop.f32.mrb[10].mxu0 }
 0x12a   : > { %v1956_v57 = vpop.f32.mrb[11].mxu0 }
 0x12b   : > { %v1269_v38 = vadd.f32 %v1873_v34, %v1845_v14  ;;  %v1315_v40 = vadd.f32 %v1898_v23, %v1266_v33  ;;  %v1957_v58 = vadd.f32 %v1956_v57, %v1955_v55 }
 0x12d   : > { %v1874_v42 = vpop.f32.mrb[12].mxu1  ;;  %v1318_v43 = vadd.f32 %v1901_v26, %v1269_v38 }
 0x12e   : > { %v1875_v44 = vpop.f32.mrb[13].mxu1 }
 0x12f   : > { %v1876_v45 = vadd.f32 %v1875_v44, %v1874_v42  ;;  %v1877_v46 = vpop.f32.mrb[14].mxu1  ;;  %v1958_v0 = vpop.f32.mrb[12].mxu0 }
 0x130   : > { %v1878_v47 = vpop.f32.mrb[15].mxu1  ;;  %v1959_v3 = vpop.f32.mrb[13].mxu0 }
 0x131   : > { %v1274_v48 = vadd.f32 %v1876_v45, %v1848_v17  ;;  %v1879_v49 = vadd.f32 %v1878_v47, %v1877_v46  ;;  %v1960_v4 = vadd.f32 %v1959_v3, %v1958_v0  ;;  %v1961_v5 = vpop.f32.mrb[14].mxu0 }
 0x132   : > { %v1962_v7 = vpop.f32.mrb[15].mxu0 }
 0x133   : > { %v1277_v51 = vadd.f32 %v1879_v49, %v1851_v22  ;;  %v1323_v52 = vadd.f32 %v1904_v36, %v1274_v48  ;;  %v1963_v9 = vadd.f32 %v1962_v7, %v1961_v5 }
 0x135   : > { %v1326_v56 = vadd.f32 %v1907_v41, %v1277_v51 }
 0x145   : > { %v1924_v59 = vpop.f32.mrb[16].mxu1 }
 0x146   : > { %v1925_v60 = vpop.f32.mrb[17].mxu1 }
 0x147   : > { %v1926_v61 = vadd.f32 %v1925_v60, %v1924_v59  ;;  %v1927_v62 = vpop.f32.mrb[18].mxu1 }
 0x148   : > { %v1928_v63 = vpop.f32.mrb[19].mxu1 }
 0x149   : > { %v1364_v1 = vadd.f32 %v1926_v61, %v1315_v40  ;;  %v1929_v2 = vadd.f32 %v1928_v63, %v1927_v62 }
 0x14b   : > { %v1367_v6 = vadd.f32 %v1929_v2, %v1318_v43  ;;  %v1413_v8 = vadd.f32 %v1954_v54, %v1364_v1 }
 0x14d   : > { %v1930_v10 = vpop.f32.mrb[20].mxu1  ;;  %v1416_v11 = vadd.f32 %v1957_v58, %v1367_v6 }
 0x14e   : > { %v1931_v12 = vpop.f32.mrb[21].mxu1 }
 0x14f   : > { %v1932_v13 = vadd.f32 %v1931_v12, %v1930_v10  ;;  %v1933_v14 = vpop.f32.mrb[22].mxu1 }
 0x150   : > { %v1934_v15 = vpop.f32.mrb[23].mxu1 }
 0x151   : > { %v1372_v16 = vadd.f32 %v1932_v13, %v1323_v52  ;;  %v1935_v17 = vadd.f32 %v1934_v15, %v1933_v14 }
 0x153   : > { %v1375_v18 = vadd.f32 %v1935_v17, %v1326_v56  ;;  %v1421_v19 = vadd.f32 %v1960_v4, %v1372_v16 }
 0x155   : > { %v1424_v20 = vadd.f32 %v1963_v9, %v1375_v18 }
 0x157   : > { %v1510_v21 = vpop.f32.mrb[16].mxu0 }
 0x158   : > { %v1512_v22 = vpop.f32.mrb[17].mxu0 }
 0x159   : > { %v1513_v23 = vpop.f32.mrb[18].mxu0 }
 0x15a   : > { %v1515_v25 = vpop.f32.mrb[19].mxu0 }
 0x15f   : > { %v1518_v32 = vpop.f32.mrb[20].mxu0 }
 0x160   : > { %v1520_v35 = vpop.f32.mrb[21].mxu0 }
 0x161   : > { %v1521_v36 = vpop.f32.mrb[22].mxu0 }
 0x162   : > { %v1523_v40 = vpop.f32.mrb[23].mxu0 }
 0x165   : > { %v1980_v24 = vpop.f32.mrb[24].mxu1 }
 0x166   : > { %v1981_v26 = vpop.f32.mrb[25].mxu1 }
 0x167   : > { %v1982_v27 = vadd.f32 %v1981_v26, %v1980_v24  ;;  %v1983_v28 = vpop.f32.mrb[26].mxu1 }
 0x168   : > { %v1984_v29 = vpop.f32.mrb[27].mxu1 }
 0x169   : > { %v1462_v30 = vadd.f32 %v1982_v27, %v1413_v8  ;;  %v1985_v31 = vadd.f32 %v1984_v29, %v1983_v28 }
 0x16b   : > { %v1511_v33 = vadd.f32 %v1510_v21, %v1462_v30  ;;  %v1465_v34 = vadd.f32 %v1985_v31, %v1416_v11 }
 0x16d   : > { %v1514_v37 = vadd.f32 %v1513_v23, %v1465_v34  ;;  %v1986_v38 = vpop.f32.mrb[28].mxu1  ;;  %v1526_v39 = vsel %vm1525_vm1, %v1511_v33, 0.0 }
 0x16e   : > { %v1987_v41 = vpop.f32.mrb[29].mxu1  ;;  %1527 = vadd.xlane.f32.xlu0 %v1526_v39 }
 0x16f   : > { %v1988_v42 = vadd.f32 %v1987_v41, %v1986_v38  ;;  %v1989_v43 = vpop.f32.mrb[30].mxu1  ;;  %v1529_v47 = vsel %vm1525_vm1, %v1514_v37, 0.0 }
 0x170   : > { %v1990_v44 = vpop.f32.mrb[31].mxu1 }
 0x171   : > { %v1470_v45 = vadd.f32 %v1988_v42, %v1421_v19  ;;  %v1991_v46 = vadd.f32 %v1990_v44, %v1989_v43 }
 0x172   : > { %1530 = vadd.xlane.f32.xlu0 %v1529_v47 }
 0x173   : > { %v1519_v48 = vadd.f32 %v1518_v32, %v1470_v45  ;;  %v1473_v49 = vadd.f32 %v1991_v46, %v1424_v20 }
 0x175   : > { %v1522_v50 = vadd.f32 %v1521_v36, %v1473_v49  ;;  %v1532_v51 = vsel %vm1525_vm1, %v1519_v48, 0.0 }
 0x176   : > { %1533 = vadd.xlane.f32.xlu1 %v1532_v51 }
 0x177   : > { %v1535_v52 = vsel %vm1525_vm1, %v1522_v50, 0.0 }
 0x17a   : > { %1536 = vadd.xlane.f32.xlu1 %v1535_v52 }
 0x1fb   : > { %v1528_v53 = vpop.xlane.xlu0 %1527 }
 0x1fc   : > { %v1539_v54 = vmul.f32 0.125, %v1528_v53 }
 0x1fe   : > { %v1543_v55 = vsub.f32 %v1511_v33, %v1539_v54 }
 0x1ff   : > { %v1531_v56 = vpop.xlane.xlu0 %1530 }
 0x200   : > { %v1540_v57 = vmul.f32 0.125, %v1531_v56  ;;  %v1547_v58 = vmul.f32 %v1543_v55, %v1543_v55 }
 0x202   : > { %v1544_v59 = vsub.f32 %v1514_v37, %v1540_v57  ;;  %v1551_v60 = vsel %vm1525_vm1, %v1547_v58, 0.0 }
 0x203   : > { %v1534_v61 = vpop.xlane.xlu1 %1533  ;;  %1552 = vadd.xlane.f32.xlu0 %v1551_v60 }
 0x204   : > { %v1541_v62 = vmul.f32 0.125, %v1534_v61  ;;  %v1548_v63 = vmul.f32 %v1544_v59, %v1544_v59 }
 0x206   : > { %v1545_v0 = vsub.f32 %v1519_v48, %v1541_v62  ;;  %v1554_v1 = vsel %vm1525_vm1, %v1548_v63, 0.0 }
 0x207   : > { %v1537_v2 = vpop.xlane.xlu1 %1536  ;;  %1555 = vadd.xlane.f32.xlu1 %v1554_v1 }
 0x208   : > { %v1542_v3 = vmul.f32 0.125, %v1537_v2  ;;  %v1549_v4 = vmul.f32 %v1545_v0, %v1545_v0 }
 0x20a   : > { %v1546_v5 = vsub.f32 %v1522_v50, %v1542_v3  ;;  %v1557_v6 = vsel %vm1525_vm1, %v1549_v4, 0.0 }
 0x20b   : > { %1558 = vadd.xlane.f32.xlu0 %v1557_v6 }
 0x20c   : > { %v1550_v7 = vmul.f32 %v1546_v5, %v1546_v5 }
 0x20e   : > { %v1560_v8 = vsel %vm1525_vm1, %v1550_v7, 0.0 }
 0x20f   : > { %1561 = vadd.xlane.f32.xlu1 %v1560_v8 }
 0x290   : > { %v1553_v9 = vpop.xlane.xlu0 %1552 }
 0x291   : > { %v1563_v10 = vmul.f32 0.125, %v1553_v9 }
 0x293   : > { %v1567_v11 = vadd.f32 1e-05, %v1563_v10 }
 0x294   : > { %v1556_v12 = vpop.xlane.xlu1 %1555 }
 0x295   : > { %2152 = vrsqrt.f32 %v1567_v11  ;;  %v1564_v13 = vmul.f32 0.125, %v1556_v12 }
 0x297   : > { %v1568_v14 = vadd.f32 1e-05, %v1564_v13 }
 0x298   : > { %v1559_v15 = vpop.xlane.xlu0 %1558 }
 0x299   : > { %2154 = vrsqrt.f32 %v1568_v14  ;;  %v1565_v16 = vmul.f32 0.125, %v1559_v15 }
 0x29b   : > { %v1569_v17 = vadd.f32 1e-05, %v1565_v16 }
 0x29c   : > { %v1562_v18 = vpop.xlane.xlu1 %1561 }
 0x29d   : > { %2156 = vrsqrt.f32 %v1569_v17  ;;  %v1566_v19 = vmul.f32 0.125, %v1562_v18 }
 0x29f   : > { %v2153_v20 = vpop.eup %2152  ;;  %v1570_v21 = vadd.f32 1e-05, %v1566_v19 }
 0x2a0   : > { %v1575_v22 = vmul.f32 %v2153_v20, %v1543_v55 }
 0x2a1   : > { %2158 = vrsqrt.f32 %v1570_v21 }
 0x2a2   : > { %vm1579_vm2 = vcmp.ge.f32.partialorder %v1575_v22, 0.0  ;;  %v1583_v23 = vmul.f32 0.01, %v1575_v22 }
 0x2a3   : > { %v2155_v24 = vpop.eup %2154 }
 0x2a4   : > { %v1587_v25 = vsel %vm1579_vm2, %v1575_v22, %v1583_v23  ;;  %v1576_v26 = vmul.f32 %v2155_v24, %v1544_v59 }
 0x2a5   : > { %v1820_v27 = vpack.c.bf16 %v1587_v25, %v1587_v25 }
 0x2a6   : > { %vm1580_vm4 = vcmp.ge.f32.partialorder %v1576_v26, 0.0  ;;  %v1584_v28 = vmul.f32 0.01, %v1576_v26 }
 0x2a7   : > { %v2157_v29 = vpop.eup %2156  ;;  %1608 = vst.msk [vmem:[%s143_s23] sm:$0xf] %vm1607_vm3, %v1820_v27 }
 0x2a8   : > { %v1588_v30 = vsel %vm1580_vm4, %v1576_v26, %v1584_v28  ;;  %v1577_v31 = vmul.f32 %v2157_v29, %v1545_v0 }
 0x2a9   : > { %v1821_v32 = vpack.c.bf16 %v1588_v30, %v1588_v30 }
 0x2aa   : > { %vm1581_vm5 = vcmp.ge.f32.partialorder %v1577_v31, 0.0  ;;  %v1585_v33 = vmul.f32 0.01, %v1577_v31 }
 0x2ab   : > { %v2159_v34 = vpop.eup %2158  ;;  %1609 = vst.msk [vmem:[%s143_s23 + $0x4] sm:$0xf] %vm1607_vm3, %v1821_v32 }
 0x2ac   : > { %v1589_v35 = vsel %vm1581_vm5, %v1577_v31, %v1585_v33  ;;  %v1578_v36 = vmul.f32 %v2159_v34, %v1546_v5 }
 0x2ad   : > { %v1822_v37 = vpack.c.bf16 %v1589_v35, %v1589_v35 }
 0x2ae   : > { %vm1582_vm6 = vcmp.ge.f32.partialorder %v1578_v36, 0.0  ;;  %v1586_v38 = vmul.f32 0.01, %v1578_v36 }
 0x2af   : > { %1610 = vst.msk [vmem:[%s143_s23 + $0x8] sm:$0xf] %vm1607_vm3, %v1822_v37 }
 0x2b0   : > { %v1590_v39 = vsel %vm1582_vm6, %v1578_v36, %v1586_v38 }
 0x2b1   : > { %v1823_v40 = vpack.c.bf16 %v1590_v39, %v1590_v39 }
 0x2b3   : > { %1611 = vst.msk [vmem:[%s143_s23 + $0xc] sm:$0xf] %vm1607_vm3, %v1823_v40 }
 0x2b4 PF: > { %s12_s9 = sadd.s32 1, %s2166_s9  }
 0x2b5   : > { %p9_p4 = scmp.ge.s32.totalorder %s12_s9, 4  }
 0x2b7   :  { %11 = sbr.rel (!%p9_p4) target bundleno = 1 (0x1), region = 58 }

// kernel: nnunet3d_forward.36
= control target key start
LH: loop header
LB: loop body
LE: loop exit
PB: predicated region body
PF: predicated region fallthrough
CT: control target
= control target key end

     0   :  { %s636_s12 = smov 0   ;;  %s638_s13 = smov 0   ;;  %s721_s0 = inlined_call_operand.vmem [shape: bf16[64,32], index: 0, kind: input, shape index: {}]   ;;  %s722_s1 = inlined_call_operand.vmem [shape: bf16[2,32,8], index: 1, kind: input, shape index: {}]   ;;  %s723_s2 = inlined_call_operand.vmem [shape: f32[64,1], index: 2, kind: input, shape index: {}]   ;;  %s724_s3 = inlined_call_operand.vmem [shape: bf16[2,64,8], index: 3, kind: output, shape index: {}]  }
   0x1   :  { %s640_s14 = smov 0  }
   0x2 LB: > { %s25_s15 = sadd.s32 1, %s609_s13  ;;  %p501_p0 = scmp.ge.s32.totalorder %s613_s14, 1  ;;  %s613_s14 = sphi %s640_s14, %s13_s14   ;;  %s609_s13 = sphi %s638_s13, %s726_s13   ;;  %s605_s12 = sphi %s636_s12, %s725_s12  }
   0x3   : > { %p27_p1 = scmp.ge.s32.totalorder %s25_s15, 2  ;;  %p156_p2 = scmp.lt.s32.totalorder %s613_s14, 3 }
   0x5   : > { %s728_s15 = smov (%p27_p1, %s25_s15), 0  ;;  %p157_p3 = pnand %p501_p0, %p156_p2 }
   0x6   : > { %p186_p4 = scmp.lt.s32.totalorder (!%p157_p3), %s605_s12, 1  ;;  %v587_v0 = vld [vmem:[%s721_s0] sm:$0xff] (!%p157_p3)   ;;  %vm295_vm0 = vcmask (!%p157_p3), 261120   ;;  %v588_v1 = vld [vmem:[%s721_s0 + $0x10] sm:$0xff] (!%p157_p3)   ;;  %v615_v2 = vmov (!%p157_p3), 0   ;;  %v218_v7 = vld [vmem:[%s723_s2 + $0x18] sm:$0xff] (!%p157_p3) }
   0x7   : > { %160 = sbr.rel (%p157_p3) target bundleno = 246 (0xf6), region = 32  ;;  %546 = vmatprep.mubr.msk.bf16.mxu0 (!%p157_p3), %vm295_vm0, %v587_v0  ;;  %550 = vmatprep.mubr.msk.bf16.mxu1 (!%p157_p3), %vm295_vm0, %v588_v1  ;;  %v217_v3 = vld [vmem:[%s723_s2 + $0x10] sm:$0xff] (!%p157_p3)  ;;  %v215_v4 = vld [vmem:[%s723_s2] sm:$0xff] (!%p157_p3)  ;;  %v216_v8 = vld [vmem:[%s723_s2 + $0x8] sm:$0xff] (!%p157_p3)  ;;  %vm405_vm1 = vcmask (!%p157_p3), 60416  }
   0x8   : > { %584 = vset.pattern.permute.xlu1 (!%p157_p3), %v615_v2  ;;  %583 = vset.pattern.permute.xlu0 (!%p157_p3), %v615_v2  ;;  %v589_v9 = vld [vmem:[%s721_s0 + $0x8] sm:$0xff] (!%p157_p3)   ;;  %v590_v10 = vld [vmem:[%s721_s0 + $0x18] sm:$0xff] (!%p157_p3)   ;;  %v219_v12 = vld [vmem:[%s723_s2 + $0x20] sm:$0xff] (!%p157_p3) }
   0x9   : > { %235 = vperm.xlu1 (!%p157_p3), %584, %v217_v3   ;;  %225 = vperm.xlu0 (!%p157_p3), %583, %v215_v4   ;;  %v220_v11 = vld [vmem:[%s723_s2 + $0x28] sm:$0xff] (!%p157_p3)  ;;  %v222_v13 = vld [vmem:[%s723_s2 + $0x38] sm:$0xff] (!%p157_p3)  ;;  %v221_v14 = vld [vmem:[%s723_s2 + $0x30] sm:$0xff] (!%p157_p3) }
   0xd   : > { %240 = vperm.xlu1 (!%p157_p3), %584, %v218_v7   ;;  %230 = vperm.xlu0 (!%p157_p3), %583, %v216_v8  }
   0xe   : > { %s730_s12 = smov (!%p186_p4, %s605_s12), 1 }
   0xf   : > { %s526_s20 = sshll.u32 %s730_s12, 4  ;;  %s527_s21 = sshll.u32 %s730_s12, 5 }
  0x10   : > { %s193_s27 = scalar_lea.vmem %s722_s1, %s526_s20  ;;  %s201_s24 = scalar_lea.vmem %s724_s3, %s527_s21 }
  0x11   : > { %v585_v5 = vld [vmem:[%s193_s27] sm:$0xff]   ;;  %v586_v6 = vld [vmem:[%s193_s27 + $0x8] sm:$0xff]   ;;  %250 = vperm.xlu1 %584, %v220_v11   ;;  %245 = vperm.xlu0 %583, %v219_v12  }
  0x12   : > { %542 = vmatprep.subr.bf16.mxu0 %v585_v5  ;;  %554 = vmatprep.subr.bf16.mxu1 %v585_v5 }
  0x13   : > { %543 = vmatpush3.bf16.msra.mxu0 %v585_v5  ;;  %556 = vmatpush3.bf16.msra.mxu1 %v585_v5 }
  0x14   : > { %544 = vmatprep.subr.bf16.mxu0 %v586_v6  ;;  %555 = vmatprep.subr.bf16.mxu1 %v586_v6 }
  0x15   : > { %260 = vperm.xlu1 %584, %v222_v13   ;;  %255 = vperm.xlu0 %583, %v221_v14  }
  0x17   : > { %545 = vmatpush3.bf16.msra.mxu0 %v586_v6  ;;  %557 = vmatpush3.bf16.msra.mxu1 %v586_v6 }
  0x1a   : > { %547 = vmatmul.mubr.msk.bf16.vlgmr.msra.gmra.mrb[0].mxu0 %vm295_vm0, %v589_v9  ;;  %551 = vmatmul.mubr.msk.bf16.vlgmr.msra.gmra.mrb[0].mxu1 %vm295_vm0, %v590_v10 }
  0x88   : > { %v236_v15 = vpop.permute.xlu1 %235  ;;  %v226_v16 = vpop.permute.xlu0 %225 }
  0x8c   : > { %v241_v17 = vpop.permute.xlu1 %240  ;;  %v231_v18 = vpop.permute.xlu0 %230 }
  0x90   : > { %v251_v19 = vpop.permute.xlu1 %250  ;;  %v246_v20 = vpop.permute.xlu0 %245 }
  0x94   : > { %v261_v21 = vpop.permute.xlu1 %260  ;;  %v256_v22 = vpop.permute.xlu0 %255 }
  0xed   : > { %v548_v23 = vpop.f32.mrb[0].mxu0  ;;  %v552_v24 = vpop.f32.mrb[0].mxu1 }
  0xee   : > { %v351_v25 = vadd.f32 %v548_v23, %v236_v15  ;;  %v367_v26 = vadd.f32 %v552_v24, %v256_v22  ;;  %v342_v27 = vpop.f32.mrb[1].mxu0  ;;  %v358_v28 = vpop.f32.mrb[1].mxu1 }
  0xef   : > { %v343_v29 = vadd.f32 %v342_v27, %v226_v16  ;;  %v359_v30 = vadd.f32 %v358_v28, %v246_v20  ;;  %v549_v31 = vpop.f32.mrb[2].mxu0  ;;  %v553_v32 = vpop.f32.mrb[2].mxu1 }
  0xf0   : > { %v530_v33 = vpack.c.bf16 %v351_v25, %v351_v25  ;;  %v534_v34 = vpack.c.bf16 %v367_v26, %v367_v26  ;;  %v354_v35 = vadd.f32 %v549_v31, %v241_v17  ;;  %v370_v36 = vadd.f32 %v553_v32, %v261_v21  ;;  %v345_v37 = vpop.f32.mrb[3].mxu0  ;;  %v361_v38 = vpop.f32.mrb[3].mxu1 }
  0xf1   : > { %v528_v39 = vpack.c.bf16 %v343_v29, %v343_v29  ;;  %v532_v40 = vpack.c.bf16 %v359_v30, %v359_v30  ;;  %v346_v41 = vadd.f32 %v345_v37, %v231_v18  ;;  %v362_v42 = vadd.f32 %v361_v38, %v251_v19 }
  0xf2   : > { %408 = vst.msk [vmem:[%s201_s24 + $0x8] sm:$0xf] %vm405_vm1, %v530_v33  ;;  %412 = vst.msk [vmem:[%s201_s24 + $0x18] sm:$0xf] %vm405_vm1, %v534_v34  ;;  %v531_v43 = vpack.c.bf16 %v354_v35, %v354_v35  ;;  %v535_v44 = vpack.c.bf16 %v370_v36, %v370_v36 }
  0xf3   : > { %406 = vst.msk [vmem:[%s201_s24] sm:$0xf] %vm405_vm1, %v528_v39  ;;  %410 = vst.msk [vmem:[%s201_s24 + $0x10] sm:$0xf] %vm405_vm1, %v532_v40  ;;  %v529_v45 = vpack.c.bf16 %v346_v41, %v346_v41  ;;  %v533_v46 = vpack.c.bf16 %v362_v42, %v362_v42 }
  0xf4   : > { %409 = vst.msk [vmem:[%s201_s24 + $0xc] sm:$0xf] %vm405_vm1, %v531_v43  ;;  %413 = vst.msk [vmem:[%s201_s24 + $0x1c] sm:$0xf] %vm405_vm1, %v535_v44 }
  0xf5   : > { %407 = vst.msk [vmem:[%s201_s24 + $0x4] sm:$0xf] %vm405_vm1, %v529_v45  ;;  %411 = vst.msk [vmem:[%s201_s24 + $0x14] sm:$0xf] %vm405_vm1, %v533_v46 }
  0xf6 PF: > { %s13_s14 = sadd.s32 1, %s613_s14   ;;  %s725_s12 = smov %s609_s13 }
  0xf7   : > { %p10_p5 = scmp.ge.s32.totalorder %s13_s14, 4   ;;  %s726_s13 = smov %s728_s15 }
  0xf9   :  { %12 = sbr.rel (!%p10_p5) target bundleno = 2 (0x2), region = 62 }

// kernel: nnunet3d_forward.37
= control target key start
LH: loop header
LB: loop body
LE: loop exit
PB: predicated region body
PF: predicated region fallthrough
CT: control target
= control target key end

     0   :  { %s1158_s9 = smov 0   ;;  %s1260_s0 = inlined_call_operand.vmem [shape: bf16[16,864], index: 0, kind: input, shape index: {}]   ;;  %s1261_s1 = inlined_call_operand.vmem [shape: bf16[2,864,32], index: 1, kind: input, shape index: {}]   ;;  %s1262_s2 = inlined_call_operand.vmem [shape: bf16[2,16,32], index: 2, kind: output, shape index: {}]  }
   0x1 LB: > { %s888_s10 = sadd.s32 4294967295, %s1139_s9   ;;  %p892_p0 = scmp.ge.s32.totalorder %s1139_s9, 1  ;;  %s1139_s9 = sphi %s1158_s9, %s12_s9  }
   0x2   : > { %p112_p1 = scmp.lt.s32.totalorder %s1139_s9, 3 }
   0x4   : > { %p113_p2 = pnand %p892_p0, %p112_p1 }
   0x5   : > { %p134_p3 = scmp.lt.s32.totalorder (!%p113_p2), %s888_s10, 1  ;;  %v1099_v0 = vld [vmem:[%s1260_s0 + $0x4] ss:$28 sps:$4 sm:$0xff] (!%p113_p2)   ;;  %v1102_v1 = vld [vmem:[%s1260_s0 + $0xc] ss:$28 sps:$4 sm:$0xff] (!%p113_p2)   ;;  %v1141_v40 = vmov (!%p113_p2), 0.0  }
   0x6   : > { %116 = sbr.rel (%p113_p2) target bundleno = 621 (0x26d), region = 28  ;;  %656 = vmatprep.mubr.bf16.mxu0 (!%p113_p2), %v1099_v0  ;;  %697 = vmatprep.mubr.bf16.mxu1 (!%p113_p2), %v1102_v1  ;;  %v1097_v32 = vld [vmem:[%s1260_s0] ss:$28 sps:$4 sm:$0xff] (!%p113_p2)   ;;  %v1100_v34 = vld [vmem:[%s1260_s0 + $0x8] ss:$28 sps:$4 sm:$0xff] (!%p113_p2)   ;;  %vm1142_vm0 = vmmov (!%p113_p2), 0  }
   0x7   : > { %v1126_v36 = vld [vmem:[%s1260_s0 + $0x14] ss:$28 sps:$4 sm:$0xff] (!%p113_p2)   ;;  %vm620_vm1 = vcmask (!%p113_p2), 785408   ;;  %vm788_vm2 = vcmask (!%p113_p2), 261120   ;;  %vm830_vm4 = vcmask (!%p113_p2), 257024  }
   0x8   : > { %v1128_v59 = vld [vmem:[%s1260_s0 + $0x18] ss:$28 sps:$4 sm:$0xff] (!%p113_p2)   ;;  %v1124_v61 = vld [vmem:[%s1260_s0 + $0x10] ss:$28 sps:$4 sm:$0xff] (!%p113_p2)  }
   0xd   : > { %s1264_s10 = smov (!%p134_p3, %s888_s10), 1 }
   0xe   : > { %s1054_s15 = smul.u32 432, %s1264_s10  ;;  %s962_s29 = sshll.u32 %s1264_s10, 3 }
   0xf   : > { %s143_s4 = scalar_lea.vmem %s1262_s2, %s962_s29 }
  0x10   : > { %s1178_s18 = scalar_lea.vmem %s1261_s1, %s1054_s15 }
  0x11   : > { %v1065_v2 = vld [vmem:[%s1178_s18 + $0x40] sm:$0xff]   ;;  %v1069_v6 = vld [vmem:[%s1178_s18 + $0x48] sm:$0xff]   ;;  %v1073_v10 = vld [vmem:[%s1178_s18 + $0x50] sm:$0xff]  }
  0x12   : > { %v1066_v3 = vld [vmem:[%s1178_s18 + $0xc0] sm:$0xff]   ;;  %965 = vmatprep.subr.bf16.mxu0 %v1065_v2  ;;  %v1070_v7 = vld [vmem:[%s1178_s18 + $0xc8] sm:$0xff]   ;;  %v1074_v11 = vld [vmem:[%s1178_s18 + $0xd0] sm:$0xff]  }
  0x13   : > { %v1067_v4 = vld [vmem:[%s1178_s18] sm:$0xff]   ;;  %987 = vmatprep.subr.bf16.mxu1 %v1066_v3  ;;  %v1071_v8 = vld [vmem:[%s1178_s18 + $0x8] sm:$0xff]   ;;  %v1075_v12 = vld [vmem:[%s1178_s18 + $0x10] sm:$0xff]  }
  0x14   : > { %v1068_v5 = vld [vmem:[%s1178_s18 + $0x80] sm:$0xff]   ;;  %966 = vmatpush3.bf16.msra.mxu0 %v1067_v4  ;;  %v1072_v9 = vld [vmem:[%s1178_s18 + $0x88] sm:$0xff]   ;;  %v1076_v13 = vld [vmem:[%s1178_s18 + $0x90] sm:$0xff]  }
  0x15   : > { %988 = vmatpush3.bf16.msra.mxu1 %v1068_v5  ;;  %967 = vmatprep.subr.bf16.mxu0 %v1069_v6  ;;  %v1077_v14 = vld [vmem:[%s1178_s18 + $0x58] sm:$0xff]   ;;  %v1081_v18 = vld [vmem:[%s1178_s18 + $0x60] sm:$0xff]   ;;  %v1085_v22 = vld [vmem:[%s1178_s18 + $0x68] sm:$0xff]  }
  0x16   : > { %989 = vmatprep.subr.bf16.mxu1 %v1070_v7  ;;  %v1078_v15 = vld [vmem:[%s1178_s18 + $0xd8] sm:$0xff]   ;;  %v1082_v19 = vld [vmem:[%s1178_s18 + $0xe0] sm:$0xff]   ;;  %v1086_v23 = vld [vmem:[%s1178_s18 + $0xe8] sm:$0xff]  }
  0x17   : > { %v1079_v16 = vld [vmem:[%s1178_s18 + $0x18] sm:$0xff]   ;;  %v1083_v20 = vld [vmem:[%s1178_s18 + $0x20] sm:$0xff]   ;;  %v1087_v24 = vld [vmem:[%s1178_s18 + $0x28] sm:$0xff]  }
  0x18   : > { %968 = vmatpush3.bf16.msra.mxu0 %v1071_v8  ;;  %v1080_v17 = vld [vmem:[%s1178_s18 + $0x98] sm:$0xff]   ;;  %v1084_v21 = vld [vmem:[%s1178_s18 + $0xa0] sm:$0xff]   ;;  %v1088_v25 = vld [vmem:[%s1178_s18 + $0xa8] sm:$0xff]  }
  0x19   : > { %990 = vmatpush3.bf16.msra.mxu1 %v1072_v9  ;;  %969 = vmatprep.subr.bf16.mxu0 %v1073_v10  ;;  %v1089_v26 = vld [vmem:[%s1178_s18 + $0x70] sm:$0xff]   ;;  %v1093_v30 = vld [vmem:[%s1178_s18 + $0x78] sm:$0xff]   ;;  %v1103_v37 = vld [vmem:[%s1178_s18 + $0x140] sm:$0xff]  }
  0x1a   : > { %991 = vmatprep.subr.bf16.mxu1 %v1074_v11  ;;  %v1090_v27 = vld [vmem:[%s1178_s18 + $0xf0] sm:$0xff]   ;;  %v1094_v31 = vld [vmem:[%s1178_s18 + $0xf8] sm:$0xff]   ;;  %v1104_v38 = vld [vmem:[%s1178_s18 + $0x100] sm:$0xff]  }
  0x1b   : > { %v1091_v28 = vld [vmem:[%s1178_s18 + $0x30] sm:$0xff]   ;;  %v1095_v33 = vld [vmem:[%s1178_s18 + $0x38] sm:$0xff]   ;;  %v1105_v39 = vld [vmem:[%s1178_s18 + $0x148] sm:$0xff]  }
  0x1c   : > { %970 = vmatpush3.bf16.msra.mxu0 %v1075_v12  ;;  %v1092_v29 = vld [vmem:[%s1178_s18 + $0xb0] sm:$0xff]   ;;  %v1096_v35 = vld [vmem:[%s1178_s18 + $0xb8] sm:$0xff]   ;;  %v1106_v41 = vld [vmem:[%s1178_s18 + $0x108] sm:$0xff]  }
  0x1d   : > { %992 = vmatpush3.bf16.msra.mxu1 %v1076_v13  ;;  %971 = vmatprep.subr.bf16.mxu0 %v1077_v14  ;;  %v1107_v42 = vld [vmem:[%s1178_s18 + $0x150] sm:$0xff]   ;;  %v1109_v43 = vld [vmem:[%s1178_s18 + $0x180] sm:$0xff]   ;;  %v1110_v45 = vld [vmem:[%s1178_s18 + $0x158] sm:$0xff]  }
  0x1e   : > { %993 = vmatprep.subr.bf16.mxu1 %v1078_v15  ;;  %v1108_v44 = vld [vmem:[%s1178_s18 + $0x110] sm:$0xff]   ;;  %v1112_v46 = vld [vmem:[%s1178_s18 + $0x188] sm:$0xff]   ;;  %v1111_v47 = vld [vmem:[%s1178_s18 + $0x118] sm:$0xff]  }
  0x1f   : > { %v1115_v48 = vld [vmem:[%s1178_s18 + $0x190] sm:$0xff]   ;;  %v1113_v49 = vld [vmem:[%s1178_s18 + $0x160] sm:$0xff]   ;;  %v1118_v51 = vld [vmem:[%s1178_s18 + $0x198] sm:$0xff]  }
  0x20   : > { %972 = vmatpush3.bf16.msra.mxu0 %v1079_v16  ;;  %v1114_v50 = vld [vmem:[%s1178_s18 + $0x120] sm:$0xff]   ;;  %v1116_v52 = vld [vmem:[%s1178_s18 + $0x168] sm:$0xff]   ;;  %v1119_v55 = vld [vmem:[%s1178_s18 + $0x170] sm:$0xff]  }
  0x21   : > { %994 = vmatpush3.bf16.msra.mxu1 %v1080_v17  ;;  %973 = vmatprep.subr.bf16.mxu0 %v1081_v18  ;;  %v1117_v53 = vld [vmem:[%s1178_s18 + $0x128] sm:$0xff]   ;;  %v1121_v54 = vld [vmem:[%s1178_s18 + $0x1a0] sm:$0xff]   ;;  %v1120_v56 = vld [vmem:[%s1178_s18 + $0x130] sm:$0xff]  }
  0x22   : > { %995 = vmatprep.subr.bf16.mxu1 %v1082_v19  ;;  %v1127_v57 = vld [vmem:[%s1178_s18 + $0x1a8] sm:$0xff]   ;;  %v1122_v58 = vld [vmem:[%s1178_s18 + $0x178] sm:$0xff]  }
  0x23   : > { %v1123_v60 = vld [vmem:[%s1178_s18 + $0x138] sm:$0xff]  }
  0x24   : > { %974 = vmatpush3.bf16.msra.mxu0 %v1083_v20 }
  0x25   : > { %996 = vmatpush3.bf16.msra.mxu1 %v1084_v21  ;;  %975 = vmatprep.subr.bf16.mxu0 %v1085_v22 }
  0x26   : > { %997 = vmatprep.subr.bf16.mxu1 %v1086_v23 }
  0x28   : > { %976 = vmatpush3.bf16.msra.mxu0 %v1087_v24 }
  0x29   : > { %998 = vmatpush3.bf16.msra.mxu1 %v1088_v25  ;;  %977 = vmatprep.subr.bf16.mxu0 %v1089_v26 }
  0x2a   : > { %999 = vmatprep.subr.bf16.mxu1 %v1090_v27 }
  0x2c   : > { %978 = vmatpush3.bf16.msra.mxu0 %v1091_v28 }
  0x2d   : > { %1000 = vmatpush3.bf16.msra.mxu1 %v1092_v29  ;;  %979 = vmatprep.subr.bf16.mxu0 %v1093_v30 }
  0x2e   : > { %1001 = vmatprep.subr.bf16.mxu1 %v1094_v31 }
  0x30   : > { %980 = vmatpush3.bf16.msra.mxu0 %v1095_v33 }
  0x31   : > { %1002 = vmatpush3.bf16.msra.mxu1 %v1096_v35  ;;  %1009 = vmatprep.subr.bf16.mxu0 %v1103_v37 }
  0x32   : > { %1038 = vmatprep.subr.bf16.mxu1 %v1141_v40 }
  0x33   : > { %657 = vmatmul.mubr.bf16.vlgmr.msra.gmra.mrb[0].mxu0 %v1097_v32 }
  0x34   : > { %698 = vmatmul.mubr.bf16.vlgmr.msra.gmra.mrb[0].mxu1 %v1100_v34  ;;  %1010 = vmatpush3.bf16.msra.mxu0 %v1104_v38 }
  0x35   : > { %1011 = vmatprep.subr.bf16.mxu0 %v1105_v39  ;;  %738 = vmatprep.mubr.bf16.mxu0 %v1126_v36 }
  0x36   : > { %1050 = vmatprep.mubr.msk.bf16.mxu1 %vm1142_vm0, %v1141_v40  ;;  %1039 = vmatpush3.bf16.msra.mxu1 %v1109_v43 }
  0x37   : > { %1040 = vmatprep.subr.bf16.mxu1 %v1141_v40 }
  0x38   : > { %1012 = vmatpush3.bf16.msra.mxu0 %v1106_v41 }
  0x39   : > { %1013 = vmatprep.subr.bf16.mxu0 %v1107_v42 }
  0x3a   : > { %1041 = vmatpush3.bf16.msra.mxu1 %v1112_v46 }
  0x3b   : > { %1042 = vmatprep.subr.bf16.mxu1 %v1141_v40 }
  0x3c   : > { %1014 = vmatpush3.bf16.msra.mxu0 %v1108_v44 }
  0x3d   : > { %1015 = vmatprep.subr.bf16.mxu0 %v1110_v45 }
  0x3e   : > { %1043 = vmatpush3.bf16.msra.mxu1 %v1115_v48 }
  0x3f   : > { %1044 = vmatprep.subr.bf16.mxu1 %v1141_v40 }
  0x40   : > { %1016 = vmatpush3.bf16.msra.mxu0 %v1111_v47 }
  0x41   : > { %1017 = vmatprep.subr.bf16.mxu0 %v1113_v49 }
  0x42   : > { %1045 = vmatpush3.bf16.msra.mxu1 %v1118_v51 }
  0x43   : > { %1046 = vmatprep.subr.bf16.mxu1 %v1141_v40 }
  0x44   : > { %1018 = vmatpush3.bf16.msra.mxu0 %v1114_v50 }
  0x45   : > { %1019 = vmatprep.subr.bf16.mxu0 %v1116_v52 }
  0x46   : > { %1047 = vmatpush3.bf16.msra.mxu1 %v1121_v54 }
  0x47   : > { %1048 = vmatprep.subr.bf16.mxu1 %v1141_v40 }
  0x48   : > { %1020 = vmatpush3.bf16.msra.mxu0 %v1117_v53 }
  0x49   : > { %1021 = vmatprep.subr.bf16.mxu0 %v1119_v55 }
  0x4a   : > { %1049 = vmatpush3.bf16.msra.mxu1 %v1127_v57 }
  0x4c   : > { %1022 = vmatpush3.bf16.msra.mxu0 %v1120_v56 }
  0x4d   : > { %1023 = vmatprep.subr.bf16.mxu0 %v1122_v58  ;;  %1051 = vmatmul.mubr.msk.bf16.vlgmr.msra.gmra.mrb[4].mxu1 %vm620_vm1, %v1128_v59 }
  0x50   : > { %1024 = vmatpush3.bf16.msra.mxu0 %v1123_v60 }
  0x53   : > { %739 = vmatmul.mubr.bf16.vlgmr.msra.gmra.mrb[4].mxu0 %v1124_v61 }
 0x106   : > { %v981_v62 = vpop.f32.mrb[0].mxu0 }
 0x107   : > { %v1003_v63 = vpop.f32.mrb[0].mxu1  ;;  %v982_v0 = vpop.f32.mrb[1].mxu0 }
 0x108   : > { %v983_v1 = vadd.f32 %v982_v0, %v981_v62  ;;  %v1004_v2 = vpop.f32.mrb[1].mxu1  ;;  %v984_v3 = vpop.f32.mrb[2].mxu0 }
 0x109   : > { %v1005_v4 = vadd.f32 %v1004_v2, %v1003_v63  ;;  %v1006_v5 = vpop.f32.mrb[2].mxu1  ;;  %v985_v6 = vpop.f32.mrb[3].mxu0 }
 0x10a   : > { %v986_v7 = vadd.f32 %v985_v6, %v984_v3  ;;  %v1007_v8 = vpop.f32.mrb[3].mxu1 }
 0x10b   : > { %v700_v9 = vadd.f32 %v1005_v4, %v983_v1  ;;  %v1008_v10 = vadd.f32 %v1007_v8, %v1006_v5 }
 0x10d   : > { %v703_v11 = vadd.f32 %v1008_v10, %v986_v7 }
 0x120   : > { %v781_v12 = vpop.f32.mrb[4].mxu1 }
 0x121   : > { %v1052_v13 = vpop.f32.mrb[5].mxu1 }
 0x122   : > { %v784_v14 = vpop.f32.mrb[6].mxu1 }
 0x123   : > { %v1053_v15 = vpop.f32.mrb[7].mxu1 }
 0x126   : > { %v1025_v16 = vpop.f32.mrb[4].mxu0 }
 0x127   : > { %v1026_v17 = vpop.f32.mrb[5].mxu0 }
 0x128   : > { %v1027_v18 = vadd.f32 %v1026_v17, %v1025_v16  ;;  %v1028_v19 = vpop.f32.mrb[6].mxu0 }
 0x129   : > { %v1029_v20 = vpop.f32.mrb[7].mxu0 }
 0x12a   : > { %v741_v21 = vadd.f32 %v1027_v18, %v700_v9  ;;  %v1030_v22 = vadd.f32 %v1029_v20, %v1028_v19 }
 0x12c   : > { %v782_v23 = vadd.f32 %v781_v12, %v741_v21  ;;  %v744_v24 = vadd.f32 %v1030_v22, %v703_v11 }
 0x12e   : > { %v785_v25 = vadd.f32 %v784_v14, %v744_v24  ;;  %v789_v26 = vsel %vm788_vm2, %v782_v23, 0.0 }
 0x12f   : > { %790 = vadd.xlane.f32.xlu0 %v789_v26 }
 0x130   : > { %v792_v27 = vsel %vm788_vm2, %v785_v25, 0.0 }
 0x133   : > { %793 = vadd.xlane.f32.xlu0 %v792_v27 }
 0x1bc   : > { %v791_v28 = vpop.xlane.xlu0 %790 }
 0x1bd   : > { %v796_v29 = vmul.f32 0.03125, %v791_v28 }
 0x1bf   : > { %v798_v30 = vsub.f32 %v782_v23, %v796_v29 }
 0x1c0   : > { %v794_v31 = vpop.xlane.xlu0 %793 }
 0x1c1   : > { %v797_v32 = vmul.f32 0.03125, %v794_v31  ;;  %v800_v33 = vmul.f32 %v798_v30, %v798_v30 }
 0x1c3   : > { %v799_v34 = vsub.f32 %v785_v25, %v797_v32  ;;  %v802_v35 = vsel %vm788_vm2, %v800_v33, 0.0 }
 0x1c4   : > { %803 = vadd.xlane.f32.xlu1 %v802_v35 }
 0x1c5   : > { %v801_v36 = vmul.f32 %v799_v34, %v799_v34 }
 0x1c7   : > { %v805_v37 = vsel %vm788_vm2, %v801_v36, 0.0 }
 0x1c8   : > { %806 = vadd.xlane.f32.xlu1 %v805_v37 }
 0x251   : > { %v804_v38 = vpop.xlane.xlu1 %803 }
 0x252   : > { %v808_v39 = vmul.f32 0.03125, %v804_v38 }
 0x254   : > { %v810_v40 = vadd.f32 1e-05, %v808_v39 }
 0x255   : > { %v807_v41 = vpop.xlane.xlu1 %806 }
 0x256   : > { %1129 = vrsqrt.f32 %v810_v40  ;;  %v809_v42 = vmul.f32 0.03125, %v807_v41 }
 0x258   : > { %v811_v43 = vadd.f32 1e-05, %v809_v42 }
 0x25a   : > { %1131 = vrsqrt.f32 %v811_v43 }
 0x260   : > { %v1130_v44 = vpop.eup %1129 }
 0x261   : > { %v814_v45 = vmul.f32 %v1130_v44, %v798_v30 }
 0x263   : > { %vm816_vm3 = vcmp.ge.f32.partialorder %v814_v45, 0.0  ;;  %v818_v46 = vmul.f32 0.01, %v814_v45 }
 0x264   : > { %v1132_v47 = vpop.eup %1131 }
 0x265   : > { %v820_v48 = vsel %vm816_vm3, %v814_v45, %v818_v46  ;;  %v815_v49 = vmul.f32 %v1132_v47, %v799_v34 }
 0x266   : > { %v963_v50 = vpack.c.bf16 %v820_v48, %v820_v48 }
 0x267   : > { %vm817_vm5 = vcmp.ge.f32.partialorder %v815_v49, 0.0  ;;  %v819_v51 = vmul.f32 0.01, %v815_v49 }
 0x268   : > { %831 = vst.msk [vmem:[%s143_s4] sm:$0xf] %vm830_vm4, %v963_v50 }
 0x269   : > { %v821_v52 = vsel %vm817_vm5, %v815_v49, %v819_v51 }
 0x26a   : > { %v964_v53 = vpack.c.bf16 %v821_v52, %v821_v52 }
 0x26c   : > { %832 = vst.msk [vmem:[%s143_s4 + $0x4] sm:$0xf] %vm830_vm4, %v964_v53 }
 0x26d PF: > { %s12_s9 = sadd.s32 1, %s1139_s9  }
 0x26e   : > { %p9_p4 = scmp.ge.s32.totalorder %s12_s9, 4  }
 0x270   :  { %11 = sbr.rel (!%p9_p4) target bundleno = 1 (0x1), region = 58 }

// kernel: nnunet3d_forward.39
= control target key start
LH: loop header
LB: loop body
LE: loop exit
PB: predicated region body
PF: predicated region fallthrough
CT: control target
= control target key end

     0   :  { %s519_s12 = smov 0   ;;  %s521_s13 = smov 0   ;;  %s572_s0 = inlined_call_operand.vmem [shape: bf16[32,16], index: 0, kind: input, shape index: {}]   ;;  %s573_s1 = inlined_call_operand.vmem [shape: bf16[2,16,32], index: 1, kind: input, shape index: {}]   ;;  %s574_s2 = inlined_call_operand.vmem [shape: f32[32,1], index: 2, kind: input, shape index: {}]   ;;  %s575_s3 = inlined_call_operand.vmem [shape: bf16[2,32,32], index: 3, kind: output, shape index: {}]  }
   0x1   :  { %s523_s14 = smov 0  }
   0x2 LB: > { %s25_s15 = sadd.s32 1, %s492_s13  ;;  %p413_p0 = scmp.ge.s32.totalorder %s496_s14, 1  ;;  %s496_s14 = sphi %s523_s14, %s13_s14   ;;  %s492_s13 = sphi %s521_s13, %s577_s13   ;;  %s488_s12 = sphi %s519_s12, %s576_s12  }
   0x3   : > { %p27_p1 = scmp.ge.s32.totalorder %s25_s15, 2  ;;  %p156_p2 = scmp.lt.s32.totalorder %s496_s14, 3 }
   0x5   : > { %s579_s15 = smov (%p27_p1, %s25_s15), 0  ;;  %p157_p3 = pnand %p413_p0, %p156_p2 }
   0x6   : > { %p186_p4 = scmp.lt.s32.totalorder (!%p157_p3), %s488_s12, 1  ;;  %v472_v0 = vld [vmem:[%s572_s0] sm:$0xff] (!%p157_p3)   ;;  %vm249_vm0 = vcmask (!%p157_p3), 130048   ;;  %v211_v1 = vld [vmem:[%s574_s2 + $0x10] sm:$0xff] (!%p157_p3)  ;;  %v498_v3 = vmov (!%p157_p3), 0   ;;  %v212_v4 = vld [vmem:[%s574_s2 + $0x18] sm:$0xff] (!%p157_p3) }
   0x7   : > { %160 = sbr.rel (%p157_p3) target bundleno = 242 (0xf2), region = 32  ;;  %440 = vmatprep.mubr.msk.bf16.mxu0 (!%p157_p3), %vm249_vm0, %v472_v0  ;;  %v209_v2 = vld [vmem:[%s574_s2] sm:$0xff] (!%p157_p3)  ;;  %470 = vset.pattern.permute.xlu1 (!%p157_p3), %v498_v3  ;;  %v210_v5 = vld [vmem:[%s574_s2 + $0x8] sm:$0xff] (!%p157_p3)  ;;  %vm321_vm1 = vcmask (!%p157_p3), 257024  }
   0x8   : > { %469 = vset.pattern.permute.xlu0 (!%p157_p3), %v498_v3  ;;  %225 = vperm.xlu1 (!%p157_p3), %470, %v211_v1   ;;  %v473_v7 = vld [vmem:[%s572_s0 + $0x8] sm:$0xff] (!%p157_p3)  }
   0x9   : > { %215 = vperm.xlu0 (!%p157_p3), %469, %v209_v2  }
   0xc   : > { %230 = vperm.xlu1 (!%p157_p3), %470, %v212_v4  }
   0xd   : > { %220 = vperm.xlu0 (!%p157_p3), %469, %v210_v5  }
   0xe   : > { %s581_s12 = smov (!%p186_p4, %s488_s12), 1 }
   0xf   : > { %s429_s22 = sshll.u32 %s581_s12, 3  ;;  %s430_s5 = sshll.u32 %s581_s12, 4 }
  0x10   : > { %s193_s25 = scalar_lea.vmem %s573_s1, %s429_s22  ;;  %s201_s8 = scalar_lea.vmem %s575_s3, %s430_s5 }
  0x11   : > { %v471_v6 = vld [vmem:[%s193_s25] sm:$0xff]  }
  0x12   : > { %438 = vmatprep.subr.bf16.mxu0 %v471_v6 }
  0x13   : > { %439 = vmatpush3.bf16.msra.mxu0 %v471_v6 }
  0x16   : > { %441 = vmatmul.mubr.msk.bf16.vlgmr.msra.gmra.mrb[0].mxu0 %vm249_vm0, %v473_v7 }
  0x87   : > { %v226_v8 = vpop.permute.xlu1 %225 }
  0x88   : > { %v216_v9 = vpop.permute.xlu0 %215 }
  0x8b   : > { %v231_v13 = vpop.permute.xlu1 %230 }
  0x8c   : > { %v221_v16 = vpop.permute.xlu0 %220 }
  0xe9   : > { %v442_v10 = vpop.f32.mrb[0].mxu0 }
  0xea   : > { %v299_v11 = vadd.f32 %v442_v10, %v226_v8  ;;  %v290_v12 = vpop.f32.mrb[1].mxu0 }
  0xeb   : > { %v291_v14 = vadd.f32 %v290_v12, %v216_v9  ;;  %v443_v15 = vpop.f32.mrb[2].mxu0 }
  0xec   : > { %v433_v17 = vpack.c.bf16 %v299_v11, %v299_v11  ;;  %v302_v18 = vadd.f32 %v443_v15, %v231_v13  ;;  %v293_v19 = vpop.f32.mrb[3].mxu0 }
  0xed   : > { %v431_v20 = vpack.c.bf16 %v291_v14, %v291_v14  ;;  %v294_v21 = vadd.f32 %v293_v19, %v221_v16 }
  0xee   : > { %324 = vst.msk [vmem:[%s201_s8 + $0x8] sm:$0xf] %vm321_vm1, %v433_v17  ;;  %v434_v22 = vpack.c.bf16 %v302_v18, %v302_v18 }
  0xef   : > { %322 = vst.msk [vmem:[%s201_s8] sm:$0xf] %vm321_vm1, %v431_v20  ;;  %v432_v23 = vpack.c.bf16 %v294_v21, %v294_v21 }
  0xf0   : > { %325 = vst.msk [vmem:[%s201_s8 + $0xc] sm:$0xf] %vm321_vm1, %v434_v22 }
  0xf1   : > { %323 = vst.msk [vmem:[%s201_s8 + $0x4] sm:$0xf] %vm321_vm1, %v432_v23 }
  0xf2 PF: > { %s13_s14 = sadd.s32 1, %s496_s14   ;;  %s576_s12 = smov %s492_s13 }
  0xf3   : > { %p10_p5 = scmp.ge.s32.totalorder %s13_s14, 4   ;;  %s577_s13 = smov %s579_s15 }
  0xf5   :  { %12 = sbr.rel (!%p10_p5) target bundleno = 2 (0x2), region = 62 }

// kernel: nnunet3d_forward.40
= control target key start
LH: loop header
LB: loop body
LE: loop exit
PB: predicated region body
PF: predicated region fallthrough
CT: control target
= control target key end

     0   :  { %s658_s9 = smov 0   ;;  %s737_s0 = inlined_call_operand.vmem [shape: bf16[8,432], index: 0, kind: input, shape index: {}]   ;;  %s738_s1 = inlined_call_operand.vmem [shape: bf16[2,432,128], index: 1, kind: input, shape index: {}]   ;;  %s739_s2 = inlined_call_operand.vmem [shape: bf16[2,8,128], index: 2, kind: output, shape index: {}]  }
   0x1 LB: > { %s528_s10 = sadd.s32 4294967295, %s640_s9   ;;  %p532_p0 = scmp.ge.s32.totalorder %s640_s9, 1  ;;  %s640_s9 = sphi %s658_s9, %s12_s9  }
   0x2   : > { %p112_p1 = scmp.lt.s32.totalorder %s640_s9, 3 }
   0x4   : > { %p113_p2 = pnand %p532_p0, %p112_p1 }
   0x5   : > { %p133_p3 = scmp.lt.s32.totalorder (!%p113_p2), %s528_s10, 1  ;;  %v669_v0 = vld [vmem:[%s737_s0] sm:$0xff] (!%p113_p2)  ;;  %v674_v1 = vld [vmem:[%s737_s0 + $0x8] sm:$0xff] (!%p113_p2)  ;;  %vm374_vm0 = vcmask (!%p113_p2), 392192   ;;  %v642_v2 = vmov (!%p113_p2), 0  }
   0x6   : > { %116 = sbr.rel (%p113_p2) target bundleno = 588 (0x24c), region = 28  ;;  %418 = vmatprep.subr.bf16.mxu1 (!%p113_p2), %v642_v2  ;;  %v536_v3 = vcombine.high (!%p113_p2), %v669_v0, %v669_v0  ;;  %v538_v4 = vcombine.high (!%p113_p2), %v674_v1, %v674_v1  ;;  %v535_v30 = vcombine.low (!%p113_p2), %v669_v0, %v669_v0  ;;  %v537_v33 = vcombine.low (!%p113_p2), %v674_v1, %v674_v1 }
   0x8   : > { %410 = vmatprep.mubr.bf16.mxu0 (!%p113_p2), %v536_v3  ;;  %566 = vmatprep.mubr.msk.bf16.mxu1 (!%p113_p2), %vm374_vm0, %v538_v4 }
   0xd   : > { %s741_s10 = smov (!%p133_p3, %s528_s10), 1 }
   0xe   : > { %s591_s15 = smul.u32 216, %s741_s10  ;;  %s534_s19 = sshll.u32 %s741_s10, 2 }
   0xf   : > { %s141_s22 = scalar_lea.vmem %s739_s2, %s534_s19 }
  0x10   : > { %s687_s18 = scalar_lea.vmem %s738_s1, %s591_s15 }
  0x11   : > { %v601_v5 = vld [vmem:[%s687_s18 + $0x80] sm:$0xff]   ;;  %v602_v6 = vld [vmem:[%s687_s18 + $0x88] sm:$0xff]   ;;  %v605_v9 = vld [vmem:[%s687_s18 + $0x90] sm:$0xff]  }
  0x12   : > { %419 = vmatpush1.bf16.msra.mxu1 %v601_v5  ;;  %v603_v7 = vld [vmem:[%s687_s18 + $0x40] sm:$0xff]   ;;  %v606_v10 = vld [vmem:[%s687_s18 + $0x48] sm:$0xff]   ;;  %v609_v12 = vld [vmem:[%s687_s18 + $0x50] sm:$0xff]  }
  0x13   : > { %420 = vmatprep.subr.bf16.mxu1 %v642_v2  ;;  %v604_v8 = vld [vmem:[%s687_s18] sm:$0xff]   ;;  %569 = vmatprep.subr.bf16.mxu0 %v603_v7  ;;  %v607_v11 = vld [vmem:[%s687_s18 + $0x8] sm:$0xff]   ;;  %v610_v13 = vld [vmem:[%s687_s18 + $0x10] sm:$0xff]  }
  0x14   : > { %570 = vmatpush3.bf16.msra.mxu0 %v604_v8  ;;  %v608_v14 = vld [vmem:[%s687_s18 + $0x98] sm:$0xff]   ;;  %v611_v16 = vld [vmem:[%s687_s18 + $0xa0] sm:$0xff]   ;;  %v614_v19 = vld [vmem:[%s687_s18 + $0xa8] sm:$0xff]  }
  0x15   : > { %571 = vmatprep.subr.bf16.mxu0 %v606_v10  ;;  %v612_v15 = vld [vmem:[%s687_s18 + $0x58] sm:$0xff]   ;;  %v615_v18 = vld [vmem:[%s687_s18 + $0x60] sm:$0xff]   ;;  %v618_v21 = vld [vmem:[%s687_s18 + $0x68] sm:$0xff]  }
  0x16   : > { %421 = vmatpush1.bf16.msra.mxu1 %v602_v6  ;;  %v613_v17 = vld [vmem:[%s687_s18 + $0x18] sm:$0xff]   ;;  %v616_v20 = vld [vmem:[%s687_s18 + $0x20] sm:$0xff]   ;;  %v617_v22 = vld [vmem:[%s687_s18 + $0xb0] sm:$0xff]  }
  0x17   : > { %422 = vmatprep.subr.bf16.mxu1 %v642_v2  ;;  %v619_v23 = vld [vmem:[%s687_s18 + $0x28] sm:$0xff]   ;;  %v621_v24 = vld [vmem:[%s687_s18 + $0x70] sm:$0xff]   ;;  %v620_v25 = vld [vmem:[%s687_s18 + $0xb8] sm:$0xff]  }
  0x18   : > { %572 = vmatpush3.bf16.msra.mxu0 %v607_v11  ;;  %v622_v26 = vld [vmem:[%s687_s18 + $0x30] sm:$0xff]   ;;  %v624_v27 = vld [vmem:[%s687_s18 + $0x78] sm:$0xff]   ;;  %v623_v29 = vld [vmem:[%s687_s18 + $0xc0] sm:$0xff]  }
  0x19   : > { %573 = vmatprep.subr.bf16.mxu0 %v609_v12  ;;  %v625_v28 = vld [vmem:[%s687_s18 + $0x38] sm:$0xff]   ;;  %v628_v31 = vld [vmem:[%s687_s18 + $0xc8] sm:$0xff]   ;;  %v629_v32 = vld [vmem:[%s687_s18 + $0xd0] sm:$0xff]  }
  0x1a   : > { %423 = vmatpush1.bf16.msra.mxu1 %v605_v9 }
  0x1b   : > { %424 = vmatprep.subr.bf16.mxu1 %v642_v2 }
  0x1c   : > { %574 = vmatpush3.bf16.msra.mxu0 %v610_v13 }
  0x1d   : > { %575 = vmatprep.subr.bf16.mxu0 %v612_v15 }
  0x1e   : > { %425 = vmatpush1.bf16.msra.mxu1 %v608_v14 }
  0x1f   : > { %426 = vmatprep.subr.bf16.mxu1 %v642_v2 }
  0x20   : > { %576 = vmatpush3.bf16.msra.mxu0 %v613_v17 }
  0x21   : > { %577 = vmatprep.subr.bf16.mxu0 %v615_v18 }
  0x22   : > { %427 = vmatpush1.bf16.msra.mxu1 %v611_v16 }
  0x23   : > { %428 = vmatprep.subr.bf16.mxu1 %v642_v2 }
  0x24   : > { %578 = vmatpush3.bf16.msra.mxu0 %v616_v20 }
  0x25   : > { %579 = vmatprep.subr.bf16.mxu0 %v618_v21 }
  0x26   : > { %429 = vmatpush1.bf16.msra.mxu1 %v614_v19 }
  0x27   : > { %430 = vmatprep.subr.bf16.mxu1 %v642_v2 }
  0x28   : > { %580 = vmatpush3.bf16.msra.mxu0 %v619_v23 }
  0x29   : > { %581 = vmatprep.subr.bf16.mxu0 %v621_v24 }
  0x2a   : > { %431 = vmatpush1.bf16.msra.mxu1 %v617_v22 }
  0x2b   : > { %432 = vmatprep.subr.bf16.mxu1 %v642_v2 }
  0x2c   : > { %582 = vmatpush3.bf16.msra.mxu0 %v622_v26 }
  0x2d   : > { %583 = vmatprep.subr.bf16.mxu0 %v624_v27 }
  0x2e   : > { %433 = vmatpush1.bf16.msra.mxu1 %v620_v25 }
  0x2f   : > { %434 = vmatprep.subr.bf16.mxu1 %v642_v2 }
  0x30   : > { %584 = vmatpush3.bf16.msra.mxu0 %v625_v28 }
  0x32   : > { %435 = vmatpush1.bf16.msra.mxu1 %v623_v29 }
  0x33   : > { %436 = vmatprep.subr.bf16.mxu1 %v642_v2  ;;  %411 = vmatmul.mubr.bf16.vlgmr.msra.gmra.mrb[0].mxu0 %v535_v30 }
  0x36   : > { %437 = vmatpush1.bf16.msra.mxu1 %v628_v31 }
  0x37   : > { %438 = vmatprep.subr.bf16.mxu1 %v642_v2 }
  0x3a   : > { %439 = vmatpush1.bf16.msra.mxu1 %v629_v32 }
  0x3d   : > { %451 = vmatmul.mubr.bf16.vlgmr.msra.gmra.mrb[0].mxu1 %v537_v33 }
 0x106   : > { %v585_v34 = vpop.f32.mrb[0].mxu0 }
 0x107   : > { %v586_v35 = vpop.f32.mrb[1].mxu0 }
 0x108   : > { %v587_v36 = vadd.f32 %v586_v35, %v585_v34  ;;  %v588_v37 = vpop.f32.mrb[2].mxu0 }
 0x109   : > { %v589_v38 = vpop.f32.mrb[3].mxu0 }
 0x110   : > { %v452_v39 = vpop.f32.mrb[0].mxu1 }
 0x111   : > { %v453_v40 = vadd.f32 %v587_v36, %v452_v39  ;;  %v454_v41 = vpop.f32.mrb[1].mxu1 }
 0x112   : > { %v455_v42 = vpop.f32.mrb[2].mxu1 }
 0x113   : > { %v456_v43 = vpop.f32.mrb[3].mxu1  ;;  %458 = vadd.xlane.f32.xlu0 %v453_v40 }
 0x1a0   : > { %v459_v44 = vpop.xlane.xlu0 %458 }
 0x1a1   : > { %v461_v45 = vmul.f32 0.0078125, %v459_v44 }
 0x1a3   : > { %v462_v46 = vsub.f32 %v453_v40, %v461_v45 }
 0x1a5   : > { %v463_v47 = vmul.f32 %v462_v46, %v462_v46 }
 0x1a7   : > { %464 = vadd.xlane.f32.xlu0 %v463_v47 }
 0x234   : > { %v465_v48 = vpop.xlane.xlu0 %464 }
 0x235   : > { %v466_v49 = vmul.f32 0.0078125, %v465_v48 }
 0x237   : > { %v467_v50 = vadd.f32 1e-05, %v466_v49 }
 0x239   : > { %632 = vrsqrt.f32 %v467_v50 }
 0x243   : > { %v633_v51 = vpop.eup %632 }
 0x244   : > { %v469_v52 = vmul.f32 %v633_v51, %v462_v46 }
 0x246   : > { %vm470_vm1 = vcmp.ge.f32.partialorder %v469_v52, 0.0  ;;  %v471_v53 = vmul.f32 0.01, %v469_v52 }
 0x248   : > { %v472_v54 = vsel %vm470_vm1, %v469_v52, %v471_v53 }
 0x249   : > { %v473_v55 = vpack.c.bf16 %v472_v54, %v472_v54 }
 0x24b   : > { %474 = vst [vmem:[%s141_s22] sm:$0xf] %v473_v55 }
 0x24c PF: > { %s12_s9 = sadd.s32 1, %s640_s9  }
 0x24d   : > { %p9_p4 = scmp.ge.s32.totalorder %s12_s9, 4  }
 0x24f   :  { %11 = sbr.rel (!%p9_p4) target bundleno = 1 (0x1), region = 58 }

// kernel: nnunet3d_forward.42
= control target key start
LH: loop header
LB: loop body
LE: loop exit
PB: predicated region body
PF: predicated region fallthrough
CT: control target
= control target key end

     0   :  { %s465_s12 = smov 0   ;;  %s467_s13 = smov 0   ;;  %s507_s0 = inlined_call_operand.vmem [shape: bf16[16,8], index: 0, kind: input, shape index: {}]   ;;  %s508_s1 = inlined_call_operand.vmem [shape: bf16[2,8,128], index: 1, kind: input, shape index: {}]   ;;  %s509_s2 = inlined_call_operand.vmem [shape: f32[16,1], index: 2, kind: input, shape index: {}]   ;;  %s510_s3 = inlined_call_operand.vmem [shape: bf16[2,16,128], index: 3, kind: output, shape index: {}]  }
   0x1   :  { %s469_s14 = smov 0  }
   0x2 LB: > { %s25_s15 = sadd.s32 1, %s436_s13  ;;  %p363_p0 = scmp.ge.s32.totalorder %s440_s14, 1  ;;  %s440_s14 = sphi %s469_s14, %s13_s14   ;;  %s436_s13 = sphi %s467_s13, %s512_s13   ;;  %s432_s12 = sphi %s465_s12, %s511_s12  }
   0x3   : > { %p27_p1 = scmp.ge.s32.totalorder %s25_s15, 2  ;;  %p155_p2 = scmp.lt.s32.totalorder %s440_s14, 3 }
   0x5   : > { %s514_s15 = smov (%p27_p1, %s25_s15), 0  ;;  %p156_p3 = pnand %p363_p0, %p155_p2 }
   0x6   : > { %p184_p4 = scmp.lt.s32.totalorder (!%p156_p3), %s432_s12, 1  ;;  %v442_v0 = vmov (!%p156_p3), 0.0   ;;  %vm443_vm0 = vmmov (!%p156_p3), 0   ;;  %v203_v1 = vld [vmem:[%s509_s2] sm:$0xff] (!%p156_p3)  ;;  %v444_v2 = vmov (!%p156_p3), 0   ;;  %vm224_vm1 = vcmask (!%p156_p3), 1043456  }
   0x7   : > { %159 = sbr.rel (%p156_p3) target bundleno = 241 (0xf1), region = 32  ;;  %383 = vmatprep.subr.bf16.mxu0 (!%p156_p3), %v442_v0  ;;  %385 = vmatprep.mubr.msk.bf16.mxu0 (!%p156_p3), %vm443_vm0, %v442_v0  ;;  %v204_v3 = vld [vmem:[%s509_s2 + $0x8] sm:$0xff] (!%p156_p3)  ;;  %v417_v6 = vld [vmem:[%s507_s0] sm:$0xff] (!%p156_p3)   ;;  %vm220_vm2 = vcmask (!%p156_p3), 64512  }
   0x8   : > { %416 = vset.pattern.permute.xlu0 (!%p156_p3), %v444_v2 }
   0x9   : > { %207 = vperm.xlu0 (!%p156_p3), %416, %v203_v1  }
   0xd   : > { %212 = vperm.xlu0 (!%p156_p3), %416, %v204_v3  }
   0xe   : > { %s516_s12 = smov (!%p184_p4, %s432_s12), 1 }
   0xf   : > { %s364_s18 = sshll.u32 %s516_s12, 2  ;;  %s373_s26 = sshll.u32 %s516_s12, 3 }
  0x10   : > { %s190_s23 = scalar_lea.vmem %s508_s1, %s364_s18  ;;  %s198_s29 = scalar_lea.vmem %s510_s3, %s373_s26 }
  0x11   : > { %v202_v4 = vld [vmem:[%s190_s23] sm:$0xf] }
  0x12   : > { %v226_v5 = vsel %vm224_vm1, %v202_v4, 0 }
  0x13   : > { %384 = vmatpush3.bf16.msra.mxu0 %v226_v5 }
  0x16   : > { %386 = vmatmul.mubr.msk.bf16.vlgmr.msra.gmra.mrb[0].mxu0 %vm220_vm2, %v417_v6 }
  0x88   : > { %v208_v7 = vpop.permute.xlu0 %207 }
  0x8c   : > { %v213_v10 = vpop.permute.xlu0 %212 }
  0xe9   : > { %v262_v8 = vpop.f32.mrb[0].mxu0 }
  0xea   : > { %v387_v9 = vpop.f32.mrb[1].mxu0  ;;  %v263_v12 = vadd.f32 %v262_v8, %v208_v7 }
  0xeb   : > { %v265_v11 = vpop.f32.mrb[2].mxu0 }
  0xec   : > { %v266_v13 = vadd.f32 %v265_v11, %v213_v10  ;;  %v388_v14 = vpop.f32.mrb[3].mxu0 }
  0xee   : > { %v379_v15 = vpack.c.bf16 %v266_v13, %v263_v12 }
  0xf0   : > { %380 = vst [vmem:[%s198_s29] sm:$0xff] %v379_v15  }
  0xf1 PF: > { %s13_s14 = sadd.s32 1, %s440_s14   ;;  %s511_s12 = smov %s436_s13 }
  0xf2   : > { %p10_p5 = scmp.ge.s32.totalorder %s13_s14, 4   ;;  %s512_s13 = smov %s514_s15 }
  0xf4   :  { %12 = sbr.rel (!%p10_p5) target bundleno = 2 (0x2), region = 62 }

// kernel: nnunet3d_forward.43
= control target key start
LH: loop header
LB: loop body
LE: loop exit
PB: predicated region body
PF: predicated region fallthrough
CT: control target
= control target key end

     0   :  { %s900_s9 = smov 0   ;;  %s998_s0 = inlined_call_operand.vmem [shape: bf16[4,216], index: 0, kind: input, shape index: {}]   ;;  %s999_s1 = inlined_call_operand.vmem [shape: bf16[2,216,512], index: 1, kind: input, shape index: {}]   ;;  %s1000_s2 = inlined_call_operand.vmem [shape: bf16[2,4,512], index: 2, kind: output, shape index: {}]  }
   0x1 LB: > { %s708_s10 = sadd.s32 4294967295, %s882_s9   ;;  %p712_p0 = scmp.ge.s32.totalorder %s882_s9, 1  ;;  %s882_s9 = sphi %s900_s9, %s12_s9  }
   0x2   : > { %p112_p1 = scmp.lt.s32.totalorder %s882_s9, 3 }
   0x4   : > { %p113_p2 = pnand %p712_p0, %p112_p1 }
   0x5   : > { %p134_p3 = scmp.lt.s32.totalorder (!%p113_p2), %s708_s10, 1  ;;  %v911_v0 = vld.sshfl [vmem:[%s998_s0] sm:$0x33 pattern:$0x76325410] (!%p113_p2)  ;;  %vm480_vm0 = vcmask (!%p113_p2), 719872  }
   0x6   : > { %116 = sbr.rel (%p113_p2) target bundleno = 620 (0x26c), region = 28  ;;  %v208_v1 = vcombine.high (!%p113_p2), %v911_v0, %v911_v0  ;;  %vm484_vm1 = vcmask (!%p113_p2), 1043456  }
   0x8   : > { %774 = vmatprep.mubr.msk.bf16.mxu0 (!%p113_p2), %vm480_vm0, %v208_v1  ;;  %776 = vmatprep.mubr.msk.bf16.mxu1 (!%p113_p2), %vm480_vm0, %v208_v1 }
   0xd   : > { %s1002_s10 = smov (!%p134_p3, %s708_s10), 1 }
   0xe   : > { %s782_s13 = smul.u32 432, %s1002_s10  ;;  %s781_s17 = sshll.u32 %s1002_s10, 3 }
   0xf   : > { %s143_s20 = scalar_lea.vmem %s1000_s2, %s781_s17 }
  0x10   : > { %s921_s16 = scalar_lea.vmem %s999_s1, %s782_s13 }
  0x11   : > { %v792_v2 = vld [vmem:[%s921_s16 + $0x4] ss:$16 sps:$4 sm:$0xff]   ;;  %v794_v3 = vld [vmem:[%s921_s16 + $0xc] ss:$16 sps:$4 sm:$0xff]   ;;  %v796_v4 = vld [vmem:[%s921_s16] ss:$16 sps:$4 sm:$0xff]  }
  0x12   : > { %497 = vmatprep.subr.bf16.mxu0 %v792_v2  ;;  %v797_v5 = vld [vmem:[%s921_s16 + $0x8] ss:$16 sps:$4 sm:$0xff]   ;;  %538 = vmatprep.subr.bf16.mxu1 %v794_v3  ;;  %v798_v6 = vld [vmem:[%s921_s16 + $0x24] ss:$16 sps:$4 sm:$0xff]   ;;  %v800_v7 = vld [vmem:[%s921_s16 + $0x2c] ss:$16 sps:$4 sm:$0xff]  }
  0x13   : > { %498 = vmatpush1.bf16.msra.mxu0 %v796_v4  ;;  %539 = vmatpush1.bf16.msra.mxu1 %v797_v5  ;;  %v802_v8 = vld [vmem:[%s921_s16 + $0x20] ss:$16 sps:$4 sm:$0xff]   ;;  %v803_v9 = vld [vmem:[%s921_s16 + $0x28] ss:$16 sps:$4 sm:$0xff]   ;;  %v804_v10 = vld [vmem:[%s921_s16 + $0x44] ss:$16 sps:$4 sm:$0xff]  }
  0x14   : > { %499 = vmatprep.subr.bf16.mxu0 %v798_v6  ;;  %540 = vmatprep.subr.bf16.mxu1 %v800_v7  ;;  %v806_v11 = vld [vmem:[%s921_s16 + $0x4c] ss:$16 sps:$4 sm:$0xff]   ;;  %v808_v12 = vld [vmem:[%s921_s16 + $0x40] ss:$16 sps:$4 sm:$0xff]   ;;  %v809_v13 = vld [vmem:[%s921_s16 + $0x48] ss:$16 sps:$4 sm:$0xff]  }
  0x15   : > { %v810_v14 = vld [vmem:[%s921_s16 + $0x64] ss:$16 sps:$4 sm:$0xff]   ;;  %v812_v15 = vld [vmem:[%s921_s16 + $0x6c] ss:$16 sps:$4 sm:$0xff]   ;;  %v814_v16 = vld [vmem:[%s921_s16 + $0x60] ss:$16 sps:$4 sm:$0xff]  }
  0x16   : > { %v815_v17 = vld [vmem:[%s921_s16 + $0x68] ss:$16 sps:$4 sm:$0xff]   ;;  %v816_v18 = vld [vmem:[%s921_s16 + $0x84] ss:$16 sps:$4 sm:$0xff]   ;;  %v818_v19 = vld [vmem:[%s921_s16 + $0x8c] ss:$16 sps:$4 sm:$0xff]  }
  0x17   : > { %500 = vmatpush1.bf16.msra.mxu0 %v802_v8  ;;  %541 = vmatpush1.bf16.msra.mxu1 %v803_v9  ;;  %v820_v20 = vld [vmem:[%s921_s16 + $0x80] ss:$16 sps:$4 sm:$0xff]   ;;  %v821_v21 = vld [vmem:[%s921_s16 + $0x88] ss:$16 sps:$4 sm:$0xff]   ;;  %v822_v22 = vld [vmem:[%s921_s16 + $0xa4] ss:$16 sps:$4 sm:$0xff]  }
  0x18   : > { %501 = vmatprep.subr.bf16.mxu0 %v804_v10  ;;  %542 = vmatprep.subr.bf16.mxu1 %v806_v11  ;;  %v824_v23 = vld [vmem:[%s921_s16 + $0xac] ss:$16 sps:$4 sm:$0xff]   ;;  %v826_v24 = vld [vmem:[%s921_s16 + $0xa0] ss:$16 sps:$4 sm:$0xff]   ;;  %v827_v25 = vld [vmem:[%s921_s16 + $0xa8] ss:$16 sps:$4 sm:$0xff]  }
  0x19   : > { %v828_v26 = vld [vmem:[%s921_s16 + $0xc4] ss:$16 sps:$4 sm:$0xff]   ;;  %v830_v27 = vld [vmem:[%s921_s16 + $0xcc] ss:$16 sps:$4 sm:$0xff]   ;;  %v832_v28 = vld [vmem:[%s921_s16 + $0xc0] ss:$16 sps:$4 sm:$0xff]  }
  0x1a   : > { %v833_v29 = vld [vmem:[%s921_s16 + $0xc8] ss:$16 sps:$4 sm:$0xff]   ;;  %v834_v30 = vld [vmem:[%s921_s16 + $0xe4] ss:$16 sps:$4 sm:$0xff]   ;;  %v836_v31 = vld [vmem:[%s921_s16 + $0xec] ss:$16 sps:$4 sm:$0xff]  }
  0x1b   : > { %502 = vmatpush1.bf16.msra.mxu0 %v808_v12  ;;  %543 = vmatpush1.bf16.msra.mxu1 %v809_v13  ;;  %v838_v32 = vld [vmem:[%s921_s16 + $0xe0] ss:$16 sps:$4 sm:$0xff]   ;;  %v839_v33 = vld [vmem:[%s921_s16 + $0xe8] ss:$16 sps:$4 sm:$0xff]   ;;  %v840_v34 = vld [vmem:[%s921_s16 + $0x104] ss:$16 sps:$4 sm:$0xff]  }
  0x1c   : > { %503 = vmatprep.subr.bf16.mxu0 %v810_v14  ;;  %544 = vmatprep.subr.bf16.mxu1 %v812_v15  ;;  %v842_v35 = vld [vmem:[%s921_s16 + $0x10c] ss:$16 sps:$4 sm:$0xff]   ;;  %v844_v36 = vld [vmem:[%s921_s16 + $0x100] ss:$16 sps:$4 sm:$0xff]   ;;  %v845_v37 = vld [vmem:[%s921_s16 + $0x108] ss:$16 sps:$4 sm:$0xff]  }
  0x1d   : > { %v846_v38 = vld [vmem:[%s921_s16 + $0x124] ss:$16 sps:$4 sm:$0xff]   ;;  %v848_v39 = vld [vmem:[%s921_s16 + $0x12c] ss:$16 sps:$4 sm:$0xff]   ;;  %v850_v40 = vld [vmem:[%s921_s16 + $0x120] ss:$16 sps:$4 sm:$0xff]  }
  0x1e   : > { %v851_v41 = vld [vmem:[%s921_s16 + $0x128] ss:$16 sps:$4 sm:$0xff]   ;;  %v852_v42 = vld [vmem:[%s921_s16 + $0x144] ss:$16 sps:$4 sm:$0xff]   ;;  %v854_v43 = vld [vmem:[%s921_s16 + $0x14c] ss:$16 sps:$4 sm:$0xff]  }
  0x1f   : > { %504 = vmatpush1.bf16.msra.mxu0 %v814_v16  ;;  %545 = vmatpush1.bf16.msra.mxu1 %v815_v17  ;;  %v856_v44 = vld [vmem:[%s921_s16 + $0x140] ss:$16 sps:$4 sm:$0xff]   ;;  %v857_v45 = vld [vmem:[%s921_s16 + $0x148] ss:$16 sps:$4 sm:$0xff]   ;;  %v858_v46 = vld [vmem:[%s921_s16 + $0x164] ss:$16 sps:$4 sm:$0xff]  }
  0x20   : > { %505 = vmatprep.subr.bf16.mxu0 %v816_v18  ;;  %546 = vmatprep.subr.bf16.mxu1 %v818_v19  ;;  %v860_v47 = vld [vmem:[%s921_s16 + $0x16c] ss:$16 sps:$4 sm:$0xff]   ;;  %v862_v48 = vld [vmem:[%s921_s16 + $0x160] ss:$16 sps:$4 sm:$0xff]   ;;  %v863_v49 = vld [vmem:[%s921_s16 + $0x168] ss:$16 sps:$4 sm:$0xff]  }
  0x21   : > { %v864_v50 = vld [vmem:[%s921_s16 + $0x184] ss:$16 sps:$4 sm:$0xff]   ;;  %v866_v51 = vld [vmem:[%s921_s16 + $0x18c] ss:$16 sps:$4 sm:$0xff]   ;;  %v868_v54 = vld [vmem:[%s921_s16 + $0x180] ss:$16 sps:$4 sm:$0xff]  }
  0x22   : > { %v198_v52 = vld [vmem:[%s921_s16 + $0x1a0] sm:$0xff]  ;;  %v199_v53 = vld [vmem:[%s921_s16 + $0x1a8] sm:$0xff] }
  0x23   : > { %506 = vmatpush1.bf16.msra.mxu0 %v820_v20  ;;  %547 = vmatpush1.bf16.msra.mxu1 %v821_v21  ;;  %v869_v55 = vld [vmem:[%s921_s16 + $0x188] ss:$16 sps:$4 sm:$0xff]   ;;  %v770_v56 = vcombine.high %v198_v52, %v198_v52  ;;  %v772_v57 = vcombine.high %v199_v53, %v199_v53  ;;  %v769_v58 = vcombine.low %v198_v52, %v198_v52 }
  0x24   : > { %507 = vmatprep.subr.bf16.mxu0 %v822_v22  ;;  %548 = vmatprep.subr.bf16.mxu1 %v824_v23  ;;  %v771_v59 = vcombine.low %v199_v53, %v199_v53 }
  0x25   : > { %v486_v60 = vsel %vm484_vm1, %v769_v58, 0 }
  0x26   : > { %v492_v61 = vsel %vm484_vm1, %v771_v59, 0 }
  0x27   : > { %508 = vmatpush1.bf16.msra.mxu0 %v826_v24  ;;  %549 = vmatpush1.bf16.msra.mxu1 %v827_v25 }
  0x28   : > { %509 = vmatprep.subr.bf16.mxu0 %v828_v26  ;;  %550 = vmatprep.subr.bf16.mxu1 %v830_v27 }
  0x2b   : > { %510 = vmatpush1.bf16.msra.mxu0 %v832_v28  ;;  %551 = vmatpush1.bf16.msra.mxu1 %v833_v29 }
  0x2c   : > { %511 = vmatprep.subr.bf16.mxu0 %v834_v30  ;;  %552 = vmatprep.subr.bf16.mxu1 %v836_v31 }
  0x2f   : > { %512 = vmatpush1.bf16.msra.mxu0 %v838_v32  ;;  %553 = vmatpush1.bf16.msra.mxu1 %v839_v33  ;;  %v884_v33 = vmov 1983009808  }
  0x30   : > { %513 = vmatprep.subr.bf16.mxu0 %v840_v34  ;;  %554 = vmatprep.subr.bf16.mxu1 %v842_v35  ;;  %v637_v34 = vunpack.c.l.s4 %v884_v33  ;;  %v639_v35 = vlaneseq }
  0x33   : > { %514 = vmatpush1.bf16.msra.mxu0 %v844_v36  ;;  %555 = vmatpush1.bf16.msra.mxu1 %v845_v37  ;;  %v638_v37 = vunpack.c.0.s8 %v637_v34 }
  0x34   : > { %515 = vmatprep.subr.bf16.mxu0 %v846_v38  ;;  %556 = vmatprep.subr.bf16.mxu1 %v848_v39  ;;  %v640_v38 = vshrl.u32 %v639_v35, 7 }
  0x37   : > { %516 = vmatpush1.bf16.msra.mxu0 %v850_v40  ;;  %557 = vmatpush1.bf16.msra.mxu1 %v851_v41 }
  0x38   : > { %517 = vmatprep.subr.bf16.mxu0 %v852_v42  ;;  %558 = vmatprep.subr.bf16.mxu1 %v854_v43 }
  0x3b   : > { %518 = vmatpush1.bf16.msra.mxu0 %v856_v44  ;;  %559 = vmatpush1.bf16.msra.mxu1 %v857_v45 }
  0x3c   : > { %519 = vmatprep.subr.bf16.mxu0 %v858_v46  ;;  %560 = vmatprep.subr.bf16.mxu1 %v860_v47  ;;  %v641_v46 = vsub.s32 %v638_v37, %v640_v38 }
  0x3f   : > { %520 = vmatpush1.bf16.msra.mxu0 %v862_v48  ;;  %561 = vmatpush1.bf16.msra.mxu1 %v863_v49 }
  0x40   : > { %521 = vmatprep.subr.bf16.mxu0 %v864_v50  ;;  %562 = vmatprep.subr.bf16.mxu1 %v866_v51 }
  0x43   : > { %522 = vmatpush1.bf16.msra.mxu0 %v868_v54  ;;  %563 = vmatpush1.bf16.msra.mxu1 %v869_v55 }
  0x44   : > { %773 = vmatprep.subr.msk.bf16.mxu0 %vm484_vm1, %v770_v56  ;;  %775 = vmatprep.subr.msk.bf16.mxu1 %vm484_vm1, %v772_v57 }
  0x47   : > { %524 = vmatpush1.bf16.msra.mxu0 %v486_v60  ;;  %565 = vmatpush1.bf16.msra.mxu1 %v492_v61 }
  0x4a   : > { %530 = vmatmul.mubr.bf16.vlgmr.msra.gmra.mrb[0].mxu0 %v911_v0  ;;  %571 = vmatmul.mubr.bf16.vlgmr.msra.gmra.mrb[0].mxu1 %v911_v0 }
 0x11d   : > { %v531_v62 = vpop.f32.mrb[0].mxu0  ;;  %v572_v63 = vpop.f32.mrb[0].mxu1 }
 0x11e   : > { %v579_v1 = vsel %vm484_vm1, %v531_v62, 0.0  ;;  %v533_v2 = vpop.f32.mrb[1].mxu0  ;;  %v574_v3 = vpop.f32.mrb[1].mxu1  ;;  %v582_v4 = vsel %vm484_vm1, %v572_v63, 0.0 }
 0x11f   : > { %v580_v5 = vsel %vm484_vm1, %v533_v2, 0.0  ;;  %v535_v6 = vpop.f32.mrb[2].mxu0  ;;  %v576_v7 = vpop.f32.mrb[2].mxu1  ;;  %v584_v12 = vsel %vm484_vm1, %v574_v3, 0.0 }
 0x120   : > { %v581_v8 = vadd.f32 %v580_v5, %v579_v1  ;;  %v536_v9 = vpop.f32.mrb[3].mxu0  ;;  %v577_v10 = vpop.f32.mrb[3].mxu1 }
 0x122   : > { %v583_v11 = vadd.f32 %v582_v4, %v581_v8 }
 0x124   : > { %v585_v13 = vadd.f32 %v584_v12, %v583_v11 }
 0x126   : > { %586 = vadd.xlane.f32.xlu0 %v585_v13 }
 0x1b3   : > { %v587_v0 = vpop.xlane.xlu0 %586 }
 0x1b4   : > { %v589_v14 = vmul.f32 0.001953125, %v587_v0 }
 0x1b6   : > { %v590_v15 = vsub.f32 %v531_v62, %v589_v14  ;;  %v591_v16 = vsub.f32 %v533_v2, %v589_v14  ;;  %v592_v17 = vsub.f32 %v572_v63, %v589_v14  ;;  %v593_v18 = vsub.f32 %v574_v3, %v589_v14 }
 0x1b8   : > { %v594_v19 = vmul.f32 %v590_v15, %v590_v15  ;;  %v595_v20 = vmul.f32 %v591_v16, %v591_v16  ;;  %v596_v21 = vmul.f32 %v592_v17, %v592_v17  ;;  %v597_v22 = vmul.f32 %v593_v18, %v593_v18 }
 0x1ba   : > { %v598_v23 = vsel %vm484_vm1, %v594_v19, 0.0  ;;  %v599_v24 = vsel %vm484_vm1, %v595_v20, 0.0  ;;  %v601_v26 = vsel %vm484_vm1, %v596_v21, 0.0  ;;  %v603_v28 = vsel %vm484_vm1, %v597_v22, 0.0 }
 0x1bb   : > { %v600_v25 = vadd.f32 %v599_v24, %v598_v23 }
 0x1bd   : > { %v602_v27 = vadd.f32 %v601_v26, %v600_v25 }
 0x1bf   : > { %v604_v29 = vadd.f32 %v603_v28, %v602_v27 }
 0x1c1   : > { %605 = vadd.xlane.f32.xlu0 %v604_v29 }
 0x24e   : > { %v606_v30 = vpop.xlane.xlu0 %605 }
 0x24f   : > { %v607_v31 = vmul.f32 0.001953125, %v606_v30 }
 0x251   : > { %v608_v32 = vadd.f32 1e-05, %v607_v31 }
 0x253   : > { %874 = vrsqrt.f32 %v608_v32 }
 0x25d   : > { %v875_v36 = vpop.eup %874 }
 0x25e   : > { %v610_v39 = vmul.f32 %v875_v36, %v590_v15  ;;  %v611_v40 = vmul.f32 %v875_v36, %v591_v16  ;;  %v612_v41 = vmul.f32 %v875_v36, %v592_v17  ;;  %v613_v42 = vmul.f32 %v875_v36, %v593_v18 }
 0x260   : > { %vm614_vm2 = vcmp.ge.f32.partialorder %v610_v39, 0.0  ;;  %vm615_vm3 = vcmp.ge.f32.partialorder %v611_v40, 0.0  ;;  %vm616_vm4 = vcmp.ge.f32.partialorder %v612_v41, 0.0  ;;  %vm617_vm5 = vcmp.ge.f32.partialorder %v613_v42, 0.0 }
 0x261   : > { %v618_v43 = vmul.f32 0.01, %v610_v39  ;;  %v619_v44 = vmul.f32 0.01, %v611_v40  ;;  %v620_v45 = vmul.f32 0.01, %v612_v41 }
 0x262   : > { %v621_v47 = vmul.f32 0.01, %v613_v42 }
 0x263   : > { %v622_v48 = vsel %vm614_vm2, %v610_v39, %v618_v43  ;;  %v623_v49 = vsel %vm615_vm3, %v611_v40, %v619_v44  ;;  %v624_v50 = vsel %vm616_vm4, %v612_v41, %v620_v45 }
 0x264   : > { %v625_v51 = vsel %vm617_vm5, %v613_v42, %v621_v47  ;;  %v777_v52 = vpack.c.bf16 %v623_v49, %v622_v48 }
 0x265   : > { %v778_v53 = vpack.c.bf16 %v625_v51, %v624_v50 }
 0x266   : > { %v642_v54 = vrot.slane %v777_v52, %v641_v46 }
 0x267   : > { %v649_v55 = vrot.slane %v778_v53, %v641_v46 }
 0x269   : > { %v650_v56 = vcombine.low %v642_v54, %v649_v55 }
 0x26b   : > { %652 = vst [vmem:[%s143_s20] sm:$0xff] %v650_v56 }
 0x26c PF: > { %s12_s9 = sadd.s32 1, %s882_s9  }
 0x26d   : > { %p9_p4 = scmp.ge.s32.totalorder %s12_s9, 4  }
 0x26f   :  { %11 = sbr.rel (!%p9_p4) target bundleno = 1 (0x1), region = 58 }

// kernel: nnunet3d_forward.45
= control target key start
LH: loop header
LB: loop body
LE: loop exit
PB: predicated region body
PF: predicated region fallthrough
CT: control target
= control target key end

     0   :  { %vm654_vm0 = vcmask 1041408   ;;  %vm461_vm1 = vcmask 31744   ;;  %vm1203_vm2 = vcmask 23552   ;;  %s5992_s1 = inlined_call_operand.vmem [shape: bf16[4,3], index: 1, kind: input, shape index: {}]   ;;  %s5993_s0 = inlined_call_operand.vmem [shape: bf16[1024,4], index: 0, kind: input, shape index: {}]   ;;  %s5994_s2 = inlined_call_operand.vmem [shape: f32[1024,3], index: 2, kind: output, shape index: {}]  }
   0x1   :  { %v140_v0 = vld [vmem:[%s5992_s1] sm:$0x3]  ;;  %v3393_v4 = vld [vmem:[%s5993_s0 + $0x8] sm:$0xff]   ;;  %v3395_v6 = vld [vmem:[%s5993_s0 + $0x10] sm:$0xff]  }
   0x2   :  { %3389 = vmatprep.subr.msk.bf16.mxu0 %vm654_vm0, %v140_v0  ;;  %3390 = vmatprep.subr.msk.bf16.mxu1 %vm654_vm0, %v140_v0  ;;  %v656_v1 = vsel %vm654_vm0, %v140_v0, 0  ;;  %v3391_v2 = vld [vmem:[%s5993_s0] sm:$0xff]   ;;  %v3394_v5 = vld [vmem:[%s5993_s0 + $0x108] sm:$0xff]   ;;  %v3396_v7 = vld [vmem:[%s5993_s0 + $0x110] sm:$0xff]  }
   0x3   :  { %3258 = vmatpush3.bf16.msra.mxu0 %v656_v1  ;;  %3388 = vmatpush3.bf16.msra.mxu1 %v656_v1  ;;  %v3392_v3 = vld [vmem:[%s5993_s0 + $0x100] sm:$0xff]   ;;  %v3397_v8 = vld [vmem:[%s5993_s0 + $0x18] sm:$0xff]   ;;  %v3401_v12 = vld [vmem:[%s5993_s0 + $0x28] sm:$0xff]  }
   0x4   :  { %3259 = vmatprep.mubr.msk.bf16.mxu0 %vm461_vm1, %v3391_v2  ;;  %3323 = vmatprep.mubr.msk.bf16.mxu1 %vm461_vm1, %v3392_v3  ;;  %v3398_v9 = vld [vmem:[%s5993_s0 + $0x118] sm:$0xff]   ;;  %v3399_v10 = vld [vmem:[%s5993_s0 + $0x20] sm:$0xff]   ;;  %v3402_v13 = vld [vmem:[%s5993_s0 + $0x128] sm:$0xff]  }
   0x5   :  { %v3400_v11 = vld [vmem:[%s5993_s0 + $0x120] sm:$0xff]   ;;  %v3403_v14 = vld [vmem:[%s5993_s0 + $0x30] sm:$0xff]   ;;  %v3405_v16 = vld [vmem:[%s5993_s0 + $0x38] sm:$0xff]  }
   0x6   :  { %3260 = vmatmul.mubr.msk.bf16.vlgmr.msra.gmra.mrb[0].mxu0 %vm461_vm1, %v3393_v4  ;;  %3324 = vmatmul.mubr.msk.bf16.vlgmr.msra.gmra.mrb[0].mxu1 %vm461_vm1, %v3394_v5  ;;  %v3404_v15 = vld [vmem:[%s5993_s0 + $0x130] sm:$0xff]   ;;  %v3406_v17 = vld [vmem:[%s5993_s0 + $0x138] sm:$0xff]   ;;  %v3407_v18 = vld [vmem:[%s5993_s0 + $0x40] sm:$0xff]  }
   0x7   :  { %3263 = vmatprep.mubr.msk.bf16.mxu0 %vm461_vm1, %v3395_v6  ;;  %3327 = vmatprep.mubr.msk.bf16.mxu1 %vm461_vm1, %v3396_v7  ;;  %v3408_v19 = vld [vmem:[%s5993_s0 + $0x140] sm:$0xff]   ;;  %v3409_v20 = vld [vmem:[%s5993_s0 + $0x48] sm:$0xff]   ;;  %v3411_v22 = vld [vmem:[%s5993_s0 + $0x50] sm:$0xff]  }
   0x8   :  { %v3410_v21 = vld [vmem:[%s5993_s0 + $0x148] sm:$0xff]   ;;  %v3412_v23 = vld [vmem:[%s5993_s0 + $0x150] sm:$0xff]   ;;  %v3413_v24 = vld [vmem:[%s5993_s0 + $0x58] sm:$0xff]  }
   0x9   :  { %v3414_v25 = vld [vmem:[%s5993_s0 + $0x158] sm:$0xff]   ;;  %v3415_v26 = vld [vmem:[%s5993_s0 + $0x60] sm:$0xff]   ;;  %v3417_v28 = vld [vmem:[%s5993_s0 + $0x68] sm:$0xff]  }
   0xa   :  { %v3416_v27 = vld [vmem:[%s5993_s0 + $0x160] sm:$0xff]   ;;  %v3418_v29 = vld [vmem:[%s5993_s0 + $0x168] sm:$0xff]   ;;  %v3419_v30 = vld [vmem:[%s5993_s0 + $0x70] sm:$0xff]  }
   0xb   :  { %v3420_v31 = vld [vmem:[%s5993_s0 + $0x170] sm:$0xff]   ;;  %v3421_v32 = vld [vmem:[%s5993_s0 + $0x78] sm:$0xff]   ;;  %v3423_v34 = vld [vmem:[%s5993_s0 + $0x80] sm:$0xff]  }
   0xc   :  { %v3422_v33 = vld [vmem:[%s5993_s0 + $0x178] sm:$0xff]   ;;  %v3424_v35 = vld [vmem:[%s5993_s0 + $0x180] sm:$0xff]   ;;  %v3425_v36 = vld [vmem:[%s5993_s0 + $0x88] sm:$0xff]  }
   0xd   :  { %v3426_v37 = vld [vmem:[%s5993_s0 + $0x188] sm:$0xff]   ;;  %v3427_v38 = vld [vmem:[%s5993_s0 + $0x90] sm:$0xff]   ;;  %v3429_v40 = vld [vmem:[%s5993_s0 + $0x98] sm:$0xff]  }
   0xe   :  { %3264 = vmatmul.mubr.msk.bf16.gmra.mrb[4].mxu0 %vm461_vm1, %v3397_v8  ;;  %3328 = vmatmul.mubr.msk.bf16.gmra.mrb[4].mxu1 %vm461_vm1, %v3398_v9  ;;  %v3428_v39 = vld [vmem:[%s5993_s0 + $0x190] sm:$0xff]   ;;  %v3430_v41 = vld [vmem:[%s5993_s0 + $0x198] sm:$0xff]   ;;  %v3431_v42 = vld [vmem:[%s5993_s0 + $0xa0] sm:$0xff]  }
   0xf   :  { %3267 = vmatprep.mubr.msk.bf16.mxu0 %vm461_vm1, %v3399_v10  ;;  %3331 = vmatprep.mubr.msk.bf16.mxu1 %vm461_vm1, %v3400_v11  ;;  %v3432_v43 = vld [vmem:[%s5993_s0 + $0x1a0] sm:$0xff]   ;;  %v3433_v44 = vld [vmem:[%s5993_s0 + $0xa8] sm:$0xff]   ;;  %v3435_v46 = vld [vmem:[%s5993_s0 + $0xb0] sm:$0xff]  }
  0x10   :  { %v3434_v45 = vld [vmem:[%s5993_s0 + $0x1a8] sm:$0xff]   ;;  %v3436_v47 = vld [vmem:[%s5993_s0 + $0x1b0] sm:$0xff]   ;;  %v3437_v48 = vld [vmem:[%s5993_s0 + $0xb8] sm:$0xff]  }
  0x11   :  { %v3438_v49 = vld [vmem:[%s5993_s0 + $0x1b8] sm:$0xff]   ;;  %v3439_v50 = vld [vmem:[%s5993_s0 + $0xc0] sm:$0xff]   ;;  %v3441_v52 = vld [vmem:[%s5993_s0 + $0xc8] sm:$0xff]  }
  0x12   :  { %v3440_v51 = vld [vmem:[%s5993_s0 + $0x1c0] sm:$0xff]   ;;  %v3442_v53 = vld [vmem:[%s5993_s0 + $0x1c8] sm:$0xff]   ;;  %v3443_v54 = vld [vmem:[%s5993_s0 + $0xd0] sm:$0xff]  }
  0x13   :  { %v3444_v55 = vld [vmem:[%s5993_s0 + $0x1d0] sm:$0xff]   ;;  %v3445_v56 = vld [vmem:[%s5993_s0 + $0xd8] sm:$0xff]   ;;  %v3447_v58 = vld [vmem:[%s5993_s0 + $0xe0] sm:$0xff]  }
  0x14   :  { %v3446_v57 = vld [vmem:[%s5993_s0 + $0x1d8] sm:$0xff]   ;;  %v3448_v59 = vld [vmem:[%s5993_s0 + $0x1e0] sm:$0xff]   ;;  %v3449_v60 = vld [vmem:[%s5993_s0 + $0xe8] sm:$0xff]  }
  0x15   :  { %v3450_v61 = vld [vmem:[%s5993_s0 + $0x1e8] sm:$0xff]   ;;  %v3451_v62 = vld [vmem:[%s5993_s0 + $0xf0] sm:$0xff]   ;;  %v3453_v0 = vld [vmem:[%s5993_s0 + $0xf8] sm:$0xff]  }
  0x16   :  { %3268 = vmatmul.mubr.msk.bf16.gmra.mrb[8].mxu0 %vm461_vm1, %v3401_v12  ;;  %3332 = vmatmul.mubr.msk.bf16.gmra.mrb[8].mxu1 %vm461_vm1, %v3402_v13  ;;  %v3452_v63 = vld [vmem:[%s5993_s0 + $0x1f0] sm:$0xff]   ;;  %v3454_v1 = vld [vmem:[%s5993_s0 + $0x1f8] sm:$0xff]  }
  0x17   :  { %3271 = vmatprep.mubr.msk.bf16.mxu0 %vm461_vm1, %v3403_v14  ;;  %3335 = vmatprep.mubr.msk.bf16.mxu1 %vm461_vm1, %v3404_v15 }
  0x1e   :  { %3272 = vmatmul.mubr.msk.bf16.gmra.mrb[12].mxu0 %vm461_vm1, %v3405_v16  ;;  %3336 = vmatmul.mubr.msk.bf16.gmra.mrb[12].mxu1 %vm461_vm1, %v3406_v17 }
  0x1f   :  { %3275 = vmatprep.mubr.msk.bf16.mxu0 %vm461_vm1, %v3407_v18  ;;  %3339 = vmatprep.mubr.msk.bf16.mxu1 %vm461_vm1, %v3408_v19 }
  0x26   :  { %3276 = vmatmul.mubr.msk.bf16.gmra.mrb[16].mxu0 %vm461_vm1, %v3409_v20  ;;  %3340 = vmatmul.mubr.msk.bf16.gmra.mrb[16].mxu1 %vm461_vm1, %v3410_v21 }
  0x27   :  { %3279 = vmatprep.mubr.msk.bf16.mxu0 %vm461_vm1, %v3411_v22  ;;  %3343 = vmatprep.mubr.msk.bf16.mxu1 %vm461_vm1, %v3412_v23 }
  0x2e   :  { %3280 = vmatmul.mubr.msk.bf16.gmra.mrb[20].mxu0 %vm461_vm1, %v3413_v24  ;;  %3344 = vmatmul.mubr.msk.bf16.gmra.mrb[20].mxu1 %vm461_vm1, %v3414_v25 }
  0x2f   :  { %3283 = vmatprep.mubr.msk.bf16.mxu0 %vm461_vm1, %v3415_v26  ;;  %3347 = vmatprep.mubr.msk.bf16.mxu1 %vm461_vm1, %v3416_v27 }
  0x36   :  { %3284 = vmatmul.mubr.msk.bf16.gmra.mrb[24].mxu0 %vm461_vm1, %v3417_v28  ;;  %3348 = vmatmul.mubr.msk.bf16.gmra.mrb[24].mxu1 %vm461_vm1, %v3418_v29 }
  0x37   :  { %3287 = vmatprep.mubr.msk.bf16.mxu0 %vm461_vm1, %v3419_v30  ;;  %3351 = vmatprep.mubr.msk.bf16.mxu1 %vm461_vm1, %v3420_v31 }
  0x3e   :  { %3288 = vmatmul.mubr.msk.bf16.gmra.mrb[28].mxu0 %vm461_vm1, %v3421_v32  ;;  %3352 = vmatmul.mubr.msk.bf16.gmra.mrb[28].mxu1 %vm461_vm1, %v3422_v33 }
  0x3f   :  { %3291 = vmatprep.mubr.msk.bf16.mxu0 %vm461_vm1, %v3423_v34  ;;  %3355 = vmatprep.mubr.msk.bf16.mxu1 %vm461_vm1, %v3424_v35 }
  0x46   :  { %3292 = vmatmul.mubr.msk.bf16.gmra.mrb[32].mxu0 %vm461_vm1, %v3425_v36  ;;  %3356 = vmatmul.mubr.msk.bf16.gmra.mrb[32].mxu1 %vm461_vm1, %v3426_v37 }
  0x47   :  { %3295 = vmatprep.mubr.msk.bf16.mxu0 %vm461_vm1, %v3427_v38  ;;  %3359 = vmatprep.mubr.msk.bf16.mxu1 %vm461_vm1, %v3428_v39 }
  0x4e   :  { %3296 = vmatmul.mubr.msk.bf16.gmra.mrb[36].mxu0 %vm461_vm1, %v3429_v40  ;;  %3360 = vmatmul.mubr.msk.bf16.gmra.mrb[36].mxu1 %vm461_vm1, %v3430_v41 }
  0x4f   :  { %3299 = vmatprep.mubr.msk.bf16.mxu0 %vm461_vm1, %v3431_v42  ;;  %3363 = vmatprep.mubr.msk.bf16.mxu1 %vm461_vm1, %v3432_v43 }
  0x56   :  { %3300 = vmatmul.mubr.msk.bf16.gmra.mrb[40].mxu0 %vm461_vm1, %v3433_v44  ;;  %3364 = vmatmul.mubr.msk.bf16.gmra.mrb[40].mxu1 %vm461_vm1, %v3434_v45 }
  0x57   :  { %3303 = vmatprep.mubr.msk.bf16.mxu0 %vm461_vm1, %v3435_v46  ;;  %3367 = vmatprep.mubr.msk.bf16.mxu1 %vm461_vm1, %v3436_v47 }
  0x5e   :  { %3304 = vmatmul.mubr.msk.bf16.gmra.mrb[44].mxu0 %vm461_vm1, %v3437_v48  ;;  %3368 = vmatmul.mubr.msk.bf16.gmra.mrb[44].mxu1 %vm461_vm1, %v3438_v49 }
  0x5f   :  { %3307 = vmatprep.mubr.msk.bf16.mxu0 %vm461_vm1, %v3439_v50  ;;  %3371 = vmatprep.mubr.msk.bf16.mxu1 %vm461_vm1, %v3440_v51 }
  0x66   :  { %3308 = vmatmul.mubr.msk.bf16.gmra.mrb[48].mxu0 %vm461_vm1, %v3441_v52  ;;  %3372 = vmatmul.mubr.msk.bf16.gmra.mrb[48].mxu1 %vm461_vm1, %v3442_v53 }
  0x67   :  { %3311 = vmatprep.mubr.msk.bf16.mxu0 %vm461_vm1, %v3443_v54  ;;  %3375 = vmatprep.mubr.msk.bf16.mxu1 %vm461_vm1, %v3444_v55 }
  0x6e   :  { %3312 = vmatmul.mubr.msk.bf16.gmra.mrb[52].mxu0 %vm461_vm1, %v3445_v56  ;;  %3376 = vmatmul.mubr.msk.bf16.gmra.mrb[52].mxu1 %vm461_vm1, %v3446_v57 }
  0x6f   :  { %3315 = vmatprep.mubr.msk.bf16.mxu0 %vm461_vm1, %v3447_v58  ;;  %3379 = vmatprep.mubr.msk.bf16.mxu1 %vm461_vm1, %v3448_v59 }
  0x76   :  { %3316 = vmatmul.mubr.msk.bf16.gmra.mrb[56].mxu0 %vm461_vm1, %v3449_v60  ;;  %3380 = vmatmul.mubr.msk.bf16.gmra.mrb[56].mxu1 %vm461_vm1, %v3450_v61 }
  0x77   :  { %3319 = vmatprep.mubr.msk.bf16.mxu0 %vm461_vm1, %v3451_v62  ;;  %3383 = vmatprep.mubr.msk.bf16.mxu1 %vm461_vm1, %v3452_v63 }
  0x7e   :  { %3320 = vmatmul.mubr.msk.bf16.gmra.mrb[60].mxu0 %vm461_vm1, %v3453_v0  ;;  %3384 = vmatmul.mubr.msk.bf16.gmra.mrb[60].mxu1 %vm461_vm1, %v3454_v1 }
  0xd9   :  { %v4113_v2 = vpop.f32.mrb[0].mxu0  ;;  %v4115_v3 = vpop.f32.mrb[0].mxu1 }
  0xda   :  { %v4117_v4 = vpop.f32.mrb[1].mxu0  ;;  %v4119_v5 = vpop.f32.mrb[1].mxu1  ;;  %v1213_v7 = vsel %vm1203_vm2, %v4113_v2, -inf  ;;  %v1501_v8 = vsel %vm1203_vm2, %v4115_v3, -inf }
  0xdb   :  { %v4121_v6 = vpop.f32.mrb[2].mxu0  ;;  %v4129_v10 = vpop.f32.mrb[2].mxu1  ;;  %v1204_v12 = vsel %vm1203_vm2, %v4117_v4, -inf  ;;  %v1492_v17 = vsel %vm1203_vm2, %v4119_v5, -inf }
  0xdc   :  { %v1214_v9 = vsel %vm1203_vm2, %v4121_v6, -inf  ;;  %v4131_v11 = vpop.f32.mrb[3].mxu0  ;;  %v1502_v14 = vsel %vm1203_vm2, %v4129_v10, -inf  ;;  %v4139_v16 = vpop.f32.mrb[3].mxu1 }
  0xdd   :  { %v1215_v13 = vmax.f32 %v1213_v7, %v1214_v9  ;;  %v1205_v15 = vsel %vm1203_vm2, %v4131_v11, -inf  ;;  %v1503_v18 = vmax.f32 %v1501_v8, %v1502_v14  ;;  %v1493_v20 = vsel %vm1203_vm2, %v4139_v16, -inf }
  0xde   :  { %v1206_v19 = vmax.f32 %v1204_v12, %v1205_v15  ;;  %v1494_v22 = vmax.f32 %v1492_v17, %v1493_v20 }
  0xdf   :  { %v1216_v21 = vrot.slane %v1215_v13, 4  ;;  %v1504_v23 = vrot.slane %v1503_v18, 4 }
  0xe0   :  { %v1207_v24 = vrot.slane %v1206_v19, 4  ;;  %v1495_v26 = vrot.slane %v1494_v22, 4 }
  0xe1   :  { %v1217_v25 = vmax.f32 %v1215_v13, %v1216_v21  ;;  %v4145_v27 = vpop.f32.mrb[4].mxu0  ;;  %v1505_v28 = vmax.f32 %v1503_v18, %v1504_v23  ;;  %v4149_v31 = vpop.f32.mrb[4].mxu1 }
  0xe2   :  { %v1208_v29 = vmax.f32 %v1206_v19, %v1207_v24  ;;  %v1231_v30 = vsel %vm1203_vm2, %v4145_v27, -inf  ;;  %v4151_v32 = vpop.f32.mrb[5].mxu0  ;;  %v1496_v34 = vmax.f32 %v1494_v22, %v1495_v26  ;;  %v1519_v35 = vsel %vm1203_vm2, %v4149_v31, -inf  ;;  %v4157_v37 = vpop.f32.mrb[5].mxu1 }
  0xe3   :  { %v1218_v33 = vrot.slane %v1217_v25, 2  ;;  %v1222_v36 = vsel %vm1203_vm2, %v4151_v32, -inf  ;;  %v4159_v38 = vpop.f32.mrb[6].mxu0  ;;  %v1506_v39 = vrot.slane %v1505_v28, 2  ;;  %v1510_v41 = vsel %vm1203_vm2, %v4157_v37, -inf  ;;  %v4165_v43 = vpop.f32.mrb[6].mxu1 }
  0xe4   :  { %v1209_v40 = vrot.slane %v1208_v29, 2  ;;  %v1232_v42 = vsel %vm1203_vm2, %v4159_v38, -inf  ;;  %v4167_v44 = vpop.f32.mrb[7].mxu0  ;;  %v1497_v46 = vrot.slane %v1496_v34, 2  ;;  %v1520_v48 = vsel %vm1203_vm2, %v4165_v43, -inf  ;;  %v4171_v49 = vpop.f32.mrb[7].mxu1 }
  0xe5   :  { %v1219_v45 = vmax.f32 %v1217_v25, %v1218_v33  ;;  %v1233_v47 = vmax.f32 %v1231_v30, %v1232_v42  ;;  %v1507_v50 = vmax.f32 %v1505_v28, %v1506_v39  ;;  %v1521_v52 = vmax.f32 %v1519_v35, %v1520_v48 }
  0xe6   :  { %v1210_v51 = vmax.f32 %v1208_v29, %v1209_v40  ;;  %v1223_v53 = vsel %vm1203_vm2, %v4167_v44, -inf  ;;  %v1498_v55 = vmax.f32 %v1496_v34, %v1497_v46  ;;  %v1511_v61 = vsel %vm1203_vm2, %v4171_v49, -inf }
  0xe7   :  { %v1220_v54 = vrot.slane %v1219_v45, 1  ;;  %v1234_v56 = vrot.slane %v1233_v47, 4  ;;  %v1224_v57 = vmax.f32 %v1222_v36, %v1223_v53  ;;  %v1508_v58 = vrot.slane %v1507_v50, 1 }
  0xe8   :  { %v1211_v59 = vrot.slane %v1210_v51, 1  ;;  %v1522_v60 = vrot.slane %v1521_v52, 4  ;;  %v1499_v63 = vrot.slane %v1498_v55, 1  ;;  %v1512_v13 = vmax.f32 %v1510_v41, %v1511_v61 }
  0xe9   :  { %v1221_v62 = vmax.f32 %v1219_v45, %v1220_v54  ;;  %v1235_v0 = vmax.f32 %v1233_v47, %v1234_v56  ;;  %v1225_v1 = vrot.slane %v1224_v57, 4  ;;  %v4177_v7 = vpop.f32.mrb[8].mxu0  ;;  %v1509_v8 = vmax.f32 %v1507_v50, %v1508_v58  ;;  %v4179_v14 = vpop.f32.mrb[8].mxu1 }
  0xea   :  { %v1212_v9 = vmax.f32 %v1210_v51, %v1211_v59  ;;  %v1523_v12 = vmax.f32 %v1521_v52, %v1522_v60  ;;  %v4181_v15 = vpop.f32.mrb[9].mxu0  ;;  %v1500_v19 = vmax.f32 %v1498_v55, %v1499_v63  ;;  %v4185_v21 = vpop.f32.mrb[9].mxu1  ;;  %v1513_v45 = vrot.slane %v1512_v13, 4 }
  0xeb   :  { %v1782_v17 = vsub.f32 %v4113_v2, %v1221_v62  ;;  %v1783_v18 = vsub.f32 %v4121_v6, %v1221_v62  ;;  %v1236_v20 = vrot.slane %v1235_v0, 2  ;;  %v4187_v22 = vpop.f32.mrb[10].mxu0  ;;  %v1846_v23 = vsub.f32 %v4115_v3, %v1509_v8  ;;  %v4193_v28 = vpop.f32.mrb[10].mxu1 }
  0xec   :  { %v1847_v24 = vsub.f32 %v4129_v10, %v1509_v8  ;;  %v1780_v25 = vsub.f32 %v4117_v4, %v1212_v9  ;;  %v1781_v26 = vsub.f32 %v4131_v11, %v1212_v9  ;;  %v4195_v29 = vpop.f32.mrb[11].mxu0  ;;  %v1844_v30 = vsub.f32 %v4119_v5, %v1500_v19  ;;  %v4199_v34 = vpop.f32.mrb[11].mxu1 }
  0xed   :  { %v1912_v2 = vmul.f32 1.442695, %v1782_v17  ;;  %v1914_v6 = vmul.f32 1.442695, %v1783_v18  ;;  %v1845_v33 = vsub.f32 %v4139_v16, %v1500_v19  ;;  %v2040_v35 = vmul.f32 1.442695, %v1846_v23 }
  0xee   :  { %v2042_v3 = vmul.f32 1.442695, %v1847_v24  ;;  %v1908_v36 = vmul.f32 1.442695, %v1780_v25  ;;  %v1237_v10 = vmax.f32 %v1235_v0, %v1236_v20  ;;  %v1910_v4 = vmul.f32 1.442695, %v1781_v26 }
  0xef   :  { %3455 = vpow2.f32 %v1912_v2  ;;  %v2036_v39 = vmul.f32 1.442695, %v1844_v30  ;;  %v2038_v11 = vmul.f32 1.442695, %v1845_v33  ;;  %v1524_v41 = vrot.slane %v1523_v12, 2 }
  0xf0   :  { %3457 = vpow2.f32 %v1914_v6  ;;  %v1238_v40 = vrot.slane %v1237_v10, 1  ;;  %v1226_v42 = vmax.f32 %v1224_v57, %v1225_v1  ;;  %v1249_v5 = vsel %vm1203_vm2, %v4177_v7, -inf }
  0xf1   :  { %3459 = vpow2.f32 %v2040_v35  ;;  %v1537_v16 = vsel %vm1203_vm2, %v4179_v14, -inf  ;;  %v4205_v46 = vpop.f32.mrb[12].mxu0  ;;  %v1525_v48 = vmax.f32 %v1523_v12, %v1524_v41  ;;  %v4207_v51 = vpop.f32.mrb[12].mxu1  ;;  %v1514_v53 = vmax.f32 %v1512_v13, %v1513_v45 }
  0xf2   :  { %3461 = vpow2.f32 %v2042_v3  ;;  %v1239_v47 = vmax.f32 %v1237_v10, %v1238_v40  ;;  %v1227_v50 = vrot.slane %v1226_v42, 2  ;;  %v4209_v52 = vpop.f32.mrb[13].mxu0  ;;  %v4213_v54 = vsel %vm1203_vm2, %v4181_v15, -inf  ;;  %v4219_v56 = vpop.f32.mrb[13].mxu1 }
  0xf3   :  { %3463 = vpow2.f32 %v1908_v36  ;;  %v4217_v55 = vsel %vm1203_vm2, %v4185_v21, -inf  ;;  %v4221_v57 = vpop.f32.mrb[14].mxu0  ;;  %v1526_v60 = vrot.slane %v1525_v48, 1  ;;  %v4225_v61 = vpop.f32.mrb[14].mxu1  ;;  %v1515_v0 = vrot.slane %v1514_v53, 2 }
  0xf4   :  { %3465 = vpow2.f32 %v1910_v4  ;;  %v1786_v58 = vsub.f32 %v4145_v27, %v1239_v47  ;;  %v1787_v59 = vsub.f32 %v4159_v38, %v1239_v47  ;;  %v4227_v62 = vpop.f32.mrb[15].mxu0  ;;  %v1228_v63 = vmax.f32 %v1226_v42, %v1227_v50  ;;  %v4231_v8 = vpop.f32.mrb[15].mxu1 }
  0xf5   :  { %3467 = vpow2.f32 %v2036_v39  ;;  %v1250_v1 = vsel %vm1203_vm2, %v4187_v22, -inf  ;;  %v1527_v13 = vmax.f32 %v1525_v48, %v1526_v60  ;;  %v1516_v17 = vmax.f32 %v1514_v53, %v1515_v0 }
  0xf6   :  { %3469 = vpow2.f32 %v2038_v11  ;;  %v1920_v9 = vmul.f32 1.442695, %v1786_v58  ;;  %v1922_v12 = vmul.f32 1.442695, %v1787_v59  ;;  %v1229_v27 = vrot.slane %v1228_v63, 1 }
  0xf7   :  { %v1251_v38 = vmax.f32 %v1249_v5, %v1250_v1  ;;  %v1538_v18 = vsel %vm1203_vm2, %v4193_v28, -inf  ;;  %v1850_v19 = vsub.f32 %v4149_v31, %v1527_v13  ;;  %v1851_v20 = vsub.f32 %v4165_v43, %v1527_v13 }
  0xf8   :  { %3471 = vpow2.f32 %v1920_v9  ;;  %v4237_v23 = vmax.f32 %v1537_v16, %v1538_v18  ;;  %v1230_v25 = vmax.f32 %v1228_v63, %v1229_v27  ;;  %v1517_v26 = vrot.slane %v1516_v17, 1 }
  0xf9   :  { %v4239_v24 = vpop.eup %3455  ;;  %3473 = vpow2.f32 %v1922_v12  ;;  %v1252_v2 = vrot.slane %v1251_v38, 4  ;;  %v4241_v6 = vpop.f32.mrb[16].mxu0  ;;  %v2048_v35 = vmul.f32 1.442695, %v1850_v19  ;;  %v2050_v3 = vmul.f32 1.442695, %v1851_v20 }
  0xfa   :  { %v4243_v30 = vpop.eup %3457  ;;  %v2173_v33 = vsel %vm1203_vm2, %v4239_v24, 0.0  ;;  %v1540_v31 = vrot.slane %v4237_v23, 4  ;;  %v1784_v10 = vsub.f32 %v4151_v32, %v1230_v25  ;;  %v1785_v4 = vsub.f32 %v4167_v44, %v1230_v25  ;;  %v4254_v11 = vpop.f32.mrb[16].mxu1 }
  0xfb   :  { %v4248_v43 = vpop.eup %3459  ;;  %v2174_v36 = vsel %vm1203_vm2, %v4243_v30, 0.0  ;;  %v1518_v39 = vmax.f32 %v1516_v17, %v1517_v26  ;;  %v4256_v40 = vpop.f32.mrb[17].mxu0  ;;  %3475 = vpow2.f32 %v2048_v35  ;;  %v1253_v5 = vmax.f32 %v1251_v38, %v1252_v2 }
  0xfc   :  { %v4258_v41 = vpop.eup %3461  ;;  %v2175_v42 = vadd.f32 %v2174_v36, %v2173_v33  ;;  %v2461_v45 = vsel %vm1203_vm2, %v4248_v43, 0.0  ;;  %v4262_v16 = vpop.f32.mrb[17].mxu1  ;;  %3477 = vpow2.f32 %v2050_v3  ;;  %v1916_v48 = vmul.f32 1.442695, %v1784_v10 }
  0xfd   :  { %v4264_v47 = vpop.f32.mrb[18].mxu0  ;;  %v4266_v32 = vpop.eup %3463  ;;  %v2462_v44 = vsel %vm1203_vm2, %v4258_v41, 0.0  ;;  %v1918_v50 = vmul.f32 1.442695, %v1785_v4  ;;  %v1848_v0 = vsub.f32 %v4157_v37, %v1518_v39  ;;  %v1849_v27 = vsub.f32 %v4171_v49, %v1518_v39 }
  0xfe   :  { %v4270_v53 = vpop.f32.mrb[18].mxu1  ;;  %v4272_v58 = vpop.eup %3465  ;;  %v2176_v59 = vrot.slane %v2175_v42, 4  ;;  %v2463_v60 = vadd.f32 %v2462_v44, %v2461_v45  ;;  %v2164_v63 = vsel %vm1203_vm2, %v4266_v32, 0.0  ;;  %3479 = vpow2.f32 %v1916_v48 }
  0xff   :  { %v4277_v1 = vpop.f32.mrb[19].mxu0  ;;  %v4279_v9 = vpop.f32.mrb[19].mxu1  ;;  %v2165_v13 = vsel %vm1203_vm2, %v4272_v58, 0.0  ;;  %v1254_v17 = vrot.slane %v1253_v5, 2  ;;  %3481 = vpow2.f32 %v1918_v50  ;;  %v2044_v26 = vmul.f32 1.442695, %v1848_v0 }
 0x100   :  { %6045 = vst [vmem:[#allocation2_spill] sm:$0xff] %v4277_v1  ;;  %6046 = vst [vmem:[#allocation3_spill] sm:$0xff] %v4279_v9  ;;  %v4281_v12 = vpop.eup %3467  ;;  %v2177_v18 = vadd.f32 %v2176_v59, %v2175_v42  ;;  %v2464_v19 = vrot.slane %v2463_v60, 4  ;;  %v2166_v20 = vadd.f32 %v2165_v13, %v2164_v63  ;;  %v2046_v2 = vmul.f32 1.442695, %v1849_v27 }
 0x101   :  { %v4286_v38 = vpop.eup %3469  ;;  %v2452_v37 = vsel %vm1203_vm2, %v4281_v12, 0.0  ;;  %v4292_v33 = vpop.f32.mrb[20].mxu0  ;;  %3483 = vpow2.f32 %v2044_v26  ;;  %v1255_v44 = vmax.f32 %v1253_v5, %v1254_v17  ;;  %v1541_v48 = vmax.f32 %v4237_v23, %v1540_v31 }
 0x102   :  { %v2453_v25 = vsel %vm1203_vm2, %v4286_v38, 0.0  ;;  %6047 = vst [vmem:[#allocation4_spill] sm:$0xff] %v4292_v33  ;;  %v4294_v35 = vpop.eup %3471  ;;  %v2178_v49 = vrot.slane %v2177_v18, 2  ;;  %v2465_v3 = vadd.f32 %v2464_v19, %v2463_v60  ;;  %v2167_v36 = vrot.slane %v2166_v20, 4  ;;  %v4296_v4 = vpop.f32.mrb[20].mxu1 }
 0x103   :  { %v2454_v10 = vadd.f32 %v2453_v25, %v2452_v37  ;;  %6048 = vst [vmem:[#allocation5_spill] sm:$0xff] %v4296_v4  ;;  %v4298_v39 = vpop.f32.mrb[21].mxu0  ;;  %v4300_v42 = vpop.eup %3473  ;;  %v2191_v45 = vsel %vm1203_vm2, %v4294_v35, 0.0  ;;  %3485 = vpow2.f32 %v2046_v2  ;;  %v1256_v25 = vrot.slane %v1255_v44, 1 }
 0x104   :  { %6049 = vst [vmem:[#allocation6_spill] sm:$0xff] %v4298_v39  ;;  %v4305_v50 = vpop.f32.mrb[21].mxu1  ;;  %v4307_v59 = vpop.f32.mrb[22].mxu0  ;;  %v2179_v60 = vadd.f32 %v2178_v49, %v2177_v18  ;;  %v2466_v63 = vrot.slane %v2465_v3, 2  ;;  %v2168_v0 = vadd.f32 %v2167_v36, %v2166_v20  ;;  %v2192_v37 = vsel %vm1203_vm2, %v4300_v42, 0.0 }
 0x105   :  { %6050 = vst [vmem:[#allocation7_spill] sm:$0xff] %v4305_v50  ;;  %6051 = vst [vmem:[#allocation8_spill] sm:$0xff] %v4307_v59  ;;  %v2455_v13 = vrot.slane %v2454_v10, 4  ;;  %v4309_v27 = vpop.f32.mrb[22].mxu1  ;;  %v4311_v19 = vpop.f32.mrb[23].mxu0  ;;  %v1542_v5 = vrot.slane %v1541_v48, 2  ;;  %v2193_v36 = vadd.f32 %v2192_v37, %v2191_v45 }
 0x106   :  { %6052 = vst [vmem:[#allocation9_spill] sm:$0xff] %v4309_v27  ;;  %6053 = vst [vmem:[#allocation10_spill] sm:$0xff] %v4311_v19  ;;  %v4315_v17 = vpop.f32.mrb[23].mxu1  ;;  %v4317_v23 = vpop.eup %3475  ;;  %v2180_v31 = vrot.slane %v2179_v60, 1  ;;  %v2467_v26 = vadd.f32 %v2466_v63, %v2465_v3  ;;  %v2169_v18 = vrot.slane %v2168_v0, 2  ;;  %v1257_v27 = vmax.f32 %v1255_v44, %v1256_v25 }
 0x107   :  { %6054 = vst [vmem:[#allocation11_spill] sm:$0xff] %v4315_v17  ;;  %v2456_v49 = vadd.f32 %v2455_v13, %v2454_v10  ;;  %v4319_v20 = vpop.eup %3477  ;;  %v2479_v19 = vsel %vm1203_vm2, %v4317_v23, 0.0  ;;  %v1543_v59 = vmax.f32 %v1541_v48, %v1542_v5  ;;  %v2194_v17 = vrot.slane %v2193_v36, 4 }
 0x108   :  { %v2181_v50 = vadd.f32 %v2180_v31, %v2179_v60  ;;  %v2468_v2 = vrot.slane %v2467_v26, 1  ;;  %v2170_v39 = vadd.f32 %v2169_v18, %v2168_v0  ;;  %v4323_v33 = vpop.eup %3479  ;;  %v2480_v3 = vsel %vm1203_vm2, %v4319_v20, 0.0 }
 0x109   :  { %v2457_v4 = vrot.slane %v2456_v49, 2  ;;  %v1790_v10 = vsub.f32 %v4177_v7, %v1257_v27  ;;  %v1791_v63 = vsub.f32 %v4187_v22, %v1257_v27  ;;  %v4329_v45 = vpop.f32.mrb[24].mxu0  ;;  %v4331_v60 = vpop.f32.mrb[24].mxu1  ;;  %v2195_v25 = vadd.f32 %v2194_v17, %v2193_v36 }
 0x10a   :  { %6055 = vst [vmem:[#allocation12_spill] sm:$0xff] %v4329_v45  ;;  %3487 = vrcp.f32 %v2181_v50  ;;  %v2469_v13 = vadd.f32 %v2468_v2, %v2467_v26  ;;  %v2171_v44 = vrot.slane %v2170_v39, 1  ;;  %6056 = vst [vmem:[#allocation13_spill] sm:$0xff] %v4331_v60  ;;  %v4333_v0 = vpop.f32.mrb[25].mxu0  ;;  %v4335_v37 = vpop.eup %3481  ;;  %v2481_v5 = vadd.f32 %v2480_v3, %v2479_v19 }
 0x10b   :  { %v2458_v48 = vadd.f32 %v2457_v4, %v2456_v49  ;;  %6057 = vst [vmem:[#allocation14_spill] sm:$0xff] %v4333_v0  ;;  %v2182_v31 = vsel %vm1203_vm2, %v4323_v33, 0.0  ;;  %v1928_v7 = vmul.f32 1.442695, %v1790_v10  ;;  %v4339_v18 = vpop.f32.mrb[25].mxu1  ;;  %v4341_v22 = vpop.f32.mrb[26].mxu0 }
 0x10c   :  { %6058 = vst [vmem:[#allocation15_spill] sm:$0xff] %v4339_v18  ;;  %6059 = vst [vmem:[#allocation16_spill] sm:$0xff] %v4341_v22  ;;  %3489 = vrcp.f32 %v2469_v13  ;;  %v2172_v50 = vadd.f32 %v2171_v44, %v2170_v39  ;;  %v2183_v4 = vsel %vm1203_vm2, %v4335_v37, 0.0  ;;  %v4345_v26 = vpop.f32.mrb[26].mxu1  ;;  %v4347_v49 = vpop.f32.mrb[27].mxu0  ;;  %v2196_v19 = vrot.slane %v2195_v25, 2 }
 0x10d   :  { %v2459_v27 = vrot.slane %v2458_v48, 1  ;;  %6060 = vst [vmem:[#allocation17_spill] sm:$0xff] %v4345_v26  ;;  %6061 = vst [vmem:[#allocation18_spill] sm:$0xff] %v4347_v49  ;;  %v4349_v17 = vpop.eup %3483  ;;  %v2482_v36 = vrot.slane %v2481_v5, 4  ;;  %v2184_v2 = vadd.f32 %v2183_v4, %v2182_v31  ;;  %3491 = vpow2.f32 %v1928_v7  ;;  %v4351_v3 = vpop.f32.mrb[27].mxu1 }
 0x10e   :  { %6062 = vst [vmem:[#allocation19_spill] sm:$0xff] %v4351_v3  ;;  %3493 = vrcp.f32 %v2172_v50  ;;  %v2470_v39 = vsel %vm1203_vm2, %v4349_v17, 0.0  ;;  %v1930_v13 = vmul.f32 1.442695, %v1791_v63  ;;  %v4355_v44 = vpop.eup %3485  ;;  %v2197_v22 = vadd.f32 %v2196_v19, %v2195_v25 }
 0x10f   :  { %v2460_v10 = vadd.f32 %v2459_v27, %v2458_v48  ;;  %v2483_v26 = vadd.f32 %v2482_v36, %v2481_v5  ;;  %v2185_v18 = vrot.slane %v2184_v2, 4  ;;  %v1544_v49 = vrot.slane %v1543_v59, 1 }
 0x110   :  { %v2471_v0 = vsel %vm1203_vm2, %v4355_v44, 0.0  ;;  %v1241_v31 = vsel %vm1203_vm2, %v4195_v29, -inf  ;;  %v1529_v48 = vsel %vm1203_vm2, %v4199_v34, -inf  ;;  %v2198_v7 = vrot.slane %v2197_v22, 1 }
 0x111   :  { %3495 = vrcp.f32 %v2460_v10  ;;  %v2484_v50 = vrot.slane %v2483_v26, 2  ;;  %v2186_v27 = vadd.f32 %v2185_v18, %v2184_v2  ;;  %v2472_v63 = vadd.f32 %v2471_v0, %v2470_v39  ;;  %v4363_v4 = vpop.f32.mrb[28].mxu0  ;;  %v4367_v36 = vpop.f32.mrb[28].mxu1 }
 0x112   :  { %3497 = vpow2.f32 %v1930_v13  ;;  %v1545_v25 = vmax.f32 %v1543_v59, %v1544_v49  ;;  %v1242_v5 = vmax.f32 %v4213_v54, %v1241_v31  ;;  %v1530_v19 = vmax.f32 %v4217_v55, %v1529_v48  ;;  %v4369_v10 = vpop.f32.mrb[29].mxu0  ;;  %v4371_v1 = vpop.f32.mrb[29].mxu1 }
 0x113   :  { %v2199_v3 = vadd.f32 %v2198_v7, %v2197_v22  ;;  %v2485_v60 = vadd.f32 %v2484_v50, %v2483_v26  ;;  %v2187_v45 = vrot.slane %v2186_v27, 2  ;;  %v2473_v9 = vrot.slane %v2472_v63, 4  ;;  %v4373_v18 = vpop.f32.mrb[30].mxu0  ;;  %v4377_v55 = vpop.f32.mrb[30].mxu1 }
 0x114   :  { %6063 = vst [vmem:[#allocation20_spill] sm:$0xff] %v4373_v18  ;;  %v3488_v0 = vpop.eup %3487  ;;  %v1854_v2 = vsub.f32 %v4179_v14, %v1545_v25  ;;  %v1855_v59 = vsub.f32 %v4193_v28, %v1545_v25  ;;  %v1243_v54 = vrot.slane %v1242_v5, 4  ;;  %v1531_v49 = vrot.slane %v1530_v19, 4  ;;  %v4379_v39 = vpop.f32.mrb[31].mxu0 }
 0x115   :  { %v2744_v22 = vmul.f32 %v3488_v0, %v4239_v24  ;;  %v2745_v26 = vmul.f32 %v3488_v0, %v4243_v30  ;;  %3499 = vrcp.f32 %v2199_v3  ;;  %v2486_v13 = vrot.slane %v2485_v60, 1  ;;  %v4383_v14 = vpop.f32.mrb[31].mxu1 }
 0x116   :  { %v3490_v31 = vpop.eup %3489  ;;  %v2188_v48 = vadd.f32 %v2187_v45, %v2186_v27  ;;  %v2474_v7 = vadd.f32 %v2473_v9, %v2472_v63  ;;  %v2056_v50 = vmul.f32 1.442695, %v1854_v2  ;;  %v2058_v18 = vmul.f32 1.442695, %v1855_v59 }
 0x117   :  { %v4385_v28 = vpop.eup %3491  ;;  %2934 = vst.msk [vmem:[%s5994_s2 + $0x10] sm:$0xff] %vm1203_vm2, %v2744_v22  ;;  %2935 = vst.msk [vmem:[%s5994_s2 + $0x18] sm:$0xff] %vm1203_vm2, %v2745_v26  ;;  %v2840_v24 = vmul.f32 %v3490_v31, %v4248_v43  ;;  %v2841_v30 = vmul.f32 %v3490_v31, %v4258_v41  ;;  %v2487_v9 = vadd.f32 %v2486_v13, %v2485_v60  ;;  %v1267_v22 = vsel %vm1203_vm2, %v4205_v46, -inf }
 0x118   :  { %v1244_v45 = vmax.f32 %v1242_v5, %v1243_v54  ;;  %v3494_v3 = vpop.eup %3493  ;;  %v2189_v27 = vrot.slane %v2188_v48, 1  ;;  %v2475_v63 = vrot.slane %v2474_v7, 2  ;;  %v2209_v25 = vsel %vm1203_vm2, %v4385_v28, 0.0 }
 0x119   :  { %3501 = vpow2.f32 %v2056_v50  ;;  %2998 = vst.msk [vmem:[%s5994_s2 + $0x210] sm:$0xff] %vm1203_vm2, %v2840_v24  ;;  %2999 = vst.msk [vmem:[%s5994_s2 + $0x218] sm:$0xff] %vm1203_vm2, %v2841_v30  ;;  %v2741_v43 = vmul.f32 %v3494_v3, %v4266_v32  ;;  %v2742_v41 = vmul.f32 %v3494_v3, %v4272_v58  ;;  %v1532_v59 = vmax.f32 %v1530_v19, %v1531_v49 }
 0x11a   :  { %3503 = vrcp.f32 %v2487_v9  ;;  %v1245_v60 = vrot.slane %v1244_v45, 2  ;;  %v2190_v0 = vadd.f32 %v2189_v27, %v2188_v48  ;;  %v2476_v2 = vadd.f32 %v2475_v63, %v2474_v7 }
 0x11b   :  { %v3496_v5 = vpop.eup %3495  ;;  %3505 = vpow2.f32 %v2058_v18  ;;  %2932 = vst.msk [vmem:[%s5994_s2] sm:$0xff] %vm1203_vm2, %v2741_v43  ;;  %2933 = vst.msk [vmem:[%s5994_s2 + $0x8] sm:$0xff] %vm1203_vm2, %v2742_v41  ;;  %v1533_v49 = vrot.slane %v1532_v59, 2  ;;  %v1555_v26 = vsel %vm1203_vm2, %v4207_v51, -inf  ;;  %v1258_v13 = vsel %vm1203_vm2, %v4209_v52, -inf }
 0x11c   :  { %v2837_v32 = vmul.f32 %v3496_v5, %v4281_v12  ;;  %v2838_v58 = vmul.f32 %v3496_v5, %v4286_v38  ;;  %v1246_v54 = vmax.f32 %v1244_v45, %v1245_v60  ;;  %v4421_v18 = vpop.eup %3497  ;;  %3507 = vrcp.f32 %v2190_v0 }
 0x11d   :  { %v2477_v19 = vrot.slane %v2476_v2, 1  ;;  %v2210_v12 = vsel %vm1203_vm2, %v4421_v18, 0.0  ;;  %v4439_v31 = vsel %vm1203_vm2, %v4219_v56, -inf  ;;  %v1534_v50 = vmax.f32 %v1532_v59, %v1533_v49  ;;  %v4453_v59 = vpop.f32.mrb[32].mxu1 }
 0x11e   :  { %2996 = vst.msk [vmem:[%s5994_s2 + $0x200] sm:$0xff] %vm1203_vm2, %v2837_v32  ;;  %2997 = vst.msk [vmem:[%s5994_s2 + $0x208] sm:$0xff] %vm1203_vm2, %v2838_v58  ;;  %v1247_v38 = vrot.slane %v1246_v54, 1  ;;  %v2211_v7 = vadd.f32 %v2210_v12, %v2209_v25  ;;  %v1268_v24 = vsel %vm1203_vm2, %v4221_v57, -inf  ;;  %v1556_v3 = vsel %vm1203_vm2, %v4225_v61, -inf }
 0x11f   :  { %v2478_v48 = vadd.f32 %v2477_v19, %v2476_v2  ;;  %v3500_v30 = vpop.eup %3499  ;;  %v1269_v45 = vmax.f32 %v1267_v22, %v1268_v24  ;;  %v1259_v27 = vsel %vm1203_vm2, %v4227_v62, -inf  ;;  %v1535_v5 = vrot.slane %v1534_v50, 1  ;;  %v4451_v2 = vpop.f32.mrb[32].mxu0 }
 0x120   :  { %v1248_v9 = vmax.f32 %v1246_v54, %v1247_v38  ;;  %v2750_v63 = vmul.f32 %v3500_v30, %v4294_v35  ;;  %v2751_v43 = vmul.f32 %v3500_v30, %v4300_v42  ;;  %v2212_v41 = vrot.slane %v2211_v7, 4  ;;  %v4467_v58 = vpop.f32.mrb[33].mxu0  ;;  %v4469_v54 = vpop.f32.mrb[33].mxu1 }
 0x121   :  { %3509 = vrcp.f32 %v2478_v48  ;;  %v1270_v0 = vrot.slane %v1269_v45, 4  ;;  %v1260_v35 = vmax.f32 %v1258_v13, %v1259_v27  ;;  %v1547_v42 = vsel %vm1203_vm2, %v4231_v8, -inf  ;;  %v4473_v48 = vpop.f32.mrb[34].mxu0 }
 0x122   :  { %v1788_v25 = vsub.f32 %v4181_v15, %v1248_v9  ;;  %v1789_v60 = vsub.f32 %v4195_v29, %v1248_v9  ;;  %2938 = vst.msk [vmem:[%s5994_s2 + $0x30] sm:$0xff] %vm1203_vm2, %v2750_v63  ;;  %2939 = vst.msk [vmem:[%s5994_s2 + $0x38] sm:$0xff] %vm1203_vm2, %v2751_v43  ;;  %v2213_v15 = vadd.f32 %v2212_v41, %v2211_v7 }
 0x123   :  { %v4455_v32 = vpop.eup %3501  ;;  %v1557_v29 = vmax.f32 %v1555_v26, %v1556_v3  ;;  %v1536_v38 = vmax.f32 %v1534_v50, %v1535_v5  ;;  %v1271_v30 = vmax.f32 %v1269_v45, %v1270_v0  ;;  %v4491_v45 = vpop.f32.mrb[34].mxu1 }
 0x124   :  { %v3504_v22 = vpop.eup %3503  ;;  %v2497_v19 = vsel %vm1203_vm2, %v4455_v32, 0.0  ;;  %v1924_v49 = vmul.f32 1.442695, %v1788_v25  ;;  %v1926_v12 = vmul.f32 1.442695, %v1789_v60  ;;  %v2214_v7 = vrot.slane %v2213_v15, 2 }
 0x125   :  { %v4475_v24 = vpop.eup %3505  ;;  %v2846_v26 = vmul.f32 %v3504_v22, %v4317_v23  ;;  %v2847_v13 = vmul.f32 %v3504_v22, %v4319_v20  ;;  %v1852_v3 = vsub.f32 %v4185_v21, %v1536_v38  ;;  %v1853_v27 = vsub.f32 %v4199_v34, %v1536_v38  ;;  %v4506_v38 = vpop.f32.mrb[35].mxu0 }
 0x126   :  { %v2498_v9 = vsel %vm1203_vm2, %v4475_v24, 0.0  ;;  %3511 = vpow2.f32 %v1924_v49  ;;  %v3508_v63 = vpop.eup %3507  ;;  %v2215_v23 = vadd.f32 %v2214_v7, %v2213_v15  ;;  %v1272_v50 = vrot.slane %v1271_v30, 2 }
 0x127   :  { %3002 = vst.msk [vmem:[%s5994_s2 + $0x230] sm:$0xff] %vm1203_vm2, %v2846_v26  ;;  %3003 = vst.msk [vmem:[%s5994_s2 + $0x238] sm:$0xff] %vm1203_vm2, %v2847_v13  ;;  %v2499_v20 = vadd.f32 %v2498_v9, %v2497_v19  ;;  %3513 = vpow2.f32 %v1926_v12  ;;  %v2747_v21 = vmul.f32 %v3508_v63, %v4323_v33  ;;  %v2748_v34 = vmul.f32 %v3508_v63, %v4335_v37 }
 0x128   :  { %v2052_v43 = vmul.f32 1.442695, %v1852_v3  ;;  %v2054_v41 = vmul.f32 1.442695, %v1853_v27  ;;  %v2216_v25 = vrot.slane %v2215_v23, 1  ;;  %v1273_v5 = vmax.f32 %v1271_v30, %v1272_v50 }
 0x129   :  { %v2500_v60 = vrot.slane %v2499_v20, 4  ;;  %v1558_v0 = vrot.slane %v1557_v29, 4  ;;  %2936 = vst.msk [vmem:[%s5994_s2 + $0x20] sm:$0xff] %vm1203_vm2, %v2747_v21  ;;  %2937 = vst.msk [vmem:[%s5994_s2 + $0x28] sm:$0xff] %vm1203_vm2, %v2748_v34  ;;  %v1261_v33 = vrot.slane %v1260_v35, 4  ;;  %v1548_v37 = vmax.f32 %v4439_v31, %v1547_v42 }
 0x12a   :  { %3515 = vpow2.f32 %v2052_v43  ;;  %v1285_v15 = vsel %vm1203_vm2, %v4241_v6, -inf  ;;  %v2217_v19 = vadd.f32 %v2216_v25, %v2215_v23  ;;  %v1274_v12 = vrot.slane %v1273_v5, 1 }
 0x12b   :  { %v3510_v22 = vpop.eup %3509  ;;  %v2501_v49 = vadd.f32 %v2500_v60, %v2499_v20  ;;  %3517 = vpow2.f32 %v2054_v41  ;;  %v1559_v7 = vmax.f32 %v1557_v29, %v1558_v0  ;;  %v1262_v30 = vmax.f32 %v1260_v35, %v1261_v33  ;;  %v4524_v35 = vpop.f32.mrb[35].mxu1 }
 0x12c   :  { %v2843_v26 = vmul.f32 %v3510_v22, %v4349_v17  ;;  %v2844_v13 = vmul.f32 %v3510_v22, %v4355_v44  ;;  %3519 = vrcp.f32 %v2217_v19  ;;  %v1275_v3 = vmax.f32 %v1273_v5, %v1274_v12 }
 0x12d   :  { %v2502_v9 = vrot.slane %v2501_v49, 2  ;;  %v1549_v31 = vrot.slane %v1548_v37, 4  ;;  %v1560_v42 = vrot.slane %v1559_v7, 2  ;;  %v1263_v17 = vrot.slane %v1262_v30, 2 }
 0x12e   :  { %3000 = vst.msk [vmem:[%s5994_s2 + $0x220] sm:$0xff] %vm1203_vm2, %v2843_v26  ;;  %3001 = vst.msk [vmem:[%s5994_s2 + $0x228] sm:$0xff] %vm1203_vm2, %v2844_v13  ;;  %v1573_v44 = vsel %vm1203_vm2, %v4254_v11, -inf  ;;  %v4522_v29 = vsel %vm1203_vm2, %v4256_v40, -inf  ;;  %v1794_v63 = vsub.f32 %v4205_v46, %v1275_v3  ;;  %v1795_v23 = vsub.f32 %v4221_v57, %v1275_v3 }
 0x12f   :  { %v2503_v27 = vadd.f32 %v2502_v9, %v2501_v49  ;;  %v1550_v20 = vmax.f32 %v1548_v37, %v1549_v31  ;;  %v1561_v21 = vmax.f32 %v1559_v7, %v1560_v42  ;;  %v1264_v34 = vmax.f32 %v1262_v30, %v1263_v17 }
 0x130   :  { %v4528_v50 = vpop.eup %3511  ;;  %v4532_v43 = vsel %vm1203_vm2, %v4262_v16, -inf  ;;  %v1286_v41 = vsel %vm1203_vm2, %v4264_v47, -inf  ;;  %v1936_v5 = vmul.f32 1.442695, %v1794_v63  ;;  %v1938_v57 = vmul.f32 1.442695, %v1795_v23 }
 0x131   :  { %v4536_v25 = vpop.eup %3513  ;;  %v2504_v60 = vrot.slane %v2503_v27, 1  ;;  %v2200_v46 = vsel %vm1203_vm2, %v4528_v50, 0.0  ;;  %v1562_v33 = vrot.slane %v1561_v21, 1  ;;  %v1265_v37 = vrot.slane %v1264_v34, 1 }
 0x132   :  { %v2201_v0 = vsel %vm1203_vm2, %v4536_v25, 0.0  ;;  %v1551_v22 = vrot.slane %v1550_v20, 2  ;;  %3521 = vpow2.f32 %v1936_v5  ;;  %v1287_v12 = vmax.f32 %v1285_v15, %v1286_v41 }
 0x133   :  { %v2505_v19 = vadd.f32 %v2504_v60, %v2503_v27  ;;  %v2202_v49 = vadd.f32 %v2201_v0, %v2200_v46  ;;  %3523 = vpow2.f32 %v1938_v57  ;;  %v1563_v13 = vmax.f32 %v1561_v21, %v1562_v33 }
 0x134   :  { %v4542_v26 = vpop.eup %3515  ;;  %v1266_v7 = vmax.f32 %v1264_v34, %v1265_v37  ;;  %v1552_v30 = vmax.f32 %v1550_v20, %v1551_v22  ;;  %v1288_v42 = vrot.slane %v1287_v12, 4 }
 0x135   :  { %v4544_v9 = vpop.eup %3517  ;;  %3525 = vrcp.f32 %v2505_v19  ;;  %v2203_v3 = vrot.slane %v2202_v49, 4  ;;  %v2488_v31 = vsel %vm1203_vm2, %v4542_v26, 0.0  ;;  %v1858_v27 = vsub.f32 %v4207_v51, %v1563_v13 }
 0x136   :  { %v2489_v17 = vsel %vm1203_vm2, %v4544_v9, 0.0  ;;  %v1859_v15 = vsub.f32 %v4225_v61, %v1563_v13  ;;  %v1792_v63 = vsub.f32 %v4209_v52, %v1266_v7  ;;  %v3520_v23 = vpop.eup %3519  ;;  %v1793_v34 = vsub.f32 %v4227_v62, %v1266_v7 }
 0x137   :  { %v2204_v21 = vadd.f32 %v2203_v3, %v2202_v49  ;;  %v2490_v20 = vadd.f32 %v2489_v17, %v2488_v31  ;;  %v1553_v41 = vrot.slane %v1552_v30, 1  ;;  %v2756_v60 = vmul.f32 %v3520_v23, %v4385_v28 }
 0x138   :  { %v2757_v46 = vmul.f32 %v3520_v23, %v4421_v18  ;;  %v2064_v5 = vmul.f32 1.442695, %v1858_v27  ;;  %v2066_v57 = vmul.f32 1.442695, %v1859_v15  ;;  %v1932_v37 = vmul.f32 1.442695, %v1792_v63 }
 0x139   :  { %v2205_v0 = vrot.slane %v2204_v21, 2  ;;  %v2491_v33 = vrot.slane %v2490_v20, 4  ;;  %v1934_v51 = vmul.f32 1.442695, %v1793_v34  ;;  %2942 = vst.msk [vmem:[%s5994_s2 + $0x50] sm:$0xff] %vm1203_vm2, %v2756_v60  ;;  %v1554_v52 = vmax.f32 %v1552_v30, %v1553_v41 }
 0x13a   :  { %2943 = vst.msk [vmem:[%s5994_s2 + $0x58] sm:$0xff] %vm1203_vm2, %v2757_v46  ;;  %3527 = vpow2.f32 %v2064_v5  ;;  %v1289_v61 = vmax.f32 %v1287_v12, %v1288_v42  ;;  %v1574_v62 = vsel %vm1203_vm2, %v4270_v53, -inf  ;;  %v4570_v12 = vpop.f32.mrb[36].mxu0  ;;  %v4572_v42 = vpop.f32.mrb[36].mxu1 }
 0x13b   :  { %v2206_v28 = vadd.f32 %v2205_v0, %v2204_v21  ;;  %v2492_v18 = vadd.f32 %v2491_v33, %v2490_v20  ;;  %3529 = vpow2.f32 %v2066_v57  ;;  %v1575_v22 = vmax.f32 %v1573_v44, %v1574_v62  ;;  %v4582_v41 = vpop.f32.mrb[37].mxu1 }
 0x13c   :  { %3531 = vpow2.f32 %v1932_v37  ;;  %v1856_v19 = vsub.f32 %v4219_v56, %v1554_v52  ;;  %v1857_v49 = vsub.f32 %v4231_v8, %v1554_v52  ;;  %v1290_v13 = vrot.slane %v1289_v61, 2  ;;  %v4568_v7 = vpop.eup %3521  ;;  %v4578_v8 = vpop.f32.mrb[37].mxu0  ;;  %6065 = vst [vmem:[#allocation22_spill] sm:$0xff] %v4582_v41 }
 0x13d   :  { %v2207_v3 = vrot.slane %v2206_v28, 1  ;;  %v2493_v31 = vrot.slane %v2492_v18, 2  ;;  %3533 = vpow2.f32 %v1934_v51  ;;  %v1576_v30 = vrot.slane %v1575_v22, 4  ;;  %v4574_v17 = vpop.eup %3523  ;;  %6064 = vst [vmem:[#allocation21_spill] sm:$0xff] %v4578_v8  ;;  %v4584_v60 = vpop.f32.mrb[38].mxu0 }
 0x13e   :  { %v2227_v44 = vsel %vm1203_vm2, %v4568_v7, 0.0  ;;  %v2060_v27 = vmul.f32 1.442695, %v1856_v19  ;;  %v2062_v56 = vmul.f32 1.442695, %v1857_v49  ;;  %v1291_v15 = vmax.f32 %v1289_v61, %v1290_v13  ;;  %6066 = vst [vmem:[#allocation23_spill] sm:$0xff] %v4584_v60 }
 0x13f   :  { %v3526_v63 = vpop.eup %3525  ;;  %v2208_v23 = vadd.f32 %v2207_v3, %v2206_v28  ;;  %v2494_v21 = vadd.f32 %v2493_v31, %v2492_v18  ;;  %v2228_v20 = vsel %vm1203_vm2, %v4574_v17, 0.0  ;;  %v1577_v34 = vmax.f32 %v1575_v22, %v1576_v30  ;;  %v4588_v0 = vpop.f32.mrb[38].mxu1  ;;  %v6069_v61 = vld [vmem:[#allocation3_spill] sm:$0xff]  ;;  %v6070_v31 = vld [vmem:[#allocation4_spill] sm:$0xff] }
 0x140   :  { %v2852_v46 = vmul.f32 %v3526_v63, %v4455_v32  ;;  %v2853_v5 = vmul.f32 %v3526_v63, %v4475_v24  ;;  %v2229_v57 = vadd.f32 %v2228_v20, %v2227_v44  ;;  %3535 = vpow2.f32 %v2060_v27  ;;  %6067 = vst [vmem:[#allocation24_spill] sm:$0xff] %v4588_v0  ;;  %v6068_v24 = vld [vmem:[#allocation2_spill] sm:$0xff]  ;;  %v6071_v44 = vld [vmem:[#allocation5_spill] sm:$0xff] }
 0x141   :  { %3537 = vrcp.f32 %v2208_v23  ;;  %v2495_v33 = vrot.slane %v2494_v21, 1  ;;  %v1292_v37 = vrot.slane %v1291_v15, 1  ;;  %v1578_v51 = vrot.slane %v1577_v34, 2 }
 0x142   :  { %3006 = vst.msk [vmem:[%s5994_s2 + $0x250] sm:$0xff] %vm1203_vm2, %v2852_v46  ;;  %3007 = vst.msk [vmem:[%s5994_s2 + $0x258] sm:$0xff] %vm1203_vm2, %v2853_v5  ;;  %v2230_v32 = vrot.slane %v2229_v57, 4  ;;  %3539 = vpow2.f32 %v2062_v56  ;;  %v1277_v52 = vsel %vm1203_vm2, %v6068_v24, -inf  ;;  %v1565_v62 = vsel %vm1203_vm2, %v6069_v61, -inf  ;;  %v4624_v46 = vpop.f32.mrb[39].mxu0 }
 0x143   :  { %v2496_v28 = vadd.f32 %v2495_v33, %v2494_v21  ;;  %v1293_v18 = vmax.f32 %v1291_v15, %v1292_v37  ;;  %v1579_v22 = vmax.f32 %v1577_v34, %v1578_v51  ;;  %v1278_v19 = vmax.f32 %v4522_v29, %v1277_v52  ;;  %6072 = vst [vmem:[#allocation2_spill] sm:$0xff] %v4624_v46 }
 0x144   :  { %v4603_v49 = vpop.eup %3527  ;;  %v2231_v13 = vadd.f32 %v2230_v32, %v2229_v57  ;;  %v1566_v3 = vmax.f32 %v4532_v43, %v1565_v62  ;;  %v4608_v30 = vsel %vm1203_vm2, %v6070_v31, -inf  ;;  %v4612_v27 = vsel %vm1203_vm2, %v6071_v44, -inf }
 0x145   :  { %v4614_v56 = vpop.eup %3529  ;;  %3541 = vrcp.f32 %v2496_v28  ;;  %v2515_v15 = vsel %vm1203_vm2, %v4603_v49, 0.0  ;;  %v1798_v29 = vsub.f32 %v4241_v6, %v1293_v18  ;;  %v1799_v63 = vsub.f32 %v4264_v47, %v1293_v18 }
 0x146   :  { %v4620_v23 = vpop.eup %3531  ;;  %v2232_v43 = vrot.slane %v2231_v13, 2  ;;  %v2516_v21 = vsel %vm1203_vm2, %v4614_v56, 0.0  ;;  %v1580_v20 = vrot.slane %v1579_v22, 1  ;;  %v1279_v34 = vrot.slane %v1278_v19, 4 }
 0x147   :  { %v4626_v5 = vpop.eup %3533  ;;  %v2517_v57 = vadd.f32 %v2516_v21, %v2515_v15  ;;  %v2218_v33 = vsel %vm1203_vm2, %v4620_v23, 0.0  ;;  %v1944_v37 = vmul.f32 1.442695, %v1798_v29  ;;  %v1946_v6 = vmul.f32 1.442695, %v1799_v63  ;;  %v4636_v29 = vpop.f32.mrb[39].mxu1 }
 0x148   :  { %v2233_v51 = vadd.f32 %v2232_v43, %v2231_v13  ;;  %v2219_v47 = vsel %vm1203_vm2, %v4626_v5, 0.0  ;;  %v1581_v32 = vmax.f32 %v1579_v22, %v1580_v20  ;;  %v1280_v52 = vmax.f32 %v1278_v19, %v1279_v34  ;;  %6073 = vst [vmem:[#allocation3_spill] sm:$0xff] %v4636_v29 }
 0x149   :  { %v2518_v62 = vrot.slane %v2517_v57, 4  ;;  %v2220_v28 = vadd.f32 %v2219_v47, %v2218_v33  ;;  %3543 = vpow2.f32 %v1944_v37  ;;  %v1567_v18 = vrot.slane %v1566_v3, 4 }
 0x14a   :  { %v4632_v0 = vpop.eup %3535  ;;  %v2234_v46 = vrot.slane %v2233_v51, 1  ;;  %3545 = vpow2.f32 %v1946_v6  ;;  %v1862_v15 = vsub.f32 %v4254_v11, %v1581_v32  ;;  %v1863_v21 = vsub.f32 %v4270_v53, %v1581_v32 }
 0x14b   :  { %v3538_v13 = vpop.eup %3537  ;;  %v2519_v63 = vadd.f32 %v2518_v62, %v2517_v57  ;;  %v2221_v43 = vrot.slane %v2220_v28, 4  ;;  %v2506_v22 = vsel %vm1203_vm2, %v4632_v0, 0.0  ;;  %v1281_v19 = vrot.slane %v1280_v52, 2 }
 0x14c   :  { %v4640_v20 = vpop.eup %3539  ;;  %v2753_v34 = vmul.f32 %v3538_v13, %v4528_v50  ;;  %v2754_v33 = vmul.f32 %v3538_v13, %v4536_v25  ;;  %v2235_v37 = vadd.f32 %v2234_v46, %v2233_v51  ;;  %v2072_v6 = vmul.f32 1.442695, %v1862_v15 }
 0x14d   :  { %v2520_v11 = vrot.slane %v2519_v63, 2  ;;  %v2222_v47 = vadd.f32 %v2221_v43, %v2220_v28  ;;  %v2507_v53 = vsel %vm1203_vm2, %v4640_v20, 0.0  ;;  %v2074_v32 = vmul.f32 1.442695, %v1863_v21  ;;  %v6074_v28 = vld [vmem:[#allocation6_spill] sm:$0xff] }
 0x14e   :  { %2940 = vst.msk [vmem:[%s5994_s2 + $0x40] sm:$0xff] %vm1203_vm2, %v2753_v34  ;;  %2941 = vst.msk [vmem:[%s5994_s2 + $0x48] sm:$0xff] %vm1203_vm2, %v2754_v33  ;;  %3547 = vrcp.f32 %v2235_v37  ;;  %v2508_v50 = vadd.f32 %v2507_v53, %v2506_v22  ;;  %v1282_v25 = vmax.f32 %v1280_v52, %v1281_v19  ;;  %v1568_v46 = vmax.f32 %v1566_v3, %v1567_v18  ;;  %v6076_v52 = vld [vmem:[#allocation8_spill] sm:$0xff] }
 0x14f   :  { %v3542_v57 = vpop.eup %3541  ;;  %v2521_v51 = vadd.f32 %v2520_v11, %v2519_v63  ;;  %v2223_v62 = vrot.slane %v2222_v47, 2  ;;  %3549 = vpow2.f32 %v2072_v6  ;;  %v4656_v15 = vsel %vm1203_vm2, %v6074_v28, -inf  ;;  %v6077_v63 = vld [vmem:[#allocation9_spill] sm:$0xff] }
 0x150   :  { %v2849_v21 = vmul.f32 %v3542_v57, %v4542_v26  ;;  %v2850_v13 = vmul.f32 %v3542_v57, %v4544_v9  ;;  %v2509_v43 = vrot.slane %v2508_v50, 4  ;;  %3551 = vpow2.f32 %v2074_v32  ;;  %v6075_v26 = vld [vmem:[#allocation7_spill] sm:$0xff] }
 0x151   :  { %v2522_v34 = vrot.slane %v2521_v51, 1  ;;  %v2224_v33 = vadd.f32 %v2223_v62, %v2222_v47  ;;  %v1283_v37 = vrot.slane %v1282_v25, 1  ;;  %v1569_v22 = vrot.slane %v1568_v46, 2 }
 0x152   :  { %3004 = vst.msk [vmem:[%s5994_s2 + $0x240] sm:$0xff] %vm1203_vm2, %v2849_v21  ;;  %3005 = vst.msk [vmem:[%s5994_s2 + $0x248] sm:$0xff] %vm1203_vm2, %v2850_v13  ;;  %v2510_v3 = vadd.f32 %v2509_v43, %v2508_v50  ;;  %v4670_v9 = vsel %vm1203_vm2, %v6075_v26, -inf  ;;  %v1304_v18 = vsel %vm1203_vm2, %v6076_v52, -inf  ;;  %v1592_v19 = vsel %vm1203_vm2, %v6077_v63, -inf }
 0x153   :  { %v4676_v6 = vpop.eup %3543  ;;  %v2523_v11 = vadd.f32 %v2522_v34, %v2521_v51  ;;  %v2225_v47 = vrot.slane %v2224_v33, 1  ;;  %v1284_v53 = vmax.f32 %v1282_v25, %v1283_v37  ;;  %v1570_v32 = vmax.f32 %v1568_v46, %v1569_v22  ;;  %v4687_v34 = vpop.f32.mrb[40].mxu0 }
 0x154   :  { %v4678_v57 = vpop.eup %3545  ;;  %v2511_v62 = vrot.slane %v2510_v3, 2  ;;  %v2245_v50 = vsel %vm1203_vm2, %v4676_v6, 0.0  ;;  %v1305_v21 = vmax.f32 %v4608_v30, %v1304_v18  ;;  %v1593_v13 = vmax.f32 %v4612_v27, %v1592_v19  ;;  %v4690_v18 = vpop.f32.mrb[40].mxu1 }
 0x155   :  { %3553 = vrcp.f32 %v2523_v11  ;;  %v2226_v43 = vadd.f32 %v2225_v47, %v2224_v33  ;;  %v2246_v29 = vsel %vm1203_vm2, %v4678_v57, 0.0  ;;  %v1796_v51 = vsub.f32 %v4256_v40, %v1284_v53 }
 0x156   :  { %v2512_v25 = vadd.f32 %v2511_v62, %v2510_v3  ;;  %v2247_v46 = vadd.f32 %v2246_v29, %v2245_v50  ;;  %v1797_v37 = vsub.f32 %v6068_v24, %v1284_v53  ;;  %v1571_v22 = vrot.slane %v1570_v32, 1 }
 0x157   :  { %3555 = vrcp.f32 %v2226_v43  ;;  %v1940_v60 = vmul.f32 1.442695, %v1796_v51  ;;  %v1306_v41 = vrot.slane %v1305_v21, 4  ;;  %v1594_v30 = vrot.slane %v1593_v13, 4  ;;  %v4700_v43 = vpop.f32.mrb[41].mxu0  ;;  %v4702_v51 = vpop.f32.mrb[41].mxu1 }
 0x158   :  { %v3548_v27 = vpop.eup %3547  ;;  %v2513_v33 = vrot.slane %v2512_v25, 1  ;;  %v2248_v19 = vrot.slane %v2247_v46, 4  ;;  %v1942_v11 = vmul.f32 1.442695, %v1797_v37  ;;  %v1572_v47 = vmax.f32 %v1570_v32, %v1571_v22  ;;  %6078 = vst [vmem:[#allocation4_spill] sm:$0xff] %v4702_v51  ;;  %v4716_v32 = vpop.f32.mrb[42].mxu0 }
 0x159   :  { %v4692_v8 = vpop.eup %3549  ;;  %v2762_v40 = vmul.f32 %v3548_v27, %v4568_v7  ;;  %v2763_v29 = vmul.f32 %v3548_v27, %v4574_v17  ;;  %3557 = vpow2.f32 %v1940_v60  ;;  %v1307_v24 = vmax.f32 %v1305_v21, %v1306_v41  ;;  %6079 = vst [vmem:[#allocation5_spill] sm:$0xff] %v4716_v32  ;;  %v4718_v37 = vpop.f32.mrb[42].mxu1 }
 0x15a   :  { %v4696_v3 = vpop.eup %3551  ;;  %v2514_v53 = vadd.f32 %v2513_v33, %v2512_v25  ;;  %v2249_v62 = vadd.f32 %v2248_v19, %v2247_v46  ;;  %v2533_v50 = vsel %vm1203_vm2, %v4692_v8, 0.0  ;;  %3559 = vpow2.f32 %v1942_v11  ;;  %6080 = vst [vmem:[#allocation6_spill] sm:$0xff] %v4718_v37  ;;  %v6081_v19 = vld [vmem:[#allocation10_spill] sm:$0xff] }
 0x15b   :  { %2946 = vst.msk [vmem:[%s5994_s2 + $0x70] sm:$0xff] %vm1203_vm2, %v2762_v40  ;;  %2947 = vst.msk [vmem:[%s5994_s2 + $0x78] sm:$0xff] %vm1203_vm2, %v2763_v29  ;;  %v2534_v7 = vsel %vm1203_vm2, %v4696_v3, 0.0  ;;  %v1860_v17 = vsub.f32 %v4262_v16, %v1572_v47  ;;  %v1861_v41 = vsub.f32 %v6069_v61, %v1572_v47  ;;  %v1308_v60 = vrot.slane %v1307_v24, 2 }
 0x15c   :  { %3561 = vrcp.f32 %v2514_v53  ;;  %v2250_v21 = vrot.slane %v2249_v62, 2  ;;  %v2535_v25 = vadd.f32 %v2534_v7, %v2533_v50  ;;  %v1595_v46 = vmax.f32 %v1593_v13, %v1594_v30  ;;  %v6082_v53 = vld [vmem:[#allocation11_spill] sm:$0xff]  ;;  %v6083_v13 = vld [vmem:[#allocation12_spill] sm:$0xff] }
 0x15d   :  { %v2068_v22 = vmul.f32 1.442695, %v1860_v17  ;;  %v2070_v27 = vmul.f32 1.442695, %v1861_v41  ;;  %v1309_v33 = vmax.f32 %v1307_v24, %v1308_v60  ;;  %v1295_v11 = vsel %vm1203_vm2, %v6081_v19, -inf }
 0x15e   :  { %v2251_v40 = vadd.f32 %v2250_v21, %v2249_v62  ;;  %v2536_v29 = vrot.slane %v2535_v25, 4  ;;  %v1596_v16 = vrot.slane %v1595_v46, 2  ;;  %v1296_v61 = vmax.f32 %v4656_v15, %v1295_v11 }
 0x15f   :  { %v3554_v47 = vpop.eup %3553  ;;  %3563 = vpow2.f32 %v2068_v22  ;;  %v1310_v32 = vrot.slane %v1309_v33, 1  ;;  %v1583_v50 = vsel %vm1203_vm2, %v6082_v53, -inf  ;;  %v4727_v30 = vsel %vm1203_vm2, %v6083_v13, -inf }
 0x160   :  { %v2858_v24 = vmul.f32 %v3554_v47, %v4603_v49  ;;  %v2859_v7 = vmul.f32 %v3554_v47, %v4614_v56  ;;  %v2252_v17 = vrot.slane %v2251_v40, 1  ;;  %v2537_v62 = vadd.f32 %v2536_v29, %v2535_v25 }
 0x161   :  { %v3556_v41 = vpop.eup %3555  ;;  %3565 = vpow2.f32 %v2070_v27  ;;  %v1311_v60 = vmax.f32 %v1309_v33, %v1310_v32  ;;  %v1597_v15 = vmax.f32 %v1595_v46, %v1596_v16  ;;  %v1297_v21 = vrot.slane %v1296_v61, 4  ;;  %v4741_v27 = vpop.f32.mrb[43].mxu0 }
 0x162   :  { %3010 = vst.msk [vmem:[%s5994_s2 + $0x270] sm:$0xff] %vm1203_vm2, %v2858_v24  ;;  %3011 = vst.msk [vmem:[%s5994_s2 + $0x278] sm:$0xff] %vm1203_vm2, %v2859_v7  ;;  %v2759_v49 = vmul.f32 %v3556_v41, %v4620_v23  ;;  %v2760_v56 = vmul.f32 %v3556_v41, %v4626_v5  ;;  %v2253_v25 = vadd.f32 %v2252_v17, %v2251_v40  ;;  %v2538_v22 = vrot.slane %v2537_v62, 2 }
 0x163   :  { %6084 = vst [vmem:[#allocation7_spill] sm:$0xff] %v4741_v27  ;;  %v4743_v32 = vpop.eup %3557  ;;  %v1802_v46 = vsub.f32 %v6070_v31, %v1311_v60  ;;  %v1803_v33 = vsub.f32 %v6076_v52, %v1311_v60  ;;  %v1598_v11 = vrot.slane %v1597_v15, 1  ;;  %v1298_v29 = vmax.f32 %v1296_v61, %v1297_v21  ;;  %v4762_v21 = vpop.f32.mrb[43].mxu1 }
 0x164   :  { %v4747_v16 = vpop.eup %3559  ;;  %2944 = vst.msk [vmem:[%s5994_s2 + $0x60] sm:$0xff] %vm1203_vm2, %v2759_v49  ;;  %2945 = vst.msk [vmem:[%s5994_s2 + $0x68] sm:$0xff] %vm1203_vm2, %v2760_v56  ;;  %3567 = vrcp.f32 %v2253_v25  ;;  %v2539_v23 = vadd.f32 %v2538_v22, %v2537_v62  ;;  %v2236_v31 = vsel %vm1203_vm2, %v4743_v32, 0.0  ;;  %v1584_v5 = vmax.f32 %v4670_v9, %v1583_v50  ;;  %v6086_v22 = vld [vmem:[#allocation13_spill] sm:$0xff] }
 0x165   :  { %v2237_v52 = vsel %vm1203_vm2, %v4747_v16, 0.0  ;;  %v1952_v40 = vmul.f32 1.442695, %v1802_v46  ;;  %v1954_v61 = vmul.f32 1.442695, %v1803_v33  ;;  %v1599_v47 = vmax.f32 %v1597_v15, %v1598_v11  ;;  %6085 = vst [vmem:[#allocation8_spill] sm:$0xff] %v4762_v21 }
 0x166   :  { %v3562_v24 = vpop.eup %3561  ;;  %v2540_v7 = vrot.slane %v2539_v23, 1  ;;  %v2238_v17 = vadd.f32 %v2237_v52, %v2236_v31  ;;  %v1299_v41 = vrot.slane %v1298_v29, 2  ;;  %v1585_v60 = vrot.slane %v1584_v5, 4 }
 0x167   :  { %v2855_v62 = vmul.f32 %v3562_v24, %v4632_v0  ;;  %v2856_v49 = vmul.f32 %v3562_v24, %v4640_v20  ;;  %3569 = vpow2.f32 %v1952_v40  ;;  %v1866_v9 = vsub.f32 %v6071_v44, %v1599_v47  ;;  %v6087_v40 = vld [vmem:[#allocation14_spill] sm:$0xff] }
 0x168   :  { %v2541_v50 = vadd.f32 %v2540_v7, %v2539_v23  ;;  %v2239_v56 = vrot.slane %v2238_v17, 4  ;;  %3571 = vpow2.f32 %v1954_v61  ;;  %v1867_v25 = vsub.f32 %v6077_v63, %v1599_v47 }
 0x169   :  { %v4768_v15 = vpop.eup %3563  ;;  %3008 = vst.msk [vmem:[%s5994_s2 + $0x260] sm:$0xff] %vm1203_vm2, %v2855_v62  ;;  %3009 = vst.msk [vmem:[%s5994_s2 + $0x268] sm:$0xff] %vm1203_vm2, %v2856_v49  ;;  %v2080_v0 = vmul.f32 1.442695, %v1866_v9  ;;  %v1300_v20 = vmax.f32 %v1298_v29, %v1299_v41  ;;  %v1586_v44 = vmax.f32 %v1584_v5, %v1585_v60  ;;  %v1609_v46 = vsel %vm1203_vm2, %v6086_v22, -inf  ;;  %v6088_v5 = vld [vmem:[#allocation15_spill] sm:$0xff] }
 0x16a   :  { %3573 = vrcp.f32 %v2541_v50  ;;  %v2240_v63 = vadd.f32 %v2239_v56, %v2238_v17  ;;  %v2524_v33 = vsel %vm1203_vm2, %v4768_v15, 0.0  ;;  %v2082_v11 = vmul.f32 1.442695, %v1867_v25  ;;  %v6089_v60 = vld [vmem:[#allocation16_spill] sm:$0xff]  ;;  %v6090_v56 = vld [vmem:[#allocation17_spill] sm:$0xff] }
 0x16b   :  { %v4782_v23 = vpop.eup %3565  ;;  %3575 = vpow2.f32 %v2080_v0  ;;  %v1301_v31 = vrot.slane %v1300_v20, 1  ;;  %v1587_v52 = vrot.slane %v1586_v44, 2  ;;  %v1312_v61 = vsel %vm1203_vm2, %v6087_v40, -inf  ;;  %v6091_v0 = vld [vmem:[#allocation18_spill] sm:$0xff] }
 0x16c   :  { %v2241_v47 = vrot.slane %v2240_v63, 2  ;;  %v2525_v29 = vsel %vm1203_vm2, %v4782_v23, 0.0  ;;  %3577 = vpow2.f32 %v2082_v11  ;;  %v4790_v24 = vsel %vm1203_vm2, %v6088_v5, -inf }
 0x16d   :  { %v2526_v7 = vadd.f32 %v2525_v29, %v2524_v33  ;;  %v1302_v17 = vmax.f32 %v1300_v20, %v1301_v31  ;;  %v1588_v41 = vmax.f32 %v1586_v44, %v1587_v52  ;;  %v1322_v62 = vsel %vm1203_vm2, %v6089_v60, -inf  ;;  %v4813_v29 = vpop.f32.mrb[44].mxu0 }
 0x16e   :  { %v3568_v49 = vpop.eup %3567  ;;  %v2242_v9 = vadd.f32 %v2241_v47, %v2240_v63  ;;  %v1323_v50 = vmax.f32 %v4727_v30, %v1322_v62  ;;  %v1610_v25 = vsel %vm1203_vm2, %v6090_v56, -inf  ;;  %v1313_v11 = vsel %vm1203_vm2, %v6091_v0, -inf  ;;  %6092 = vst [vmem:[#allocation9_spill] sm:$0xff] %v4813_v29 }
 0x16f   :  { %v2768_v21 = vmul.f32 %v3568_v49, %v4676_v6  ;;  %v2769_v27 = vmul.f32 %v3568_v49, %v4678_v57  ;;  %v2527_v33 = vrot.slane %v2526_v7, 4  ;;  %v1800_v20 = vsub.f32 %v6074_v28, %v1302_v17 }
 0x170   :  { %v2243_v44 = vrot.slane %v2242_v9, 1  ;;  %v1801_v31 = vsub.f32 %v6081_v19, %v1302_v17  ;;  %v1589_v52 = vrot.slane %v1588_v41, 1  ;;  %v1324_v63 = vrot.slane %v1323_v50, 4  ;;  %v4815_v19 = vpop.f32.mrb[44].mxu1 }
 0x171   :  { %v4803_v47 = vpop.eup %3569  ;;  %2950 = vst.msk [vmem:[%s5994_s2 + $0x90] sm:$0xff] %vm1203_vm2, %v2768_v21  ;;  %2951 = vst.msk [vmem:[%s5994_s2 + $0x98] sm:$0xff] %vm1203_vm2, %v2769_v27  ;;  %v2528_v6 = vadd.f32 %v2527_v33, %v2526_v7  ;;  %v1948_v57 = vmul.f32 1.442695, %v1800_v20  ;;  %v1611_v28 = vmax.f32 %v1609_v46, %v1610_v25  ;;  %v1314_v30 = vmax.f32 %v1312_v61, %v1313_v11  ;;  %v4823_v46 = vpop.f32.mrb[45].mxu0 }
 0x172   :  { %6093 = vst [vmem:[#allocation10_spill] sm:$0xff] %v4815_v19  ;;  %v4817_v17 = vpop.eup %3571  ;;  %v2244_v62 = vadd.f32 %v2243_v44, %v2242_v9  ;;  %v2263_v49 = vsel %vm1203_vm2, %v4803_v47, 0.0  ;;  %v1950_v21 = vmul.f32 1.442695, %v1801_v31  ;;  %v1590_v37 = vmax.f32 %v1588_v41, %v1589_v52  ;;  %6094 = vst [vmem:[#allocation11_spill] sm:$0xff] %v4823_v46  ;;  %v4827_v33 = vpop.f32.mrb[45].mxu1 }
 0x173   :  { %v2529_v51 = vrot.slane %v2528_v6, 2  ;;  %v2264_v27 = vsel %vm1203_vm2, %v4817_v17, 0.0  ;;  %3579 = vpow2.f32 %v1948_v57  ;;  %v1325_v7 = vmax.f32 %v1323_v50, %v1324_v63  ;;  %6095 = vst [vmem:[#allocation12_spill] sm:$0xff] %v4827_v33  ;;  %v6096_v33 = vld [vmem:[#allocation19_spill] sm:$0xff] }
 0x174   :  { %v3574_v61 = vpop.eup %3573  ;;  %3581 = vrcp.f32 %v2244_v62  ;;  %v2265_v25 = vadd.f32 %v2264_v27, %v2263_v49  ;;  %v1864_v11 = vsub.f32 %v6075_v26, %v1590_v37  ;;  %v1865_v9 = vsub.f32 %v6082_v53, %v1590_v37  ;;  %v4847_v53 = vpop.f32.mrb[46].mxu0 }
 0x175   :  { %v4829_v20 = vpop.eup %3575  ;;  %v2864_v41 = vmul.f32 %v3574_v61, %v4692_v8  ;;  %v2865_v44 = vmul.f32 %v3574_v61, %v4696_v3  ;;  %v2530_v31 = vadd.f32 %v2529_v51, %v2528_v6  ;;  %3583 = vpow2.f32 %v1950_v21  ;;  %v4849_v21 = vpop.f32.mrb[46].mxu1 }
 0x176   :  { %v4833_v50 = vpop.eup %3577  ;;  %v2266_v52 = vrot.slane %v2265_v25, 4  ;;  %v2551_v63 = vsel %vm1203_vm2, %v4829_v20, 0.0  ;;  %v2076_v57 = vmul.f32 1.442695, %v1864_v11  ;;  %v2078_v26 = vmul.f32 1.442695, %v1865_v9 }
 0x177   :  { %3014 = vst.msk [vmem:[%s5994_s2 + $0x290] sm:$0xff] %vm1203_vm2, %v2864_v41  ;;  %3015 = vst.msk [vmem:[%s5994_s2 + $0x298] sm:$0xff] %vm1203_vm2, %v2865_v44  ;;  %v2531_v8 = vrot.slane %v2530_v31, 1  ;;  %v2552_v3 = vsel %vm1203_vm2, %v4833_v50, 0.0  ;;  %v1326_v51 = vrot.slane %v1325_v7, 2  ;;  %v1612_v37 = vrot.slane %v1611_v28, 4 }
 0x178   :  { %v2267_v6 = vadd.f32 %v2266_v52, %v2265_v25  ;;  %v2553_v62 = vadd.f32 %v2552_v3, %v2551_v63  ;;  %3585 = vpow2.f32 %v2076_v57  ;;  %v1315_v49 = vrot.slane %v1314_v30, 4 }
 0x179   :  { %v2532_v27 = vadd.f32 %v2531_v8, %v2530_v31  ;;  %3587 = vpow2.f32 %v2078_v26  ;;  %v1327_v61 = vmax.f32 %v1325_v7, %v1326_v51  ;;  %v1613_v11 = vmax.f32 %v1611_v28, %v1612_v37  ;;  %v4858_v7 = vpop.f32.mrb[47].mxu0 }
 0x17a   :  { %v2268_v9 = vrot.slane %v2267_v6, 2  ;;  %v2554_v41 = vrot.slane %v2553_v62, 4  ;;  %v1316_v44 = vmax.f32 %v1314_v30, %v1315_v49  ;;  %v1601_v46 = vsel %vm1203_vm2, %v6096_v33, -inf }
 0x17b   :  { %3589 = vrcp.f32 %v2532_v27  ;;  %v1328_v19 = vrot.slane %v1327_v61, 1  ;;  %v1614_v29 = vrot.slane %v1613_v11, 2  ;;  %v1602_v25 = vmax.f32 %v4790_v24, %v1601_v46 }
 0x17c   :  { %v2269_v52 = vadd.f32 %v2268_v9, %v2267_v6  ;;  %v2555_v63 = vadd.f32 %v2554_v41, %v2553_v62  ;;  %v1317_v57 = vrot.slane %v1316_v44, 2  ;;  %v4856_v31 = vsel %vm1203_vm2, %v4363_v4, -inf }
 0x17d   :  { %v4860_v28 = vpop.eup %3579  ;;  %v1329_v30 = vmax.f32 %v1327_v61, %v1328_v19  ;;  %v1615_v26 = vmax.f32 %v1613_v11, %v1614_v29  ;;  %v1603_v8 = vrot.slane %v1602_v25, 4  ;;  %v4864_v3 = vsel %vm1203_vm2, %v4367_v36, -inf }
 0x17e   :  { %v3582_v51 = vpop.eup %3581  ;;  %v2270_v24 = vrot.slane %v2269_v52, 1  ;;  %v2556_v46 = vrot.slane %v2555_v63, 2  ;;  %v2254_v37 = vsel %vm1203_vm2, %v4860_v28, 0.0  ;;  %v1318_v6 = vmax.f32 %v1316_v44, %v1317_v57 }
 0x17f   :  { %v4868_v62 = vpop.eup %3583  ;;  %v2765_v49 = vmul.f32 %v3582_v51, %v4743_v32  ;;  %v2766_v27 = vmul.f32 %v3582_v51, %v4747_v16  ;;  %v1806_v29 = vsub.f32 %v6083_v13, %v1329_v30  ;;  %v1807_v19 = vsub.f32 %v6089_v60, %v1329_v30  ;;  %v4886_v30 = vpop.f32.mrb[47].mxu1 }
 0x180   :  { %v2271_v61 = vadd.f32 %v2270_v24, %v2269_v52  ;;  %v2557_v11 = vadd.f32 %v2556_v46, %v2555_v63  ;;  %v2255_v9 = vsel %vm1203_vm2, %v4868_v62, 0.0  ;;  %v1616_v41 = vrot.slane %v1615_v26, 1 }
 0x181   :  { %2948 = vst.msk [vmem:[%s5994_s2 + $0x80] sm:$0xff] %vm1203_vm2, %v2765_v49  ;;  %2949 = vst.msk [vmem:[%s5994_s2 + $0x88] sm:$0xff] %vm1203_vm2, %v2766_v27  ;;  %v2256_v32 = vadd.f32 %v2255_v9, %v2254_v37  ;;  %v1960_v13 = vmul.f32 1.442695, %v1806_v29  ;;  %v1962_v16 = vmul.f32 1.442695, %v1807_v19  ;;  %v1604_v57 = vmax.f32 %v1602_v25, %v1603_v8 }
 0x182   :  { %v1319_v60 = vrot.slane %v1318_v6, 1  ;;  %v4884_v44 = vpop.eup %3585  ;;  %3591 = vrcp.f32 %v2271_v61  ;;  %v2558_v52 = vrot.slane %v2557_v11, 1  ;;  %v1617_v63 = vmax.f32 %v1615_v26, %v1616_v41 }
 0x183   :  { %v4888_v51 = vpop.eup %3587  ;;  %v2257_v24 = vrot.slane %v2256_v32, 4  ;;  %v2542_v46 = vsel %vm1203_vm2, %v4884_v44, 0.0  ;;  %3593 = vpow2.f32 %v1960_v13 }
 0x184   :  { %v1320_v49 = vmax.f32 %v1318_v6, %v1319_v60  ;;  %v2559_v37 = vadd.f32 %v2558_v52, %v2557_v11  ;;  %v2543_v27 = vsel %vm1203_vm2, %v4888_v51, 0.0  ;;  %3595 = vpow2.f32 %v1962_v16 }
 0x185   :  { %v1870_v29 = vsub.f32 %v6086_v22, %v1617_v63  ;;  %v3590_v19 = vpop.eup %3589  ;;  %v2258_v26 = vadd.f32 %v2257_v24, %v2256_v32  ;;  %v2544_v25 = vadd.f32 %v2543_v27, %v2542_v46  ;;  %v1871_v8 = vsub.f32 %v6090_v56, %v1617_v63  ;;  %v6097_v63 = vld [vmem:[#allocation20_spill] sm:$0xff] }
 0x186   :  { %v1804_v61 = vsub.f32 %v6087_v40, %v1320_v49  ;;  %v2861_v9 = vmul.f32 %v3590_v19, %v4768_v15  ;;  %v2862_v41 = vmul.f32 %v3590_v19, %v4782_v23  ;;  %3597 = vrcp.f32 %v2559_v37 }
 0x187   :  { %v2088_v6 = vmul.f32 1.442695, %v1870_v29  ;;  %v2259_v11 = vrot.slane %v2258_v26, 2  ;;  %v2545_v13 = vrot.slane %v2544_v25, 4  ;;  %v2090_v60 = vmul.f32 1.442695, %v1871_v8 }
 0x188   :  { %v1805_v16 = vsub.f32 %v6091_v0, %v1320_v49  ;;  %3012 = vst.msk [vmem:[%s5994_s2 + $0x280] sm:$0xff] %vm1203_vm2, %v2861_v9  ;;  %3013 = vst.msk [vmem:[%s5994_s2 + $0x288] sm:$0xff] %vm1203_vm2, %v2862_v41  ;;  %v1956_v15 = vmul.f32 1.442695, %v1804_v61  ;;  %v1605_v22 = vrot.slane %v1604_v57, 2  ;;  %v1330_v23 = vsel %vm1203_vm2, %v4369_v10, -inf }
 0x189   :  { %3599 = vpow2.f32 %v2088_v6  ;;  %v2260_v40 = vadd.f32 %v2259_v11, %v2258_v26  ;;  %v2546_v56 = vadd.f32 %v2545_v13, %v2544_v25  ;;  %v4912_v52 = vsel %vm1203_vm2, %v4371_v1, -inf  ;;  %v4923_v25 = vpop.f32.mrb[48].mxu0  ;;  %v4925_v8 = vpop.f32.mrb[48].mxu1 }
 0x18a   :  { %3601 = vpow2.f32 %v2090_v60  ;;  %v1958_v0 = vmul.f32 1.442695, %v1805_v16  ;;  %v1606_v32 = vmax.f32 %v1604_v57, %v1605_v22  ;;  %v1340_v24 = vsel %vm1203_vm2, %v6097_v63, -inf  ;;  %6098 = vst [vmem:[#allocation13_spill] sm:$0xff] %v4925_v8  ;;  %v4936_v22 = vpop.f32.mrb[49].mxu0 }
 0x18b   :  { %3603 = vpow2.f32 %v1956_v15  ;;  %v2261_v46 = vrot.slane %v2260_v40, 1  ;;  %v2547_v49 = vrot.slane %v2546_v56, 2  ;;  %v1341_v37 = vmax.f32 %v4856_v31, %v1340_v24  ;;  %6099 = vst [vmem:[#allocation14_spill] sm:$0xff] %v4936_v22 }
 0x18c   :  { %3605 = vpow2.f32 %v1958_v0  ;;  %v3592_v27 = vpop.eup %3591  ;;  %v1607_v29 = vrot.slane %v1606_v32, 1  ;;  %v1628_v19 = vsel %vm1203_vm2, %v4377_v55, -inf  ;;  %v1331_v57 = vsel %vm1203_vm2, %v4379_v39, -inf  ;;  %v4938_v0 = vpop.f32.mrb[49].mxu1 }
 0x18d   :  { %v1619_v26 = vsel %vm1203_vm2, %v4383_v14, -inf  ;;  %v4927_v61 = vpop.eup %3593  ;;  %v2774_v9 = vmul.f32 %v3592_v27, %v4803_v47  ;;  %v2775_v31 = vmul.f32 %v3592_v27, %v4817_v17  ;;  %v2262_v41 = vadd.f32 %v2261_v46, %v2260_v40  ;;  %6100 = vst [vmem:[#allocation15_spill] sm:$0xff] %v4938_v0 }
 0x18e   :  { %v2548_v6 = vadd.f32 %v2547_v49, %v2546_v56  ;;  %v4931_v11 = vpop.eup %3595  ;;  %v2281_v13 = vsel %vm1203_vm2, %v4927_v61, 0.0  ;;  %v1608_v60 = vmax.f32 %v1606_v32, %v1607_v29  ;;  %v1342_v16 = vrot.slane %v1341_v37, 4  ;;  %v4952_v49 = vpop.f32.mrb[50].mxu0 }
 0x18f   :  { %v1629_v15 = vmax.f32 %v4864_v3, %v1628_v19  ;;  %2954 = vst.msk [vmem:[%s5994_s2 + $0xb0] sm:$0xff] %vm1203_vm2, %v2774_v9  ;;  %2955 = vst.msk [vmem:[%s5994_s2 + $0xb8] sm:$0xff] %vm1203_vm2, %v2775_v31  ;;  %3607 = vrcp.f32 %v2262_v41  ;;  %v2282_v17 = vsel %vm1203_vm2, %v4931_v11, 0.0  ;;  %v1332_v3 = vmax.f32 %v1330_v23, %v1331_v57 }
 0x190   :  { %v2549_v47 = vrot.slane %v2548_v6, 1  ;;  %v3598_v40 = vpop.eup %3597  ;;  %v2283_v56 = vadd.f32 %v2282_v17, %v2281_v13  ;;  %v1868_v32 = vsub.f32 %v6088_v5, %v1608_v60  ;;  %v1869_v24 = vsub.f32 %v6096_v33, %v1608_v60  ;;  %6101 = vst [vmem:[#allocation16_spill] sm:$0xff] %v4952_v49 }
 0x191   :  { %v1343_v46 = vmax.f32 %v1341_v37, %v1342_v16  ;;  %v2870_v27 = vmul.f32 %v3598_v40, %v4829_v20  ;;  %v2871_v29 = vmul.f32 %v3598_v40, %v4833_v50  ;;  %v1630_v9 = vrot.slane %v1629_v15, 4  ;;  %v4970_v50 = vpop.f32.mrb[50].mxu1 }
 0x192   :  { %v2550_v19 = vadd.f32 %v2549_v47, %v2548_v6  ;;  %v2284_v41 = vrot.slane %v2283_v56, 4  ;;  %v2084_v0 = vmul.f32 1.442695, %v1868_v32  ;;  %v2086_v23 = vmul.f32 1.442695, %v1869_v24  ;;  %6102 = vst [vmem:[#allocation17_spill] sm:$0xff] %v4970_v50 }
 0x193   :  { %v4956_v31 = vpop.eup %3599  ;;  %v1344_v57 = vrot.slane %v1343_v46, 2  ;;  %3018 = vst.msk [vmem:[%s5994_s2 + $0x2b0] sm:$0xff] %vm1203_vm2, %v2870_v27  ;;  %3019 = vst.msk [vmem:[%s5994_s2 + $0x2b8] sm:$0xff] %vm1203_vm2, %v2871_v29  ;;  %v1631_v33 = vmax.f32 %v1629_v15, %v1630_v9  ;;  %v1333_v20 = vrot.slane %v1332_v3, 4 }
 0x194   :  { %v4958_v13 = vpop.eup %3601  ;;  %3609 = vrcp.f32 %v2550_v19  ;;  %v2569_v5 = vsel %vm1203_vm2, %v4956_v31, 0.0  ;;  %v2285_v6 = vadd.f32 %v2284_v41, %v2283_v56 }
 0x195   :  { %v4972_v37 = vpop.eup %3603  ;;  %v2570_v60 = vsel %vm1203_vm2, %v4958_v13, 0.0  ;;  %3611 = vpow2.f32 %v2084_v0  ;;  %v1345_v16 = vmax.f32 %v1343_v46, %v1344_v57  ;;  %v1632_v32 = vrot.slane %v1631_v33, 2 }
 0x196   :  { %v4976_v47 = vpop.eup %3605  ;;  %v2571_v17 = vadd.f32 %v2570_v60, %v2569_v5  ;;  %v2272_v40 = vsel %vm1203_vm2, %v4972_v37, 0.0  ;;  %3613 = vpow2.f32 %v2086_v23  ;;  %v2286_v15 = vrot.slane %v2285_v6, 2  ;;  %v4987_v23 = vpop.f32.mrb[51].mxu0 }
 0x197   :  { %v2273_v24 = vsel %vm1203_vm2, %v4976_v47, 0.0  ;;  %v1346_v27 = vrot.slane %v1345_v16, 1  ;;  %v1334_v29 = vmax.f32 %v1332_v3, %v1333_v20  ;;  %v1633_v9 = vmax.f32 %v1631_v33, %v1632_v32 }
 0x198   :  { %v2572_v56 = vrot.slane %v2571_v17, 4  ;;  %v2274_v19 = vadd.f32 %v2273_v24, %v2272_v40  ;;  %v1620_v0 = vmax.f32 %v4912_v52, %v1619_v26  ;;  %v2287_v46 = vadd.f32 %v2286_v15, %v2285_v6 }
 0x199   :  { %v1347_v41 = vmax.f32 %v1345_v16, %v1346_v27  ;;  %v1335_v57 = vrot.slane %v1334_v29, 2  ;;  %v4985_v5 = vsel %vm1203_vm2, %v4451_v2, -inf  ;;  %v3608_v60 = vpop.eup %3607  ;;  %v1634_v22 = vrot.slane %v1633_v9, 1 }
 0x19a   :  { %v2573_v50 = vadd.f32 %v2572_v56, %v2571_v17  ;;  %v2275_v49 = vrot.slane %v2274_v19, 4  ;;  %v1621_v8 = vrot.slane %v1620_v0, 4  ;;  %v2771_v3 = vmul.f32 %v3608_v60, %v4860_v28 }
 0x19b   :  { %v2772_v33 = vmul.f32 %v3608_v60, %v4868_v62  ;;  %v2288_v20 = vrot.slane %v2287_v46, 1  ;;  %v1810_v52 = vsub.f32 %v4363_v4, %v1347_v41  ;;  %v1811_v16 = vsub.f32 %v6097_v63, %v1347_v41 }
 0x19c   :  { %v2574_v26 = vrot.slane %v2573_v50, 2  ;;  %v2276_v6 = vadd.f32 %v2275_v49, %v2274_v19  ;;  %v1635_v40 = vmax.f32 %v1633_v9, %v1634_v22  ;;  %2952 = vst.msk [vmem:[%s5994_s2 + $0xa0] sm:$0xff] %vm1203_vm2, %v2771_v3  ;;  %v1336_v17 = vmax.f32 %v1334_v29, %v1335_v57  ;;  %v5007_v9 = vpop.f32.mrb[51].mxu1 }
 0x19d   :  { %2953 = vst.msk [vmem:[%s5994_s2 + $0xa8] sm:$0xff] %vm1203_vm2, %v2772_v33  ;;  %v2289_v28 = vadd.f32 %v2288_v20, %v2287_v46  ;;  %v1968_v62 = vmul.f32 1.442695, %v1810_v52  ;;  %v1622_v32 = vmax.f32 %v1620_v0, %v1621_v8  ;;  %v1970_v24 = vmul.f32 1.442695, %v1811_v16 }
 0x19e   :  { %v3610_v4 = vpop.eup %3609  ;;  %v2575_v15 = vadd.f32 %v2574_v26, %v2573_v50  ;;  %v2277_v49 = vrot.slane %v2276_v6, 2  ;;  %v1874_v63 = vsub.f32 %v4367_v36, %v1635_v40  ;;  %v1875_v19 = vsub.f32 %v4377_v55, %v1635_v40 }
 0x19f   :  { %v5002_v22 = vpop.eup %3611  ;;  %v2867_v27 = vmul.f32 %v3610_v4, %v4884_v44  ;;  %v2868_v56 = vmul.f32 %v3610_v4, %v4888_v51  ;;  %3615 = vrcp.f32 %v2289_v28  ;;  %v1337_v57 = vrot.slane %v1336_v17, 1 }
 0x1a0   :  { %v5009_v46 = vpop.eup %3613  ;;  %v2576_v8 = vrot.slane %v2575_v15, 1  ;;  %v2278_v29 = vadd.f32 %v2277_v49, %v2276_v6  ;;  %v2560_v50 = vsel %vm1203_vm2, %v5002_v22, 0.0  ;;  %3617 = vpow2.f32 %v1968_v62 }
 0x1a1   :  { %3016 = vst.msk [vmem:[%s5994_s2 + $0x2a0] sm:$0xff] %vm1203_vm2, %v2867_v27  ;;  %3017 = vst.msk [vmem:[%s5994_s2 + $0x2a8] sm:$0xff] %vm1203_vm2, %v2868_v56  ;;  %v2561_v36 = vsel %vm1203_vm2, %v5009_v46, 0.0  ;;  %3619 = vpow2.f32 %v1970_v24  ;;  %v2096_v55 = vmul.f32 1.442695, %v1874_v63  ;;  %v1623_v60 = vrot.slane %v1622_v32, 2 }
 0x1a2   :  { %v2098_v44 = vmul.f32 1.442695, %v1875_v19  ;;  %v2577_v51 = vadd.f32 %v2576_v8, %v2575_v15  ;;  %v2279_v0 = vrot.slane %v2278_v29, 1  ;;  %v2562_v41 = vadd.f32 %v2561_v36, %v2560_v50 }
 0x1a3   :  { %3621 = vpow2.f32 %v2096_v55  ;;  %v1645_v3 = vsel %vm1203_vm2, %v4453_v59, -inf  ;;  %v1348_v33 = vsel %vm1203_vm2, %v4467_v58, -inf  ;;  %v1338_v26 = vmax.f32 %v1336_v17, %v1337_v57 }
 0x1a4   :  { %3623 = vrcp.f32 %v2577_v51  ;;  %v2280_v20 = vadd.f32 %v2279_v0, %v2278_v29  ;;  %v2563_v52 = vrot.slane %v2562_v41, 4  ;;  %v1624_v6 = vmax.f32 %v1622_v32, %v1623_v60 }
 0x1a5   :  { %3625 = vpow2.f32 %v2098_v44  ;;  %v5029_v16 = vsel %vm1203_vm2, %v4469_v54, -inf  ;;  %v1358_v40 = vsel %vm1203_vm2, %v4473_v48, -inf  ;;  %v1808_v62 = vsub.f32 %v4369_v10, %v1338_v26 }
 0x1a6   :  { %3627 = vrcp.f32 %v2280_v20  ;;  %v2564_v28 = vadd.f32 %v2563_v52, %v2562_v41  ;;  %v1809_v4 = vsub.f32 %v4379_v39, %v1338_v26  ;;  %v1625_v15 = vrot.slane %v1624_v6, 1  ;;  %v5042_v39 = vpop.f32.mrb[52].mxu0 }
 0x1a7   :  { %v1359_v49 = vmax.f32 %v4985_v5, %v1358_v40  ;;  %v1646_v17 = vsel %vm1203_vm2, %v4491_v45, -inf  ;;  %v1349_v32 = vsel %vm1203_vm2, %v4506_v38, -inf  ;;  %v1964_v63 = vmul.f32 1.442695, %v1808_v62  ;;  %v5044_v5 = vpop.f32.mrb[52].mxu1  ;;  %v5050_v0 = vpop.f32.mrb[53].mxu0 }
 0x1a8   :  { %v2565_v24 = vrot.slane %v2564_v28, 2  ;;  %v1966_v27 = vmul.f32 1.442695, %v1809_v4  ;;  %v1647_v56 = vmax.f32 %v1645_v3, %v1646_v17  ;;  %v1626_v8 = vmax.f32 %v1624_v6, %v1625_v15  ;;  %v5052_v41 = vpop.f32.mrb[53].mxu1  ;;  %v5060_v20 = vpop.f32.mrb[54].mxu0 }
 0x1a9   :  { %v3616_v19 = vpop.eup %3615  ;;  %v1360_v29 = vrot.slane %v1359_v49, 4  ;;  %v1350_v50 = vmax.f32 %v1348_v33, %v1349_v32  ;;  %v1637_v10 = vsel %vm1203_vm2, %v4524_v35, -inf  ;;  %3629 = vpow2.f32 %v1964_v63 }
 0x1aa   :  { %v5046_v36 = vpop.eup %3617  ;;  %v2780_v55 = vmul.f32 %v3616_v19, %v4927_v61  ;;  %v2781_v44 = vmul.f32 %v3616_v19, %v4931_v11  ;;  %v2566_v51 = vadd.f32 %v2565_v24, %v2564_v28  ;;  %3631 = vpow2.f32 %v1966_v27  ;;  %v5080_v19 = vpop.f32.mrb[54].mxu1 }
 0x1ab   :  { %v5054_v57 = vpop.eup %3619  ;;  %v2299_v60 = vsel %vm1203_vm2, %v5046_v36, 0.0  ;;  %v1872_v3 = vsub.f32 %v4371_v1, %v1626_v8  ;;  %v1873_v33 = vsub.f32 %v4383_v14, %v1626_v8  ;;  %v1361_v52 = vmax.f32 %v1359_v49, %v1360_v29 }
 0x1ac   :  { %2958 = vst.msk [vmem:[%s5994_s2 + $0xd0] sm:$0xff] %vm1203_vm2, %v2780_v55  ;;  %2959 = vst.msk [vmem:[%s5994_s2 + $0xd8] sm:$0xff] %vm1203_vm2, %v2781_v44  ;;  %v2567_v61 = vrot.slane %v2566_v51, 1  ;;  %v2300_v11 = vsel %vm1203_vm2, %v5054_v57, 0.0  ;;  %v1648_v1 = vrot.slane %v1647_v56, 4  ;;  %v1351_v28 = vrot.slane %v1350_v50, 4 }
 0x1ad   :  { %v5072_v26 = vpop.eup %3621  ;;  %v2301_v14 = vadd.f32 %v2300_v11, %v2299_v60  ;;  %v2092_v6 = vmul.f32 1.442695, %v1872_v3  ;;  %v2094_v40 = vmul.f32 1.442695, %v1873_v33  ;;  %v1362_v17 = vrot.slane %v1361_v52, 2 }
 0x1ae   :  { %v3624_v62 = vpop.eup %3623  ;;  %v2568_v4 = vadd.f32 %v2567_v61, %v2566_v51  ;;  %v2587_v15 = vsel %vm1203_vm2, %v5072_v26, 0.0  ;;  %v1649_v32 = vmax.f32 %v1647_v56, %v1648_v1  ;;  %v1352_v33 = vmax.f32 %v1350_v50, %v1351_v28  ;;  %v5094_v61 = vpop.f32.mrb[55].mxu0 }
 0x1af   :  { %v5076_v24 = vpop.eup %3625  ;;  %v2876_v63 = vmul.f32 %v3624_v62, %v4956_v31  ;;  %v2877_v49 = vmul.f32 %v3624_v62, %v4958_v13  ;;  %v2302_v27 = vrot.slane %v2301_v14, 4  ;;  %3633 = vpow2.f32 %v2092_v6 }
 0x1b0   :  { %v3628_v8 = vpop.eup %3627  ;;  %3635 = vrcp.f32 %v2568_v4  ;;  %v2588_v29 = vsel %vm1203_vm2, %v5076_v24, 0.0  ;;  %v1363_v55 = vmax.f32 %v1361_v52, %v1362_v17  ;;  %v1650_v44 = vrot.slane %v1649_v32, 2 }
 0x1b1   :  { %3022 = vst.msk [vmem:[%s5994_s2 + $0x2d0] sm:$0xff] %vm1203_vm2, %v2876_v63  ;;  %3023 = vst.msk [vmem:[%s5994_s2 + $0x2d8] sm:$0xff] %vm1203_vm2, %v2877_v49  ;;  %v2777_v31 = vmul.f32 %v3628_v8, %v4972_v37  ;;  %v2778_v13 = vmul.f32 %v3628_v8, %v4976_v47  ;;  %v2303_v56 = vadd.f32 %v2302_v27, %v2301_v14  ;;  %3637 = vpow2.f32 %v2094_v40 }
 0x1b2   :  { %v2589_v51 = vadd.f32 %v2588_v29, %v2587_v15  ;;  %v1364_v60 = vrot.slane %v1363_v55, 1  ;;  %v1651_v3 = vmax.f32 %v1649_v32, %v1650_v44  ;;  %v1638_v11 = vmax.f32 %v5029_v16, %v1637_v10 }
 0x1b3   :  { %2956 = vst.msk [vmem:[%s5994_s2 + $0xc0] sm:$0xff] %vm1203_vm2, %v2777_v31  ;;  %2957 = vst.msk [vmem:[%s5994_s2 + $0xc8] sm:$0xff] %vm1203_vm2, %v2778_v13  ;;  %v2304_v37 = vrot.slane %v2303_v56, 2  ;;  %v5107_v52 = vsel %vm1203_vm2, %v4570_v12, -inf  ;;  %v5109_v50 = vpop.eup %3629  ;;  %v1353_v6 = vrot.slane %v1352_v33, 2  ;;  %v5113_v40 = vsel %vm1203_vm2, %v4572_v42, -inf }
 0x1b4   :  { %v2590_v47 = vrot.slane %v2589_v51, 4  ;;  %v1365_v1 = vmax.f32 %v1363_v55, %v1364_v60  ;;  %v1652_v14 = vrot.slane %v1651_v3, 1  ;;  %v5115_v28 = vpop.eup %3631  ;;  %v2290_v16 = vsel %vm1203_vm2, %v5109_v50, 0.0 }
 0x1b5   :  { %v2305_v62 = vadd.f32 %v2304_v37, %v2303_v56  ;;  %v1639_v10 = vrot.slane %v1638_v11, 4  ;;  %v2291_v15 = vsel %vm1203_vm2, %v5115_v28, 0.0  ;;  %v1354_v29 = vmax.f32 %v1352_v33, %v1353_v6  ;;  %v5125_v56 = vpop.f32.mrb[55].mxu1 }
 0x1b6   :  { %v2591_v4 = vadd.f32 %v2590_v47, %v2589_v51  ;;  %v1814_v17 = vsub.f32 %v4451_v2, %v1365_v1  ;;  %v1815_v32 = vsub.f32 %v4473_v48, %v1365_v1  ;;  %v1653_v63 = vmax.f32 %v1651_v3, %v1652_v14 }
 0x1b7   :  { %v2306_v49 = vrot.slane %v2305_v62, 1  ;;  %v2292_v8 = vadd.f32 %v2291_v15, %v2290_v16  ;;  %v1355_v47 = vrot.slane %v1354_v29, 1  ;;  %v6103_v15 = vld [vmem:[#allocation21_spill] sm:$0xff] }
 0x1b8   :  { %v2592_v27 = vrot.slane %v2591_v4, 2  ;;  %v1976_v55 = vmul.f32 1.442695, %v1814_v17  ;;  %v1978_v44 = vmul.f32 1.442695, %v1815_v32  ;;  %v1878_v31 = vsub.f32 %v4453_v59, %v1653_v63 }
 0x1b9   :  { %v1879_v13 = vsub.f32 %v4491_v45, %v1653_v63  ;;  %v5127_v51 = vpop.eup %3633  ;;  %v2307_v60 = vadd.f32 %v2306_v49, %v2305_v62  ;;  %v2293_v2 = vrot.slane %v2292_v8, 4  ;;  %v1356_v62 = vmax.f32 %v1354_v29, %v1355_v47  ;;  %v6106_v47 = vld [vmem:[#allocation24_spill] sm:$0xff] }
 0x1ba   :  { %v2593_v37 = vadd.f32 %v2592_v27, %v2591_v4  ;;  %v3636_v48 = vpop.eup %3635  ;;  %v2578_v3 = vsel %vm1203_vm2, %v5127_v51, 0.0  ;;  %3639 = vpow2.f32 %v1976_v55  ;;  %v2104_v33 = vmul.f32 1.442695, %v1878_v31  ;;  %v6104_v27 = vld [vmem:[#allocation22_spill] sm:$0xff]  ;;  %v6105_v31 = vld [vmem:[#allocation23_spill] sm:$0xff] }
 0x1bb   :  { %v2106_v1 = vmul.f32 1.442695, %v1879_v13  ;;  %v2873_v14 = vmul.f32 %v3636_v48, %v5002_v22  ;;  %v2874_v59 = vmul.f32 %v3636_v48, %v5009_v46  ;;  %3641 = vrcp.f32 %v2307_v60  ;;  %v5133_v6 = vpop.eup %3637 }
 0x1bc   :  { %v2594_v45 = vrot.slane %v2593_v37, 1  ;;  %v2294_v16 = vadd.f32 %v2293_v2, %v2292_v8  ;;  %3643 = vpow2.f32 %v1978_v44  ;;  %v1640_v4 = vmax.f32 %v1638_v11, %v1639_v10 }
 0x1bd   :  { %3020 = vst.msk [vmem:[%s5994_s2 + $0x2c0] sm:$0xff] %vm1203_vm2, %v2873_v14  ;;  %3021 = vst.msk [vmem:[%s5994_s2 + $0x2c8] sm:$0xff] %vm1203_vm2, %v2874_v59  ;;  %v2579_v46 = vsel %vm1203_vm2, %v5133_v6, 0.0  ;;  %3645 = vpow2.f32 %v2104_v33  ;;  %v1366_v17 = vsel %vm1203_vm2, %v6103_v15, -inf  ;;  %v1812_v10 = vsub.f32 %v4467_v58, %v1356_v62  ;;  %v6107_v14 = vld [vmem:[#allocation2_spill] sm:$0xff] }
 0x1be   :  { %v2595_v22 = vadd.f32 %v2594_v45, %v2593_v37  ;;  %v2295_v32 = vrot.slane %v2294_v16, 2  ;;  %v2580_v11 = vadd.f32 %v2579_v46, %v2578_v3  ;;  %3647 = vpow2.f32 %v2106_v1 }
 0x1bf   :  { %v1813_v63 = vsub.f32 %v4506_v38, %v1356_v62  ;;  %v1641_v49 = vrot.slane %v1640_v4, 2  ;;  %v5151_v8 = vsel %vm1203_vm2, %v6104_v27, -inf  ;;  %v1972_v44 = vmul.f32 1.442695, %v1812_v10  ;;  %v6108_v10 = vld [vmem:[#allocation3_spill] sm:$0xff] }
 0x1c0   :  { %3649 = vrcp.f32 %v2595_v22  ;;  %v2296_v29 = vadd.f32 %v2295_v32, %v2294_v16  ;;  %v2581_v55 = vrot.slane %v2580_v11, 4  ;;  %v1376_v13 = vsel %vm1203_vm2, %v6105_v31, -inf }
 0x1c1   :  { %v1974_v60 = vmul.f32 1.442695, %v1813_v63  ;;  %v1642_v37 = vmax.f32 %v1640_v4, %v1641_v49  ;;  %v1377_v2 = vmax.f32 %v5107_v52, %v1376_v13  ;;  %v1664_v58 = vsel %vm1203_vm2, %v6106_v47, -inf }
 0x1c2   :  { %v2297_v48 = vrot.slane %v2296_v29, 1  ;;  %v2582_v38 = vadd.f32 %v2581_v55, %v2580_v11  ;;  %3651 = vpow2.f32 %v1972_v44  ;;  %v1665_v3 = vmax.f32 %v5113_v40, %v1664_v58  ;;  %v5171_v44 = vpop.f32.mrb[56].mxu0 }
 0x1c3   :  { %3653 = vpow2.f32 %v1974_v60  ;;  %v1643_v33 = vrot.slane %v1642_v37, 1  ;;  %v1378_v1 = vrot.slane %v1377_v2, 4  ;;  %v1367_v59 = vsel %vm1203_vm2, %v6107_v14, -inf }
 0x1c4   :  { %v5161_v45 = vpop.eup %3639  ;;  %v2298_v16 = vadd.f32 %v2297_v48, %v2296_v29  ;;  %v2583_v62 = vrot.slane %v2582_v38, 2  ;;  %v1666_v4 = vrot.slane %v1665_v3, 4  ;;  %v1368_v52 = vmax.f32 %v1366_v17, %v1367_v59  ;;  %v5173_v17 = vpop.f32.mrb[56].mxu1 }
 0x1c5   :  { %v3642_v22 = vpop.eup %3641  ;;  %v2317_v46 = vsel %vm1203_vm2, %v5161_v45, 0.0  ;;  %v1644_v32 = vmax.f32 %v1642_v37, %v1643_v33  ;;  %v1379_v11 = vmax.f32 %v1377_v2, %v1378_v1  ;;  %v1655_v40 = vsel %vm1203_vm2, %v6108_v10, -inf  ;;  %6109 = vst [vmem:[#allocation18_spill] sm:$0xff] %v5173_v17  ;;  %v5181_v48 = vpop.f32.mrb[57].mxu0 }
 0x1c6   :  { %v5167_v63 = vpop.eup %3643  ;;  %v2786_v49 = vmul.f32 %v3642_v22, %v5046_v36  ;;  %v2787_v55 = vmul.f32 %v3642_v22, %v5054_v57  ;;  %3655 = vrcp.f32 %v2298_v16  ;;  %v2584_v29 = vadd.f32 %v2583_v62, %v2582_v38  ;;  %6110 = vst [vmem:[#allocation19_spill] sm:$0xff] %v5181_v48  ;;  %v5183_v36 = vpop.f32.mrb[57].mxu1 }
 0x1c7   :  { %v5175_v13 = vpop.eup %3645  ;;  %v2318_v60 = vsel %vm1203_vm2, %v5167_v63, 0.0  ;;  %v1876_v37 = vsub.f32 %v4469_v54, %v1644_v32  ;;  %v1877_v2 = vsub.f32 %v4524_v35, %v1644_v32  ;;  %v1380_v58 = vrot.slane %v1379_v11, 2  ;;  %6111 = vst [vmem:[#allocation20_spill] sm:$0xff] %v5183_v36  ;;  %v5197_v1 = vpop.f32.mrb[58].mxu0 }
 0x1c8   :  { %v5185_v57 = vpop.eup %3647  ;;  %2962 = vst.msk [vmem:[%s5994_s2 + $0xf0] sm:$0xff] %vm1203_vm2, %v2786_v49  ;;  %2963 = vst.msk [vmem:[%s5994_s2 + $0xf8] sm:$0xff] %vm1203_vm2, %v2787_v55  ;;  %v2585_v54 = vrot.slane %v2584_v29, 1  ;;  %v2319_v38 = vadd.f32 %v2318_v60, %v2317_v46  ;;  %v2605_v35 = vsel %vm1203_vm2, %v5175_v13, 0.0  ;;  %v1667_v33 = vmax.f32 %v1665_v3, %v1666_v4  ;;  %v5199_v59 = vpop.f32.mrb[58].mxu1 }
 0x1c9   :  { %6112 = vst [vmem:[#allocation21_spill] sm:$0xff] %v5197_v1  ;;  %6113 = vst [vmem:[#allocation22_spill] sm:$0xff] %v5199_v59  ;;  %v2606_v62 = vsel %vm1203_vm2, %v5185_v57, 0.0  ;;  %v2100_v22 = vmul.f32 1.442695, %v1876_v37  ;;  %v1381_v49 = vmax.f32 %v1379_v11, %v1380_v58  ;;  %v1656_v11 = vmax.f32 %v5151_v8, %v1655_v40 }
 0x1ca   :  { %v3650_v16 = vpop.eup %3649  ;;  %v2102_v32 = vmul.f32 1.442695, %v1877_v2  ;;  %v2586_v46 = vadd.f32 %v2585_v54, %v2584_v29  ;;  %v2320_v60 = vrot.slane %v2319_v38, 4  ;;  %v2607_v48 = vadd.f32 %v2606_v62, %v2605_v35  ;;  %v5222_v62 = vpop.f32.mrb[59].mxu0 }
 0x1cb   :  { %v2882_v36 = vmul.f32 %v3650_v16, %v5072_v26  ;;  %v2883_v55 = vmul.f32 %v3650_v16, %v5076_v24  ;;  %3657 = vpow2.f32 %v2100_v22  ;;  %v1382_v3 = vrot.slane %v1381_v49, 1 }
 0x1cc   :  { %v1668_v4 = vrot.slane %v1667_v33, 2  ;;  %v5205_v1 = vpop.eup %3651  ;;  %3659 = vrcp.f32 %v2586_v46  ;;  %v2321_v26 = vadd.f32 %v2320_v60, %v2319_v38  ;;  %v1369_v24 = vrot.slane %v1368_v52, 4 }
 0x1cd   :  { %3026 = vst.msk [vmem:[%s5994_s2 + $0x2f0] sm:$0xff] %vm1203_vm2, %v2882_v36  ;;  %3027 = vst.msk [vmem:[%s5994_s2 + $0x2f8] sm:$0xff] %vm1203_vm2, %v2883_v55  ;;  %v5216_v29 = vpop.eup %3653  ;;  %v2608_v37 = vrot.slane %v2607_v48, 4  ;;  %v2308_v2 = vsel %vm1203_vm2, %v5205_v1, 0.0  ;;  %3661 = vpow2.f32 %v2102_v32  ;;  %v1383_v58 = vmax.f32 %v1381_v49, %v1382_v3 }
 0x1ce   :  { %v2322_v54 = vrot.slane %v2321_v26, 2  ;;  %v2309_v36 = vsel %vm1203_vm2, %v5216_v29, 0.0  ;;  %v1669_v35 = vmax.f32 %v1667_v33, %v1668_v4  ;;  %v1370_v16 = vmax.f32 %v1368_v52, %v1369_v24 }
 0x1cf   :  { %v2609_v38 = vadd.f32 %v2608_v37, %v2607_v48  ;;  %v2310_v22 = vadd.f32 %v2309_v36, %v2308_v2  ;;  %v1818_v8 = vsub.f32 %v4570_v12, %v1383_v58  ;;  %v1819_v40 = vsub.f32 %v6105_v31, %v1383_v58  ;;  %v5228_v37 = vpop.f32.mrb[59].mxu1 }
 0x1d0   :  { %v3656_v55 = vpop.eup %3655  ;;  %v2323_v46 = vadd.f32 %v2322_v54, %v2321_v26  ;;  %v1670_v60 = vrot.slane %v1669_v35, 1  ;;  %v1371_v59 = vrot.slane %v1370_v16, 2  ;;  %v1657_v32 = vrot.slane %v1656_v11, 4 }
 0x1d1   :  { %v2783_v49 = vmul.f32 %v3656_v55, %v5109_v50  ;;  %v2784_v3 = vmul.f32 %v3656_v55, %v5115_v28  ;;  %v2610_v17 = vrot.slane %v2609_v38, 2  ;;  %v2311_v33 = vrot.slane %v2310_v22, 4 }
 0x1d2   :  { %v2324_v52 = vrot.slane %v2323_v46, 1  ;;  %v1984_v4 = vmul.f32 1.442695, %v1818_v8  ;;  %v1986_v24 = vmul.f32 1.442695, %v1819_v40  ;;  %v1671_v48 = vmax.f32 %v1669_v35, %v1670_v60 }
 0x1d3   :  { %2960 = vst.msk [vmem:[%s5994_s2 + $0xe0] sm:$0xff] %vm1203_vm2, %v2783_v49  ;;  %2961 = vst.msk [vmem:[%s5994_s2 + $0xe8] sm:$0xff] %vm1203_vm2, %v2784_v3  ;;  %v2611_v12 = vadd.f32 %v2610_v17, %v2609_v38  ;;  %v2312_v50 = vadd.f32 %v2311_v33, %v2310_v22  ;;  %v1372_v28 = vmax.f32 %v1370_v16, %v1371_v59 }
 0x1d4   :  { %v1658_v31 = vmax.f32 %v1656_v11, %v1657_v32  ;;  %v2325_v26 = vadd.f32 %v2324_v52, %v2323_v46  ;;  %3663 = vpow2.f32 %v1984_v4  ;;  %v1882_v2 = vsub.f32 %v4572_v42, %v1671_v48 }
 0x1d5   :  { %v1883_v58 = vsub.f32 %v6106_v47, %v1671_v48  ;;  %v5240_v54 = vpop.eup %3657  ;;  %v2612_v36 = vrot.slane %v2611_v12, 1  ;;  %v2313_v35 = vrot.slane %v2312_v50, 2  ;;  %3665 = vpow2.f32 %v1986_v24 }
 0x1d6   :  { %v1373_v8 = vrot.slane %v1372_v28, 1  ;;  %v3660_v40 = vpop.eup %3659  ;;  %3667 = vrcp.f32 %v2325_v26  ;;  %v2596_v17 = vsel %vm1203_vm2, %v5240_v54, 0.0  ;;  %v2112_v38 = vmul.f32 1.442695, %v1882_v2  ;;  %v6114_v26 = vld [vmem:[#allocation4_spill] sm:$0xff] }
 0x1d7   :  { %v2114_v59 = vmul.f32 1.442695, %v1883_v58  ;;  %v5244_v11 = vpop.eup %3661  ;;  %v2879_v16 = vmul.f32 %v3660_v40, %v5127_v51  ;;  %v2880_v42 = vmul.f32 %v3660_v40, %v5133_v6  ;;  %v2613_v47 = vadd.f32 %v2612_v36, %v2611_v12  ;;  %v6115_v58 = vld [vmem:[#allocation5_spill] sm:$0xff] }
 0x1d8   :  { %v2314_v22 = vadd.f32 %v2313_v35, %v2312_v50  ;;  %v2597_v55 = vsel %vm1203_vm2, %v5244_v11, 0.0  ;;  %3669 = vpow2.f32 %v2112_v38  ;;  %v1374_v46 = vmax.f32 %v1372_v28, %v1373_v8 }
 0x1d9   :  { %v1659_v60 = vrot.slane %v1658_v31, 2  ;;  %3024 = vst.msk [vmem:[%s5994_s2 + $0x2e0] sm:$0xff] %vm1203_vm2, %v2879_v16  ;;  %3025 = vst.msk [vmem:[%s5994_s2 + $0x2e8] sm:$0xff] %vm1203_vm2, %v2880_v42  ;;  %3671 = vrcp.f32 %v2613_v47  ;;  %v2598_v6 = vadd.f32 %v2597_v55, %v2596_v17  ;;  %v1393_v32 = vsel %vm1203_vm2, %v4687_v34, -inf  ;;  %v6117_v42 = vld [vmem:[#allocation7_spill] sm:$0xff]  ;;  %v5284_v55 = vpop.f32.mrb[60].mxu1 }
 0x1da   :  { %v2315_v51 = vrot.slane %v2314_v22, 1  ;;  %3673 = vpow2.f32 %v2114_v59  ;;  %v1816_v49 = vsub.f32 %v6103_v15, %v1374_v46  ;;  %v1817_v3 = vsub.f32 %v6107_v14, %v1374_v46  ;;  %6118 = vst [vmem:[#allocation23_spill] sm:$0xff] %v5284_v55 }
 0x1db   :  { %v1660_v33 = vmax.f32 %v1658_v31, %v1659_v60  ;;  %v2599_v4 = vrot.slane %v2598_v6, 4  ;;  %v1681_v24 = vsel %vm1203_vm2, %v4690_v18, -inf  ;;  %v1384_v48 = vsel %vm1203_vm2, %v4700_v43, -inf  ;;  %v6116_v31 = vld [vmem:[#allocation6_spill] sm:$0xff] }
 0x1dc   :  { %v2316_v52 = vadd.f32 %v2315_v51, %v2314_v22  ;;  %v1980_v12 = vmul.f32 1.442695, %v1816_v49  ;;  %v1982_v50 = vmul.f32 1.442695, %v1817_v3  ;;  %v5268_v2 = vsel %vm1203_vm2, %v6114_v26, -inf  ;;  %v5282_v22 = vpop.f32.mrb[60].mxu0 }
 0x1dd   :  { %v1661_v28 = vrot.slane %v1660_v33, 1  ;;  %v2600_v15 = vadd.f32 %v2599_v4, %v2598_v6  ;;  %v1394_v14 = vsel %vm1203_vm2, %v6115_v58, -inf  ;;  %v1682_v36 = vsel %vm1203_vm2, %v6116_v31, -inf  ;;  %v5290_v49 = vpop.f32.mrb[61].mxu0  ;;  %v5292_v3 = vpop.f32.mrb[61].mxu1 }
 0x1de   :  { %3675 = vrcp.f32 %v2316_v52  ;;  %v5274_v35 = vpop.eup %3663  ;;  %v1395_v40 = vmax.f32 %v1393_v32, %v1394_v14  ;;  %v1683_v17 = vmax.f32 %v1681_v24, %v1682_v36  ;;  %v1385_v47 = vsel %vm1203_vm2, %v6117_v42, -inf  ;;  %6119 = vst [vmem:[#allocation24_spill] sm:$0xff] %v5290_v49  ;;  %6120 = vst [vmem:[#allocation2_spill] sm:$0xff] %v5292_v3 }
 0x1df   :  { %3677 = vpow2.f32 %v1980_v12  ;;  %v1662_v8 = vmax.f32 %v1660_v33, %v1661_v28  ;;  %v5276_v38 = vpop.eup %3665  ;;  %v2601_v59 = vrot.slane %v2600_v15, 2  ;;  %v2335_v16 = vsel %vm1203_vm2, %v5274_v35, 0.0 }
 0x1e0   :  { %3679 = vpow2.f32 %v1982_v50  ;;  %v3668_v46 = vpop.eup %3667  ;;  %v2336_v60 = vsel %vm1203_vm2, %v5276_v38, 0.0  ;;  %v1396_v32 = vrot.slane %v1395_v40, 4  ;;  %v1684_v36 = vrot.slane %v1683_v17, 4 }
 0x1e1   :  { %v1880_v51 = vsub.f32 %v6104_v27, %v1662_v8  ;;  %v1881_v6 = vsub.f32 %v6108_v10, %v1662_v8  ;;  %v2792_v33 = vmul.f32 %v3668_v46, %v5161_v45  ;;  %v2793_v52 = vmul.f32 %v3668_v46, %v5167_v63  ;;  %v5298_v27 = vpop.f32.mrb[62].mxu0 }
 0x1e2   :  { %v2602_v4 = vadd.f32 %v2601_v59, %v2600_v15  ;;  %v2337_v24 = vadd.f32 %v2336_v60, %v2335_v16  ;;  %v5296_v12 = vpop.eup %3669  ;;  %v1397_v14 = vmax.f32 %v1395_v40, %v1396_v32  ;;  %6121 = vst [vmem:[#allocation3_spill] sm:$0xff] %v5298_v27  ;;  %v1386_v8 = vmax.f32 %v1384_v48, %v1385_v47  ;;  %v5310_v40 = vpop.f32.mrb[62].mxu1 }
 0x1e3   :  { %v2108_v50 = vmul.f32 1.442695, %v1880_v51  ;;  %v2110_v28 = vmul.f32 1.442695, %v1881_v6  ;;  %v3672_v10 = vpop.eup %3671  ;;  %2966 = vst.msk [vmem:[%s5994_s2 + $0x110] sm:$0xff] %vm1203_vm2, %v2792_v33  ;;  %2967 = vst.msk [vmem:[%s5994_s2 + $0x118] sm:$0xff] %vm1203_vm2, %v2793_v52  ;;  %v1685_v48 = vmax.f32 %v1683_v17, %v1684_v36 }
 0x1e4   :  { %v2603_v45 = vrot.slane %v2602_v4, 1  ;;  %v2338_v63 = vrot.slane %v2337_v24, 4  ;;  %v2623_v15 = vsel %vm1203_vm2, %v5296_v12, 0.0  ;;  %6122 = vst [vmem:[#allocation4_spill] sm:$0xff] %v5310_v40  ;;  %v5312_v59 = vpop.eup %3673  ;;  %v2888_v16 = vmul.f32 %v3672_v10, %v5175_v13  ;;  %v5326_v33 = vpop.f32.mrb[63].mxu0 }
 0x1e5   :  { %v2889_v46 = vmul.f32 %v3672_v10, %v5185_v57  ;;  %3681 = vpow2.f32 %v2108_v50  ;;  %v1398_v60 = vrot.slane %v1397_v14, 2  ;;  %v2624_v32 = vsel %vm1203_vm2, %v5312_v59, 0.0  ;;  %6123 = vst [vmem:[#allocation5_spill] sm:$0xff] %v5326_v33 }
 0x1e6   :  { %v2604_v51 = vadd.f32 %v2603_v45, %v2602_v4  ;;  %v2339_v6 = vadd.f32 %v2338_v63, %v2337_v24  ;;  %3683 = vpow2.f32 %v2110_v28  ;;  %3030 = vst.msk [vmem:[%s5994_s2 + $0x310] sm:$0xff] %vm1203_vm2, %v2888_v16  ;;  %v2625_v13 = vadd.f32 %v2624_v32, %v2623_v15  ;;  %v6124_v24 = vld [vmem:[#allocation8_spill] sm:$0xff]  ;;  %v6125_v28 = vld [vmem:[#allocation9_spill] sm:$0xff] }
 0x1e7   :  { %3031 = vst.msk [vmem:[%s5994_s2 + $0x318] sm:$0xff] %vm1203_vm2, %v2889_v46  ;;  %v1399_v57 = vmax.f32 %v1397_v14, %v1398_v60  ;;  %v1387_v47 = vrot.slane %v1386_v8, 4  ;;  %v1673_v50 = vsel %vm1203_vm2, %v6124_v24, -inf  ;;  %v5332_v10 = vsel %vm1203_vm2, %v6125_v28, -inf }
 0x1e8   :  { %v3676_v52 = vpop.eup %3675  ;;  %3685 = vrcp.f32 %v2604_v51  ;;  %v2340_v4 = vrot.slane %v2339_v6, 2  ;;  %v2626_v17 = vrot.slane %v2625_v13, 4  ;;  %v1686_v60 = vrot.slane %v1685_v48, 2 }
 0x1e9   :  { %v5334_v45 = vpop.eup %3677  ;;  %v2789_v63 = vmul.f32 %v3676_v52, %v5205_v1  ;;  %v2790_v14 = vmul.f32 %v3676_v52, %v5216_v29  ;;  %v1400_v36 = vrot.slane %v1399_v57, 1  ;;  %v1388_v51 = vmax.f32 %v1386_v8, %v1387_v47 }
 0x1ea   :  { %v5338_v15 = vpop.eup %3679  ;;  %v2341_v16 = vadd.f32 %v2340_v4, %v2339_v6  ;;  %v2326_v46 = vsel %vm1203_vm2, %v5334_v45, 0.0  ;;  %v2627_v1 = vadd.f32 %v2626_v17, %v2625_v13  ;;  %v1674_v32 = vmax.f32 %v5268_v2, %v1673_v50  ;;  %v5355_v17 = vpop.f32.mrb[63].mxu1 }
 0x1eb   :  { %2964 = vst.msk [vmem:[%s5994_s2 + $0x100] sm:$0xff] %vm1203_vm2, %v2789_v63  ;;  %2965 = vst.msk [vmem:[%s5994_s2 + $0x108] sm:$0xff] %vm1203_vm2, %v2790_v14  ;;  %v2327_v29 = vsel %vm1203_vm2, %v5338_v15, 0.0  ;;  %v1401_v6 = vmax.f32 %v1399_v57, %v1400_v36  ;;  %v1687_v8 = vmax.f32 %v1685_v48, %v1686_v60  ;;  %v1389_v47 = vrot.slane %v1388_v51, 2 }
 0x1ec   :  { %v2342_v52 = vrot.slane %v2341_v16, 1  ;;  %v2328_v4 = vadd.f32 %v2327_v29, %v2326_v46  ;;  %v2628_v33 = vrot.slane %v2627_v1, 2  ;;  %v1675_v27 = vrot.slane %v1674_v32, 4 }
 0x1ed   :  { %v1822_v40 = vsub.f32 %v4687_v34, %v1401_v6  ;;  %v1823_v63 = vsub.f32 %v6115_v58, %v1401_v6  ;;  %v1688_v14 = vrot.slane %v1687_v8, 1  ;;  %v1390_v13 = vmax.f32 %v1388_v51, %v1389_v47 }
 0x1ee   :  { %v2343_v3 = vadd.f32 %v2342_v52, %v2341_v16  ;;  %v2329_v49 = vrot.slane %v2328_v4, 4  ;;  %v2629_v57 = vadd.f32 %v2628_v33, %v2627_v1  ;;  %v1676_v36 = vmax.f32 %v1674_v32, %v1675_v27 }
 0x1ef   :  { %v5357_v55 = vpop.eup %3681  ;;  %v1992_v2 = vmul.f32 1.442695, %v1822_v40  ;;  %v1994_v50 = vmul.f32 1.442695, %v1823_v63  ;;  %v1689_v58 = vmax.f32 %v1687_v8, %v1688_v14  ;;  %v1391_v51 = vrot.slane %v1390_v13, 1 }
 0x1f0   :  { %v5359_v48 = vpop.eup %3683  ;;  %3687 = vrcp.f32 %v2343_v3  ;;  %v2330_v46 = vadd.f32 %v2329_v49, %v2328_v4  ;;  %v2614_v34 = vsel %vm1203_vm2, %v5357_v55, 0.0  ;;  %v2630_v16 = vrot.slane %v2629_v57, 1 }
 0x1f1   :  { %v2615_v60 = vsel %vm1203_vm2, %v5359_v48, 0.0  ;;  %3689 = vpow2.f32 %v1992_v2  ;;  %v1886_v27 = vsub.f32 %v4690_v18, %v1689_v58  ;;  %v1887_v1 = vsub.f32 %v6116_v31, %v1689_v58  ;;  %v6127_v2 = vld [vmem:[#allocation11_spill] sm:$0xff] }
 0x1f2   :  { %v3686_v29 = vpop.eup %3685  ;;  %v2331_v6 = vrot.slane %v2330_v46, 2  ;;  %v2616_v33 = vadd.f32 %v2615_v60, %v2614_v34  ;;  %3691 = vpow2.f32 %v1994_v50  ;;  %v2631_v3 = vadd.f32 %v2630_v16, %v2629_v57  ;;  %v6128_v16 = vld [vmem:[#allocation12_spill] sm:$0xff] }
 0x1f3   :  { %v2885_v40 = vmul.f32 %v3686_v29, %v5240_v54  ;;  %v2886_v49 = vmul.f32 %v3686_v29, %v5244_v11  ;;  %v2120_v4 = vmul.f32 1.442695, %v1886_v27  ;;  %v1392_v8 = vmax.f32 %v1390_v13, %v1391_v51  ;;  %v6126_v11 = vld [vmem:[#allocation10_spill] sm:$0xff] }
 0x1f4   :  { %v2332_v32 = vadd.f32 %v2331_v6, %v2330_v46  ;;  %v2617_v52 = vrot.slane %v2616_v33, 4  ;;  %3693 = vrcp.f32 %v2631_v3  ;;  %v2122_v18 = vmul.f32 1.442695, %v1887_v1 }
 0x1f5   :  { %3028 = vst.msk [vmem:[%s5994_s2 + $0x300] sm:$0xff] %vm1203_vm2, %v2885_v40  ;;  %3029 = vst.msk [vmem:[%s5994_s2 + $0x308] sm:$0xff] %vm1203_vm2, %v2886_v49  ;;  %v1677_v54 = vrot.slane %v1676_v36, 2  ;;  %v1699_v31 = vsel %vm1203_vm2, %v6126_v11, -inf  ;;  %3695 = vpow2.f32 %v2120_v4  ;;  %v1820_v14 = vsub.f32 %v4700_v43, %v1392_v8 }
 0x1f6   :  { %v2333_v47 = vrot.slane %v2332_v32, 1  ;;  %v2618_v63 = vadd.f32 %v2617_v52, %v2616_v33  ;;  %3697 = vpow2.f32 %v2122_v18  ;;  %v1821_v13 = vsub.f32 %v6117_v42, %v1392_v8 }
 0x1f7   :  { %v1678_v57 = vmax.f32 %v1676_v36, %v1677_v54  ;;  %v1402_v50 = vsel %vm1203_vm2, %v6127_v2, -inf  ;;  %v1988_v58 = vmul.f32 1.442695, %v1820_v14  ;;  %v1690_v60 = vsel %vm1203_vm2, %v6128_v16, -inf }
 0x1f8   :  { %v2334_v46 = vadd.f32 %v2333_v47, %v2332_v32  ;;  %v2619_v34 = vrot.slane %v2618_v63, 2  ;;  %v1990_v51 = vmul.f32 1.442695, %v1821_v13  ;;  %v1412_v6 = vsel %vm1203_vm2, %v4847_v53, -inf }
 0x1f9   :  { %v1679_v29 = vrot.slane %v1678_v57, 1  ;;  %v1700_v43 = vsel %vm1203_vm2, %v4849_v21, -inf  ;;  %v1413_v36 = vmax.f32 %v5332_v10, %v1412_v6 }
 0x1fa   :  { %v3688_v33 = vpop.eup %3687  ;;  %3699 = vrcp.f32 %v2334_v46  ;;  %v2620_v42 = vadd.f32 %v2619_v34, %v2618_v63  ;;  %v1701_v27 = vmax.f32 %v1699_v31, %v1700_v43  ;;  %v1403_v63 = vsel %vm1203_vm2, %v4858_v7, -inf }
 0x1fb   :  { %v5390_v40 = vpop.eup %3689  ;;  %v2798_v49 = vmul.f32 %v3688_v33, %v5274_v35  ;;  %v2799_v3 = vmul.f32 %v3688_v33, %v5276_v38  ;;  %3701 = vpow2.f32 %v1988_v58  ;;  %v1680_v1 = vmax.f32 %v1678_v57, %v1679_v29 }
 0x1fc   :  { %v5394_v32 = vpop.eup %3691  ;;  %v2621_v52 = vrot.slane %v2620_v42, 1  ;;  %v2353_v4 = vsel %vm1203_vm2, %v5390_v40, 0.0  ;;  %3703 = vpow2.f32 %v1990_v51  ;;  %v1414_v8 = vrot.slane %v1413_v36, 4 }
 0x1fd   :  { %2970 = vst.msk [vmem:[%s5994_s2 + $0x130] sm:$0xff] %vm1203_vm2, %v2798_v49  ;;  %2971 = vst.msk [vmem:[%s5994_s2 + $0x138] sm:$0xff] %vm1203_vm2, %v2799_v3  ;;  %v2354_v35 = vsel %vm1203_vm2, %v5394_v32, 0.0  ;;  %v1884_v38 = vsub.f32 %v6114_v26, %v1680_v1  ;;  %v1885_v10 = vsub.f32 %v6124_v24, %v1680_v1  ;;  %v1702_v18 = vrot.slane %v1701_v27, 4 }
 0x1fe   :  { %v2622_v54 = vadd.f32 %v2621_v52, %v2620_v42  ;;  %v2355_v31 = vadd.f32 %v2354_v35, %v2353_v4  ;;  %v1415_v47 = vmax.f32 %v1413_v36, %v1414_v8  ;;  %v3694_v14 = vpop.eup %3693  ;;  %v1404_v34 = vmax.f32 %v1402_v50, %v1403_v63 }
 0x1ff   :  { %v2116_v13 = vmul.f32 1.442695, %v1884_v38  ;;  %v2118_v57 = vmul.f32 1.442695, %v1885_v10  ;;  %v1703_v46 = vmax.f32 %v1701_v27, %v1702_v18  ;;  %v5412_v58 = vpop.eup %3695  ;;  %v2894_v51 = vmul.f32 %v3694_v14, %v5296_v12 }
 0x200   :  { %v2895_v26 = vmul.f32 %v3694_v14, %v5312_v59  ;;  %3705 = vrcp.f32 %v2622_v54  ;;  %v2356_v24 = vrot.slane %v2355_v31, 4  ;;  %v5416_v29 = vpop.eup %3697  ;;  %v2641_v6 = vsel %vm1203_vm2, %v5412_v58, 0.0 }
 0x201   :  { %3707 = vpow2.f32 %v2116_v13  ;;  %v1416_v43 = vrot.slane %v1415_v47, 2  ;;  %v1704_v33 = vrot.slane %v1703_v46, 2  ;;  %3034 = vst.msk [vmem:[%s5994_s2 + $0x330] sm:$0xff] %vm1203_vm2, %v2894_v51  ;;  %v2642_v59 = vsel %vm1203_vm2, %v5416_v29, 0.0 }
 0x202   :  { %3035 = vst.msk [vmem:[%s5994_s2 + $0x338] sm:$0xff] %vm1203_vm2, %v2895_v26  ;;  %v2357_v12 = vadd.f32 %v2356_v24, %v2355_v31  ;;  %3709 = vpow2.f32 %v2118_v57  ;;  %v1405_v50 = vrot.slane %v1404_v34, 4  ;;  %v2643_v42 = vadd.f32 %v2642_v59, %v2641_v6 }
 0x203   :  { %v1417_v36 = vmax.f32 %v1415_v47, %v1416_v43  ;;  %v1705_v27 = vmax.f32 %v1703_v46, %v1704_v33  ;;  %v1691_v49 = vsel %vm1203_vm2, %v4886_v30, -inf  ;;  %v5434_v8 = vsel %vm1203_vm2, %v4923_v25, -inf }
 0x204   :  { %v3700_v3 = vpop.eup %3699  ;;  %v2358_v1 = vrot.slane %v2357_v12, 2  ;;  %v1406_v52 = vmax.f32 %v1404_v34, %v1405_v50  ;;  %v1692_v4 = vmax.f32 %v1690_v60, %v1691_v49  ;;  %v2644_v18 = vrot.slane %v2643_v42, 4 }
 0x205   :  { %v5436_v35 = vpop.eup %3701  ;;  %v2795_v38 = vmul.f32 %v3700_v3, %v5334_v45  ;;  %v2796_v10 = vmul.f32 %v3700_v3, %v5338_v15  ;;  %v1418_v54 = vrot.slane %v1417_v36, 1  ;;  %v1706_v14 = vrot.slane %v1705_v27, 1 }
 0x206   :  { %v5440_v31 = vpop.eup %3703  ;;  %v2359_v47 = vadd.f32 %v2358_v1, %v2357_v12  ;;  %v2344_v63 = vsel %vm1203_vm2, %v5436_v35, 0.0  ;;  %v1407_v60 = vrot.slane %v1406_v52, 2  ;;  %v2645_v45 = vadd.f32 %v2644_v18, %v2643_v42 }
 0x207   :  { %2968 = vst.msk [vmem:[%s5994_s2 + $0x120] sm:$0xff] %vm1203_vm2, %v2795_v38  ;;  %2969 = vst.msk [vmem:[%s5994_s2 + $0x128] sm:$0xff] %vm1203_vm2, %v2796_v10  ;;  %v2345_v15 = vsel %vm1203_vm2, %v5440_v31, 0.0  ;;  %v1419_v13 = vmax.f32 %v1417_v36, %v1418_v54  ;;  %v1693_v57 = vrot.slane %v1692_v4, 4  ;;  %v1707_v51 = vmax.f32 %v1705_v27, %v1706_v14 }
 0x208   :  { %v2360_v46 = vrot.slane %v2359_v47, 1  ;;  %v2346_v34 = vadd.f32 %v2345_v15, %v2344_v63  ;;  %v1408_v26 = vmax.f32 %v1406_v52, %v1407_v60  ;;  %v2646_v24 = vrot.slane %v2645_v45, 2 }
 0x209   :  { %v1826_v6 = vsub.f32 %v6125_v28, %v1419_v13  ;;  %v1827_v43 = vsub.f32 %v4847_v53, %v1419_v13  ;;  %v1694_v33 = vmax.f32 %v1692_v4, %v1693_v57  ;;  %v1890_v42 = vsub.f32 %v6126_v11, %v1707_v51 }
 0x20a   :  { %v3706_v12 = vpop.eup %3705  ;;  %v2361_v59 = vadd.f32 %v2360_v46, %v2359_v47  ;;  %v2347_v50 = vrot.slane %v2346_v34, 4  ;;  %v1891_v49 = vsub.f32 %v4849_v21, %v1707_v51  ;;  %v2647_v1 = vadd.f32 %v2646_v24, %v2645_v45  ;;  %v6129_v45 = vld [vmem:[#allocation13_spill] sm:$0xff]  ;;  %v6130_v46 = vld [vmem:[#allocation14_spill] sm:$0xff] }
 0x20b   :  { %v5458_v3 = vpop.eup %3707  ;;  %v2891_v36 = vmul.f32 %v3706_v12, %v5357_v55  ;;  %v2892_v27 = vmul.f32 %v3706_v12, %v5359_v48  ;;  %v2000_v52 = vmul.f32 1.442695, %v1826_v6  ;;  %v2002_v4 = vmul.f32 1.442695, %v1827_v43  ;;  %v6131_v6 = vld [vmem:[#allocation15_spill] sm:$0xff]  ;;  %v6132_v12 = vld [vmem:[#allocation16_spill] sm:$0xff] }
 0x20c   :  { %v5462_v38 = vpop.eup %3709  ;;  %3711 = vrcp.f32 %v2361_v59  ;;  %v2348_v53 = vadd.f32 %v2347_v50, %v2346_v34  ;;  %v2632_v28 = vsel %vm1203_vm2, %v5458_v3, 0.0  ;;  %v2648_v21 = vrot.slane %v2647_v1, 1 }
 0x20d   :  { %3032 = vst.msk [vmem:[%s5994_s2 + $0x320] sm:$0xff] %vm1203_vm2, %v2891_v36  ;;  %3033 = vst.msk [vmem:[%s5994_s2 + $0x328] sm:$0xff] %vm1203_vm2, %v2892_v27  ;;  %v2633_v55 = vsel %vm1203_vm2, %v5462_v38, 0.0  ;;  %3713 = vpow2.f32 %v2000_v52  ;;  %v2128_v48 = vmul.f32 1.442695, %v1890_v42  ;;  %v1409_v47 = vrot.slane %v1408_v26, 1 }
 0x20e   :  { %v2349_v11 = vrot.slane %v2348_v53, 2  ;;  %v2634_v10 = vadd.f32 %v2633_v55, %v2632_v28  ;;  %3715 = vpow2.f32 %v2002_v4  ;;  %v2130_v18 = vmul.f32 1.442695, %v1891_v49  ;;  %v6133_v27 = vld [vmem:[#allocation17_spill] sm:$0xff] }
 0x20f   :  { %v2649_v54 = vadd.f32 %v2648_v21, %v2647_v1  ;;  %3717 = vpow2.f32 %v2128_v48  ;;  %v1695_v63 = vrot.slane %v1694_v33, 2  ;;  %v1717_v15 = vsel %vm1203_vm2, %v6129_v45, -inf }
 0x210   :  { %v2350_v14 = vadd.f32 %v2349_v11, %v2348_v53  ;;  %v2635_v60 = vrot.slane %v2634_v10, 4  ;;  %3719 = vpow2.f32 %v2130_v18  ;;  %v1410_v13 = vmax.f32 %v1408_v26, %v1409_v47 }
 0x211   :  { %3721 = vrcp.f32 %v2649_v54  ;;  %v1696_v57 = vmax.f32 %v1694_v33, %v1695_v63  ;;  %v1420_v34 = vsel %vm1203_vm2, %v6130_v46, -inf  ;;  %v5482_v43 = vsel %vm1203_vm2, %v6131_v6, -inf }
 0x212   :  { %v2351_v51 = vrot.slane %v2350_v14, 1  ;;  %v2636_v24 = vadd.f32 %v2635_v60, %v2634_v10  ;;  %v1430_v59 = vsel %vm1203_vm2, %v6132_v12, -inf  ;;  %v1824_v50 = vsub.f32 %v6127_v2, %v1410_v13 }
 0x213   :  { %v1825_v42 = vsub.f32 %v4858_v7, %v1410_v13  ;;  %v1697_v49 = vrot.slane %v1696_v57, 1  ;;  %v1431_v26 = vmax.f32 %v5434_v8, %v1430_v59  ;;  %v1718_v1 = vsel %vm1203_vm2, %v6133_v27, -inf }
 0x214   :  { %v2352_v33 = vadd.f32 %v2351_v51, %v2350_v14  ;;  %v2637_v36 = vrot.slane %v2636_v24, 2  ;;  %v1421_v52 = vsel %vm1203_vm2, %v4987_v23, -inf  ;;  %v1996_v53 = vmul.f32 1.442695, %v1824_v50 }
 0x215   :  { %v1998_v28 = vmul.f32 1.442695, %v1825_v42  ;;  %v1698_v4 = vmax.f32 %v1696_v57, %v1697_v49  ;;  %v1432_v21 = vrot.slane %v1431_v26, 4  ;;  %v1719_v48 = vmax.f32 %v1717_v15, %v1718_v1 }
 0x216   :  { %v3712_v55 = vpop.eup %3711  ;;  %3723 = vrcp.f32 %v2352_v33  ;;  %v2638_v2 = vadd.f32 %v2637_v36, %v2636_v24  ;;  %v1422_v7 = vmax.f32 %v1420_v34, %v1421_v52 }
 0x217   :  { %v5493_v11 = vpop.eup %3713  ;;  %v2804_v8 = vmul.f32 %v3712_v55, %v5390_v40  ;;  %v2805_v10 = vmul.f32 %v3712_v55, %v5394_v32  ;;  %3725 = vpow2.f32 %v1996_v53  ;;  %v1888_v18 = vsub.f32 %v6128_v16, %v1698_v4 }
 0x218   :  { %v5498_v54 = vpop.eup %3715  ;;  %v2639_v47 = vrot.slane %v2638_v2, 1  ;;  %v2371_v63 = vsel %vm1203_vm2, %v5493_v11, 0.0  ;;  %3727 = vpow2.f32 %v1998_v28  ;;  %v1889_v14 = vsub.f32 %v4886_v30, %v1698_v4 }
 0x219   :  { %v5503_v60 = vpop.eup %3717  ;;  %2974 = vst.msk [vmem:[%s5994_s2 + $0x150] sm:$0xff] %vm1203_vm2, %v2804_v8  ;;  %2975 = vst.msk [vmem:[%s5994_s2 + $0x158] sm:$0xff] %vm1203_vm2, %v2805_v10  ;;  %v2372_v16 = vsel %vm1203_vm2, %v5498_v54, 0.0  ;;  %v2124_v40 = vmul.f32 1.442695, %v1888_v18  ;;  %v1433_v32 = vmax.f32 %v1431_v26, %v1432_v21  ;;  %v1720_v15 = vrot.slane %v1719_v48, 4 }
 0x21a   :  { %v5515_v13 = vpop.eup %3719  ;;  %v2640_v30 = vadd.f32 %v2639_v47, %v2638_v2  ;;  %v2373_v57 = vadd.f32 %v2372_v16, %v2371_v63  ;;  %v2659_v34 = vsel %vm1203_vm2, %v5503_v60, 0.0  ;;  %v2126_v51 = vmul.f32 1.442695, %v1889_v14 }
 0x21b   :  { %v3722_v24 = vpop.eup %3721  ;;  %v2660_v59 = vsel %vm1203_vm2, %v5515_v13, 0.0  ;;  %3729 = vpow2.f32 %v2124_v40  ;;  %v1434_v50 = vrot.slane %v1433_v32, 2  ;;  %v1721_v42 = vmax.f32 %v1719_v48, %v1720_v15 }
 0x21c   :  { %v2900_v49 = vmul.f32 %v3722_v24, %v5412_v58  ;;  %v2901_v26 = vmul.f32 %v3722_v24, %v5416_v29  ;;  %3731 = vrcp.f32 %v2640_v30  ;;  %v2374_v33 = vrot.slane %v2373_v57, 4 }
 0x21d   :  { %v2661_v36 = vadd.f32 %v2660_v59, %v2659_v34  ;;  %3733 = vpow2.f32 %v2126_v51  ;;  %v1435_v1 = vmax.f32 %v1433_v32, %v1434_v50  ;;  %v1722_v52 = vrot.slane %v1721_v42, 2 }
 0x21e   :  { %3038 = vst.msk [vmem:[%s5994_s2 + $0x350] sm:$0xff] %vm1203_vm2, %v2900_v49  ;;  %3039 = vst.msk [vmem:[%s5994_s2 + $0x358] sm:$0xff] %vm1203_vm2, %v2901_v26  ;;  %v2375_v53 = vadd.f32 %v2374_v33, %v2373_v57  ;;  %v1423_v58 = vrot.slane %v1422_v7, 4  ;;  %v1709_v29 = vsel %vm1203_vm2, %v5007_v9, -inf  ;;  %v5535_v28 = vsel %vm1203_vm2, %v5042_v39, -inf }
 0x21f   :  { %v2662_v4 = vrot.slane %v2661_v36, 4  ;;  %v1436_v21 = vrot.slane %v1435_v1, 1  ;;  %v1723_v55 = vmax.f32 %v1721_v42, %v1722_v52  ;;  %v1710_v2 = vmax.f32 %v5482_v43, %v1709_v29 }
 0x220   :  { %v3724_v48 = vpop.eup %3723  ;;  %v2376_v8 = vrot.slane %v2375_v53, 2  ;;  %v1424_v10 = vmax.f32 %v1422_v7, %v1423_v58  ;;  %v5540_v18 = vsel %vm1203_vm2, %v5044_v5, -inf  ;;  %v5544_v47 = vsel %vm1203_vm2, %v5050_v0, -inf }
 0x221   :  { %v5546_v63 = vpop.eup %3725  ;;  %v2801_v14 = vmul.f32 %v3724_v48, %v5436_v35  ;;  %v2802_v16 = vmul.f32 %v3724_v48, %v5440_v31  ;;  %v2663_v40 = vadd.f32 %v2662_v4, %v2661_v36  ;;  %v1437_v32 = vmax.f32 %v1435_v1, %v1436_v21 }
 0x222   :  { %v5550_v43 = vpop.eup %3727  ;;  %v2377_v15 = vadd.f32 %v2376_v8, %v2375_v53  ;;  %v2362_v7 = vsel %vm1203_vm2, %v5546_v63, 0.0  ;;  %v1724_v30 = vrot.slane %v1723_v55, 1  ;;  %v1425_v57 = vrot.slane %v1424_v10, 2 }
 0x223   :  { %2972 = vst.msk [vmem:[%s5994_s2 + $0x140] sm:$0xff] %vm1203_vm2, %v2801_v14  ;;  %2973 = vst.msk [vmem:[%s5994_s2 + $0x148] sm:$0xff] %vm1203_vm2, %v2802_v16  ;;  %v2664_v35 = vrot.slane %v2663_v40, 2  ;;  %v2363_v31 = vsel %vm1203_vm2, %v5550_v43, 0.0  ;;  %v1830_v34 = vsub.f32 %v4923_v25, %v1437_v32  ;;  %v1831_v51 = vsub.f32 %v6132_v12, %v1437_v32 }
 0x224   :  { %v2378_v24 = vrot.slane %v2377_v15, 1  ;;  %v2364_v59 = vadd.f32 %v2363_v31, %v2362_v7  ;;  %v1725_v50 = vmax.f32 %v1723_v55, %v1724_v30  ;;  %v1426_v42 = vmax.f32 %v1424_v10, %v1425_v57 }
 0x225   :  { %v5566_v49 = vpop.eup %3729  ;;  %v2665_v26 = vadd.f32 %v2664_v35, %v2663_v40  ;;  %v2008_v33 = vmul.f32 1.442695, %v1830_v34  ;;  %v2010_v36 = vmul.f32 1.442695, %v1831_v51  ;;  %v1711_v1 = vrot.slane %v1710_v2, 4 }
 0x226   :  { %v3732_v52 = vpop.eup %3731  ;;  %v2379_v53 = vadd.f32 %v2378_v24, %v2377_v15  ;;  %v2365_v58 = vrot.slane %v2364_v59, 4  ;;  %v2650_v29 = vsel %vm1203_vm2, %v5566_v49, 0.0  ;;  %v1894_v25 = vsub.f32 %v6129_v45, %v1725_v50 }
 0x227   :  { %v5571_v4 = vpop.eup %3733  ;;  %v2897_v12 = vmul.f32 %v3732_v52, %v5458_v3  ;;  %v2898_v21 = vmul.f32 %v3732_v52, %v5462_v38  ;;  %v2666_v55 = vrot.slane %v2665_v26, 1  ;;  %3735 = vpow2.f32 %v2008_v33 }
 0x228   :  { %3737 = vrcp.f32 %v2379_v53  ;;  %v2366_v48 = vadd.f32 %v2365_v58, %v2364_v59  ;;  %v2651_v8 = vsel %vm1203_vm2, %v5571_v4, 0.0  ;;  %v1895_v10 = vsub.f32 %v6133_v27, %v1725_v50 }
 0x229   :  { %3036 = vst.msk [vmem:[%s5994_s2 + $0x340] sm:$0xff] %vm1203_vm2, %v2897_v12  ;;  %3037 = vst.msk [vmem:[%s5994_s2 + $0x348] sm:$0xff] %vm1203_vm2, %v2898_v21  ;;  %v2667_v3 = vadd.f32 %v2666_v55, %v2665_v26  ;;  %v2652_v38 = vadd.f32 %v2651_v8, %v2650_v29  ;;  %3739 = vpow2.f32 %v2010_v36  ;;  %v2136_v45 = vmul.f32 1.442695, %v1894_v25 }
 0x22a   :  { %v2367_v14 = vrot.slane %v2366_v48, 2  ;;  %v2138_v16 = vmul.f32 1.442695, %v1895_v10  ;;  %v1427_v40 = vrot.slane %v1426_v42, 1  ;;  %v1712_v32 = vmax.f32 %v1710_v2, %v1711_v1 }
 0x22b   :  { %3741 = vrcp.f32 %v2667_v3  ;;  %v2653_v27 = vrot.slane %v2652_v38, 4  ;;  %v5588_v15 = vsel %vm1203_vm2, %v5052_v41, -inf  ;;  %v1448_v7 = vsel %vm1203_vm2, %v5060_v20, -inf }
 0x22c   :  { %v2368_v30 = vadd.f32 %v2367_v14, %v2366_v48  ;;  %3743 = vpow2.f32 %v2136_v45  ;;  %v1428_v57 = vmax.f32 %v1426_v42, %v1427_v40  ;;  %v1713_v35 = vrot.slane %v1712_v32, 2 }
 0x22d   :  { %v2654_v31 = vadd.f32 %v2653_v27, %v2652_v38  ;;  %3745 = vpow2.f32 %v2138_v16  ;;  %v1449_v34 = vmax.f32 %v5535_v28, %v1448_v7  ;;  %v1736_v2 = vsel %vm1203_vm2, %v5080_v19, -inf }
 0x22e   :  { %v2369_v51 = vrot.slane %v2368_v30, 1  ;;  %v1828_v24 = vsub.f32 %v6130_v46, %v1428_v57  ;;  %v1829_v59 = vsub.f32 %v4987_v23, %v1428_v57  ;;  %v1714_v50 = vmax.f32 %v1712_v32, %v1713_v35 }
 0x22f   :  { %v2655_v26 = vrot.slane %v2654_v31, 2  ;;  %v1450_v33 = vrot.slane %v1449_v34, 4  ;;  %v1737_v36 = vmax.f32 %v5540_v18, %v1736_v2  ;;  %v1439_v42 = vsel %vm1203_vm2, %v5094_v61, -inf }
 0x230   :  { %v2370_v1 = vadd.f32 %v2369_v51, %v2368_v30  ;;  %v2004_v52 = vmul.f32 1.442695, %v1828_v24  ;;  %v2006_v53 = vmul.f32 1.442695, %v1829_v59  ;;  %v1715_v28 = vrot.slane %v1714_v50, 1 }
 0x231   :  { %v5600_v58 = vpop.eup %3735  ;;  %v2656_v29 = vadd.f32 %v2655_v26, %v2654_v31  ;;  %v1451_v25 = vmax.f32 %v1449_v34, %v1450_v33  ;;  %v1738_v12 = vrot.slane %v1737_v36, 4  ;;  %v1440_v46 = vmax.f32 %v5544_v47, %v1439_v42 }
 0x232   :  { %v3738_v23 = vpop.eup %3737  ;;  %3747 = vrcp.f32 %v2370_v1  ;;  %v2389_v21 = vsel %vm1203_vm2, %v5600_v58, 0.0  ;;  %v1716_v18 = vmax.f32 %v1714_v50, %v1715_v28  ;;  %v1727_v55 = vsel %vm1203_vm2, %v5125_v56, -inf }
 0x233   :  { %v5607_v48 = vpop.eup %3739  ;;  %v2810_v8 = vmul.f32 %v3738_v23, %v5493_v11  ;;  %v2811_v10 = vmul.f32 %v3738_v23, %v5498_v54  ;;  %v2657_v3 = vrot.slane %v2656_v29, 1  ;;  %3749 = vpow2.f32 %v2004_v52  ;;  %v6134_v52 = vld [vmem:[#allocation18_spill] sm:$0xff]  ;;  %v6135_v23 = vld [vmem:[#allocation19_spill] sm:$0xff] }
 0x234   :  { %v2390_v47 = vsel %vm1203_vm2, %v5607_v48, 0.0  ;;  %3751 = vpow2.f32 %v2006_v53  ;;  %v1892_v38 = vsub.f32 %v6131_v6, %v1716_v18  ;;  %v1893_v45 = vsub.f32 %v5007_v9, %v1716_v18 }
 0x235   :  { %v3742_v14 = vpop.eup %3741  ;;  %2978 = vst.msk [vmem:[%s5994_s2 + $0x170] sm:$0xff] %vm1203_vm2, %v2810_v8  ;;  %2979 = vst.msk [vmem:[%s5994_s2 + $0x178] sm:$0xff] %vm1203_vm2, %v2811_v10  ;;  %v2658_v11 = vadd.f32 %v2657_v3, %v2656_v29  ;;  %v2391_v54 = vadd.f32 %v2390_v47, %v2389_v21  ;;  %v1452_v16 = vrot.slane %v1451_v25, 2  ;;  %v1739_v40 = vmax.f32 %v1737_v36, %v1738_v12 }
 0x236   :  { %v5623_v32 = vpop.eup %3743  ;;  %v2906_v6 = vmul.f32 %v3742_v14, %v5503_v60  ;;  %v2907_v9 = vmul.f32 %v3742_v14, %v5515_v13  ;;  %v2132_v27 = vmul.f32 1.442695, %v1892_v38  ;;  %v2134_v7 = vmul.f32 1.442695, %v1893_v45 }
 0x237   :  { %v5627_v30 = vpop.eup %3745  ;;  %3753 = vrcp.f32 %v2658_v11  ;;  %v2392_v57 = vrot.slane %v2391_v54, 4  ;;  %v2677_v35 = vsel %vm1203_vm2, %v5623_v32, 0.0  ;;  %v1453_v31 = vmax.f32 %v1451_v25, %v1452_v16 }
 0x238   :  { %3042 = vst.msk [vmem:[%s5994_s2 + $0x370] sm:$0xff] %vm1203_vm2, %v2906_v6  ;;  %3043 = vst.msk [vmem:[%s5994_s2 + $0x378] sm:$0xff] %vm1203_vm2, %v2907_v9  ;;  %v2678_v60 = vsel %vm1203_vm2, %v5627_v30, 0.0  ;;  %3755 = vpow2.f32 %v2132_v27  ;;  %v1740_v13 = vrot.slane %v1739_v40, 2  ;;  %v1441_v34 = vrot.slane %v1440_v46, 4 }
 0x239   :  { %v2393_v2 = vadd.f32 %v2392_v57, %v2391_v54  ;;  %v2679_v51 = vadd.f32 %v2678_v60, %v2677_v35  ;;  %3757 = vpow2.f32 %v2134_v7  ;;  %v1454_v24 = vrot.slane %v1453_v31, 1 }
 0x23a   :  { %v1741_v59 = vmax.f32 %v1739_v40, %v1740_v13  ;;  %v1442_v50 = vmax.f32 %v1440_v46, %v1441_v34  ;;  %v1728_v26 = vmax.f32 %v5588_v15, %v1727_v55  ;;  %v5644_v33 = vsel %vm1203_vm2, %v5171_v44, -inf }
 0x23b   :  { %v2394_v36 = vrot.slane %v2393_v2, 2  ;;  %v2680_v42 = vrot.slane %v2679_v51, 4  ;;  %v1455_v1 = vmax.f32 %v1453_v31, %v1454_v24  ;;  %v5648_v53 = vsel %vm1203_vm2, %v6134_v52, -inf }
 0x23c   :  { %v3748_v28 = vpop.eup %3747  ;;  %v1742_v29 = vrot.slane %v1741_v59, 1  ;;  %v1443_v25 = vrot.slane %v1442_v50, 2  ;;  %v1729_v12 = vrot.slane %v1728_v26, 4  ;;  %v5652_v46 = vsel %vm1203_vm2, %v6135_v23, -inf }
 0x23d   :  { %v5654_v15 = vpop.eup %3749  ;;  %v2807_v21 = vmul.f32 %v3748_v28, %v5546_v63  ;;  %v2808_v18 = vmul.f32 %v3748_v28, %v5550_v43  ;;  %v2395_v55 = vadd.f32 %v2394_v36, %v2393_v2  ;;  %v2681_v8 = vadd.f32 %v2680_v42, %v2679_v51  ;;  %v6136_v42 = vld [vmem:[#allocation20_spill] sm:$0xff] }
 0x23e   :  { %v5658_v10 = vpop.eup %3751  ;;  %v2380_v3 = vsel %vm1203_vm2, %v5654_v15, 0.0  ;;  %v1834_v47 = vsub.f32 %v5042_v39, %v1455_v1  ;;  %v1835_v38 = vsub.f32 %v5060_v20, %v1455_v1  ;;  %v1743_v45 = vmax.f32 %v1741_v59, %v1742_v29 }
 0x23f   :  { %2976 = vst.msk [vmem:[%s5994_s2 + $0x160] sm:$0xff] %vm1203_vm2, %v2807_v21  ;;  %2977 = vst.msk [vmem:[%s5994_s2 + $0x168] sm:$0xff] %vm1203_vm2, %v2808_v18  ;;  %v2396_v63 = vrot.slane %v2395_v55, 1  ;;  %v2682_v43 = vrot.slane %v2681_v8, 2  ;;  %v2381_v14 = vsel %vm1203_vm2, %v5658_v10, 0.0  ;;  %v1444_v11 = vmax.f32 %v1442_v50, %v1443_v25 }
 0x240   :  { %v2382_v39 = vadd.f32 %v2381_v14, %v2380_v3  ;;  %v2016_v54 = vmul.f32 1.442695, %v1834_v47  ;;  %v2018_v20 = vmul.f32 1.442695, %v1835_v38  ;;  %v1898_v16 = vsub.f32 %v5044_v5, %v1743_v45  ;;  %v6138_v3 = vld [vmem:[#allocation22_spill] sm:$0xff] }
 0x241   :  { %v3754_v40 = vpop.eup %3753  ;;  %v2397_v6 = vadd.f32 %v2396_v63, %v2395_v55  ;;  %v2683_v9 = vadd.f32 %v2682_v43, %v2681_v8  ;;  %v1899_v27 = vsub.f32 %v5080_v19, %v1743_v45  ;;  %v1445_v7 = vrot.slane %v1444_v11, 1  ;;  %v6137_v55 = vld [vmem:[#allocation21_spill] sm:$0xff] }
 0x242   :  { %v5676_v57 = vpop.eup %3755  ;;  %v2903_v35 = vmul.f32 %v3754_v40, %v5566_v49  ;;  %v2904_v31 = vmul.f32 %v3754_v40, %v5571_v4  ;;  %v2383_v60 = vrot.slane %v2382_v39, 4  ;;  %3759 = vpow2.f32 %v2016_v54 }
 0x243   :  { %v5680_v13 = vpop.eup %3757  ;;  %3761 = vrcp.f32 %v2397_v6  ;;  %v2684_v34 = vrot.slane %v2683_v9, 1  ;;  %v2668_v5 = vsel %vm1203_vm2, %v5676_v57, 0.0  ;;  %v2144_v2 = vmul.f32 1.442695, %v1898_v16 }
 0x244   :  { %3040 = vst.msk [vmem:[%s5994_s2 + $0x360] sm:$0xff] %vm1203_vm2, %v2903_v35  ;;  %3041 = vst.msk [vmem:[%s5994_s2 + $0x368] sm:$0xff] %vm1203_vm2, %v2904_v31  ;;  %v2384_v19 = vadd.f32 %v2383_v60, %v2382_v39  ;;  %v2669_v49 = vsel %vm1203_vm2, %v5680_v13, 0.0  ;;  %3763 = vpow2.f32 %v2018_v20  ;;  %v2146_v4 = vmul.f32 1.442695, %v1899_v27 }
 0x245   :  { %v2685_v51 = vadd.f32 %v2684_v34, %v2683_v9  ;;  %v2670_v24 = vadd.f32 %v2669_v49, %v2668_v5  ;;  %3765 = vpow2.f32 %v2144_v2  ;;  %v1446_v59 = vmax.f32 %v1444_v11, %v1445_v7 }
 0x246   :  { %v2385_v50 = vrot.slane %v2384_v19, 2  ;;  %3767 = vpow2.f32 %v2146_v4  ;;  %v1730_v36 = vmax.f32 %v1728_v26, %v1729_v12  ;;  %v5696_v1 = vsel %vm1203_vm2, %v6136_v42, -inf }
 0x247   :  { %3769 = vrcp.f32 %v2685_v51  ;;  %v2671_v28 = vrot.slane %v2670_v24, 4  ;;  %v1832_v29 = vsub.f32 %v5050_v0, %v1446_v59  ;;  %v1833_v25 = vsub.f32 %v5094_v61, %v1446_v59 }
 0x248   :  { %v2386_v21 = vadd.f32 %v2385_v50, %v2384_v19  ;;  %v1731_v18 = vrot.slane %v1730_v36, 2  ;;  %v1466_v8 = vsel %vm1203_vm2, %v6137_v55, -inf  ;;  %v1754_v47 = vsel %vm1203_vm2, %v6138_v3, -inf }
 0x249   :  { %v2672_v38 = vadd.f32 %v2671_v28, %v2670_v24  ;;  %v2012_v26 = vmul.f32 1.442695, %v1832_v29  ;;  %v2014_v12 = vmul.f32 1.442695, %v1833_v25  ;;  %v1467_v45 = vmax.f32 %v5644_v33, %v1466_v8 }
 0x24a   :  { %v2387_v63 = vrot.slane %v2386_v21, 1  ;;  %v1732_v43 = vmax.f32 %v1730_v36, %v1731_v18  ;;  %v1755_v14 = vmax.f32 %v5648_v53, %v1754_v47  ;;  %v1457_v0 = vsel %vm1203_vm2, %v5222_v62, -inf }
 0x24b   :  { %v2673_v61 = vrot.slane %v2672_v38, 2  ;;  %3771 = vpow2.f32 %v2012_v26  ;;  %v1468_v11 = vrot.slane %v1467_v45, 4  ;;  %v1458_v39 = vmax.f32 %v5652_v46, %v1457_v0 }
 0x24c   :  { %v5709_v54 = vpop.eup %3759  ;;  %v2388_v20 = vadd.f32 %v2387_v63, %v2386_v21  ;;  %3773 = vpow2.f32 %v2014_v12  ;;  %v1733_v16 = vrot.slane %v1732_v43, 1  ;;  %v1756_v40 = vrot.slane %v1755_v14, 4 }
 0x24d   :  { %v3762_v6 = vpop.eup %3761  ;;  %v2674_v33 = vadd.f32 %v2673_v61, %v2672_v38  ;;  %v2407_v9 = vsel %vm1203_vm2, %v5709_v54, 0.0  ;;  %v1469_v53 = vmax.f32 %v1467_v45, %v1468_v11  ;;  %v1459_v27 = vrot.slane %v1458_v39, 4 }
 0x24e   :  { %v5713_v7 = vpop.eup %3763  ;;  %v2816_v35 = vmul.f32 %v3762_v6, %v5600_v58  ;;  %v2817_v31 = vmul.f32 %v3762_v6, %v5607_v48  ;;  %3775 = vrcp.f32 %v2388_v20  ;;  %v1734_v46 = vmax.f32 %v1732_v43, %v1733_v16 }
 0x24f   :  { %v5717_v60 = vpop.eup %3765  ;;  %v2675_v34 = vrot.slane %v2674_v33, 1  ;;  %v2408_v5 = vsel %vm1203_vm2, %v5713_v7, 0.0  ;;  %v1470_v2 = vrot.slane %v1469_v53, 2  ;;  %v1757_v19 = vmax.f32 %v1755_v14, %v1756_v40 }
 0x250   :  { %v5721_v49 = vpop.eup %3767  ;;  %2982 = vst.msk [vmem:[%s5994_s2 + $0x190] sm:$0xff] %vm1203_vm2, %v2816_v35  ;;  %2983 = vst.msk [vmem:[%s5994_s2 + $0x198] sm:$0xff] %vm1203_vm2, %v2817_v31  ;;  %v2409_v58 = vadd.f32 %v2408_v5, %v2407_v9  ;;  %v2695_v48 = vsel %vm1203_vm2, %v5717_v60, 0.0  ;;  %v1896_v4 = vsub.f32 %v5052_v41, %v1734_v46  ;;  %v1897_v51 = vsub.f32 %v5125_v56, %v1734_v46 }
 0x251   :  { %v3770_v24 = vpop.eup %3769  ;;  %v2676_v59 = vadd.f32 %v2675_v34, %v2674_v33  ;;  %v2696_v50 = vsel %vm1203_vm2, %v5721_v49, 0.0  ;;  %v1471_v36 = vmax.f32 %v1469_v53, %v1470_v2  ;;  %v1758_v28 = vrot.slane %v1757_v19, 2 }
 0x252   :  { %v2912_v29 = vmul.f32 %v3770_v24, %v5623_v32  ;;  %v2913_v25 = vmul.f32 %v3770_v24, %v5627_v30  ;;  %v2410_v21 = vrot.slane %v2409_v58, 4  ;;  %v2697_v18 = vadd.f32 %v2696_v50, %v2695_v48 }
 0x253   :  { %3777 = vrcp.f32 %v2676_v59  ;;  %v2140_v8 = vmul.f32 1.442695, %v1896_v4  ;;  %v2142_v47 = vmul.f32 1.442695, %v1897_v51  ;;  %v1472_v38 = vrot.slane %v1471_v36, 1 }
 0x254   :  { %3046 = vst.msk [vmem:[%s5994_s2 + $0x390] sm:$0xff] %vm1203_vm2, %v2912_v29  ;;  %3047 = vst.msk [vmem:[%s5994_s2 + $0x398] sm:$0xff] %vm1203_vm2, %v2913_v25  ;;  %v2411_v41 = vadd.f32 %v2410_v21, %v2409_v58  ;;  %v2698_v56 = vrot.slane %v2697_v18, 4  ;;  %v1759_v32 = vmax.f32 %v1757_v19, %v1758_v28  ;;  %v1460_v30 = vmax.f32 %v1458_v39, %v1459_v27 }
 0x255   :  { %v5747_v26 = vpop.eup %3771  ;;  %3779 = vpow2.f32 %v2140_v8  ;;  %v1473_v12 = vmax.f32 %v1471_v36, %v1472_v38  ;;  %v1745_v45 = vsel %vm1203_vm2, %v5228_v37, -inf  ;;  %v5753_v63 = vsel %vm1203_vm2, %v5282_v22, -inf }
 0x256   :  { %v5755_v43 = vpop.eup %3773  ;;  %v2412_v14 = vrot.slane %v2411_v41, 2  ;;  %v2699_v0 = vadd.f32 %v2698_v56, %v2697_v18  ;;  %v2398_v61 = vsel %vm1203_vm2, %v5747_v26, 0.0  ;;  %3781 = vpow2.f32 %v2142_v47 }
 0x257   :  { %v2399_v11 = vsel %vm1203_vm2, %v5755_v43, 0.0  ;;  %v1838_v39 = vsub.f32 %v5171_v44, %v1473_v12  ;;  %v1839_v20 = vsub.f32 %v6137_v55, %v1473_v12  ;;  %v1760_v16 = vrot.slane %v1759_v32, 1 }
 0x258   :  { %v3776_v40 = vpop.eup %3775  ;;  %v2413_v6 = vadd.f32 %v2412_v14, %v2411_v41  ;;  %v2700_v33 = vrot.slane %v2699_v0, 2  ;;  %v2400_v9 = vadd.f32 %v2399_v11, %v2398_v61  ;;  %v1461_v53 = vrot.slane %v1460_v30, 2  ;;  %v6141_v61 = vld [vmem:[#allocation2_spill] sm:$0xff] }
 0x259   :  { %v2813_v27 = vmul.f32 %v3776_v40, %v5654_v15  ;;  %v2814_v35 = vmul.f32 %v3776_v40, %v5658_v10  ;;  %v2024_v31 = vmul.f32 1.442695, %v1838_v39  ;;  %v2026_v46 = vmul.f32 1.442695, %v1839_v20  ;;  %v6139_v10 = vld [vmem:[#allocation23_spill] sm:$0xff] }
 0x25a   :  { %v2414_v34 = vrot.slane %v2413_v6, 1  ;;  %v2701_v5 = vadd.f32 %v2700_v33, %v2699_v0  ;;  %v2401_v2 = vrot.slane %v2400_v9, 4  ;;  %v1761_v19 = vmax.f32 %v1759_v32, %v1760_v16  ;;  %v6142_v39 = vld [vmem:[#allocation3_spill] sm:$0xff] }
 0x25b   :  { %2980 = vst.msk [vmem:[%s5994_s2 + $0x180] sm:$0xff] %vm1203_vm2, %v2813_v27  ;;  %2981 = vst.msk [vmem:[%s5994_s2 + $0x188] sm:$0xff] %vm1203_vm2, %v2814_v35  ;;  %3783 = vpow2.f32 %v2024_v31  ;;  %v1462_v44 = vmax.f32 %v1460_v30, %v1461_v53  ;;  %v1746_v15 = vmax.f32 %v5696_v1, %v1745_v45  ;;  %v1771_v55 = vsel %vm1203_vm2, %v6139_v10, -inf  ;;  %v6144_v27 = vld [vmem:[#allocation5_spill] sm:$0xff] }
 0x25c   :  { %v2415_v58 = vadd.f32 %v2414_v34, %v2413_v6  ;;  %v2702_v48 = vrot.slane %v2701_v5, 1  ;;  %v2402_v4 = vadd.f32 %v2401_v2, %v2400_v9  ;;  %3785 = vpow2.f32 %v2026_v46 }
 0x25d   :  { %v3778_v51 = vpop.eup %3777  ;;  %v1902_v24 = vsub.f32 %v6134_v52, %v1761_v19  ;;  %v1903_v59 = vsub.f32 %v6138_v3, %v1761_v19  ;;  %v1463_v50 = vrot.slane %v1462_v44, 1  ;;  %v1747_v36 = vrot.slane %v1746_v15, 4 }
 0x25e   :  { %v2909_v28 = vmul.f32 %v3778_v51, %v5676_v57  ;;  %v2910_v29 = vmul.f32 %v3778_v51, %v5680_v13  ;;  %3787 = vrcp.f32 %v2415_v58  ;;  %v2703_v1 = vadd.f32 %v2702_v48, %v2701_v5  ;;  %v6140_v13 = vld [vmem:[#allocation24_spill] sm:$0xff] }
 0x25f   :  { %v5780_v25 = vpop.eup %3779  ;;  %v2403_v21 = vrot.slane %v2402_v4, 2  ;;  %v2152_v18 = vmul.f32 1.442695, %v1902_v24  ;;  %v2154_v8 = vmul.f32 1.442695, %v1903_v59  ;;  %v1464_v47 = vmax.f32 %v1462_v44, %v1463_v50 }
 0x260   :  { %v5782_v38 = vpop.eup %3781  ;;  %3044 = vst.msk [vmem:[%s5994_s2 + $0x380] sm:$0xff] %vm1203_vm2, %v2909_v28  ;;  %3045 = vst.msk [vmem:[%s5994_s2 + $0x388] sm:$0xff] %vm1203_vm2, %v2910_v29  ;;  %3789 = vrcp.f32 %v2703_v1  ;;  %v2686_v52 = vsel %vm1203_vm2, %v5780_v25, 0.0  ;;  %v1748_v57 = vmax.f32 %v1746_v15, %v1747_v36  ;;  %v1474_v3 = vsel %vm1203_vm2, %v6140_v13, -inf }
 0x261   :  { %v2404_v41 = vadd.f32 %v2403_v21, %v2402_v4  ;;  %v2687_v56 = vsel %vm1203_vm2, %v5782_v38, 0.0  ;;  %3791 = vpow2.f32 %v2152_v18  ;;  %v1836_v32 = vsub.f32 %v6135_v23, %v1464_v47 }
 0x262   :  { %v2688_v30 = vadd.f32 %v2687_v56, %v2686_v52  ;;  %3793 = vpow2.f32 %v2154_v8  ;;  %v1837_v12 = vsub.f32 %v5222_v62, %v1464_v47  ;;  %v1749_v45 = vrot.slane %v1748_v57, 2  ;;  %v6143_v62 = vld [vmem:[#allocation4_spill] sm:$0xff] }
 0x263   :  { %v2405_v14 = vrot.slane %v2404_v41, 1  ;;  %v2020_v0 = vmul.f32 1.442695, %v1836_v32  ;;  %v5802_v11 = vsel %vm1203_vm2, %v6141_v61, -inf  ;;  %v1484_v20 = vsel %vm1203_vm2, %v6142_v39, -inf }
 0x264   :  { %v2689_v16 = vrot.slane %v2688_v30, 4  ;;  %v2022_v40 = vmul.f32 1.442695, %v1837_v12  ;;  %v1750_v6 = vmax.f32 %v1748_v57, %v1749_v45  ;;  %v1485_v33 = vmax.f32 %v5753_v63, %v1484_v20 }
 0x265   :  { %v5807_v23 = vpop.eup %3783  ;;  %v2406_v9 = vadd.f32 %v2405_v14, %v2404_v41  ;;  %3795 = vpow2.f32 %v2020_v0  ;;  %v1772_v53 = vsel %vm1203_vm2, %v6143_v62, -inf  ;;  %v1475_v35 = vsel %vm1203_vm2, %v6144_v27, -inf }
 0x266   :  { %v5813_v31 = vpop.eup %3785  ;;  %v2690_v46 = vadd.f32 %v2689_v16, %v2688_v30  ;;  %v2425_v34 = vsel %vm1203_vm2, %v5807_v23, 0.0  ;;  %3797 = vpow2.f32 %v2022_v40  ;;  %v1751_v5 = vrot.slane %v1750_v6, 1 }
 0x267   :  { %3799 = vrcp.f32 %v2406_v9  ;;  %v2426_v63 = vsel %vm1203_vm2, %v5813_v31, 0.0  ;;  %v1486_v2 = vrot.slane %v1485_v33, 4  ;;  %v1773_v19 = vmax.f32 %v1771_v55, %v1772_v53 }
 0x268   :  { %v3788_v44 = vpop.eup %3787  ;;  %v2691_v15 = vrot.slane %v2690_v46, 2  ;;  %v2427_v58 = vadd.f32 %v2426_v63, %v2425_v34  ;;  %v1752_v48 = vmax.f32 %v1750_v6, %v1751_v5  ;;  %v1476_v4 = vmax.f32 %v1474_v3, %v1475_v35 }
 0x269   :  { %v2822_v51 = vmul.f32 %v3788_v44, %v5709_v54  ;;  %v2823_v24 = vmul.f32 %v3788_v44, %v5713_v7  ;;  %v1487_v59 = vmax.f32 %v1485_v33, %v1486_v2  ;;  %v1774_v50 = vrot.slane %v1773_v19, 4 }
 0x26a   :  { %v3790_v36 = vpop.eup %3789  ;;  %v2692_v28 = vadd.f32 %v2691_v15, %v2690_v46  ;;  %v2428_v29 = vrot.slane %v2427_v58, 4  ;;  %v1900_v1 = vsub.f32 %v6136_v42, %v1752_v48  ;;  %v1901_v21 = vsub.f32 %v5228_v37, %v1752_v48 }
 0x26b   :  { %v5823_v18 = vpop.eup %3791  ;;  %2986 = vst.msk [vmem:[%s5994_s2 + $0x1b0] sm:$0xff] %vm1203_vm2, %v2822_v51  ;;  %2987 = vst.msk [vmem:[%s5994_s2 + $0x1b8] sm:$0xff] %vm1203_vm2, %v2823_v24  ;;  %v2918_v54 = vmul.f32 %v3790_v36, %v5717_v60  ;;  %v2919_v7 = vmul.f32 %v3790_v36, %v5721_v49  ;;  %v1488_v55 = vrot.slane %v1487_v59, 2  ;;  %v1775_v42 = vmax.f32 %v1773_v19, %v1774_v50 }
 0x26c   :  { %v5835_v8 = vpop.eup %3793  ;;  %v2693_v37 = vrot.slane %v2692_v28, 1  ;;  %v2429_v47 = vadd.f32 %v2428_v29, %v2427_v58  ;;  %v2713_v52 = vsel %vm1203_vm2, %v5823_v18, 0.0  ;;  %v2148_v57 = vmul.f32 1.442695, %v1900_v1 }
 0x26d   :  { %3050 = vst.msk [vmem:[%s5994_s2 + $0x3b0] sm:$0xff] %vm1203_vm2, %v2918_v54  ;;  %3051 = vst.msk [vmem:[%s5994_s2 + $0x3b8] sm:$0xff] %vm1203_vm2, %v2919_v7  ;;  %v2714_v60 = vsel %vm1203_vm2, %v5835_v8, 0.0  ;;  %v2150_v49 = vmul.f32 1.442695, %v1901_v21  ;;  %v1489_v3 = vmax.f32 %v1487_v59, %v1488_v55  ;;  %v1776_v41 = vrot.slane %v1775_v42, 2 }
 0x26e   :  { %v2694_v56 = vadd.f32 %v2693_v37, %v2692_v28  ;;  %v2430_v32 = vrot.slane %v2429_v47, 2  ;;  %v2715_v30 = vadd.f32 %v2714_v60, %v2713_v52  ;;  %3801 = vpow2.f32 %v2148_v57 }
 0x26f   :  { %v5849_v12 = vpop.eup %3795  ;;  %3803 = vpow2.f32 %v2150_v49  ;;  %v1490_v45 = vrot.slane %v1489_v3, 1  ;;  %v1777_v14 = vmax.f32 %v1775_v42, %v1776_v41  ;;  %v1477_v0 = vrot.slane %v1476_v4, 4 }
 0x270   :  { %v5851_v20 = vpop.eup %3797  ;;  %3805 = vrcp.f32 %v2694_v56  ;;  %v2431_v16 = vadd.f32 %v2430_v32, %v2429_v47  ;;  %v2716_v40 = vrot.slane %v2715_v30, 4  ;;  %v2416_v6 = vsel %vm1203_vm2, %v5849_v12, 0.0 }
 0x271   :  { %v3800_v33 = vpop.eup %3799  ;;  %v2417_v9 = vsel %vm1203_vm2, %v5851_v20, 0.0  ;;  %v1491_v53 = vmax.f32 %v1489_v3, %v1490_v45  ;;  %v1778_v35 = vrot.slane %v1777_v14, 1  ;;  %v1478_v46 = vmax.f32 %v1476_v4, %v1477_v0 }
 0x272   :  { %v2819_v34 = vmul.f32 %v3800_v33, %v5747_v26  ;;  %v2820_v5 = vmul.f32 %v3800_v33, %v5755_v43  ;;  %v2432_v63 = vrot.slane %v2431_v16, 1  ;;  %v2717_v2 = vadd.f32 %v2716_v40, %v2715_v30 }
 0x273   :  { %v2418_v19 = vadd.f32 %v2417_v9, %v2416_v6  ;;  %v1842_v44 = vsub.f32 %v5282_v22, %v1491_v53  ;;  %v1843_v15 = vsub.f32 %v6142_v39, %v1491_v53  ;;  %v1779_v58 = vmax.f32 %v1777_v14, %v1778_v35 }
 0x274   :  { %2984 = vst.msk [vmem:[%s5994_s2 + $0x1a0] sm:$0xff] %vm1203_vm2, %v2819_v34  ;;  %2985 = vst.msk [vmem:[%s5994_s2 + $0x1a8] sm:$0xff] %vm1203_vm2, %v2820_v5  ;;  %v2433_v26 = vadd.f32 %v2432_v63, %v2431_v16  ;;  %v2718_v43 = vrot.slane %v2717_v2, 2  ;;  %v1479_v48 = vrot.slane %v1478_v46, 2  ;;  %v1763_v4 = vsel %vm1203_vm2, %v5355_v17, -inf }
 0x275   :  { %v2419_v22 = vrot.slane %v2418_v19, 4  ;;  %v2032_v51 = vmul.f32 1.442695, %v1842_v44  ;;  %v2034_v39 = vmul.f32 1.442695, %v1843_v15  ;;  %v1906_v24 = vsub.f32 %v6139_v10, %v1779_v58 }
 0x276   :  { %3807 = vrcp.f32 %v2433_v26  ;;  %v2719_v59 = vadd.f32 %v2718_v43, %v2717_v2  ;;  %v1907_v50 = vsub.f32 %v6143_v62, %v1779_v58  ;;  %v1480_v36 = vmax.f32 %v1478_v46, %v1479_v48 }
 0x277   :  { %v2420_v28 = vadd.f32 %v2419_v22, %v2418_v19  ;;  %3809 = vpow2.f32 %v2032_v51  ;;  %v2160_v29 = vmul.f32 1.442695, %v1906_v24  ;;  %v1764_v1 = vmax.f32 %v5802_v11, %v1763_v4 }
 0x278   :  { %v5874_v21 = vpop.eup %3801  ;;  %v2720_v54 = vrot.slane %v2719_v59, 1  ;;  %3811 = vpow2.f32 %v2034_v39  ;;  %v2162_v7 = vmul.f32 1.442695, %v1907_v50  ;;  %v1481_v55 = vrot.slane %v1480_v36, 1 }
 0x279   :  { %v5876_v42 = vpop.eup %3803  ;;  %v2421_v37 = vrot.slane %v2420_v28, 2  ;;  %v2704_v10 = vsel %vm1203_vm2, %v5874_v21, 0.0  ;;  %3813 = vpow2.f32 %v2160_v29  ;;  %v1765_v62 = vrot.slane %v1764_v1, 4 }
 0x27a   :  { %v3806_v47 = vpop.eup %3805  ;;  %v2721_v52 = vadd.f32 %v2720_v54, %v2719_v59  ;;  %v2705_v57 = vsel %vm1203_vm2, %v5876_v42, 0.0  ;;  %3815 = vpow2.f32 %v2162_v7  ;;  %v1482_v11 = vmax.f32 %v1480_v36, %v1481_v55 }
 0x27b   :  { %v2915_v60 = vmul.f32 %v3806_v47, %v5780_v25  ;;  %v2916_v49 = vmul.f32 %v3806_v47, %v5782_v38  ;;  %v2422_v3 = vadd.f32 %v2421_v37, %v2420_v28  ;;  %v2706_v41 = vadd.f32 %v2705_v57, %v2704_v10 }
 0x27c   :  { %3817 = vrcp.f32 %v2721_v52  ;;  %v1840_v56 = vsub.f32 %v6140_v13, %v1482_v11  ;;  %v1841_v32 = vsub.f32 %v6144_v27, %v1482_v11  ;;  %v1766_v30 = vmax.f32 %v1764_v1, %v1765_v62 }
 0x27d   :  { %3048 = vst.msk [vmem:[%s5994_s2 + $0x3a0] sm:$0xff] %vm1203_vm2, %v2915_v60  ;;  %3049 = vst.msk [vmem:[%s5994_s2 + $0x3a8] sm:$0xff] %vm1203_vm2, %v2916_v49  ;;  %v2423_v25 = vrot.slane %v2422_v3, 1  ;;  %v2707_v38 = vrot.slane %v2706_v41, 4 }
 0x27e   :  { %v2028_v45 = vmul.f32 1.442695, %v1840_v56  ;;  %v2030_v14 = vmul.f32 1.442695, %v1841_v32  ;;  %v1767_v0 = vrot.slane %v1766_v30, 2 }
 0x27f   :  { %v2424_v16 = vadd.f32 %v2423_v25, %v2422_v3  ;;  %v2708_v13 = vadd.f32 %v2707_v38, %v2706_v41 }
 0x280   :  { %v3808_v40 = vpop.eup %3807  ;;  %3819 = vpow2.f32 %v2028_v45  ;;  %v1768_v27 = vmax.f32 %v1766_v30, %v1767_v0 }
 0x281   :  { %v5894_v6 = vpop.eup %3809  ;;  %v2828_v33 = vmul.f32 %v3808_v40, %v5807_v23  ;;  %v2829_v9 = vmul.f32 %v3808_v40, %v5813_v31  ;;  %3821 = vrcp.f32 %v2424_v16  ;;  %v2709_v53 = vrot.slane %v2708_v13, 2 }
 0x282   :  { %v5898_v35 = vpop.eup %3811  ;;  %v2443_v46 = vsel %vm1203_vm2, %v5894_v6, 0.0  ;;  %3823 = vpow2.f32 %v2030_v14  ;;  %v1769_v34 = vrot.slane %v1768_v27, 1 }
 0x283   :  { %v5902_v5 = vpop.eup %3813  ;;  %2990 = vst.msk [vmem:[%s5994_s2 + $0x1d0] sm:$0xff] %vm1203_vm2, %v2828_v33  ;;  %2991 = vst.msk [vmem:[%s5994_s2 + $0x1d8] sm:$0xff] %vm1203_vm2, %v2829_v9  ;;  %v2710_v23 = vadd.f32 %v2709_v53, %v2708_v13  ;;  %v2444_v31 = vsel %vm1203_vm2, %v5898_v35, 0.0 }
 0x284   :  { %v5914_v63 = vpop.eup %3815  ;;  %v2445_v2 = vadd.f32 %v2444_v31, %v2443_v46  ;;  %v2731_v19 = vsel %vm1203_vm2, %v5902_v5, 0.0  ;;  %v1770_v44 = vmax.f32 %v1768_v27, %v1769_v34 }
 0x285   :  { %v2711_v15 = vrot.slane %v2710_v23, 1  ;;  %v2732_v58 = vsel %vm1203_vm2, %v5914_v63, 0.0 }
 0x286   :  { %v3818_v26 = vpop.eup %3817  ;;  %v2446_v43 = vrot.slane %v2445_v2, 4  ;;  %v2733_v48 = vadd.f32 %v2732_v58, %v2731_v19  ;;  %v1904_v4 = vsub.f32 %v6141_v61, %v1770_v44  ;;  %v1905_v22 = vsub.f32 %v5355_v17, %v1770_v44 }
 0x287   :  { %v2924_v51 = vmul.f32 %v3818_v26, %v5823_v18  ;;  %v2925_v39 = vmul.f32 %v3818_v26, %v5835_v8  ;;  %v2712_v24 = vadd.f32 %v2711_v15, %v2710_v23 }
 0x288   :  { %v2447_v59 = vadd.f32 %v2446_v43, %v2445_v2  ;;  %v2734_v50 = vrot.slane %v2733_v48, 4  ;;  %v2156_v36 = vmul.f32 1.442695, %v1904_v4  ;;  %v2158_v28 = vmul.f32 1.442695, %v1905_v22 }
 0x289   :  { %3054 = vst.msk [vmem:[%s5994_s2 + $0x3d0] sm:$0xff] %vm1203_vm2, %v2924_v51  ;;  %3055 = vst.msk [vmem:[%s5994_s2 + $0x3d8] sm:$0xff] %vm1203_vm2, %v2925_v39  ;;  %3825 = vrcp.f32 %v2712_v24 }
 0x28a   :  { %v3820_v17 = vpop.eup %3819  ;;  %v2448_v61 = vrot.slane %v2447_v59, 2  ;;  %v2735_v18 = vadd.f32 %v2734_v50, %v2733_v48  ;;  %3827 = vpow2.f32 %v2156_v36 }
 0x28b   :  { %v3822_v8 = vpop.eup %3821  ;;  %v2434_v29 = vsel %vm1203_vm2, %v3820_v17, 0.0  ;;  %3829 = vpow2.f32 %v2158_v28 }
 0x28c   :  { %v3824_v1 = vpop.eup %3823  ;;  %v2825_v54 = vmul.f32 %v3822_v8, %v5849_v12  ;;  %v2826_v7 = vmul.f32 %v3822_v8, %v5851_v20  ;;  %v2449_v55 = vadd.f32 %v2448_v61, %v2447_v59  ;;  %v2736_v37 = vrot.slane %v2735_v18, 2 }
 0x28d   :  { %v2435_v10 = vsel %vm1203_vm2, %v3824_v1, 0.0 }
 0x28e   :  { %2988 = vst.msk [vmem:[%s5994_s2 + $0x1c0] sm:$0xff] %vm1203_vm2, %v2825_v54  ;;  %2989 = vst.msk [vmem:[%s5994_s2 + $0x1c8] sm:$0xff] %vm1203_vm2, %v2826_v7  ;;  %v2450_v62 = vrot.slane %v2449_v55, 1  ;;  %v2737_v47 = vadd.f32 %v2736_v37, %v2735_v18  ;;  %v2436_v52 = vadd.f32 %v2435_v10, %v2434_v29 }
 0x290   :  { %v2451_v12 = vadd.f32 %v2450_v62, %v2449_v55  ;;  %v2738_v57 = vrot.slane %v2737_v47, 1  ;;  %v2437_v20 = vrot.slane %v2436_v52, 4 }
 0x292   :  { %3831 = vrcp.f32 %v2451_v12  ;;  %v2739_v11 = vadd.f32 %v2738_v57, %v2737_v47  ;;  %v2438_v60 = vadd.f32 %v2437_v20, %v2436_v52 }
 0x293   :  { %v3826_v49 = vpop.eup %3825 }
 0x294   :  { %v3828_v3 = vpop.eup %3827  ;;  %v2921_v41 = vmul.f32 %v3826_v49, %v5874_v21  ;;  %v2922_v56 = vmul.f32 %v3826_v49, %v5876_v42  ;;  %3833 = vrcp.f32 %v2739_v11  ;;  %v2439_v32 = vrot.slane %v2438_v60, 2 }
 0x295   :  { %v3830_v30 = vpop.eup %3829  ;;  %v2722_v25 = vsel %vm1203_vm2, %v3828_v3, 0.0 }
 0x296   :  { %3052 = vst.msk [vmem:[%s5994_s2 + $0x3c0] sm:$0xff] %vm1203_vm2, %v2921_v41  ;;  %3053 = vst.msk [vmem:[%s5994_s2 + $0x3c8] sm:$0xff] %vm1203_vm2, %v2922_v56  ;;  %v2440_v38 = vadd.f32 %v2439_v32, %v2438_v60  ;;  %v2723_v21 = vsel %vm1203_vm2, %v3830_v30, 0.0 }
 0x297   :  { %v2724_v45 = vadd.f32 %v2723_v21, %v2722_v25 }
 0x298   :  { %v2441_v42 = vrot.slane %v2440_v38, 1 }
 0x299   :  { %v2725_v14 = vrot.slane %v2724_v45, 4 }
 0x29a   :  { %v2442_v0 = vadd.f32 %v2441_v42, %v2440_v38 }
 0x29b   :  { %v2726_v16 = vadd.f32 %v2725_v14, %v2724_v45 }
 0x29c   :  { %v3832_v13 = vpop.eup %3831  ;;  %3835 = vrcp.f32 %v2442_v0 }
 0x29d   :  { %v2834_v40 = vmul.f32 %v3832_v13, %v5894_v6  ;;  %v2835_v27 = vmul.f32 %v3832_v13, %v5898_v35  ;;  %v2727_v33 = vrot.slane %v2726_v16, 2 }
 0x29e   :  { %v3834_v9 = vpop.eup %3833 }
 0x29f   :  { %2994 = vst.msk [vmem:[%s5994_s2 + $0x1f0] sm:$0xff] %vm1203_vm2, %v2834_v40  ;;  %2995 = vst.msk [vmem:[%s5994_s2 + $0x1f8] sm:$0xff] %vm1203_vm2, %v2835_v27  ;;  %v2930_v53 = vmul.f32 %v3834_v9, %v5902_v5  ;;  %v2931_v46 = vmul.f32 %v3834_v9, %v5914_v63  ;;  %v2728_v34 = vadd.f32 %v2727_v33, %v2726_v16 }
 0x2a1   :  { %3058 = vst.msk [vmem:[%s5994_s2 + $0x3f0] sm:$0xff] %vm1203_vm2, %v2930_v53  ;;  %3059 = vst.msk [vmem:[%s5994_s2 + $0x3f8] sm:$0xff] %vm1203_vm2, %v2931_v46  ;;  %v2729_v6 = vrot.slane %v2728_v34, 1 }
 0x2a3   :  { %v2730_v35 = vadd.f32 %v2729_v6, %v2728_v34 }
 0x2a5   :  { %3837 = vrcp.f32 %v2730_v35 }
 0x2a6   :  { %v3836_v23 = vpop.eup %3835 }
 0x2a7   :  { %v2831_v31 = vmul.f32 %v3836_v23, %v3820_v17  ;;  %v2832_v2 = vmul.f32 %v3836_v23, %v3824_v1 }
 0x2a9   :  { %2992 = vst.msk [vmem:[%s5994_s2 + $0x1e0] sm:$0xff] %vm1203_vm2, %v2831_v31  ;;  %2993 = vst.msk [vmem:[%s5994_s2 + $0x1e8] sm:$0xff] %vm1203_vm2, %v2832_v2 }
 0x2af   :  { %v3838_v5 = vpop.eup %3837 }
 0x2b0   :  { %v2927_v63 = vmul.f32 %v3838_v5, %v3828_v3  ;;  %v2928_v19 = vmul.f32 %v3838_v5, %v3830_v30 }
 0x2b2   :  { %3056 = vst.msk [vmem:[%s5994_s2 + $0x3e0] sm:$0xff] %vm1203_vm2, %v2927_v63  ;;  %3057 = vst.msk [vmem:[%s5994_s2 + $0x3e8] sm:$0xff] %vm1203_vm2, %v2928_v19 }

</bundles_post_ra>
